<compile_context>
chip_gen: v6e
topology: v6e:2x2x1
jax: 0.10.0
libtpu: 0.0.40
codegen_flags: <defaults>
</compile_context>

<pallas_src>
import functools

import numpy as np

import jax
import jax.numpy as jnp
from jax import lax
from jax.experimental import pallas as pl
from jax.experimental.pallas import tpu as pltpu


def _admm_kernel(qc_ref, w_ref, lb_ref, ub_ref, u_ref, *,
                 rho, n_chunks, check_every, tol, unroll, n_chains):
    """Fused OSQP-style ADMM.

    Carries, per chain, u = [rho*x | rho*z - y] and the padded dual y (first n
    lanes identically zero).  Per iteration and per chain: one
    (rows_c, nm)@(nm, nm) MXU matmul plus a handful of VPU ops; no slicing or
    concatenation inside the loop.  With n_chains=2 the two dependence chains
    are independent so the scheduler can overlap MXU latency of one chain with
    VPU work of the other.
    """
    qc_full = qc_ref[...]                  # (Bb, nm) constant rows [q@Minv | q@Minv@A.T]
    W = w_ref[...]                         # (nm, nm) fused iteration operator
    Bb, nm = qc_full.shape
    rows_c = Bb // n_chains

    # Hoist the (1, nm) -> (rows_c, nm) broadcasts out of the loop
    # (JAX does not CSE broadcast_in_dim).
    lb = jnp.broadcast_to(lb_ref[...], (rows_c, nm))
    ub = jnp.broadcast_to(ub_ref[...], (rows_c, nm))

    # One-time, sublane-aligned split of the constant rows per chain.
    qcs = tuple(qc_full[c * rows_c:(c + 1) * rows_c] for c in range(n_chains))

    unit_rho = (float(rho) == 1.0)
    inv_rho = 1.0 / rho

    def one_iter(_, carry):
        us, ys = carry
        new_us, new_ys = [], []
        for c in range(n_chains):
            u, y, qc = us[c], ys[c], qcs[c]
            # v = [x_new | A @ x_new]  -- single fused MXU matmul per chain.
            # Precision pinned to HIGHEST: true f32 fixed point (matches the
            # "all iterations stay in f32" contract against the GUROBI ref).
            v = jnp.dot(u, W, preferred_element_type=jnp.float32,
                        precision=lax.Precision.HIGHEST) - qc
            if unit_rho:
                # rho == 1: all rho / inv_rho multiplies elided at trace time.
                z = jnp.clip(v + y, lb, ub)
                y_new = y + (v - z)
                u_new = z - y_new
            else:
                # Projection onto [l, u] (first n lanes: +/-BIG -> identity).
                z = jnp.clip(v + y * inv_rho, lb, ub)
                # Dual update (first n lanes stay exactly zero).
                y_new = y + rho * (v - z)
                # Next carry: [rho*x_new | rho*z_new - y_new].
                u_new = rho * z - y_new
            new_us.append(u_new)
            new_ys.append(y_new)
        return tuple(new_us), tuple(new_ys)

    u0 = tuple(jnp.zeros((rows_c, nm), jnp.float32) for _ in range(n_chains))
    y0 = tuple(jnp.zeros((rows_c, nm), jnp.float32) for _ in range(n_chains))

    def cond(state):
        k, _, _, delta = state
        return jnp.logical_and(k < n_chunks, delta > tol)

    def chunk(state):
        k, us, ys, _ = state
        new_us, new_ys = lax.fori_loop(0, check_every, one_iter, (us, ys),
                                       unroll=unroll)
        # Iterate-change surrogate for the residuals; u only (cheaper check).
        delta = jnp.float32(0.0)
        for c in range(n_chains):
            delta = jnp.maximum(delta, jnp.max(jnp.abs(new_us[c] - us[c])))
        return k + 1, new_us, new_ys, delta

    init = (jnp.int32(0), u0, y0, jnp.float32(jnp.inf))
    _, us, _, _ = lax.while_loop(cond, chunk, init)

    for c in range(n_chains):
        u_ref[pl.ds(c * rows_c, rows_c), :] = us[c]


def _num_tensorcores():
    """Best-effort TensorCore count per chip (2 on v7x, else 1)."""
    try:
        kind = jax.devices()[0].device_kind.lower()
    except Exception:
        return 1
    return 2 if "v7" in kind else 1


def dragent_quad_forward(price, *, c1, c2, E1, E2, eta, P1, P2,
                         rho=1.0, sigma=1e-6, n_iter=3000,
                         check_every=50, tol=1e-6, unroll=None,
                         num_batch_blocks=None, max_rows_per_block=32):
    """Forward pass of DRagent_Quad: returns (d, p), each of shape (B, T)."""
    price = jnp.asarray(price, jnp.float32)
    B, T = price.shape
    n = 2 * T           # primal dim: x = [d | p]
    m = 3 * T           # constraint rows: [d-box | p-box | storage]
    nm = n + m

    c1 = float(c1); c2 = float(c2); E1 = float(E1); E2 = float(E2)
    eta = float(eta); P1 = float(P1); P2 = float(P2)
    rho = float(rho); sigma = float(sigma)

    # ---- Build the QP operators on host in float64 (conditioning + Minv
    # ---- symmetry for the fused-W algebra), cast to f32 at the end. ----
    eps = 1e-4
    cumeps = np.arange(1, T + 1, dtype=np.float64) * eps    # [eps, ..., T*eps]

    I = np.eye(T, dtype=np.float64)
    Z = np.zeros((T, T), dtype=np.float64)
    L = np.tril(np.ones((T, T), dtype=np.float64))

    # Constraint matrix (two-sided form  l <= A x <= u).
    A = np.block([
        [I, Z],                        # d box     (ineq3 / ineq4)
        [Z, I],                        # p box     (ineq1 / ineq2)
        [-L / eta, eta * L],           # state of charge (ineq5 / ineq6)
    ])                                 # (m, n)

    lvec = np.concatenate([
        np.full(T, 1e-9),              # d >= 1e-9
        np.full(T, 1e-9),              # p >= 1e-9
        E2 + cumeps,                   # soc lower
    ])
    uvec = np.concatenate([
        np.full(T, P2),                # d <= P2
        np.full(T, P1),                # p <= P1
        E1 + cumeps,                   # soc upper
    ])

    # Objective:  price@p - price@d + c1*sum(d) + c2*sum(d^2)
    # => P = diag([2*c2]*T + [0]*T),  q = [-price + c1 | price]
    p_diag = np.concatenate([np.full(T, 2.0 * c2), np.zeros(T)])
    M = np.diag(p_diag + sigma) + rho * (A.T @ A)
    Minv = np.linalg.inv(M)
    Minv = 0.5 * (Minv + Minv.T)       # enforce symmetry (fused-W relies on it)

    # Fused iteration operator.  With u = [rho*x | rho*z - y], one matmul gives
    # [x_new | A@x_new] = u @ W - [q@Minv | q@Minv@A.T].
    G1 = sigma * Minv                  # (n, n)
    G2 = A @ Minv                      # (m, n)
    H1 = G1 @ A.T                      # (n, m)
    H2 = G2 @ A.T                      # (m, m)
    W = jnp.asarray(np.block([[G1 / rho, H1 / rho],
                              [G2,       H2]]), jnp.float32)        # (nm, nm)

    # Constant-row operator  Qc = [Minv | Minv @ A.T]  (n, nm), f64 on host.
    Qc = jnp.asarray(np.concatenate([Minv, Minv @ A.T], axis=1), jnp.float32)

    q = jnp.concatenate([-price + c1, price], axis=1).astype(jnp.float32)   # (B, n)
    qc = jnp.dot(q, Qc, preferred_element_type=jnp.float32,
                 precision=lax.Precision.HIGHEST)                           # (B, nm)

    BIG = 1e30
    lb = jnp.asarray(np.concatenate([np.full(n, -BIG), lvec])[None, :], jnp.float32)
    ub = jnp.asarray(np.concatenate([np.full(n, BIG), uvec])[None, :], jnp.float32)

    # ---- Batch blocking: use both TensorCores on v7x, cap rows per block. ----
    if num_batch_blocks is None:
        num_batch_blocks = 2 if (_num_tensorcores() >= 2 and B >= 2) else 1
    num_batch_blocks = max(int(num_batch_blocks),
                           -(-B // int(max_rows_per_block)))

    if num_batch_blocks > 1:
        rows = -(-B // num_batch_blocks)
        rows = -(-rows // 8) * 8                    # 8-aligned sublanes per block
        Bp = rows * num_batch_blocks
    else:
        rows, Bp = B, B
    if Bp != B:
        qc = jnp.pad(qc, ((0, Bp - B), (0, 0)))     # padded rows: q=0 -> harmless QP

    # Two interleaved carry chains when the block is big enough to fill two
    # 8-row sub-groups without sublane waste.
    n_chains = 2 if (rows >= 16 and rows % 16 == 0) else 1

    n_chunks = -(-n_iter // check_every)            # cap of n_chunks*check_every iters
    if unroll is None:
        unroll = check_every                        # straight-line chunk body

    # VMEM budgeting: only relevant when scaling T (W is (5T)^2*4 B and the
    # BlockSpec pipeliner double-buffers it).  Irrelevant at small T.
    est_bytes = 4 * (2 * (rows * nm + nm * nm + 2 * nm) + 4 * rows * nm)
    vmem_limit = None
    if est_bytes > 12 * 1024 * 1024:
        vmem_limit = min(int(1.5 * est_bytes) + (1 << 20), 64 * 1024 * 1024)
    # TODO(synk): for very large T, single-buffer the constant W/lb/ub specs
    # (pipeline_mode=pl.Buffered(1)) or keep W in HBM and tile the contraction.

    kernel = functools.partial(
        _admm_kernel, rho=rho, n_chunks=int(n_chunks),
        check_every=int(check_every), tol=float(tol), unroll=int(unroll),
        n_chains=int(n_chains))

    u = pl.pallas_call(
        kernel,
        out_shape=jax.ShapeDtypeStruct((Bp, nm), jnp.float32),
        grid_spec=pl.GridSpec(
            grid=(num_batch_blocks,),
            in_specs=[
                pl.BlockSpec((rows, nm), lambda i: (i, 0)),   # qc (per batch block)
                pl.BlockSpec((nm, nm), lambda i: (0, 0)),     # W  (shared)
                pl.BlockSpec((1, nm), lambda i: (0, 0)),      # lb (shared)
                pl.BlockSpec((1, nm), lambda i: (0, 0)),      # ub (shared)
            ],
            out_specs=pl.BlockSpec((rows, nm), lambda i: (i, 0)),
        ),
        compiler_params=pltpu.CompilerParams(
            dimension_semantics=("parallel",),
            vmem_limit_bytes=vmem_limit),
    )(qc, W, lb, ub)

    x = u[:B, :n] / rho        # u carries rho*x in its first n lanes
    d = x[:, :T]
    p = x[:, T:]
    return d, p


if __name__ == "__main__":
    key = jax.random.PRNGKey(0)
    B, T = 4, 8
    # DRagent_Quad(P1, P2, T) constructor arguments:
    P1, P2 = 2.0, 2.0
    # Deterministic parameter init exactly as in __init__:
    c1, c2, E1, E2, eta = 10.0, 10.0, 1.0, -1.0, 0.9

    price = jax.random.uniform(key, (B, T), minval=0.0, maxval=20.0,
                               dtype=jnp.float32)

    d, p = dragent_quad_forward(price, c1=c1, c2=c2, E1=E1, E2=E2, eta=eta,
                                P1=P1, P2=P2)
    jax.block_until_ready((d, p))
    print("KERNEL_OK")
</pallas_src>

<mosaic_0001>
module attributes {stable_mosaic.version = 11 : i64} {
  func.func @_admm_kernel(%arg0: i32, %arg1: memref<4x40xf32, #tpu.memory_space<vmem>>, %arg2: memref<40x40xf32, #tpu.memory_space<vmem>>, %arg3: memref<1x40xf32, #tpu.memory_space<vmem>>, %arg4: memref<1x40xf32, #tpu.memory_space<vmem>>, %arg5: memref<4x40xf32, #tpu.memory_space<vmem>>) attributes {dimension_semantics = [#tpu.dimension_semantics<parallel>], iteration_bounds = array<i64: 1>, scalar_prefetch = 0 : i64, scratch_operands = 0 : i64, tpu.core_type = #tpu.core_type<tc>, window_params = [{transform_indices = @transform_0, window_bounds = array<i64: 4, 40>}, {pipeline_mode = #tpu.pipeline_mode<synchronous>, transform_indices = @transform_1, window_bounds = array<i64: 40, 40>}, {pipeline_mode = #tpu.pipeline_mode<synchronous>, transform_indices = @transform_2, window_bounds = array<i64: 1, 40>}, {pipeline_mode = #tpu.pipeline_mode<synchronous>, transform_indices = @transform_3, window_bounds = array<i64: 1, 40>}, {transform_indices = @transform_4, window_bounds = array<i64: 4, 40>}]} {
    %c0 = arith.constant 0 : index
    %c0_0 = arith.constant 0 : index
    %0 = vector.load %arg1[%c0, %c0_0] : memref<4x40xf32, #tpu.memory_space<vmem>>, vector<4x40xf32>
    %c0_1 = arith.constant 0 : index
    %c0_2 = arith.constant 0 : index
    %1 = vector.load %arg2[%c0_1, %c0_2] : memref<40x40xf32, #tpu.memory_space<vmem>>, vector<40x40xf32>
    %c0_3 = arith.constant 0 : index
    %c0_4 = arith.constant 0 : index
    %2 = vector.load %arg3[%c0_3, %c0_4] : memref<1x40xf32, #tpu.memory_space<vmem>>, vector<1x40xf32>
    %3 = vector.shape_cast %2 : vector<1x40xf32> to vector<1x40xf32>
    %4 = vector.broadcast %3 : vector<1x40xf32> to vector<4x40xf32>
    %c0_5 = arith.constant 0 : index
    %c0_6 = arith.constant 0 : index
    %5 = vector.load %arg4[%c0_5, %c0_6] : memref<1x40xf32, #tpu.memory_space<vmem>>, vector<1x40xf32>
    %6 = vector.shape_cast %5 : vector<1x40xf32> to vector<1x40xf32>
    %7 = vector.broadcast %6 : vector<1x40xf32> to vector<4x40xf32>
    %cst = arith.constant 0.000000e+00 : f32
    %8 = vector.broadcast %cst : f32 to vector<4x40xf32>
    %cst_7 = arith.constant 0.000000e+00 : f32
    %9 = vector.broadcast %cst_7 : f32 to vector<4x40xf32>
    %c0_i32 = arith.constant 0 : i32
    %cst_8 = arith.constant 0x7F800000 : f32
    %10:4 = scf.while (%arg6 = %c0_i32, %arg7 = %8, %arg8 = %9, %arg9 = %cst_8) : (i32, vector<4x40xf32>, vector<4x40xf32>, f32) -> (i32, vector<4x40xf32>, vector<4x40xf32>, f32) {
      %c60_i32 = arith.constant 60 : i32
      %12 = arith.cmpi slt, %arg6, %c60_i32 : i32
      %cst_11 = arith.constant 9.99999997E-7 : f32
      %13 = arith.cmpf ogt, %arg9, %cst_11 : f32
      %14 = arith.andi %12, %13 : i1
      scf.condition(%14) %arg6, %arg7, %arg8, %arg9 : i32, vector<4x40xf32>, vector<4x40xf32>, f32
    } do {
    ^bb0(%arg6: i32, %arg7: vector<4x40xf32>, %arg8: vector<4x40xf32>, %arg9: f32):
      %c0_i32_11 = arith.constant 0 : i32
      %cst_12 = arith.constant dense<0.000000e+00> : vector<4x40xf32>
      %12 = tpu.matmul %arg7, %1, %cst_12 {dimension_numbers = #tpu.dot_dimension_numbers<[1], [0], [0], [1], [0, 0, 1, 1], [], []>, precision = #tpu.contract_precision<fp32>} : vector<4x40xf32>, vector<40x40xf32>, vector<4x40xf32> -> vector<4x40xf32>
      %13 = arith.subf %12, %0 : vector<4x40xf32>
      %14 = arith.addf %13, %arg8 : vector<4x40xf32>
      %15 = arith.maximumf %4, %14 : vector<4x40xf32>
      %16 = arith.minimumf %7, %15 : vector<4x40xf32>
      %17 = arith.subf %13, %16 : vector<4x40xf32>
      %18 = arith.addf %arg8, %17 : vector<4x40xf32>
      %19 = arith.subf %16, %18 : vector<4x40xf32>
      %c1_i32 = arith.constant 1 : i32
      %cst_13 = arith.constant dense<0.000000e+00> : vector<4x40xf32>
      %20 = tpu.matmul %19, %1, %cst_13 {dimension_numbers = #tpu.dot_dimension_numbers<[1], [0], [0], [1], [0, 0, 1, 1], [], []>, precision = #tpu.contract_precision<fp32>} : vector<4x40xf32>, vector<40x40xf32>, vector<4x40xf32> -> vector<4x40xf32>
      %21 = arith.subf %20, %0 : vector<4x40xf32>
      %22 = arith.addf %21, %18 : vector<4x40xf32>
      %23 = arith.maximumf %4, %22 : vector<4x40xf32>
      %24 = arith.minimumf %7, %23 : vector<4x40xf32>
      %25 = arith.subf %21, %24 : vector<4x40xf32>
      %26 = arith.addf %18, %25 : vector<4x40xf32>
      %27 = arith.subf %24, %26 : vector<4x40xf32>
      %c2_i32 = arith.constant 2 : i32
      %cst_14 = arith.constant dense<0.000000e+00> : vector<4x40xf32>
      %28 = tpu.matmul %27, %1, %cst_14 {dimension_numbers = #tpu.dot_dimension_numbers<[1], [0], [0], [1], [0, 0, 1, 1], [], []>, precision = #tpu.contract_precision<fp32>} : vector<4x40xf32>, vector<40x40xf32>, vector<4x40xf32> -> vector<4x40xf32>
      %29 = arith.subf %28, %0 : vector<4x40xf32>
      %30 = arith.addf %29, %26 : vector<4x40xf32>
      %31 = arith.maximumf %4, %30 : vector<4x40xf32>
      %32 = arith.minimumf %7, %31 : vector<4x40xf32>
      %33 = arith.subf %29, %32 : vector<4x40xf32>
      %34 = arith.addf %26, %33 : vector<4x40xf32>
      %35 = arith.subf %32, %34 : vector<4x40xf32>
      %c3_i32 = arith.constant 3 : i32
      %cst_15 = arith.constant dense<0.000000e+00> : vector<4x40xf32>
      %36 = tpu.matmul %35, %1, %cst_15 {dimension_numbers = #tpu.dot_dimension_numbers<[1], [0], [0], [1], [0, 0, 1, 1], [], []>, precision = #tpu.contract_precision<fp32>} : vector<4x40xf32>, vector<40x40xf32>, vector<4x40xf32> -> vector<4x40xf32>
      %37 = arith.subf %36, %0 : vector<4x40xf32>
      %38 = arith.addf %37, %34 : vector<4x40xf32>
      %39 = arith.maximumf %4, %38 : vector<4x40xf32>
      %40 = arith.minimumf %7, %39 : vector<4x40xf32>
      %41 = arith.subf %37, %40 : vector<4x40xf32>
      %42 = arith.addf %34, %41 : vector<4x40xf32>
      %43 = arith.subf %40, %42 : vector<4x40xf32>
      %c4_i32 = arith.constant 4 : i32
      %cst_16 = arith.constant dense<0.000000e+00> : vector<4x40xf32>
      %44 = tpu.matmul %43, %1, %cst_16 {dimension_numbers = #tpu.dot_dimension_numbers<[1], [0], [0], [1], [0, 0, 1, 1], [], []>, precision = #tpu.contract_precision<fp32>} : vector<4x40xf32>, vector<40x40xf32>, vector<4x40xf32> -> vector<4x40xf32>
      %45 = arith.subf %44, %0 : vector<4x40xf32>
      %46 = arith.addf %45, %42 : vector<4x40xf32>
      %47 = arith.maximumf %4, %46 : vector<4x40xf32>
      %48 = arith.minimumf %7, %47 : vector<4x40xf32>
      %49 = arith.subf %45, %48 : vector<4x40xf32>
      %50 = arith.addf %42, %49 : vector<4x40xf32>
      %51 = arith.subf %48, %50 : vector<4x40xf32>
      %c5_i32 = arith.constant 5 : i32
      %cst_17 = arith.constant dense<0.000000e+00> : vector<4x40xf32>
      %52 = tpu.matmul %51, %1, %cst_17 {dimension_numbers = #tpu.dot_dimension_numbers<[1], [0], [0], [1], [0, 0, 1, 1], [], []>, precision = #tpu.contract_precision<fp32>} : vector<4x40xf32>, vector<40x40xf32>, vector<4x40xf32> -> vector<4x40xf32>
      %53 = arith.subf %52, %0 : vector<4x40xf32>
      %54 = arith.addf %53, %50 : vector<4x40xf32>
      %55 = arith.maximumf %4, %54 : vector<4x40xf32>
      %56 = arith.minimumf %7, %55 : vector<4x40xf32>
      %57 = arith.subf %53, %56 : vector<4x40xf32>
      %58 = arith.addf %50, %57 : vector<4x40xf32>
      %59 = arith.subf %56, %58 : vector<4x40xf32>
      %c6_i32 = arith.constant 6 : i32
      %cst_18 = arith.constant dense<0.000000e+00> : vector<4x40xf32>
      %60 = tpu.matmul %59, %1, %cst_18 {dimension_numbers = #tpu.dot_dimension_numbers<[1], [0], [0], [1], [0, 0, 1, 1], [], []>, precision = #tpu.contract_precision<fp32>} : vector<4x40xf32>, vector<40x40xf32>, vector<4x40xf32> -> vector<4x40xf32>
      %61 = arith.subf %60, %0 : vector<4x40xf32>
      %62 = arith.addf %61, %58 : vector<4x40xf32>
      %63 = arith.maximumf %4, %62 : vector<4x40xf32>
      %64 = arith.minimumf %7, %63 : vector<4x40xf32>
      %65 = arith.subf %61, %64 : vector<4x40xf32>
      %66 = arith.addf %58, %65 : vector<4x40xf32>
      %67 = arith.subf %64, %66 : vector<4x40xf32>
      %c7_i32 = arith.constant 7 : i32
      %cst_19 = arith.constant dense<0.000000e+00> : vector<4x40xf32>
      %68 = tpu.matmul %67, %1, %cst_19 {dimension_numbers = #tpu.dot_dimension_numbers<[1], [0], [0], [1], [0, 0, 1, 1], [], []>, precision = #tpu.contract_precision<fp32>} : vector<4x40xf32>, vector<40x40xf32>, vector<4x40xf32> -> vector<4x40xf32>
      %69 = arith.subf %68, %0 : vector<4x40xf32>
      %70 = arith.addf %69, %66 : vector<4x40xf32>
      %71 = arith.maximumf %4, %70 : vector<4x40xf32>
      %72 = arith.minimumf %7, %71 : vector<4x40xf32>
      %73 = arith.subf %69, %72 : vector<4x40xf32>
      %74 = arith.addf %66, %73 : vector<4x40xf32>
      %75 = arith.subf %72, %74 : vector<4x40xf32>
      %c8_i32 = arith.constant 8 : i32
      %cst_20 = arith.constant dense<0.000000e+00> : vector<4x40xf32>
      %76 = tpu.matmul %75, %1, %cst_20 {dimension_numbers = #tpu.dot_dimension_numbers<[1], [0], [0], [1], [0, 0, 1, 1], [], []>, precision = #tpu.contract_precision<fp32>} : vector<4x40xf32>, vector<40x40xf32>, vector<4x40xf32> -> vector<4x40xf32>
      %77 = arith.subf %76, %0 : vector<4x40xf32>
      %78 = arith.addf %77, %74 : vector<4x40xf32>
      %79 = arith.maximumf %4, %78 : vector<4x40xf32>
      %80 = arith.minimumf %7, %79 : vector<4x40xf32>
      %81 = arith.subf %77, %80 : vector<4x40xf32>
      %82 = arith.addf %74, %81 : vector<4x40xf32>
      %83 = arith.subf %80, %82 : vector<4x40xf32>
      %c9_i32 = arith.constant 9 : i32
      %cst_21 = arith.constant dense<0.000000e+00> : vector<4x40xf32>
      %84 = tpu.matmul %83, %1, %cst_21 {dimension_numbers = #tpu.dot_dimension_numbers<[1], [0], [0], [1], [0, 0, 1, 1], [], []>, precision = #tpu.contract_precision<fp32>} : vector<4x40xf32>, vector<40x40xf32>, vector<4x40xf32> -> vector<4x40xf32>
      %85 = arith.subf %84, %0 : vector<4x40xf32>
      %86 = arith.addf %85, %82 : vector<4x40xf32>
      %87 = arith.maximumf %4, %86 : vector<4x40xf32>
      %88 = arith.minimumf %7, %87 : vector<4x40xf32>
      %89 = arith.subf %85, %88 : vector<4x40xf32>
      %90 = arith.addf %82, %89 : vector<4x40xf32>
      %91 = arith.subf %88, %90 : vector<4x40xf32>
      %c10_i32 = arith.constant 10 : i32
      %cst_22 = arith.constant dense<0.000000e+00> : vector<4x40xf32>
      %92 = tpu.matmul %91, %1, %cst_22 {dimension_numbers = #tpu.dot_dimension_numbers<[1], [0], [0], [1], [0, 0, 1, 1], [], []>, precision = #tpu.contract_precision<fp32>} : vector<4x40xf32>, vector<40x40xf32>, vector<4x40xf32> -> vector<4x40xf32>
      %93 = arith.subf %92, %0 : vector<4x40xf32>
      %94 = arith.addf %93, %90 : vector<4x40xf32>
      %95 = arith.maximumf %4, %94 : vector<4x40xf32>
      %96 = arith.minimumf %7, %95 : vector<4x40xf32>
      %97 = arith.subf %93, %96 : vector<4x40xf32>
      %98 = arith.addf %90, %97 : vector<4x40xf32>
      %99 = arith.subf %96, %98 : vector<4x40xf32>
      %c11_i32 = arith.constant 11 : i32
      %cst_23 = arith.constant dense<0.000000e+00> : vector<4x40xf32>
      %100 = tpu.matmul %99, %1, %cst_23 {dimension_numbers = #tpu.dot_dimension_numbers<[1], [0], [0], [1], [0, 0, 1, 1], [], []>, precision = #tpu.contract_precision<fp32>} : vector<4x40xf32>, vector<40x40xf32>, vector<4x40xf32> -> vector<4x40xf32>
      %101 = arith.subf %100, %0 : vector<4x40xf32>
      %102 = arith.addf %101, %98 : vector<4x40xf32>
      %103 = arith.maximumf %4, %102 : vector<4x40xf32>
      %104 = arith.minimumf %7, %103 : vector<4x40xf32>
      %105 = arith.subf %101, %104 : vector<4x40xf32>
      %106 = arith.addf %98, %105 : vector<4x40xf32>
      %107 = arith.subf %104, %106 : vector<4x40xf32>
      %c12_i32 = arith.constant 12 : i32
      %cst_24 = arith.constant dense<0.000000e+00> : vector<4x40xf32>
      %108 = tpu.matmul %107, %1, %cst_24 {dimension_numbers = #tpu.dot_dimension_numbers<[1], [0], [0], [1], [0, 0, 1, 1], [], []>, precision = #tpu.contract_precision<fp32>} : vector<4x40xf32>, vector<40x40xf32>, vector<4x40xf32> -> vector<4x40xf32>
      %109 = arith.subf %108, %0 : vector<4x40xf32>
      %110 = arith.addf %109, %106 : vector<4x40xf32>
      %111 = arith.maximumf %4, %110 : vector<4x40xf32>
      %112 = arith.minimumf %7, %111 : vector<4x40xf32>
      %113 = arith.subf %109, %112 : vector<4x40xf32>
      %114 = arith.addf %106, %113 : vector<4x40xf32>
      %115 = arith.subf %112, %114 : vector<4x40xf32>
      %c13_i32 = arith.constant 13 : i32
      %cst_25 = arith.constant dense<0.000000e+00> : vector<4x40xf32>
      %116 = tpu.matmul %115, %1, %cst_25 {dimension_numbers = #tpu.dot_dimension_numbers<[1], [0], [0], [1], [0, 0, 1, 1], [], []>, precision = #tpu.contract_precision<fp32>} : vector<4x40xf32>, vector<40x40xf32>, vector<4x40xf32> -> vector<4x40xf32>
      %117 = arith.subf %116, %0 : vector<4x40xf32>
      %118 = arith.addf %117, %114 : vector<4x40xf32>
      %119 = arith.maximumf %4, %118 : vector<4x40xf32>
      %120 = arith.minimumf %7, %119 : vector<4x40xf32>
      %121 = arith.subf %117, %120 : vector<4x40xf32>
      %122 = arith.addf %114, %121 : vector<4x40xf32>
      %123 = arith.subf %120, %122 : vector<4x40xf32>
      %c14_i32 = arith.constant 14 : i32
      %cst_26 = arith.constant dense<0.000000e+00> : vector<4x40xf32>
      %124 = tpu.matmul %123, %1, %cst_26 {dimension_numbers = #tpu.dot_dimension_numbers<[1], [0], [0], [1], [0, 0, 1, 1], [], []>, precision = #tpu.contract_precision<fp32>} : vector<4x40xf32>, vector<40x40xf32>, vector<4x40xf32> -> vector<4x40xf32>
      %125 = arith.subf %124, %0 : vector<4x40xf32>
      %126 = arith.addf %125, %122 : vector<4x40xf32>
      %127 = arith.maximumf %4, %126 : vector<4x40xf32>
      %128 = arith.minimumf %7, %127 : vector<4x40xf32>
      %129 = arith.subf %125, %128 : vector<4x40xf32>
      %130 = arith.addf %122, %129 : vector<4x40xf32>
      %131 = arith.subf %128, %130 : vector<4x40xf32>
      %c15_i32 = arith.constant 15 : i32
      %cst_27 = arith.constant dense<0.000000e+00> : vector<4x40xf32>
      %132 = tpu.matmul %131, %1, %cst_27 {dimension_numbers = #tpu.dot_dimension_numbers<[1], [0], [0], [1], [0, 0, 1, 1], [], []>, precision = #tpu.contract_precision<fp32>} : vector<4x40xf32>, vector<40x40xf32>, vector<4x40xf32> -> vector<4x40xf32>
      %133 = arith.subf %132, %0 : vector<4x40xf32>
      %134 = arith.addf %133, %130 : vector<4x40xf32>
      %135 = arith.maximumf %4, %134 : vector<4x40xf32>
      %136 = arith.minimumf %7, %135 : vector<4x40xf32>
      %137 = arith.subf %133, %136 : vector<4x40xf32>
      %138 = arith.addf %130, %137 : vector<4x40xf32>
      %139 = arith.subf %136, %138 : vector<4x40xf32>
      %c16_i32 = arith.constant 16 : i32
      %cst_28 = arith.constant dense<0.000000e+00> : vector<4x40xf32>
      %140 = tpu.matmul %139, %1, %cst_28 {dimension_numbers = #tpu.dot_dimension_numbers<[1], [0], [0], [1], [0, 0, 1, 1], [], []>, precision = #tpu.contract_precision<fp32>} : vector<4x40xf32>, vector<40x40xf32>, vector<4x40xf32> -> vector<4x40xf32>
      %141 = arith.subf %140, %0 : vector<4x40xf32>
      %142 = arith.addf %141, %138 : vector<4x40xf32>
      %143 = arith.maximumf %4, %142 : vector<4x40xf32>
      %144 = arith.minimumf %7, %143 : vector<4x40xf32>
      %145 = arith.subf %141, %144 : vector<4x40xf32>
      %146 = arith.addf %138, %145 : vector<4x40xf32>
      %147 = arith.subf %144, %146 : vector<4x40xf32>
      %c17_i32 = arith.constant 17 : i32
      %cst_29 = arith.constant dense<0.000000e+00> : vector<4x40xf32>
      %148 = tpu.matmul %147, %1, %cst_29 {dimension_numbers = #tpu.dot_dimension_numbers<[1], [0], [0], [1], [0, 0, 1, 1], [], []>, precision = #tpu.contract_precision<fp32>} : vector<4x40xf32>, vector<40x40xf32>, vector<4x40xf32> -> vector<4x40xf32>
      %149 = arith.subf %148, %0 : vector<4x40xf32>
      %150 = arith.addf %149, %146 : vector<4x40xf32>
      %151 = arith.maximumf %4, %150 : vector<4x40xf32>
      %152 = arith.minimumf %7, %151 : vector<4x40xf32>
      %153 = arith.subf %149, %152 : vector<4x40xf32>
      %154 = arith.addf %146, %153 : vector<4x40xf32>
      %155 = arith.subf %152, %154 : vector<4x40xf32>
      %c18_i32 = arith.constant 18 : i32
      %cst_30 = arith.constant dense<0.000000e+00> : vector<4x40xf32>
      %156 = tpu.matmul %155, %1, %cst_30 {dimension_numbers = #tpu.dot_dimension_numbers<[1], [0], [0], [1], [0, 0, 1, 1], [], []>, precision = #tpu.contract_precision<fp32>} : vector<4x40xf32>, vector<40x40xf32>, vector<4x40xf32> -> vector<4x40xf32>
      %157 = arith.subf %156, %0 : vector<4x40xf32>
      %158 = arith.addf %157, %154 : vector<4x40xf32>
      %159 = arith.maximumf %4, %158 : vector<4x40xf32>
      %160 = arith.minimumf %7, %159 : vector<4x40xf32>
      %161 = arith.subf %157, %160 : vector<4x40xf32>
      %162 = arith.addf %154, %161 : vector<4x40xf32>
      %163 = arith.subf %160, %162 : vector<4x40xf32>
      %c19_i32 = arith.constant 19 : i32
      %cst_31 = arith.constant dense<0.000000e+00> : vector<4x40xf32>
      %164 = tpu.matmul %163, %1, %cst_31 {dimension_numbers = #tpu.dot_dimension_numbers<[1], [0], [0], [1], [0, 0, 1, 1], [], []>, precision = #tpu.contract_precision<fp32>} : vector<4x40xf32>, vector<40x40xf32>, vector<4x40xf32> -> vector<4x40xf32>
      %165 = arith.subf %164, %0 : vector<4x40xf32>
      %166 = arith.addf %165, %162 : vector<4x40xf32>
      %167 = arith.maximumf %4, %166 : vector<4x40xf32>
      %168 = arith.minimumf %7, %167 : vector<4x40xf32>
      %169 = arith.subf %165, %168 : vector<4x40xf32>
      %170 = arith.addf %162, %169 : vector<4x40xf32>
      %171 = arith.subf %168, %170 : vector<4x40xf32>
      %c20_i32 = arith.constant 20 : i32
      %cst_32 = arith.constant dense<0.000000e+00> : vector<4x40xf32>
      %172 = tpu.matmul %171, %1, %cst_32 {dimension_numbers = #tpu.dot_dimension_numbers<[1], [0], [0], [1], [0, 0, 1, 1], [], []>, precision = #tpu.contract_precision<fp32>} : vector<4x40xf32>, vector<40x40xf32>, vector<4x40xf32> -> vector<4x40xf32>
      %173 = arith.subf %172, %0 : vector<4x40xf32>
      %174 = arith.addf %173, %170 : vector<4x40xf32>
      %175 = arith.maximumf %4, %174 : vector<4x40xf32>
      %176 = arith.minimumf %7, %175 : vector<4x40xf32>
      %177 = arith.subf %173, %176 : vector<4x40xf32>
      %178 = arith.addf %170, %177 : vector<4x40xf32>
      %179 = arith.subf %176, %178 : vector<4x40xf32>
      %c21_i32 = arith.constant 21 : i32
      %cst_33 = arith.constant dense<0.000000e+00> : vector<4x40xf32>
      %180 = tpu.matmul %179, %1, %cst_33 {dimension_numbers = #tpu.dot_dimension_numbers<[1], [0], [0], [1], [0, 0, 1, 1], [], []>, precision = #tpu.contract_precision<fp32>} : vector<4x40xf32>, vector<40x40xf32>, vector<4x40xf32> -> vector<4x40xf32>
      %181 = arith.subf %180, %0 : vector<4x40xf32>
      %182 = arith.addf %181, %178 : vector<4x40xf32>
      %183 = arith.maximumf %4, %182 : vector<4x40xf32>
      %184 = arith.minimumf %7, %183 : vector<4x40xf32>
      %185 = arith.subf %181, %184 : vector<4x40xf32>
      %186 = arith.addf %178, %185 : vector<4x40xf32>
      %187 = arith.subf %184, %186 : vector<4x40xf32>
      %c22_i32 = arith.constant 22 : i32
      %cst_34 = arith.constant dense<0.000000e+00> : vector<4x40xf32>
      %188 = tpu.matmul %187, %1, %cst_34 {dimension_numbers = #tpu.dot_dimension_numbers<[1], [0], [0], [1], [0, 0, 1, 1], [], []>, precision = #tpu.contract_precision<fp32>} : vector<4x40xf32>, vector<40x40xf32>, vector<4x40xf32> -> vector<4x40xf32>
      %189 = arith.subf %188, %0 : vector<4x40xf32>
      %190 = arith.addf %189, %186 : vector<4x40xf32>
      %191 = arith.maximumf %4, %190 : vector<4x40xf32>
      %192 = arith.minimumf %7, %191 : vector<4x40xf32>
      %193 = arith.subf %189, %192 : vector<4x40xf32>
      %194 = arith.addf %186, %193 : vector<4x40xf32>
      %195 = arith.subf %192, %194 : vector<4x40xf32>
      %c23_i32 = arith.constant 23 : i32
      %cst_35 = arith.constant dense<0.000000e+00> : vector<4x40xf32>
      %196 = tpu.matmul %195, %1, %cst_35 {dimension_numbers = #tpu.dot_dimension_numbers<[1], [0], [0], [1], [0, 0, 1, 1], [], []>, precision = #tpu.contract_precision<fp32>} : vector<4x40xf32>, vector<40x40xf32>, vector<4x40xf32> -> vector<4x40xf32>
      %197 = arith.subf %196, %0 : vector<4x40xf32>
      %198 = arith.addf %197, %194 : vector<4x40xf32>
      %199 = arith.maximumf %4, %198 : vector<4x40xf32>
      %200 = arith.minimumf %7, %199 : vector<4x40xf32>
      %201 = arith.subf %197, %200 : vector<4x40xf32>
      %202 = arith.addf %194, %201 : vector<4x40xf32>
      %203 = arith.subf %200, %202 : vector<4x40xf32>
      %c24_i32 = arith.constant 24 : i32
      %cst_36 = arith.constant dense<0.000000e+00> : vector<4x40xf32>
      %204 = tpu.matmul %203, %1, %cst_36 {dimension_numbers = #tpu.dot_dimension_numbers<[1], [0], [0], [1], [0, 0, 1, 1], [], []>, precision = #tpu.contract_precision<fp32>} : vector<4x40xf32>, vector<40x40xf32>, vector<4x40xf32> -> vector<4x40xf32>
      %205 = arith.subf %204, %0 : vector<4x40xf32>
      %206 = arith.addf %205, %202 : vector<4x40xf32>
      %207 = arith.maximumf %4, %206 : vector<4x40xf32>
      %208 = arith.minimumf %7, %207 : vector<4x40xf32>
      %209 = arith.subf %205, %208 : vector<4x40xf32>
      %210 = arith.addf %202, %209 : vector<4x40xf32>
      %211 = arith.subf %208, %210 : vector<4x40xf32>
      %c25_i32 = arith.constant 25 : i32
      %cst_37 = arith.constant dense<0.000000e+00> : vector<4x40xf32>
      %212 = tpu.matmul %211, %1, %cst_37 {dimension_numbers = #tpu.dot_dimension_numbers<[1], [0], [0], [1], [0, 0, 1, 1], [], []>, precision = #tpu.contract_precision<fp32>} : vector<4x40xf32>, vector<40x40xf32>, vector<4x40xf32> -> vector<4x40xf32>
      %213 = arith.subf %212, %0 : vector<4x40xf32>
      %214 = arith.addf %213, %210 : vector<4x40xf32>
      %215 = arith.maximumf %4, %214 : vector<4x40xf32>
      %216 = arith.minimumf %7, %215 : vector<4x40xf32>
      %217 = arith.subf %213, %216 : vector<4x40xf32>
      %218 = arith.addf %210, %217 : vector<4x40xf32>
      %219 = arith.subf %216, %218 : vector<4x40xf32>
      %c26_i32 = arith.constant 26 : i32
      %cst_38 = arith.constant dense<0.000000e+00> : vector<4x40xf32>
      %220 = tpu.matmul %219, %1, %cst_38 {dimension_numbers = #tpu.dot_dimension_numbers<[1], [0], [0], [1], [0, 0, 1, 1], [], []>, precision = #tpu.contract_precision<fp32>} : vector<4x40xf32>, vector<40x40xf32>, vector<4x40xf32> -> vector<4x40xf32>
      %221 = arith.subf %220, %0 : vector<4x40xf32>
      %222 = arith.addf %221, %218 : vector<4x40xf32>
      %223 = arith.maximumf %4, %222 : vector<4x40xf32>
      %224 = arith.minimumf %7, %223 : vector<4x40xf32>
      %225 = arith.subf %221, %224 : vector<4x40xf32>
      %226 = arith.addf %218, %225 : vector<4x40xf32>
      %227 = arith.subf %224, %226 : vector<4x40xf32>
      %c27_i32 = arith.constant 27 : i32
      %cst_39 = arith.constant dense<0.000000e+00> : vector<4x40xf32>
      %228 = tpu.matmul %227, %1, %cst_39 {dimension_numbers = #tpu.dot_dimension_numbers<[1], [0], [0], [1], [0, 0, 1, 1], [], []>, precision = #tpu.contract_precision<fp32>} : vector<4x40xf32>, vector<40x40xf32>, vector<4x40xf32> -> vector<4x40xf32>
      %229 = arith.subf %228, %0 : vector<4x40xf32>
      %230 = arith.addf %229, %226 : vector<4x40xf32>
      %231 = arith.maximumf %4, %230 : vector<4x40xf32>
      %232 = arith.minimumf %7, %231 : vector<4x40xf32>
      %233 = arith.subf %229, %232 : vector<4x40xf32>
      %234 = arith.addf %226, %233 : vector<4x40xf32>
      %235 = arith.subf %232, %234 : vector<4x40xf32>
      %c28_i32 = arith.constant 28 : i32
      %cst_40 = arith.constant dense<0.000000e+00> : vector<4x40xf32>
      %236 = tpu.matmul %235, %1, %cst_40 {dimension_numbers = #tpu.dot_dimension_numbers<[1], [0], [0], [1], [0, 0, 1, 1], [], []>, precision = #tpu.contract_precision<fp32>} : vector<4x40xf32>, vector<40x40xf32>, vector<4x40xf32> -> vector<4x40xf32>
      %237 = arith.subf %236, %0 : vector<4x40xf32>
      %238 = arith.addf %237, %234 : vector<4x40xf32>
      %239 = arith.maximumf %4, %238 : vector<4x40xf32>
      %240 = arith.minimumf %7, %239 : vector<4x40xf32>
      %241 = arith.subf %237, %240 : vector<4x40xf32>
      %242 = arith.addf %234, %241 : vector<4x40xf32>
      %243 = arith.subf %240, %242 : vector<4x40xf32>
      %c29_i32 = arith.constant 29 : i32
      %cst_41 = arith.constant dense<0.000000e+00> : vector<4x40xf32>
      %244 = tpu.matmul %243, %1, %cst_41 {dimension_numbers = #tpu.dot_dimension_numbers<[1], [0], [0], [1], [0, 0, 1, 1], [], []>, precision = #tpu.contract_precision<fp32>} : vector<4x40xf32>, vector<40x40xf32>, vector<4x40xf32> -> vector<4x40xf32>
      %245 = arith.subf %244, %0 : vector<4x40xf32>
      %246 = arith.addf %245, %242 : vector<4x40xf32>
      %247 = arith.maximumf %4, %246 : vector<4x40xf32>
      %248 = arith.minimumf %7, %247 : vector<4x40xf32>
      %249 = arith.subf %245, %248 : vector<4x40xf32>
      %250 = arith.addf %242, %249 : vector<4x40xf32>
      %251 = arith.subf %248, %250 : vector<4x40xf32>
      %c30_i32 = arith.constant 30 : i32
      %cst_42 = arith.constant dense<0.000000e+00> : vector<4x40xf32>
      %252 = tpu.matmul %251, %1, %cst_42 {dimension_numbers = #tpu.dot_dimension_numbers<[1], [0], [0], [1], [0, 0, 1, 1], [], []>, precision = #tpu.contract_precision<fp32>} : vector<4x40xf32>, vector<40x40xf32>, vector<4x40xf32> -> vector<4x40xf32>
      %253 = arith.subf %252, %0 : vector<4x40xf32>
      %254 = arith.addf %253, %250 : vector<4x40xf32>
      %255 = arith.maximumf %4, %254 : vector<4x40xf32>
      %256 = arith.minimumf %7, %255 : vector<4x40xf32>
      %257 = arith.subf %253, %256 : vector<4x40xf32>
      %258 = arith.addf %250, %257 : vector<4x40xf32>
      %259 = arith.subf %256, %258 : vector<4x40xf32>
      %c31_i32 = arith.constant 31 : i32
      %cst_43 = arith.constant dense<0.000000e+00> : vector<4x40xf32>
      %260 = tpu.matmul %259, %1, %cst_43 {dimension_numbers = #tpu.dot_dimension_numbers<[1], [0], [0], [1], [0, 0, 1, 1], [], []>, precision = #tpu.contract_precision<fp32>} : vector<4x40xf32>, vector<40x40xf32>, vector<4x40xf32> -> vector<4x40xf32>
      %261 = arith.subf %260, %0 : vector<4x40xf32>
      %262 = arith.addf %261, %258 : vector<4x40xf32>
      %263 = arith.maximumf %4, %262 : vector<4x40xf32>
      %264 = arith.minimumf %7, %263 : vector<4x40xf32>
      %265 = arith.subf %261, %264 : vector<4x40xf32>
      %266 = arith.addf %258, %265 : vector<4x40xf32>
      %267 = arith.subf %264, %266 : vector<4x40xf32>
      %c32_i32 = arith.constant 32 : i32
      %cst_44 = arith.constant dense<0.000000e+00> : vector<4x40xf32>
      %268 = tpu.matmul %267, %1, %cst_44 {dimension_numbers = #tpu.dot_dimension_numbers<[1], [0], [0], [1], [0, 0, 1, 1], [], []>, precision = #tpu.contract_precision<fp32>} : vector<4x40xf32>, vector<40x40xf32>, vector<4x40xf32> -> vector<4x40xf32>
      %269 = arith.subf %268, %0 : vector<4x40xf32>
      %270 = arith.addf %269, %266 : vector<4x40xf32>
      %271 = arith.maximumf %4, %270 : vector<4x40xf32>
      %272 = arith.minimumf %7, %271 : vector<4x40xf32>
      %273 = arith.subf %269, %272 : vector<4x40xf32>
      %274 = arith.addf %266, %273 : vector<4x40xf32>
      %275 = arith.subf %272, %274 : vector<4x40xf32>
      %c33_i32 = arith.constant 33 : i32
      %cst_45 = arith.constant dense<0.000000e+00> : vector<4x40xf32>
      %276 = tpu.matmul %275, %1, %cst_45 {dimension_numbers = #tpu.dot_dimension_numbers<[1], [0], [0], [1], [0, 0, 1, 1], [], []>, precision = #tpu.contract_precision<fp32>} : vector<4x40xf32>, vector<40x40xf32>, vector<4x40xf32> -> vector<4x40xf32>
      %277 = arith.subf %276, %0 : vector<4x40xf32>
      %278 = arith.addf %277, %274 : vector<4x40xf32>
      %279 = arith.maximumf %4, %278 : vector<4x40xf32>
      %280 = arith.minimumf %7, %279 : vector<4x40xf32>
      %281 = arith.subf %277, %280 : vector<4x40xf32>
      %282 = arith.addf %274, %281 : vector<4x40xf32>
      %283 = arith.subf %280, %282 : vector<4x40xf32>
      %c34_i32 = arith.constant 34 : i32
      %cst_46 = arith.constant dense<0.000000e+00> : vector<4x40xf32>
      %284 = tpu.matmul %283, %1, %cst_46 {dimension_numbers = #tpu.dot_dimension_numbers<[1], [0], [0], [1], [0, 0, 1, 1], [], []>, precision = #tpu.contract_precision<fp32>} : vector<4x40xf32>, vector<40x40xf32>, vector<4x40xf32> -> vector<4x40xf32>
      %285 = arith.subf %284, %0 : vector<4x40xf32>
      %286 = arith.addf %285, %282 : vector<4x40xf32>
      %287 = arith.maximumf %4, %286 : vector<4x40xf32>
      %288 = arith.minimumf %7, %287 : vector<4x40xf32>
      %289 = arith.subf %285, %288 : vector<4x40xf32>
      %290 = arith.addf %282, %289 : vector<4x40xf32>
      %291 = arith.subf %288, %290 : vector<4x40xf32>
      %c35_i32 = arith.constant 35 : i32
      %cst_47 = arith.constant dense<0.000000e+00> : vector<4x40xf32>
      %292 = tpu.matmul %291, %1, %cst_47 {dimension_numbers = #tpu.dot_dimension_numbers<[1], [0], [0], [1], [0, 0, 1, 1], [], []>, precision = #tpu.contract_precision<fp32>} : vector<4x40xf32>, vector<40x40xf32>, vector<4x40xf32> -> vector<4x40xf32>
      %293 = arith.subf %292, %0 : vector<4x40xf32>
      %294 = arith.addf %293, %290 : vector<4x40xf32>
      %295 = arith.maximumf %4, %294 : vector<4x40xf32>
      %296 = arith.minimumf %7, %295 : vector<4x40xf32>
      %297 = arith.subf %293, %296 : vector<4x40xf32>
      %298 = arith.addf %290, %297 : vector<4x40xf32>
      %299 = arith.subf %296, %298 : vector<4x40xf32>
      %c36_i32 = arith.constant 36 : i32
      %cst_48 = arith.constant dense<0.000000e+00> : vector<4x40xf32>
      %300 = tpu.matmul %299, %1, %cst_48 {dimension_numbers = #tpu.dot_dimension_numbers<[1], [0], [0], [1], [0, 0, 1, 1], [], []>, precision = #tpu.contract_precision<fp32>} : vector<4x40xf32>, vector<40x40xf32>, vector<4x40xf32> -> vector<4x40xf32>
      %301 = arith.subf %300, %0 : vector<4x40xf32>
      %302 = arith.addf %301, %298 : vector<4x40xf32>
      %303 = arith.maximumf %4, %302 : vector<4x40xf32>
      %304 = arith.minimumf %7, %303 : vector<4x40xf32>
      %305 = arith.subf %301, %304 : vector<4x40xf32>
      %306 = arith.addf %298, %305 : vector<4x40xf32>
      %307 = arith.subf %304, %306 : vector<4x40xf32>
      %c37_i32 = arith.constant 37 : i32
      %cst_49 = arith.constant dense<0.000000e+00> : vector<4x40xf32>
      %308 = tpu.matmul %307, %1, %cst_49 {dimension_numbers = #tpu.dot_dimension_numbers<[1], [0], [0], [1], [0, 0, 1, 1], [], []>, precision = #tpu.contract_precision<fp32>} : vector<4x40xf32>, vector<40x40xf32>, vector<4x40xf32> -> vector<4x40xf32>
      %309 = arith.subf %308, %0 : vector<4x40xf32>
      %310 = arith.addf %309, %306 : vector<4x40xf32>
      %311 = arith.maximumf %4, %310 : vector<4x40xf32>
      %312 = arith.minimumf %7, %311 : vector<4x40xf32>
      %313 = arith.subf %309, %312 : vector<4x40xf32>
      %314 = arith.addf %306, %313 : vector<4x40xf32>
      %315 = arith.subf %312, %314 : vector<4x40xf32>
      %c38_i32 = arith.constant 38 : i32
      %cst_50 = arith.constant dense<0.000000e+00> : vector<4x40xf32>
      %316 = tpu.matmul %315, %1, %cst_50 {dimension_numbers = #tpu.dot_dimension_numbers<[1], [0], [0], [1], [0, 0, 1, 1], [], []>, precision = #tpu.contract_precision<fp32>} : vector<4x40xf32>, vector<40x40xf32>, vector<4x40xf32> -> vector<4x40xf32>
      %317 = arith.subf %316, %0 : vector<4x40xf32>
      %318 = arith.addf %317, %314 : vector<4x40xf32>
      %319 = arith.maximumf %4, %318 : vector<4x40xf32>
      %320 = arith.minimumf %7, %319 : vector<4x40xf32>
      %321 = arith.subf %317, %320 : vector<4x40xf32>
      %322 = arith.addf %314, %321 : vector<4x40xf32>
      %323 = arith.subf %320, %322 : vector<4x40xf32>
      %c39_i32 = arith.constant 39 : i32
      %cst_51 = arith.constant dense<0.000000e+00> : vector<4x40xf32>
      %324 = tpu.matmul %323, %1, %cst_51 {dimension_numbers = #tpu.dot_dimension_numbers<[1], [0], [0], [1], [0, 0, 1, 1], [], []>, precision = #tpu.contract_precision<fp32>} : vector<4x40xf32>, vector<40x40xf32>, vector<4x40xf32> -> vector<4x40xf32>
      %325 = arith.subf %324, %0 : vector<4x40xf32>
      %326 = arith.addf %325, %322 : vector<4x40xf32>
      %327 = arith.maximumf %4, %326 : vector<4x40xf32>
      %328 = arith.minimumf %7, %327 : vector<4x40xf32>
      %329 = arith.subf %325, %328 : vector<4x40xf32>
      %330 = arith.addf %322, %329 : vector<4x40xf32>
      %331 = arith.subf %328, %330 : vector<4x40xf32>
      %c40_i32 = arith.constant 40 : i32
      %cst_52 = arith.constant dense<0.000000e+00> : vector<4x40xf32>
      %332 = tpu.matmul %331, %1, %cst_52 {dimension_numbers = #tpu.dot_dimension_numbers<[1], [0], [0], [1], [0, 0, 1, 1], [], []>, precision = #tpu.contract_precision<fp32>} : vector<4x40xf32>, vector<40x40xf32>, vector<4x40xf32> -> vector<4x40xf32>
      %333 = arith.subf %332, %0 : vector<4x40xf32>
      %334 = arith.addf %333, %330 : vector<4x40xf32>
      %335 = arith.maximumf %4, %334 : vector<4x40xf32>
      %336 = arith.minimumf %7, %335 : vector<4x40xf32>
      %337 = arith.subf %333, %336 : vector<4x40xf32>
      %338 = arith.addf %330, %337 : vector<4x40xf32>
      %339 = arith.subf %336, %338 : vector<4x40xf32>
      %c41_i32 = arith.constant 41 : i32
      %cst_53 = arith.constant dense<0.000000e+00> : vector<4x40xf32>
      %340 = tpu.matmul %339, %1, %cst_53 {dimension_numbers = #tpu.dot_dimension_numbers<[1], [0], [0], [1], [0, 0, 1, 1], [], []>, precision = #tpu.contract_precision<fp32>} : vector<4x40xf32>, vector<40x40xf32>, vector<4x40xf32> -> vector<4x40xf32>
      %341 = arith.subf %340, %0 : vector<4x40xf32>
      %342 = arith.addf %341, %338 : vector<4x40xf32>
      %343 = arith.maximumf %4, %342 : vector<4x40xf32>
      %344 = arith.minimumf %7, %343 : vector<4x40xf32>
      %345 = arith.subf %341, %344 : vector<4x40xf32>
      %346 = arith.addf %338, %345 : vector<4x40xf32>
      %347 = arith.subf %344, %346 : vector<4x40xf32>
      %c42_i32 = arith.constant 42 : i32
      %cst_54 = arith.constant dense<0.000000e+00> : vector<4x40xf32>
      %348 = tpu.matmul %347, %1, %cst_54 {dimension_numbers = #tpu.dot_dimension_numbers<[1], [0], [0], [1], [0, 0, 1, 1], [], []>, precision = #tpu.contract_precision<fp32>} : vector<4x40xf32>, vector<40x40xf32>, vector<4x40xf32> -> vector<4x40xf32>
      %349 = arith.subf %348, %0 : vector<4x40xf32>
      %350 = arith.addf %349, %346 : vector<4x40xf32>
      %351 = arith.maximumf %4, %350 : vector<4x40xf32>
      %352 = arith.minimumf %7, %351 : vector<4x40xf32>
      %353 = arith.subf %349, %352 : vector<4x40xf32>
      %354 = arith.addf %346, %353 : vector<4x40xf32>
      %355 = arith.subf %352, %354 : vector<4x40xf32>
      %c43_i32 = arith.constant 43 : i32
      %cst_55 = arith.constant dense<0.000000e+00> : vector<4x40xf32>
      %356 = tpu.matmul %355, %1, %cst_55 {dimension_numbers = #tpu.dot_dimension_numbers<[1], [0], [0], [1], [0, 0, 1, 1], [], []>, precision = #tpu.contract_precision<fp32>} : vector<4x40xf32>, vector<40x40xf32>, vector<4x40xf32> -> vector<4x40xf32>
      %357 = arith.subf %356, %0 : vector<4x40xf32>
      %358 = arith.addf %357, %354 : vector<4x40xf32>
      %359 = arith.maximumf %4, %358 : vector<4x40xf32>
      %360 = arith.minimumf %7, %359 : vector<4x40xf32>
      %361 = arith.subf %357, %360 : vector<4x40xf32>
      %362 = arith.addf %354, %361 : vector<4x40xf32>
      %363 = arith.subf %360, %362 : vector<4x40xf32>
      %c44_i32 = arith.constant 44 : i32
      %cst_56 = arith.constant dense<0.000000e+00> : vector<4x40xf32>
      %364 = tpu.matmul %363, %1, %cst_56 {dimension_numbers = #tpu.dot_dimension_numbers<[1], [0], [0], [1], [0, 0, 1, 1], [], []>, precision = #tpu.contract_precision<fp32>} : vector<4x40xf32>, vector<40x40xf32>, vector<4x40xf32> -> vector<4x40xf32>
      %365 = arith.subf %364, %0 : vector<4x40xf32>
      %366 = arith.addf %365, %362 : vector<4x40xf32>
      %367 = arith.maximumf %4, %366 : vector<4x40xf32>
      %368 = arith.minimumf %7, %367 : vector<4x40xf32>
      %369 = arith.subf %365, %368 : vector<4x40xf32>
      %370 = arith.addf %362, %369 : vector<4x40xf32>
      %371 = arith.subf %368, %370 : vector<4x40xf32>
      %c45_i32 = arith.constant 45 : i32
      %cst_57 = arith.constant dense<0.000000e+00> : vector<4x40xf32>
      %372 = tpu.matmul %371, %1, %cst_57 {dimension_numbers = #tpu.dot_dimension_numbers<[1], [0], [0], [1], [0, 0, 1, 1], [], []>, precision = #tpu.contract_precision<fp32>} : vector<4x40xf32>, vector<40x40xf32>, vector<4x40xf32> -> vector<4x40xf32>
      %373 = arith.subf %372, %0 : vector<4x40xf32>
      %374 = arith.addf %373, %370 : vector<4x40xf32>
      %375 = arith.maximumf %4, %374 : vector<4x40xf32>
      %376 = arith.minimumf %7, %375 : vector<4x40xf32>
      %377 = arith.subf %373, %376 : vector<4x40xf32>
      %378 = arith.addf %370, %377 : vector<4x40xf32>
      %379 = arith.subf %376, %378 : vector<4x40xf32>
      %c46_i32 = arith.constant 46 : i32
      %cst_58 = arith.constant dense<0.000000e+00> : vector<4x40xf32>
      %380 = tpu.matmul %379, %1, %cst_58 {dimension_numbers = #tpu.dot_dimension_numbers<[1], [0], [0], [1], [0, 0, 1, 1], [], []>, precision = #tpu.contract_precision<fp32>} : vector<4x40xf32>, vector<40x40xf32>, vector<4x40xf32> -> vector<4x40xf32>
      %381 = arith.subf %380, %0 : vector<4x40xf32>
      %382 = arith.addf %381, %378 : vector<4x40xf32>
      %383 = arith.maximumf %4, %382 : vector<4x40xf32>
      %384 = arith.minimumf %7, %383 : vector<4x40xf32>
      %385 = arith.subf %381, %384 : vector<4x40xf32>
      %386 = arith.addf %378, %385 : vector<4x40xf32>
      %387 = arith.subf %384, %386 : vector<4x40xf32>
      %c47_i32 = arith.constant 47 : i32
      %cst_59 = arith.constant dense<0.000000e+00> : vector<4x40xf32>
      %388 = tpu.matmul %387, %1, %cst_59 {dimension_numbers = #tpu.dot_dimension_numbers<[1], [0], [0], [1], [0, 0, 1, 1], [], []>, precision = #tpu.contract_precision<fp32>} : vector<4x40xf32>, vector<40x40xf32>, vector<4x40xf32> -> vector<4x40xf32>
      %389 = arith.subf %388, %0 : vector<4x40xf32>
      %390 = arith.addf %389, %386 : vector<4x40xf32>
      %391 = arith.maximumf %4, %390 : vector<4x40xf32>
      %392 = arith.minimumf %7, %391 : vector<4x40xf32>
      %393 = arith.subf %389, %392 : vector<4x40xf32>
      %394 = arith.addf %386, %393 : vector<4x40xf32>
      %395 = arith.subf %392, %394 : vector<4x40xf32>
      %c48_i32 = arith.constant 48 : i32
      %cst_60 = arith.constant dense<0.000000e+00> : vector<4x40xf32>
      %396 = tpu.matmul %395, %1, %cst_60 {dimension_numbers = #tpu.dot_dimension_numbers<[1], [0], [0], [1], [0, 0, 1, 1], [], []>, precision = #tpu.contract_precision<fp32>} : vector<4x40xf32>, vector<40x40xf32>, vector<4x40xf32> -> vector<4x40xf32>
      %397 = arith.subf %396, %0 : vector<4x40xf32>
      %398 = arith.addf %397, %394 : vector<4x40xf32>
      %399 = arith.maximumf %4, %398 : vector<4x40xf32>
      %400 = arith.minimumf %7, %399 : vector<4x40xf32>
      %401 = arith.subf %397, %400 : vector<4x40xf32>
      %402 = arith.addf %394, %401 : vector<4x40xf32>
      %403 = arith.subf %400, %402 : vector<4x40xf32>
      %c49_i32 = arith.constant 49 : i32
      %cst_61 = arith.constant dense<0.000000e+00> : vector<4x40xf32>
      %404 = tpu.matmul %403, %1, %cst_61 {dimension_numbers = #tpu.dot_dimension_numbers<[1], [0], [0], [1], [0, 0, 1, 1], [], []>, precision = #tpu.contract_precision<fp32>} : vector<4x40xf32>, vector<40x40xf32>, vector<4x40xf32> -> vector<4x40xf32>
      %405 = arith.subf %404, %0 : vector<4x40xf32>
      %406 = arith.addf %405, %402 : vector<4x40xf32>
      %407 = arith.maximumf %4, %406 : vector<4x40xf32>
      %408 = arith.minimumf %7, %407 : vector<4x40xf32>
      %409 = arith.subf %405, %408 : vector<4x40xf32>
      %410 = arith.addf %402, %409 : vector<4x40xf32>
      %411 = arith.subf %408, %410 : vector<4x40xf32>
      %c50_i32 = arith.constant 50 : i32
      %412 = arith.subf %411, %arg7 : vector<4x40xf32>
      %413 = math.absf %412 : vector<4x40xf32>
      %414 = vector.shape_cast %413 : vector<4x40xf32> to vector<1x4x40xf32>
      %cst_62 = arith.constant dense<0xFF800000> : vector<1xf32>
      %415 = vector.multi_reduction <maximumf>, %414, %cst_62 [1, 2] : vector<1x4x40xf32> to vector<1xf32>
      %416 = vector.shape_cast %415 : vector<1xf32> to vector<1x1x1xf32>
      %417 = vector.extract %416[0, 0, 0] : f32 from vector<1x1x1xf32>
      %cst_63 = arith.constant 0.000000e+00 : f32
      %418 = arith.maximumf %cst_63, %417 : f32
      %c1_i32_64 = arith.constant 1 : i32
      %419 = arith.addi %arg6, %c1_i32_64 : i32
      scf.yield %419, %411, %410, %418 : i32, vector<4x40xf32>, vector<4x40xf32>, f32
    }
    %c0_9 = arith.constant 0 : index
    %c0_10 = arith.constant 0 : index
    %11 = vector.load %arg5[%c0_9, %c0_10] : memref<4x40xf32, #tpu.memory_space<vmem>>, vector<4x40xf32>
    tpu.vector_store %arg5[%c0_9, %c0_10], %10#1 {strides = array<i32>} : memref<4x40xf32, #tpu.memory_space<vmem>>, vector<4x40xf32>,
    return
  }
  func.func @transform_0(%arg0: i32) -> (i32, i32) {
    %c0_i32 = arith.constant 0 : i32
    %c0_i32_0 = arith.constant 0 : i32
    return %arg0, %c0_i32 : i32, i32
  }
  func.func @transform_1(%arg0: i32) -> (i32, i32) {
    %c0_i32 = arith.constant 0 : i32
    %c0_i32_0 = arith.constant 0 : i32
    %c0_i32_1 = arith.constant 0 : i32
    return %c0_i32, %c0_i32_0 : i32, i32
  }
  func.func @transform_2(%arg0: i32) -> (i32, i32) {
    %c0_i32 = arith.constant 0 : i32
    %c0_i32_0 = arith.constant 0 : i32
    %c0_i32_1 = arith.constant 0 : i32
    return %c0_i32, %c0_i32_0 : i32, i32
  }
  func.func @transform_3(%arg0: i32) -> (i32, i32) {
    %c0_i32 = arith.constant 0 : i32
    %c0_i32_0 = arith.constant 0 : i32
    %c0_i32_1 = arith.constant 0 : i32
    return %c0_i32, %c0_i32_0 : i32, i32
  }
  func.func @transform_4(%arg0: i32) -> (i32, i32) {
    %c0_i32 = arith.constant 0 : i32
    %c0_i32_0 = arith.constant 0 : i32
    return %arg0, %c0_i32 : i32, i32
  }
}

</mosaic_0001>

<bundles_post_ra>
// kernel: tpu_custom_call.1
= control target key start
LH: loop header
LB: loop body
LE: loop exit
PB: predicated region body
PF: predicated region fallthrough
CT: control target
= control target key end

     0   :  { %9 = vsyncpa [#allocation3], 0  ;;  %s35562_s0 = inlined_call_operand.hbm [shape: f32[4,40], index: 0, kind: input, shape index: {}]   ;;  %s35563_s1 = inlined_call_operand.hbm [shape: f32[40,40], index: 1, kind: input, shape index: {}]   ;;  %s35564_s2 = inlined_call_operand.vmem [shape: f32[1,40], index: 2, kind: input, shape index: {}]   ;;  %s35565_s3 = inlined_call_operand.vmem [shape: f32[1,40], index: 3, kind: input, shape index: {}]   ;;  %s35566_s4 = inlined_call_operand.hbm [shape: f32[4,40], index: 4, kind: output, shape index: {}]  }
   0x1   :  { %10 = vsyncpa [#allocation6], 0 }
   0x2   :  { %11 = vsyncpa [#allocation4], 0  ;;  %s31349_s15 = smov [#allocation2]   ;;  %s31350_s17 = smov [#allocation5]  }
   0x3   :  { %s18_s16 = sshll.u32 %s31349_s15, 4  ;;  %s27_s18 = sshll.u32 %s31350_s17, 4  ;;  %s19_s16 = int_to_ptr.vmem [resolvable:$true] %s18_s16  ;;  %s28_s18 = int_to_ptr.vmem [resolvable:$true] %s27_s18 }
   0x4   :  { %s31267_s19 = scalar_lea.vmem %s19_s16, 64  ;;  %p31272_p1 = scmp.lt.s32.totalorder %s19_s16, %s19_s16 }
   0x5   :  { %p31268_p0 = scmp.ne.s32.totalorder %s19_s16, %s31267_s19  ;;  %p31273_p2 = scmp.lt.s32.totalorder %s31267_s19, %s31267_s19 }
   0x7   :  { %p31274_p3 = por %p31273_p2, %p31272_p1 }
   0x9   :  { %p31275_p4 = pnand %p31274_p3, %p31268_p0 }
   0xb   :  { %31278 = shalt.err (!%p31275_p4)
}
   0xc   :  { %21 = dma.hbm_to_vmem [thread:$0]  %s35562_s0, 64, %s19_s16, [#allocation3]  }
   0xd   :  { %s31287_s22 = scalar_lea.vmem %s28_s18, 640  ;;  %p31292_p6 = scmp.lt.s32.totalorder %s28_s18, %s28_s18 }
   0xe   :  { %p31288_p5 = scmp.ne.s32.totalorder %s28_s18, %s31287_s22  ;;  %p31293_p7 = scmp.lt.s32.totalorder %s31287_s22, %s31287_s22 }
  0x10   :  { %p31294_p8 = por %p31293_p7, %p31292_p6 }
  0x12   :  { %p31295_p9 = pnand %p31294_p8, %p31288_p5 }
  0x14   :  { %31298 = shalt.err (!%p31295_p9)
}
  0x15   :  { %s31351_s23 = smov 128   ;;  %s31352_s24 = smov 8  }
  0x16   :  { %33 = dma.hbm_to_vmem [thread:$0]  %s35563_s1, 640, %s28_s18, [#allocation6], %s31351_s23, %s31351_s23, %s31352_s24  }
  0x17   :  { %31331 = dma.done.wait [#allocation3], 64  }
  0x18   :  { %31332 = vsyncadd [#allocation3], 4294967232 }
  0x19   :  { %31333 = dma.done.wait [#allocation6], 640  }
  0x1a   :  { %31334 = vsyncadd [#allocation6], 4294966656  ;;  %v31388_v0 = vld [vmem:[#allocation2] sm:$0xf]  ;;  %v31390_v1 = vld [vmem:[#allocation5] sm:$0xff]  ;;  %v31410_v8 = vmov 0.0  }
  0x1b   :  { %v31392_v2 = vld [vmem:[#allocation5 + $0x8] sm:$0xff]  ;;  %v31394_v3 = vld [vmem:[#allocation5 + $0x10] sm:$0xff]  ;;  %v31396_v4 = vld [vmem:[#allocation5 + $0x18] sm:$0xff]  ;;  %v31412_v9 = vmov 0.0   ;;  %s31414_s29 = smov 0  }
  0x1c   :  { %v31398_v5 = vld [vmem:[#allocation5 + $0x20] sm:$0xff]  ;;  %v31403_v6 = vld [vmem:[%s35564_s2] ss:$0 sm:$0xff] }
  0x1d   :  { %v31408_v7 = vld [vmem:[%s35565_s3] ss:$0 sm:$0xff] }
  0x1e LB: > { %v31426_v10 = vand.u32 4294901760, %v31398_v5  ;;  %v31429_v11 = vand.u32 4294901760, %v31396_v4  ;;  %v31432_v12 = vand.u32 4294901760, %v31394_v3  ;;  %v31353_v13 = vmov 0.0   ;;  %s25490_s29 = sadd.s32 1, %s31347_s29   ;;  %s31355_s3 = smov 0.0   ;;  %s31347_s29 = sphi %s31414_s29, %s25490_s29   ;;  %v31343_v9 = vphi %v31412_v9, %v35567_v9   ;;  %v31339_v8 = vphi %v31410_v8, %v25474_v8  }
  0x1f   : > { %27325 = vmatprep.subr.mxu0 %v31353_v13  ;;  %v31436_v14 = vand.u32 4294901760, %v31392_v2  ;;  %27338 = vmatprep.subr.mxu1 %v31353_v13  ;;  %v31440_v15 = vand.u32 4294901760, %v31390_v1  ;;  %vm31354_vm0 = vmmov 0   ;;  %vm75_vm1 = vcmask 326656   ;;  %p69_p10 = scmp.lt.s32.totalorder %s25490_s29, 60 }
  0x20   : > { %27326 = vmatpush3.msra.mxu0 %v31426_v10  ;;  %v31445_v16 = vsub.f32 %v31398_v5, %v31426_v10  ;;  %27335 = vmatprep.mubr.msk.f32.mxu0 %vm31354_vm0, %v31353_v13  ;;  %v31451_v17 = vsub.f32 %v31396_v4, %v31429_v11  ;;  %v77_v18 = vsel %vm75_vm1, %v31343_v9, 0  ;;  %v31458_v19 = vsub.f32 %v31394_v3, %v31432_v12 }
  0x21   : > { %27327 = vmatprep.subr.mxu0 %v31353_v13  ;;  %v31462_v20 = vsub.f32 %v31392_v2, %v31436_v14  ;;  %v31466_v21 = vsub.f32 %v31390_v1, %v31440_v15  ;;  %27348 = vmatprep.mubr.msk.f32.mxu1 %vm31354_vm0, %v31353_v13  ;;  %v31477_v24 = vand.u32 4294901760, %v77_v18  ;;  %vm25478_vm2 = vcmask 322560  }
  0x22   : > { %27328 = vmatpush3.msra.mxu0 %v31429_v11  ;;  %v31472_v22 = vand.u32 4294901760, %v31445_v16  ;;  %v31475_v23 = vand.u32 4294901760, %v31451_v17  ;;  %v31481_v25 = vand.u32 4294901760, %v31458_v19 }
  0x23   : > { %27329 = vmatprep.subr.mxu0 %v31353_v13  ;;  %v31484_v26 = vand.u32 4294901760, %v31462_v20  ;;  %v150_v29 = vsub.f32 %v77_v18, %v31477_v24  ;;  %v31493_v30 = vand.u32 4294901760, %v31466_v21 }
  0x24   : > { %27330 = vmatpush3.msra.mxu0 %v31432_v12  ;;  %v185_v27 = vsub.f32 %v31445_v16, %v31472_v22  ;;  %v192_v28 = vsub.f32 %v31451_v17, %v31475_v23  ;;  %v199_v31 = vsub.f32 %v31458_v19, %v31481_v25 }
  0x25   : > { %27331 = vmatprep.subr.mxu0 %v31353_v13  ;;  %v151_v34 = vand.u32 4294901760, %v150_v29  ;;  %v206_v35 = vsub.f32 %v31462_v20, %v31484_v26  ;;  %v213_v38 = vsub.f32 %v31466_v21, %v31493_v30 }
  0x26   : > { %27332 = vmatpush3.msra.mxu0 %v31436_v14  ;;  %v31499_v32 = vand.u32 4294901760, %v185_v27  ;;  %v31501_v33 = vand.u32 4294901760, %v192_v28  ;;  %v31508_v37 = vand.u32 4294901760, %v199_v31 }
  0x27   : > { %27333 = vmatprep.subr.mxu0 %v31353_v13  ;;  %v152_v36 = vsub.f32 %v150_v29, %v151_v34  ;;  %v31515_v40 = vand.u32 4294901760, %v206_v35  ;;  %v31519_v41 = vand.u32 4294901760, %v213_v38 }
  0x28   : > { %27339 = vmatpush3.msra.mxu1 %v31499_v32  ;;  %27334 = vmatpush3.msra.mxu0 %v31440_v15 }
  0x29   : > { %27340 = vmatprep.subr.mxu1 %v31353_v13  ;;  %27351 = vmatprep.subr.mxu0 %v31353_v13  ;;  %v153_v39 = vand.u32 4294901760, %v152_v36 }
  0x2a   : > { %27341 = vmatpush3.msra.mxu1 %v31501_v33 }
  0x2b   : > { %27342 = vmatprep.subr.mxu1 %v31353_v13  ;;  %27336 = vmatmul.mubr.f32.vlgmr.msra.gmra.mxu0 %v153_v39 }
  0x2c   : > { %27343 = vmatpush3.msra.mxu1 %v31508_v37  ;;  %27352 = vmatpush3.msra.mxu0 %v31445_v16 }
  0x2d   : > { %27344 = vmatprep.subr.mxu1 %v31353_v13  ;;  %27353 = vmatprep.subr.mxu0 %v31353_v13 }
  0x2e   : > { %27345 = vmatpush3.msra.mxu1 %v31515_v40  ;;  %27354 = vmatpush3.msra.mxu0 %v31451_v17 }
  0x2f   : > { %27346 = vmatprep.subr.mxu1 %v31353_v13  ;;  %27355 = vmatprep.subr.mxu0 %v31353_v13 }
  0x30   : > { %27347 = vmatpush3.msra.mxu1 %v31519_v41  ;;  %27356 = vmatpush3.msra.mxu0 %v31458_v19 }
  0x31   : > { %27349 = vmatmul.mubr.f32.vlgmr.msra.gmra.mxu1 %v31477_v24  ;;  %27357 = vmatprep.subr.mxu0 %v31353_v13 }
  0x32   : > { %27364 = vmatprep.subr.mxu1 %v31353_v13  ;;  %27358 = vmatpush3.msra.mxu0 %v31462_v20 }
  0x33   : > { %27365 = vmatpush3.msra.mxu1 %v31426_v10  ;;  %27359 = vmatprep.subr.mxu0 %v31353_v13 }
  0x34   : > { %27361 = vmatprep.mubr.msk.f32.mxu0 %vm31354_vm0, %v31353_v13  ;;  %27360 = vmatpush3.msra.mxu0 %v31466_v21 }
  0x35   : > { %27366 = vmatprep.subr.mxu1 %v31353_v13  ;;  %27362 = vmatmul.mubr.f32.vlgmr.msra.gmra.mxu0 %v150_v29 }
  0x36   : > { %27367 = vmatpush3.msra.mxu1 %v31429_v11  ;;  %27377 = vmatprep.subr.mxu0 %v31353_v13 }
  0x37   : > { %27368 = vmatprep.subr.mxu1 %v31353_v13  ;;  %27378 = vmatpush3.msra.mxu0 %v31472_v22 }
  0x38   : > { %27369 = vmatpush3.msra.mxu1 %v31432_v12  ;;  %27379 = vmatprep.subr.mxu0 %v31353_v13 }
  0x39   : > { %27370 = vmatprep.subr.mxu1 %v31353_v13  ;;  %27380 = vmatpush3.msra.mxu0 %v31475_v23 }
  0x3a   : > { %27371 = vmatpush3.msra.mxu1 %v31436_v14  ;;  %27381 = vmatprep.subr.mxu0 %v31353_v13 }
  0x3b   : > { %27372 = vmatprep.subr.mxu1 %v31353_v13  ;;  %27382 = vmatpush3.msra.mxu0 %v31481_v25 }
  0x3c   : > { %27373 = vmatpush3.msra.mxu1 %v31440_v15  ;;  %27374 = vmatprep.mubr.msk.f32.mxu1 %vm31354_vm0, %v31353_v13 }
  0x3d   : > { %27383 = vmatprep.subr.mxu0 %v31353_v13  ;;  %27375 = vmatmul.mubr.f32.vlgmr.msra.gmra.mxu1 %v151_v34 }
  0x3e   : > { %27384 = vmatpush3.msra.mxu0 %v31484_v26  ;;  %27390 = vmatprep.subr.mxu1 %v31353_v13 }
  0x3f   : > { %27385 = vmatprep.subr.mxu0 %v31353_v13  ;;  %27391 = vmatpush3.msra.mxu1 %v31426_v10 }
  0x40   : > { %27386 = vmatpush3.msra.mxu0 %v31493_v30  ;;  %27387 = vmatprep.mubr.msk.f32.mxu0 %vm31354_vm0, %v31353_v13 }
  0x41   : > { %27392 = vmatprep.subr.mxu1 %v31353_v13  ;;  %27388 = vmatmul.mubr.f32.vlgmr.msra.gmra.mxu0 %v31477_v24 }
  0x42   : > { %27393 = vmatpush3.msra.mxu1 %v31429_v11  ;;  %27400 = vmatprep.mubr.msk.f32.mxu1 %vm31354_vm0, %v31353_v13 }
  0x43   : > { %27394 = vmatprep.subr.mxu1 %v31353_v13  ;;  %27403 = vmatprep.subr.mxu0 %v31353_v13 }
  0x44   : > { %27395 = vmatpush3.msra.mxu1 %v31432_v12  ;;  %27404 = vmatpush3.msra.mxu0 %v31426_v10 }
  0x45   : > { %27396 = vmatprep.subr.mxu1 %v31353_v13  ;;  %27405 = vmatprep.subr.mxu0 %v31353_v13 }
  0x46   : > { %27397 = vmatpush3.msra.mxu1 %v31436_v14  ;;  %27406 = vmatpush3.msra.mxu0 %v31429_v11 }
  0x47   : > { %27398 = vmatprep.subr.mxu1 %v31353_v13  ;;  %27407 = vmatprep.subr.mxu0 %v31353_v13 }
  0x48   : > { %27399 = vmatpush3.msra.mxu1 %v31440_v15  ;;  %27408 = vmatpush3.msra.mxu0 %v31432_v12 }
  0x49   : > { %27401 = vmatmul.mubr.f32.vlgmr.msra.gmra.mxu1 %v31477_v24  ;;  %27416 = vmatprep.subr.mxu1 %v31353_v13 }
  0x4a   : > { %27417 = vmatpush3.msra.mxu1 %v31499_v32  ;;  %27426 = vmatprep.mubr.msk.f32.mxu1 %vm31354_vm0, %v31353_v13 }
  0x4b   : > { %27418 = vmatprep.subr.mxu1 %v31353_v13  ;;  %27409 = vmatprep.subr.mxu0 %v31353_v13 }
  0x4c   : > { %27419 = vmatpush3.msra.mxu1 %v31501_v33  ;;  %27410 = vmatpush3.msra.mxu0 %v31436_v14 }
  0x4d   : > { %27420 = vmatprep.subr.mxu1 %v31353_v13  ;;  %27411 = vmatprep.subr.mxu0 %v31353_v13 }
  0x4e   : > { %27421 = vmatpush3.msra.mxu1 %v31508_v37  ;;  %27412 = vmatpush3.msra.mxu0 %v31440_v15 }
  0x4f   : > { %27422 = vmatprep.subr.mxu1 %v31353_v13  ;;  %27413 = vmatprep.mubr.msk.f32.mxu0 %vm31354_vm0, %v31353_v13 }
  0x50   : > { %27423 = vmatpush3.msra.mxu1 %v31515_v40  ;;  %27429 = vmatprep.subr.mxu0 %v31353_v13 }
  0x51   : > { %27424 = vmatprep.subr.mxu1 %v31353_v13 }
  0x52   : > { %27425 = vmatpush3.msra.mxu1 %v31519_v41 }
  0x53   : > { %27442 = vmatprep.subr.mxu1 %v31353_v13 }
  0xeb   : > { %v155_v42 = vpop.f32.mrf.mxu0 }
  0xed   : > { %v27337_v43 = vpop.f32.mrf.mxu0 }
  0xf1   : > { %v251_v44 = vpop.f32.mrf.mxu1 }
  0xf2   : > { %v252_v48 = vadd.f32 %v251_v44, %v155_v42 }
  0xf3   : > { %v27350_v45 = vpop.f32.mrf.mxu1 }
  0xf5   : > { %v333_v46 = vpop.f32.mrf.mxu0 }
  0xf6   : > { %v334_v51 = vadd.f32 %v333_v46, %v252_v48 }
  0xf7   : > { %v27363_v47 = vpop.f32.mrf.mxu0 }
  0xfd   : > { %v411_v49 = vpop.f32.mrf.mxu1 }
  0xfe   : > { %v412_v53 = vadd.f32 %v411_v49, %v334_v51 }
  0xff   : > { %v27376_v50 = vpop.f32.mrf.mxu1 }
 0x101   : > { %v497_v52 = vpop.f32.mrf.mxu0 }
 0x102   : > { %v498_v55 = vadd.f32 %v497_v52, %v412_v53 }
 0x103   : > { %v27389_v54 = vpop.f32.mrf.mxu0 }
 0x109   : > { %v573_v56 = vpop.f32.mrf.mxu1 }
 0x10a   : > { %v574_v57 = vadd.f32 %v573_v56, %v498_v55 }
 0x10b   : > { %v27402_v58 = vpop.f32.mrf.mxu1 }
 0x10c   : > { %v577_v59 = vsub.f32 %v574_v57, %v31388_v0 }
 0x10e   : > { %v578_v60 = vadd.f32 %v31339_v8, %v577_v59 }
 0x110   : > { %v579_v61 = vmax.f32 %v31403_v6, %v578_v60 }
 0x112   : > { %v580_v62 = vmin.f32 %v31408_v7, %v579_v61 }
 0x114   : > { %v581_v63 = vsub.f32 %v577_v59, %v580_v62 }
 0x116   : > { %v31606_v18 = vadd.f32 %v31339_v8, %v581_v63 }
 0x118   : > { %v583_v24 = vsub.f32 %v580_v62, %v31606_v18 }
 0x11a   : > { %v585_v27 = vsel %vm75_vm1, %v583_v24, 0 }
 0x11b   : > { %v657_v28 = vand.u32 4294901760, %v585_v27 }
 0x11d   : > { %27427 = vmatmul.mubr.f32.vlgmr.msra.gmra.mxu1 %v657_v28  ;;  %v658_v29 = vsub.f32 %v585_v27, %v657_v28 }
 0x11e   : > { %27443 = vmatpush3.msra.mxu1 %v31426_v10  ;;  %27452 = vmatprep.mubr.msk.f32.mxu1 %vm31354_vm0, %v31353_v13 }
 0x11f   : > { %27444 = vmatprep.subr.mxu1 %v31353_v13  ;;  %v659_v31 = vand.u32 4294901760, %v658_v29 }
 0x120   : > { %27445 = vmatpush3.msra.mxu1 %v31429_v11 }
 0x121   : > { %27446 = vmatprep.subr.mxu1 %v31353_v13  ;;  %v660_v8 = vsub.f32 %v658_v29, %v659_v31 }
 0x122   : > { %27447 = vmatpush3.msra.mxu1 %v31432_v12 }
 0x123   : > { %27448 = vmatprep.subr.mxu1 %v31353_v13  ;;  %v661_v34 = vand.u32 4294901760, %v660_v8 }
 0x124   : > { %27449 = vmatpush3.msra.mxu1 %v31436_v14 }
 0x125   : > { %27450 = vmatprep.subr.mxu1 %v31353_v13  ;;  %27414 = vmatmul.mubr.f32.vlgmr.msra.gmra.mxu0 %v661_v34 }
 0x126   : > { %27430 = vmatpush3.msra.mxu0 %v31445_v16  ;;  %27451 = vmatpush3.msra.mxu1 %v31440_v15 }
 0x127   : > { %27431 = vmatprep.subr.mxu0 %v31353_v13  ;;  %27453 = vmatmul.mubr.f32.vlgmr.msra.gmra.mxu1 %v659_v31 }
 0x128   : > { %27468 = vmatprep.subr.mxu1 %v31353_v13  ;;  %27432 = vmatpush3.msra.mxu0 %v31451_v17 }
 0x129   : > { %27469 = vmatpush3.msra.mxu1 %v31426_v10  ;;  %27433 = vmatprep.subr.mxu0 %v31353_v13 }
 0x12a   : > { %27470 = vmatprep.subr.mxu1 %v31353_v13  ;;  %27434 = vmatpush3.msra.mxu0 %v31458_v19 }
 0x12b   : > { %27471 = vmatpush3.msra.mxu1 %v31429_v11  ;;  %27435 = vmatprep.subr.mxu0 %v31353_v13 }
 0x12c   : > { %27472 = vmatprep.subr.mxu1 %v31353_v13  ;;  %27436 = vmatpush3.msra.mxu0 %v31462_v20 }
 0x12d   : > { %27473 = vmatpush3.msra.mxu1 %v31432_v12  ;;  %27437 = vmatprep.subr.mxu0 %v31353_v13 }
 0x12e   : > { %27474 = vmatprep.subr.mxu1 %v31353_v13  ;;  %27438 = vmatpush3.msra.mxu0 %v31466_v21 }
 0x12f   : > { %27439 = vmatprep.mubr.msk.f32.mxu0 %vm31354_vm0, %v31353_v13  ;;  %27475 = vmatpush3.msra.mxu1 %v31436_v14 }
 0x130   : > { %27440 = vmatmul.mubr.f32.vlgmr.msra.gmra.mxu0 %v658_v29  ;;  %27455 = vmatprep.subr.mxu0 %v31353_v13 }
 0x131   : > { %27476 = vmatprep.subr.mxu1 %v31353_v13  ;;  %27456 = vmatpush3.msra.mxu0 %v31472_v22 }
 0x132   : > { %27477 = vmatpush3.msra.mxu1 %v31440_v15  ;;  %27478 = vmatprep.mubr.msk.f32.mxu1 %vm31354_vm0, %v31353_v13 }
 0x133   : > { %27457 = vmatprep.subr.mxu0 %v31353_v13  ;;  %27479 = vmatmul.mubr.f32.vlgmr.msra.gmra.mxu1 %v657_v28 }
 0x134   : > { %27458 = vmatpush3.msra.mxu0 %v31475_v23  ;;  %27465 = vmatprep.mubr.msk.f32.mxu0 %vm31354_vm0, %v31353_v13 }
 0x135   : > { %27459 = vmatprep.subr.mxu0 %v31353_v13  ;;  %27494 = vmatprep.subr.mxu1 %v31353_v13 }
 0x136   : > { %27460 = vmatpush3.msra.mxu0 %v31481_v25  ;;  %27495 = vmatpush3.msra.mxu1 %v31499_v32 }
 0x137   : > { %27461 = vmatprep.subr.mxu0 %v31353_v13  ;;  %27496 = vmatprep.subr.mxu1 %v31353_v13 }
 0x138   : > { %27462 = vmatpush3.msra.mxu0 %v31484_v26  ;;  %27497 = vmatpush3.msra.mxu1 %v31501_v33 }
 0x139   : > { %27463 = vmatprep.subr.mxu0 %v31353_v13  ;;  %27498 = vmatprep.subr.mxu1 %v31353_v13 }
 0x13a   : > { %27464 = vmatpush3.msra.mxu0 %v31493_v30  ;;  %27499 = vmatpush3.msra.mxu1 %v31508_v37 }
 0x13b   : > { %27466 = vmatmul.mubr.f32.vlgmr.msra.gmra.mxu0 %v657_v28  ;;  %27500 = vmatprep.subr.mxu1 %v31353_v13 }
 0x13c   : > { %27501 = vmatpush3.msra.mxu1 %v31515_v40  ;;  %27481 = vmatprep.subr.mxu0 %v31353_v13 }
 0x13d   : > { %27502 = vmatprep.subr.mxu1 %v31353_v13  ;;  %27482 = vmatpush3.msra.mxu0 %v31426_v10 }
 0x13e   : > { %27503 = vmatpush3.msra.mxu1 %v31519_v41  ;;  %27483 = vmatprep.subr.mxu0 %v31353_v13 }
 0x13f   : > { %27504 = vmatprep.mubr.msk.f32.mxu1 %vm31354_vm0, %v31353_v13  ;;  %27520 = vmatprep.subr.mxu1 %v31353_v13 }
 0x140   : > { %27484 = vmatpush3.msra.mxu0 %v31429_v11  ;;  %27491 = vmatprep.mubr.msk.f32.mxu0 %vm31354_vm0, %v31353_v13 }
 0x141   : > { %27485 = vmatprep.subr.mxu0 %v31353_v13 }
 0x142   : > { %27486 = vmatpush3.msra.mxu0 %v31432_v12 }
 0x143   : > { %27487 = vmatprep.subr.mxu0 %v31353_v13 }
 0x144   : > { %27488 = vmatpush3.msra.mxu0 %v31436_v14 }
 0x145   : > { %27489 = vmatprep.subr.mxu0 %v31353_v13 }
 0x146   : > { %27490 = vmatpush3.msra.mxu0 %v31440_v15 }
 0x147   : > { %27507 = vmatprep.subr.mxu0 %v31353_v13 }
 0x1dd   : > { %v759_v35 = vpop.f32.mrf.mxu1 }
 0x1df   : > { %v27428_v36 = vpop.f32.mrf.mxu1 }
 0x1e5   : > { %v663_v38 = vpop.f32.mrf.mxu0 }
 0x1e6   : > { %v760_v47 = vadd.f32 %v759_v35, %v663_v38 }
 0x1e7   : > { %v919_v39 = vpop.f32.mrf.mxu1  ;;  %v27415_v42 = vpop.f32.mrf.mxu0 }
 0x1e9   : > { %v27454_v43 = vpop.f32.mrf.mxu1 }
 0x1f0   : > { %v841_v44 = vpop.f32.mrf.mxu0 }
 0x1f1   : > { %v842_v49 = vadd.f32 %v841_v44, %v760_v47 }
 0x1f2   : > { %v27441_v45 = vpop.f32.mrf.mxu0 }
 0x1f3   : > { %v1081_v46 = vpop.f32.mrf.mxu1  ;;  %v920_v50 = vadd.f32 %v919_v39, %v842_v49 }
 0x1f5   : > { %v27480_v48 = vpop.f32.mrf.mxu1 }
 0x1fb   : > { %v1005_v51 = vpop.f32.mrf.mxu0 }
 0x1fc   : > { %v1006_v52 = vadd.f32 %v1005_v51, %v920_v50 }
 0x1fd   : > { %v27467_v53 = vpop.f32.mrf.mxu0 }
 0x1fe   : > { %v1082_v54 = vadd.f32 %v1081_v46, %v1006_v52 }
 0x200   : > { %v1085_v55 = vsub.f32 %v1082_v54, %v31388_v0 }
 0x202   : > { %v1086_v56 = vadd.f32 %v1085_v55, %v31606_v18 }
 0x204   : > { %v1087_v57 = vmax.f32 %v31403_v6, %v1086_v56 }
 0x206   : > { %v1088_v58 = vmin.f32 %v31408_v7, %v1087_v57 }
 0x208   : > { %v1089_v59 = vsub.f32 %v1085_v55, %v1088_v58 }
 0x20a   : > { %v31687_v60 = vadd.f32 %v1089_v59, %v31606_v18 }
 0x20c   : > { %v1091_v61 = vsub.f32 %v1088_v58, %v31687_v60 }
 0x20e   : > { %v1093_v62 = vsel %vm75_vm1, %v1091_v61, 0 }
 0x20f   : > { %v1165_v63 = vand.u32 4294901760, %v1093_v62 }
 0x211   : > { %v1166_v24 = vsub.f32 %v1093_v62, %v1165_v63  ;;  %27505 = vmatmul.mubr.f32.vlgmr.msra.gmra.mxu1 %v1165_v63 }
 0x212   : > { %27521 = vmatpush3.msra.mxu1 %v31426_v10  ;;  %27530 = vmatprep.mubr.msk.f32.mxu1 %vm31354_vm0, %v31353_v13 }
 0x213   : > { %27522 = vmatprep.subr.mxu1 %v31353_v13  ;;  %v1167_v27 = vand.u32 4294901760, %v1166_v24 }
 0x214   : > { %27523 = vmatpush3.msra.mxu1 %v31429_v11 }
 0x215   : > { %27524 = vmatprep.subr.mxu1 %v31353_v13  ;;  %v1168_v18 = vsub.f32 %v1166_v24, %v1167_v27 }
 0x216   : > { %27525 = vmatpush3.msra.mxu1 %v31432_v12 }
 0x217   : > { %27526 = vmatprep.subr.mxu1 %v31353_v13  ;;  %v1169_v28 = vand.u32 4294901760, %v1168_v18 }
 0x218   : > { %27527 = vmatpush3.msra.mxu1 %v31436_v14 }
 0x219   : > { %27528 = vmatprep.subr.mxu1 %v31353_v13  ;;  %27492 = vmatmul.mubr.f32.vlgmr.msra.gmra.mxu0 %v1169_v28 }
 0x21a   : > { %27508 = vmatpush3.msra.mxu0 %v31445_v16  ;;  %27529 = vmatpush3.msra.mxu1 %v31440_v15 }
 0x21b   : > { %27509 = vmatprep.subr.mxu0 %v31353_v13  ;;  %27531 = vmatmul.mubr.f32.vlgmr.msra.gmra.mxu1 %v1167_v27 }
 0x21c   : > { %27546 = vmatprep.subr.mxu1 %v31353_v13  ;;  %27510 = vmatpush3.msra.mxu0 %v31451_v17 }
 0x21d   : > { %27547 = vmatpush3.msra.mxu1 %v31426_v10  ;;  %27511 = vmatprep.subr.mxu0 %v31353_v13 }
 0x21e   : > { %27548 = vmatprep.subr.mxu1 %v31353_v13  ;;  %27512 = vmatpush3.msra.mxu0 %v31458_v19 }
 0x21f   : > { %27549 = vmatpush3.msra.mxu1 %v31429_v11  ;;  %27513 = vmatprep.subr.mxu0 %v31353_v13 }
 0x220   : > { %27550 = vmatprep.subr.mxu1 %v31353_v13  ;;  %27514 = vmatpush3.msra.mxu0 %v31462_v20 }
 0x221   : > { %27551 = vmatpush3.msra.mxu1 %v31432_v12  ;;  %27515 = vmatprep.subr.mxu0 %v31353_v13 }
 0x222   : > { %27552 = vmatprep.subr.mxu1 %v31353_v13  ;;  %27516 = vmatpush3.msra.mxu0 %v31466_v21 }
 0x223   : > { %27517 = vmatprep.mubr.msk.f32.mxu0 %vm31354_vm0, %v31353_v13  ;;  %27553 = vmatpush3.msra.mxu1 %v31436_v14 }
 0x224   : > { %27518 = vmatmul.mubr.f32.vlgmr.msra.gmra.mxu0 %v1166_v24  ;;  %27533 = vmatprep.subr.mxu0 %v31353_v13 }
 0x225   : > { %27554 = vmatprep.subr.mxu1 %v31353_v13  ;;  %27534 = vmatpush3.msra.mxu0 %v31472_v22 }
 0x226   : > { %27555 = vmatpush3.msra.mxu1 %v31440_v15  ;;  %27556 = vmatprep.mubr.msk.f32.mxu1 %vm31354_vm0, %v31353_v13 }
 0x227   : > { %27535 = vmatprep.subr.mxu0 %v31353_v13  ;;  %27557 = vmatmul.mubr.f32.vlgmr.msra.gmra.mxu1 %v1165_v63 }
 0x228   : > { %27536 = vmatpush3.msra.mxu0 %v31475_v23  ;;  %27543 = vmatprep.mubr.msk.f32.mxu0 %vm31354_vm0, %v31353_v13 }
 0x229   : > { %27537 = vmatprep.subr.mxu0 %v31353_v13  ;;  %27572 = vmatprep.subr.mxu1 %v31353_v13 }
 0x22a   : > { %27538 = vmatpush3.msra.mxu0 %v31481_v25  ;;  %27573 = vmatpush3.msra.mxu1 %v31499_v32 }
 0x22b   : > { %27539 = vmatprep.subr.mxu0 %v31353_v13  ;;  %27574 = vmatprep.subr.mxu1 %v31353_v13 }
 0x22c   : > { %27540 = vmatpush3.msra.mxu0 %v31484_v26  ;;  %27575 = vmatpush3.msra.mxu1 %v31501_v33 }
 0x22d   : > { %27541 = vmatprep.subr.mxu0 %v31353_v13  ;;  %27576 = vmatprep.subr.mxu1 %v31353_v13 }
 0x22e   : > { %27542 = vmatpush3.msra.mxu0 %v31493_v30  ;;  %27577 = vmatpush3.msra.mxu1 %v31508_v37 }
 0x22f   : > { %27544 = vmatmul.mubr.f32.vlgmr.msra.gmra.mxu0 %v1165_v63  ;;  %27578 = vmatprep.subr.mxu1 %v31353_v13 }
 0x230   : > { %27579 = vmatpush3.msra.mxu1 %v31515_v40  ;;  %27559 = vmatprep.subr.mxu0 %v31353_v13 }
 0x231   : > { %27580 = vmatprep.subr.mxu1 %v31353_v13  ;;  %27560 = vmatpush3.msra.mxu0 %v31426_v10 }
 0x232   : > { %27581 = vmatpush3.msra.mxu1 %v31519_v41  ;;  %27561 = vmatprep.subr.mxu0 %v31353_v13 }
 0x233   : > { %27582 = vmatprep.mubr.msk.f32.mxu1 %vm31354_vm0, %v31353_v13  ;;  %27598 = vmatprep.subr.mxu1 %v31353_v13 }
 0x234   : > { %27562 = vmatpush3.msra.mxu0 %v31429_v11  ;;  %27569 = vmatprep.mubr.msk.f32.mxu0 %vm31354_vm0, %v31353_v13 }
 0x235   : > { %27563 = vmatprep.subr.mxu0 %v31353_v13 }
 0x236   : > { %27564 = vmatpush3.msra.mxu0 %v31432_v12 }
 0x237   : > { %27565 = vmatprep.subr.mxu0 %v31353_v13 }
 0x238   : > { %27566 = vmatpush3.msra.mxu0 %v31436_v14 }
 0x239   : > { %27567 = vmatprep.subr.mxu0 %v31353_v13 }
 0x23a   : > { %27568 = vmatpush3.msra.mxu0 %v31440_v15 }
 0x23b   : > { %27585 = vmatprep.subr.mxu0 %v31353_v13 }
 0x2d1   : > { %v1267_v29 = vpop.f32.mrf.mxu1 }
 0x2d3   : > { %v27506_v31 = vpop.f32.mrf.mxu1 }
 0x2d9   : > { %v1171_v8 = vpop.f32.mrf.mxu0 }
 0x2da   : > { %v1268_v43 = vadd.f32 %v1267_v29, %v1171_v8 }
 0x2db   : > { %v1427_v34 = vpop.f32.mrf.mxu1  ;;  %v27493_v35 = vpop.f32.mrf.mxu0 }
 0x2dd   : > { %v27532_v36 = vpop.f32.mrf.mxu1 }
 0x2e4   : > { %v1349_v38 = vpop.f32.mrf.mxu0 }
 0x2e5   : > { %v1350_v45 = vadd.f32 %v1349_v38, %v1268_v43 }
 0x2e6   : > { %v27519_v39 = vpop.f32.mrf.mxu0 }
 0x2e7   : > { %v1589_v42 = vpop.f32.mrf.mxu1  ;;  %v1428_v46 = vadd.f32 %v1427_v34, %v1350_v45 }
 0x2e9   : > { %v27558_v44 = vpop.f32.mrf.mxu1 }
 0x2ef   : > { %v1513_v47 = vpop.f32.mrf.mxu0 }
 0x2f0   : > { %v1514_v48 = vadd.f32 %v1513_v47, %v1428_v46 }
 0x2f1   : > { %v27545_v49 = vpop.f32.mrf.mxu0 }
 0x2f2   : > { %v1590_v50 = vadd.f32 %v1589_v42, %v1514_v48 }
 0x2f4   : > { %v1593_v51 = vsub.f32 %v1590_v50, %v31388_v0 }
 0x2f6   : > { %v1594_v52 = vadd.f32 %v1593_v51, %v31687_v60 }
 0x2f8   : > { %v1595_v53 = vmax.f32 %v31403_v6, %v1594_v52 }
 0x2fa   : > { %v1596_v54 = vmin.f32 %v31408_v7, %v1595_v53 }
 0x2fc   : > { %v1597_v55 = vsub.f32 %v1593_v51, %v1596_v54 }
 0x2fe   : > { %v31768_v56 = vadd.f32 %v1597_v55, %v31687_v60 }
 0x300   : > { %v1599_v57 = vsub.f32 %v1596_v54, %v31768_v56 }
 0x302   : > { %v1601_v58 = vsel %vm75_vm1, %v1599_v57, 0 }
 0x303   : > { %v1673_v59 = vand.u32 4294901760, %v1601_v58 }
 0x305   : > { %v1674_v61 = vsub.f32 %v1601_v58, %v1673_v59  ;;  %27583 = vmatmul.mubr.f32.vlgmr.msra.gmra.mxu1 %v1673_v59 }
 0x306   : > { %27599 = vmatpush3.msra.mxu1 %v31426_v10  ;;  %27608 = vmatprep.mubr.msk.f32.mxu1 %vm31354_vm0, %v31353_v13 }
 0x307   : > { %27600 = vmatprep.subr.mxu1 %v31353_v13  ;;  %v1675_v62 = vand.u32 4294901760, %v1674_v61 }
 0x308   : > { %27601 = vmatpush3.msra.mxu1 %v31429_v11 }
 0x309   : > { %27602 = vmatprep.subr.mxu1 %v31353_v13  ;;  %v1676_v60 = vsub.f32 %v1674_v61, %v1675_v62 }
 0x30a   : > { %27603 = vmatpush3.msra.mxu1 %v31432_v12 }
 0x30b   : > { %27604 = vmatprep.subr.mxu1 %v31353_v13  ;;  %v1677_v63 = vand.u32 4294901760, %v1676_v60 }
 0x30c   : > { %27605 = vmatpush3.msra.mxu1 %v31436_v14 }
 0x30d   : > { %27606 = vmatprep.subr.mxu1 %v31353_v13  ;;  %27570 = vmatmul.mubr.f32.vlgmr.msra.gmra.mxu0 %v1677_v63 }
 0x30e   : > { %27586 = vmatpush3.msra.mxu0 %v31445_v16  ;;  %27607 = vmatpush3.msra.mxu1 %v31440_v15 }
 0x30f   : > { %27587 = vmatprep.subr.mxu0 %v31353_v13  ;;  %27609 = vmatmul.mubr.f32.vlgmr.msra.gmra.mxu1 %v1675_v62 }
 0x310   : > { %27624 = vmatprep.subr.mxu1 %v31353_v13  ;;  %27588 = vmatpush3.msra.mxu0 %v31451_v17 }
 0x311   : > { %27625 = vmatpush3.msra.mxu1 %v31426_v10  ;;  %27589 = vmatprep.subr.mxu0 %v31353_v13 }
 0x312   : > { %27626 = vmatprep.subr.mxu1 %v31353_v13  ;;  %27590 = vmatpush3.msra.mxu0 %v31458_v19 }
 0x313   : > { %27627 = vmatpush3.msra.mxu1 %v31429_v11  ;;  %27591 = vmatprep.subr.mxu0 %v31353_v13 }
 0x314   : > { %27628 = vmatprep.subr.mxu1 %v31353_v13  ;;  %27592 = vmatpush3.msra.mxu0 %v31462_v20 }
 0x315   : > { %27629 = vmatpush3.msra.mxu1 %v31432_v12  ;;  %27593 = vmatprep.subr.mxu0 %v31353_v13 }
 0x316   : > { %27630 = vmatprep.subr.mxu1 %v31353_v13  ;;  %27594 = vmatpush3.msra.mxu0 %v31466_v21 }
 0x317   : > { %27595 = vmatprep.mubr.msk.f32.mxu0 %vm31354_vm0, %v31353_v13  ;;  %27631 = vmatpush3.msra.mxu1 %v31436_v14 }
 0x318   : > { %27596 = vmatmul.mubr.f32.vlgmr.msra.gmra.mxu0 %v1674_v61  ;;  %27611 = vmatprep.subr.mxu0 %v31353_v13 }
 0x319   : > { %27632 = vmatprep.subr.mxu1 %v31353_v13  ;;  %27612 = vmatpush3.msra.mxu0 %v31472_v22 }
 0x31a   : > { %27633 = vmatpush3.msra.mxu1 %v31440_v15  ;;  %27634 = vmatprep.mubr.msk.f32.mxu1 %vm31354_vm0, %v31353_v13 }
 0x31b   : > { %27613 = vmatprep.subr.mxu0 %v31353_v13  ;;  %27635 = vmatmul.mubr.f32.vlgmr.msra.gmra.mxu1 %v1673_v59 }
 0x31c   : > { %27614 = vmatpush3.msra.mxu0 %v31475_v23  ;;  %27621 = vmatprep.mubr.msk.f32.mxu0 %vm31354_vm0, %v31353_v13 }
 0x31d   : > { %27615 = vmatprep.subr.mxu0 %v31353_v13  ;;  %27650 = vmatprep.subr.mxu1 %v31353_v13 }
 0x31e   : > { %27616 = vmatpush3.msra.mxu0 %v31481_v25  ;;  %27651 = vmatpush3.msra.mxu1 %v31499_v32 }
 0x31f   : > { %27617 = vmatprep.subr.mxu0 %v31353_v13  ;;  %27652 = vmatprep.subr.mxu1 %v31353_v13 }
 0x320   : > { %27618 = vmatpush3.msra.mxu0 %v31484_v26  ;;  %27653 = vmatpush3.msra.mxu1 %v31501_v33 }
 0x321   : > { %27619 = vmatprep.subr.mxu0 %v31353_v13  ;;  %27654 = vmatprep.subr.mxu1 %v31353_v13 }
 0x322   : > { %27620 = vmatpush3.msra.mxu0 %v31493_v30  ;;  %27655 = vmatpush3.msra.mxu1 %v31508_v37 }
 0x323   : > { %27622 = vmatmul.mubr.f32.vlgmr.msra.gmra.mxu0 %v1673_v59  ;;  %27656 = vmatprep.subr.mxu1 %v31353_v13 }
 0x324   : > { %27657 = vmatpush3.msra.mxu1 %v31515_v40  ;;  %27637 = vmatprep.subr.mxu0 %v31353_v13 }
 0x325   : > { %27658 = vmatprep.subr.mxu1 %v31353_v13  ;;  %27638 = vmatpush3.msra.mxu0 %v31426_v10 }
 0x326   : > { %27659 = vmatpush3.msra.mxu1 %v31519_v41  ;;  %27639 = vmatprep.subr.mxu0 %v31353_v13 }
 0x327   : > { %27660 = vmatprep.mubr.msk.f32.mxu1 %vm31354_vm0, %v31353_v13  ;;  %27676 = vmatprep.subr.mxu1 %v31353_v13 }
 0x328   : > { %27640 = vmatpush3.msra.mxu0 %v31429_v11  ;;  %27647 = vmatprep.mubr.msk.f32.mxu0 %vm31354_vm0, %v31353_v13 }
 0x329   : > { %27641 = vmatprep.subr.mxu0 %v31353_v13 }
 0x32a   : > { %27642 = vmatpush3.msra.mxu0 %v31432_v12 }
 0x32b   : > { %27643 = vmatprep.subr.mxu0 %v31353_v13 }
 0x32c   : > { %27644 = vmatpush3.msra.mxu0 %v31436_v14 }
 0x32d   : > { %27645 = vmatprep.subr.mxu0 %v31353_v13 }
 0x32e   : > { %27646 = vmatpush3.msra.mxu0 %v31440_v15 }
 0x32f   : > { %27663 = vmatprep.subr.mxu0 %v31353_v13 }
 0x3c5   : > { %v1775_v24 = vpop.f32.mrf.mxu1 }
 0x3c7   : > { %v27584_v27 = vpop.f32.mrf.mxu1 }
 0x3cd   : > { %v1679_v18 = vpop.f32.mrf.mxu0 }
 0x3ce   : > { %v1776_v36 = vadd.f32 %v1775_v24, %v1679_v18 }
 0x3cf   : > { %v1935_v28 = vpop.f32.mrf.mxu1  ;;  %v27571_v29 = vpop.f32.mrf.mxu0 }
 0x3d1   : > { %v27610_v31 = vpop.f32.mrf.mxu1 }
 0x3d8   : > { %v1857_v8 = vpop.f32.mrf.mxu0 }
 0x3d9   : > { %v1858_v39 = vadd.f32 %v1857_v8, %v1776_v36 }
 0x3da   : > { %v27597_v34 = vpop.f32.mrf.mxu0 }
 0x3db   : > { %v2097_v35 = vpop.f32.mrf.mxu1  ;;  %v1936_v42 = vadd.f32 %v1935_v28, %v1858_v39 }
 0x3dd   : > { %v27636_v38 = vpop.f32.mrf.mxu1 }
 0x3e3   : > { %v2021_v43 = vpop.f32.mrf.mxu0 }
 0x3e4   : > { %v2022_v44 = vadd.f32 %v2021_v43, %v1936_v42 }
 0x3e5   : > { %v27623_v45 = vpop.f32.mrf.mxu0 }
 0x3e6   : > { %v2098_v46 = vadd.f32 %v2097_v35, %v2022_v44 }
 0x3e8   : > { %v2101_v47 = vsub.f32 %v2098_v46, %v31388_v0 }
 0x3ea   : > { %v2102_v48 = vadd.f32 %v2101_v47, %v31768_v56 }
 0x3ec   : > { %v2103_v49 = vmax.f32 %v31403_v6, %v2102_v48 }
 0x3ee   : > { %v2104_v50 = vmin.f32 %v31408_v7, %v2103_v49 }
 0x3f0   : > { %v2105_v51 = vsub.f32 %v2101_v47, %v2104_v50 }
 0x3f2   : > { %v31849_v52 = vadd.f32 %v2105_v51, %v31768_v56 }
 0x3f4   : > { %v2107_v53 = vsub.f32 %v2104_v50, %v31849_v52 }
 0x3f6   : > { %v2109_v54 = vsel %vm75_vm1, %v2107_v53, 0 }
 0x3f7   : > { %v2181_v55 = vand.u32 4294901760, %v2109_v54 }
 0x3f9   : > { %v2182_v57 = vsub.f32 %v2109_v54, %v2181_v55  ;;  %27661 = vmatmul.mubr.f32.vlgmr.msra.gmra.mxu1 %v2181_v55 }
 0x3fa   : > { %27677 = vmatpush3.msra.mxu1 %v31426_v10  ;;  %27686 = vmatprep.mubr.msk.f32.mxu1 %vm31354_vm0, %v31353_v13 }
 0x3fb   : > { %27678 = vmatprep.subr.mxu1 %v31353_v13  ;;  %v2183_v58 = vand.u32 4294901760, %v2182_v57 }
 0x3fc   : > { %27679 = vmatpush3.msra.mxu1 %v31429_v11 }
 0x3fd   : > { %27680 = vmatprep.subr.mxu1 %v31353_v13  ;;  %v2184_v56 = vsub.f32 %v2182_v57, %v2183_v58 }
 0x3fe   : > { %27681 = vmatpush3.msra.mxu1 %v31432_v12 }
 0x3ff   : > { %27682 = vmatprep.subr.mxu1 %v31353_v13  ;;  %v2185_v59 = vand.u32 4294901760, %v2184_v56 }
 0x400   : > { %27683 = vmatpush3.msra.mxu1 %v31436_v14 }
 0x401   : > { %27684 = vmatprep.subr.mxu1 %v31353_v13  ;;  %27648 = vmatmul.mubr.f32.vlgmr.msra.gmra.mxu0 %v2185_v59 }
 0x402   : > { %27664 = vmatpush3.msra.mxu0 %v31445_v16  ;;  %27685 = vmatpush3.msra.mxu1 %v31440_v15 }
 0x403   : > { %27665 = vmatprep.subr.mxu0 %v31353_v13  ;;  %27687 = vmatmul.mubr.f32.vlgmr.msra.gmra.mxu1 %v2183_v58 }
 0x404   : > { %27702 = vmatprep.subr.mxu1 %v31353_v13  ;;  %27666 = vmatpush3.msra.mxu0 %v31451_v17 }
 0x405   : > { %27703 = vmatpush3.msra.mxu1 %v31426_v10  ;;  %27667 = vmatprep.subr.mxu0 %v31353_v13 }
 0x406   : > { %27704 = vmatprep.subr.mxu1 %v31353_v13  ;;  %27668 = vmatpush3.msra.mxu0 %v31458_v19 }
 0x407   : > { %27705 = vmatpush3.msra.mxu1 %v31429_v11  ;;  %27669 = vmatprep.subr.mxu0 %v31353_v13 }
 0x408   : > { %27706 = vmatprep.subr.mxu1 %v31353_v13  ;;  %27670 = vmatpush3.msra.mxu0 %v31462_v20 }
 0x409   : > { %27707 = vmatpush3.msra.mxu1 %v31432_v12  ;;  %27671 = vmatprep.subr.mxu0 %v31353_v13 }
 0x40a   : > { %27708 = vmatprep.subr.mxu1 %v31353_v13  ;;  %27672 = vmatpush3.msra.mxu0 %v31466_v21 }
 0x40b   : > { %27673 = vmatprep.mubr.msk.f32.mxu0 %vm31354_vm0, %v31353_v13  ;;  %27709 = vmatpush3.msra.mxu1 %v31436_v14 }
 0x40c   : > { %27674 = vmatmul.mubr.f32.vlgmr.msra.gmra.mxu0 %v2182_v57  ;;  %27689 = vmatprep.subr.mxu0 %v31353_v13 }
 0x40d   : > { %27710 = vmatprep.subr.mxu1 %v31353_v13  ;;  %27690 = vmatpush3.msra.mxu0 %v31472_v22 }
 0x40e   : > { %27711 = vmatpush3.msra.mxu1 %v31440_v15  ;;  %27712 = vmatprep.mubr.msk.f32.mxu1 %vm31354_vm0, %v31353_v13 }
 0x40f   : > { %27691 = vmatprep.subr.mxu0 %v31353_v13  ;;  %27713 = vmatmul.mubr.f32.vlgmr.msra.gmra.mxu1 %v2181_v55 }
 0x410   : > { %27692 = vmatpush3.msra.mxu0 %v31475_v23  ;;  %27699 = vmatprep.mubr.msk.f32.mxu0 %vm31354_vm0, %v31353_v13 }
 0x411   : > { %27693 = vmatprep.subr.mxu0 %v31353_v13  ;;  %27728 = vmatprep.subr.mxu1 %v31353_v13 }
 0x412   : > { %27694 = vmatpush3.msra.mxu0 %v31481_v25  ;;  %27729 = vmatpush3.msra.mxu1 %v31499_v32 }
 0x413   : > { %27695 = vmatprep.subr.mxu0 %v31353_v13  ;;  %27730 = vmatprep.subr.mxu1 %v31353_v13 }
 0x414   : > { %27696 = vmatpush3.msra.mxu0 %v31484_v26  ;;  %27731 = vmatpush3.msra.mxu1 %v31501_v33 }
 0x415   : > { %27697 = vmatprep.subr.mxu0 %v31353_v13  ;;  %27732 = vmatprep.subr.mxu1 %v31353_v13 }
 0x416   : > { %27698 = vmatpush3.msra.mxu0 %v31493_v30  ;;  %27733 = vmatpush3.msra.mxu1 %v31508_v37 }
 0x417   : > { %27700 = vmatmul.mubr.f32.vlgmr.msra.gmra.mxu0 %v2181_v55  ;;  %27734 = vmatprep.subr.mxu1 %v31353_v13 }
 0x418   : > { %27735 = vmatpush3.msra.mxu1 %v31515_v40  ;;  %27715 = vmatprep.subr.mxu0 %v31353_v13 }
 0x419   : > { %27736 = vmatprep.subr.mxu1 %v31353_v13  ;;  %27716 = vmatpush3.msra.mxu0 %v31426_v10 }
 0x41a   : > { %27737 = vmatpush3.msra.mxu1 %v31519_v41  ;;  %27717 = vmatprep.subr.mxu0 %v31353_v13 }
 0x41b   : > { %27738 = vmatprep.mubr.msk.f32.mxu1 %vm31354_vm0, %v31353_v13  ;;  %27754 = vmatprep.subr.mxu1 %v31353_v13 }
 0x41c   : > { %27718 = vmatpush3.msra.mxu0 %v31429_v11  ;;  %27725 = vmatprep.mubr.msk.f32.mxu0 %vm31354_vm0, %v31353_v13 }
 0x41d   : > { %27719 = vmatprep.subr.mxu0 %v31353_v13 }
 0x41e   : > { %27720 = vmatpush3.msra.mxu0 %v31432_v12 }
 0x41f   : > { %27721 = vmatprep.subr.mxu0 %v31353_v13 }
 0x420   : > { %27722 = vmatpush3.msra.mxu0 %v31436_v14 }
 0x421   : > { %27723 = vmatprep.subr.mxu0 %v31353_v13 }
 0x422   : > { %27724 = vmatpush3.msra.mxu0 %v31440_v15 }
 0x423   : > { %27741 = vmatprep.subr.mxu0 %v31353_v13 }
 0x4b9   : > { %v2283_v61 = vpop.f32.mrf.mxu1 }
 0x4bb   : > { %v27662_v62 = vpop.f32.mrf.mxu1 }
 0x4c1   : > { %v2187_v60 = vpop.f32.mrf.mxu0 }
 0x4c2   : > { %v2284_v31 = vadd.f32 %v2283_v61, %v2187_v60 }
 0x4c3   : > { %v2443_v63 = vpop.f32.mrf.mxu1  ;;  %v27649_v24 = vpop.f32.mrf.mxu0 }
 0x4c5   : > { %v27688_v27 = vpop.f32.mrf.mxu1 }
 0x4cc   : > { %v2365_v18 = vpop.f32.mrf.mxu0 }
 0x4cd   : > { %v2366_v34 = vadd.f32 %v2365_v18, %v2284_v31 }
 0x4ce   : > { %v27675_v28 = vpop.f32.mrf.mxu0 }
 0x4cf   : > { %v2605_v29 = vpop.f32.mrf.mxu1  ;;  %v2444_v35 = vadd.f32 %v2443_v63, %v2366_v34 }
 0x4d1   : > { %v27714_v8 = vpop.f32.mrf.mxu1 }
 0x4d7   : > { %v2529_v36 = vpop.f32.mrf.mxu0 }
 0x4d8   : > { %v2530_v38 = vadd.f32 %v2529_v36, %v2444_v35 }
 0x4d9   : > { %v27701_v39 = vpop.f32.mrf.mxu0 }
 0x4da   : > { %v2606_v42 = vadd.f32 %v2605_v29, %v2530_v38 }
 0x4dc   : > { %v2609_v43 = vsub.f32 %v2606_v42, %v31388_v0 }
 0x4de   : > { %v2610_v44 = vadd.f32 %v2609_v43, %v31849_v52 }
 0x4e0   : > { %v2611_v45 = vmax.f32 %v31403_v6, %v2610_v44 }
 0x4e2   : > { %v2612_v46 = vmin.f32 %v31408_v7, %v2611_v45 }
 0x4e4   : > { %v2613_v47 = vsub.f32 %v2609_v43, %v2612_v46 }
 0x4e6   : > { %v31930_v48 = vadd.f32 %v2613_v47, %v31849_v52 }
 0x4e8   : > { %v2615_v49 = vsub.f32 %v2612_v46, %v31930_v48 }
 0x4ea   : > { %v2617_v50 = vsel %vm75_vm1, %v2615_v49, 0 }
 0x4eb   : > { %v2689_v51 = vand.u32 4294901760, %v2617_v50 }
 0x4ed   : > { %v2690_v53 = vsub.f32 %v2617_v50, %v2689_v51  ;;  %27739 = vmatmul.mubr.f32.vlgmr.msra.gmra.mxu1 %v2689_v51 }
 0x4ee   : > { %27755 = vmatpush3.msra.mxu1 %v31426_v10  ;;  %27764 = vmatprep.mubr.msk.f32.mxu1 %vm31354_vm0, %v31353_v13 }
 0x4ef   : > { %27756 = vmatprep.subr.mxu1 %v31353_v13  ;;  %v2691_v54 = vand.u32 4294901760, %v2690_v53 }
 0x4f0   : > { %27757 = vmatpush3.msra.mxu1 %v31429_v11 }
 0x4f1   : > { %27758 = vmatprep.subr.mxu1 %v31353_v13  ;;  %v2692_v52 = vsub.f32 %v2690_v53, %v2691_v54 }
 0x4f2   : > { %27759 = vmatpush3.msra.mxu1 %v31432_v12 }
 0x4f3   : > { %27760 = vmatprep.subr.mxu1 %v31353_v13  ;;  %v2693_v55 = vand.u32 4294901760, %v2692_v52 }
 0x4f4   : > { %27761 = vmatpush3.msra.mxu1 %v31436_v14 }
 0x4f5   : > { %27762 = vmatprep.subr.mxu1 %v31353_v13  ;;  %27726 = vmatmul.mubr.f32.vlgmr.msra.gmra.mxu0 %v2693_v55 }
 0x4f6   : > { %27742 = vmatpush3.msra.mxu0 %v31445_v16  ;;  %27763 = vmatpush3.msra.mxu1 %v31440_v15 }
 0x4f7   : > { %27743 = vmatprep.subr.mxu0 %v31353_v13  ;;  %27765 = vmatmul.mubr.f32.vlgmr.msra.gmra.mxu1 %v2691_v54 }
 0x4f8   : > { %27780 = vmatprep.subr.mxu1 %v31353_v13  ;;  %27744 = vmatpush3.msra.mxu0 %v31451_v17 }
 0x4f9   : > { %27781 = vmatpush3.msra.mxu1 %v31426_v10  ;;  %27745 = vmatprep.subr.mxu0 %v31353_v13 }
 0x4fa   : > { %27782 = vmatprep.subr.mxu1 %v31353_v13  ;;  %27746 = vmatpush3.msra.mxu0 %v31458_v19 }
 0x4fb   : > { %27783 = vmatpush3.msra.mxu1 %v31429_v11  ;;  %27747 = vmatprep.subr.mxu0 %v31353_v13 }
 0x4fc   : > { %27784 = vmatprep.subr.mxu1 %v31353_v13  ;;  %27748 = vmatpush3.msra.mxu0 %v31462_v20 }
 0x4fd   : > { %27785 = vmatpush3.msra.mxu1 %v31432_v12  ;;  %27749 = vmatprep.subr.mxu0 %v31353_v13 }
 0x4fe   : > { %27786 = vmatprep.subr.mxu1 %v31353_v13  ;;  %27750 = vmatpush3.msra.mxu0 %v31466_v21 }
 0x4ff   : > { %27751 = vmatprep.mubr.msk.f32.mxu0 %vm31354_vm0, %v31353_v13  ;;  %27787 = vmatpush3.msra.mxu1 %v31436_v14 }
 0x500   : > { %27752 = vmatmul.mubr.f32.vlgmr.msra.gmra.mxu0 %v2690_v53  ;;  %27767 = vmatprep.subr.mxu0 %v31353_v13 }
 0x501   : > { %27788 = vmatprep.subr.mxu1 %v31353_v13  ;;  %27768 = vmatpush3.msra.mxu0 %v31472_v22 }
 0x502   : > { %27789 = vmatpush3.msra.mxu1 %v31440_v15  ;;  %27790 = vmatprep.mubr.msk.f32.mxu1 %vm31354_vm0, %v31353_v13 }
 0x503   : > { %27769 = vmatprep.subr.mxu0 %v31353_v13  ;;  %27791 = vmatmul.mubr.f32.vlgmr.msra.gmra.mxu1 %v2689_v51 }
 0x504   : > { %27770 = vmatpush3.msra.mxu0 %v31475_v23  ;;  %27777 = vmatprep.mubr.msk.f32.mxu0 %vm31354_vm0, %v31353_v13 }
 0x505   : > { %27771 = vmatprep.subr.mxu0 %v31353_v13  ;;  %27806 = vmatprep.subr.mxu1 %v31353_v13 }
 0x506   : > { %27772 = vmatpush3.msra.mxu0 %v31481_v25  ;;  %27807 = vmatpush3.msra.mxu1 %v31499_v32 }
 0x507   : > { %27773 = vmatprep.subr.mxu0 %v31353_v13  ;;  %27808 = vmatprep.subr.mxu1 %v31353_v13 }
 0x508   : > { %27774 = vmatpush3.msra.mxu0 %v31484_v26  ;;  %27809 = vmatpush3.msra.mxu1 %v31501_v33 }
 0x509   : > { %27775 = vmatprep.subr.mxu0 %v31353_v13  ;;  %27810 = vmatprep.subr.mxu1 %v31353_v13 }
 0x50a   : > { %27776 = vmatpush3.msra.mxu0 %v31493_v30  ;;  %27811 = vmatpush3.msra.mxu1 %v31508_v37 }
 0x50b   : > { %27778 = vmatmul.mubr.f32.vlgmr.msra.gmra.mxu0 %v2689_v51  ;;  %27812 = vmatprep.subr.mxu1 %v31353_v13 }
 0x50c   : > { %27813 = vmatpush3.msra.mxu1 %v31515_v40  ;;  %27793 = vmatprep.subr.mxu0 %v31353_v13 }
 0x50d   : > { %27814 = vmatprep.subr.mxu1 %v31353_v13  ;;  %27794 = vmatpush3.msra.mxu0 %v31426_v10 }
 0x50e   : > { %27815 = vmatpush3.msra.mxu1 %v31519_v41  ;;  %27795 = vmatprep.subr.mxu0 %v31353_v13 }
 0x50f   : > { %27816 = vmatprep.mubr.msk.f32.mxu1 %vm31354_vm0, %v31353_v13  ;;  %27832 = vmatprep.subr.mxu1 %v31353_v13 }
 0x510   : > { %27796 = vmatpush3.msra.mxu0 %v31429_v11  ;;  %27803 = vmatprep.mubr.msk.f32.mxu0 %vm31354_vm0, %v31353_v13 }
 0x511   : > { %27797 = vmatprep.subr.mxu0 %v31353_v13 }
 0x512   : > { %27798 = vmatpush3.msra.mxu0 %v31432_v12 }
 0x513   : > { %27799 = vmatprep.subr.mxu0 %v31353_v13 }
 0x514   : > { %27800 = vmatpush3.msra.mxu0 %v31436_v14 }
 0x515   : > { %27801 = vmatprep.subr.mxu0 %v31353_v13 }
 0x516   : > { %27802 = vmatpush3.msra.mxu0 %v31440_v15 }
 0x517   : > { %27819 = vmatprep.subr.mxu0 %v31353_v13 }
 0x5ad   : > { %v2791_v57 = vpop.f32.mrf.mxu1 }
 0x5af   : > { %v27740_v58 = vpop.f32.mrf.mxu1 }
 0x5b5   : > { %v2695_v56 = vpop.f32.mrf.mxu0 }
 0x5b6   : > { %v2792_v27 = vadd.f32 %v2791_v57, %v2695_v56 }
 0x5b7   : > { %v2951_v59 = vpop.f32.mrf.mxu1  ;;  %v27727_v61 = vpop.f32.mrf.mxu0 }
 0x5b9   : > { %v27766_v62 = vpop.f32.mrf.mxu1 }
 0x5c0   : > { %v2873_v60 = vpop.f32.mrf.mxu0 }
 0x5c1   : > { %v2874_v28 = vadd.f32 %v2873_v60, %v2792_v27 }
 0x5c2   : > { %v27753_v63 = vpop.f32.mrf.mxu0 }
 0x5c3   : > { %v3113_v24 = vpop.f32.mrf.mxu1  ;;  %v2952_v29 = vadd.f32 %v2951_v59, %v2874_v28 }
 0x5c5   : > { %v27792_v18 = vpop.f32.mrf.mxu1 }
 0x5cb   : > { %v3037_v31 = vpop.f32.mrf.mxu0 }
 0x5cc   : > { %v3038_v8 = vadd.f32 %v3037_v31, %v2952_v29 }
 0x5cd   : > { %v27779_v34 = vpop.f32.mrf.mxu0 }
 0x5ce   : > { %v3114_v35 = vadd.f32 %v3113_v24, %v3038_v8 }
 0x5d0   : > { %v3117_v36 = vsub.f32 %v3114_v35, %v31388_v0 }
 0x5d2   : > { %v3118_v38 = vadd.f32 %v3117_v36, %v31930_v48 }
 0x5d4   : > { %v3119_v39 = vmax.f32 %v31403_v6, %v3118_v38 }
 0x5d6   : > { %v3120_v42 = vmin.f32 %v31408_v7, %v3119_v39 }
 0x5d8   : > { %v3121_v43 = vsub.f32 %v3117_v36, %v3120_v42 }
 0x5da   : > { %v32011_v44 = vadd.f32 %v3121_v43, %v31930_v48 }
 0x5dc   : > { %v3123_v45 = vsub.f32 %v3120_v42, %v32011_v44 }
 0x5de   : > { %v3125_v46 = vsel %vm75_vm1, %v3123_v45, 0 }
 0x5df   : > { %v3197_v47 = vand.u32 4294901760, %v3125_v46 }
 0x5e1   : > { %v3198_v49 = vsub.f32 %v3125_v46, %v3197_v47  ;;  %27817 = vmatmul.mubr.f32.vlgmr.msra.gmra.mxu1 %v3197_v47 }
 0x5e2   : > { %27833 = vmatpush3.msra.mxu1 %v31426_v10  ;;  %27842 = vmatprep.mubr.msk.f32.mxu1 %vm31354_vm0, %v31353_v13 }
 0x5e3   : > { %27834 = vmatprep.subr.mxu1 %v31353_v13  ;;  %v3199_v50 = vand.u32 4294901760, %v3198_v49 }
 0x5e4   : > { %27835 = vmatpush3.msra.mxu1 %v31429_v11 }
 0x5e5   : > { %27836 = vmatprep.subr.mxu1 %v31353_v13  ;;  %v3200_v48 = vsub.f32 %v3198_v49, %v3199_v50 }
 0x5e6   : > { %27837 = vmatpush3.msra.mxu1 %v31432_v12 }
 0x5e7   : > { %27838 = vmatprep.subr.mxu1 %v31353_v13  ;;  %v3201_v51 = vand.u32 4294901760, %v3200_v48 }
 0x5e8   : > { %27839 = vmatpush3.msra.mxu1 %v31436_v14 }
 0x5e9   : > { %27840 = vmatprep.subr.mxu1 %v31353_v13  ;;  %27804 = vmatmul.mubr.f32.vlgmr.msra.gmra.mxu0 %v3201_v51 }
 0x5ea   : > { %27820 = vmatpush3.msra.mxu0 %v31445_v16  ;;  %27841 = vmatpush3.msra.mxu1 %v31440_v15 }
 0x5eb   : > { %27821 = vmatprep.subr.mxu0 %v31353_v13  ;;  %27843 = vmatmul.mubr.f32.vlgmr.msra.gmra.mxu1 %v3199_v50 }
 0x5ec   : > { %27858 = vmatprep.subr.mxu1 %v31353_v13  ;;  %27822 = vmatpush3.msra.mxu0 %v31451_v17 }
 0x5ed   : > { %27859 = vmatpush3.msra.mxu1 %v31426_v10  ;;  %27823 = vmatprep.subr.mxu0 %v31353_v13 }
 0x5ee   : > { %27860 = vmatprep.subr.mxu1 %v31353_v13  ;;  %27824 = vmatpush3.msra.mxu0 %v31458_v19 }
 0x5ef   : > { %27861 = vmatpush3.msra.mxu1 %v31429_v11  ;;  %27825 = vmatprep.subr.mxu0 %v31353_v13 }
 0x5f0   : > { %27862 = vmatprep.subr.mxu1 %v31353_v13  ;;  %27826 = vmatpush3.msra.mxu0 %v31462_v20 }
 0x5f1   : > { %27863 = vmatpush3.msra.mxu1 %v31432_v12  ;;  %27827 = vmatprep.subr.mxu0 %v31353_v13 }
 0x5f2   : > { %27864 = vmatprep.subr.mxu1 %v31353_v13  ;;  %27828 = vmatpush3.msra.mxu0 %v31466_v21 }
 0x5f3   : > { %27829 = vmatprep.mubr.msk.f32.mxu0 %vm31354_vm0, %v31353_v13  ;;  %27865 = vmatpush3.msra.mxu1 %v31436_v14 }
 0x5f4   : > { %27830 = vmatmul.mubr.f32.vlgmr.msra.gmra.mxu0 %v3198_v49  ;;  %27845 = vmatprep.subr.mxu0 %v31353_v13 }
 0x5f5   : > { %27866 = vmatprep.subr.mxu1 %v31353_v13  ;;  %27846 = vmatpush3.msra.mxu0 %v31472_v22 }
 0x5f6   : > { %27867 = vmatpush3.msra.mxu1 %v31440_v15  ;;  %27868 = vmatprep.mubr.msk.f32.mxu1 %vm31354_vm0, %v31353_v13 }
 0x5f7   : > { %27847 = vmatprep.subr.mxu0 %v31353_v13  ;;  %27869 = vmatmul.mubr.f32.vlgmr.msra.gmra.mxu1 %v3197_v47 }
 0x5f8   : > { %27848 = vmatpush3.msra.mxu0 %v31475_v23  ;;  %27855 = vmatprep.mubr.msk.f32.mxu0 %vm31354_vm0, %v31353_v13 }
 0x5f9   : > { %27849 = vmatprep.subr.mxu0 %v31353_v13  ;;  %27884 = vmatprep.subr.mxu1 %v31353_v13 }
 0x5fa   : > { %27850 = vmatpush3.msra.mxu0 %v31481_v25  ;;  %27885 = vmatpush3.msra.mxu1 %v31499_v32 }
 0x5fb   : > { %27851 = vmatprep.subr.mxu0 %v31353_v13  ;;  %27886 = vmatprep.subr.mxu1 %v31353_v13 }
 0x5fc   : > { %27852 = vmatpush3.msra.mxu0 %v31484_v26  ;;  %27887 = vmatpush3.msra.mxu1 %v31501_v33 }
 0x5fd   : > { %27853 = vmatprep.subr.mxu0 %v31353_v13  ;;  %27888 = vmatprep.subr.mxu1 %v31353_v13 }
 0x5fe   : > { %27854 = vmatpush3.msra.mxu0 %v31493_v30  ;;  %27889 = vmatpush3.msra.mxu1 %v31508_v37 }
 0x5ff   : > { %27856 = vmatmul.mubr.f32.vlgmr.msra.gmra.mxu0 %v3197_v47  ;;  %27890 = vmatprep.subr.mxu1 %v31353_v13 }
 0x600   : > { %27891 = vmatpush3.msra.mxu1 %v31515_v40  ;;  %27871 = vmatprep.subr.mxu0 %v31353_v13 }
 0x601   : > { %27892 = vmatprep.subr.mxu1 %v31353_v13  ;;  %27872 = vmatpush3.msra.mxu0 %v31426_v10 }
 0x602   : > { %27893 = vmatpush3.msra.mxu1 %v31519_v41  ;;  %27873 = vmatprep.subr.mxu0 %v31353_v13 }
 0x603   : > { %27894 = vmatprep.mubr.msk.f32.mxu1 %vm31354_vm0, %v31353_v13  ;;  %27910 = vmatprep.subr.mxu1 %v31353_v13 }
 0x604   : > { %27874 = vmatpush3.msra.mxu0 %v31429_v11  ;;  %27881 = vmatprep.mubr.msk.f32.mxu0 %vm31354_vm0, %v31353_v13 }
 0x605   : > { %27875 = vmatprep.subr.mxu0 %v31353_v13 }
 0x606   : > { %27876 = vmatpush3.msra.mxu0 %v31432_v12 }
 0x607   : > { %27877 = vmatprep.subr.mxu0 %v31353_v13 }
 0x608   : > { %27878 = vmatpush3.msra.mxu0 %v31436_v14 }
 0x609   : > { %27879 = vmatprep.subr.mxu0 %v31353_v13 }
 0x60a   : > { %27880 = vmatpush3.msra.mxu0 %v31440_v15 }
 0x60b   : > { %27897 = vmatprep.subr.mxu0 %v31353_v13 }
 0x6a1   : > { %v3299_v53 = vpop.f32.mrf.mxu1 }
 0x6a3   : > { %v27818_v54 = vpop.f32.mrf.mxu1 }
 0x6a9   : > { %v3203_v52 = vpop.f32.mrf.mxu0 }
 0x6aa   : > { %v3300_v62 = vadd.f32 %v3299_v53, %v3203_v52 }
 0x6ab   : > { %v3459_v55 = vpop.f32.mrf.mxu1  ;;  %v27805_v57 = vpop.f32.mrf.mxu0 }
 0x6ad   : > { %v27844_v58 = vpop.f32.mrf.mxu1 }
 0x6b4   : > { %v3381_v56 = vpop.f32.mrf.mxu0 }
 0x6b5   : > { %v3382_v63 = vadd.f32 %v3381_v56, %v3300_v62 }
 0x6b6   : > { %v27831_v59 = vpop.f32.mrf.mxu0 }
 0x6b7   : > { %v3621_v61 = vpop.f32.mrf.mxu1  ;;  %v3460_v24 = vadd.f32 %v3459_v55, %v3382_v63 }
 0x6b9   : > { %v27870_v60 = vpop.f32.mrf.mxu1 }
 0x6bf   : > { %v3545_v27 = vpop.f32.mrf.mxu0 }
 0x6c0   : > { %v3546_v18 = vadd.f32 %v3545_v27, %v3460_v24 }
 0x6c1   : > { %v27857_v28 = vpop.f32.mrf.mxu0 }
 0x6c2   : > { %v3622_v29 = vadd.f32 %v3621_v61, %v3546_v18 }
 0x6c4   : > { %v3625_v31 = vsub.f32 %v3622_v29, %v31388_v0 }
 0x6c6   : > { %v3626_v8 = vadd.f32 %v3625_v31, %v32011_v44 }
 0x6c8   : > { %v3627_v34 = vmax.f32 %v31403_v6, %v3626_v8 }
 0x6ca   : > { %v3628_v35 = vmin.f32 %v31408_v7, %v3627_v34 }
 0x6cc   : > { %v3629_v36 = vsub.f32 %v3625_v31, %v3628_v35 }
 0x6ce   : > { %v32092_v38 = vadd.f32 %v3629_v36, %v32011_v44 }
 0x6d0   : > { %v3631_v39 = vsub.f32 %v3628_v35, %v32092_v38 }
 0x6d2   : > { %v3633_v42 = vsel %vm75_vm1, %v3631_v39, 0 }
 0x6d3   : > { %v3705_v43 = vand.u32 4294901760, %v3633_v42 }
 0x6d5   : > { %v3706_v45 = vsub.f32 %v3633_v42, %v3705_v43  ;;  %27895 = vmatmul.mubr.f32.vlgmr.msra.gmra.mxu1 %v3705_v43 }
 0x6d6   : > { %27911 = vmatpush3.msra.mxu1 %v31426_v10  ;;  %27920 = vmatprep.mubr.msk.f32.mxu1 %vm31354_vm0, %v31353_v13 }
 0x6d7   : > { %27912 = vmatprep.subr.mxu1 %v31353_v13  ;;  %v3707_v46 = vand.u32 4294901760, %v3706_v45 }
 0x6d8   : > { %27913 = vmatpush3.msra.mxu1 %v31429_v11 }
 0x6d9   : > { %27914 = vmatprep.subr.mxu1 %v31353_v13  ;;  %v3708_v44 = vsub.f32 %v3706_v45, %v3707_v46 }
 0x6da   : > { %27915 = vmatpush3.msra.mxu1 %v31432_v12 }
 0x6db   : > { %27916 = vmatprep.subr.mxu1 %v31353_v13  ;;  %v3709_v47 = vand.u32 4294901760, %v3708_v44 }
 0x6dc   : > { %27917 = vmatpush3.msra.mxu1 %v31436_v14 }
 0x6dd   : > { %27918 = vmatprep.subr.mxu1 %v31353_v13  ;;  %27882 = vmatmul.mubr.f32.vlgmr.msra.gmra.mxu0 %v3709_v47 }
 0x6de   : > { %27898 = vmatpush3.msra.mxu0 %v31445_v16  ;;  %27919 = vmatpush3.msra.mxu1 %v31440_v15 }
 0x6df   : > { %27899 = vmatprep.subr.mxu0 %v31353_v13  ;;  %27921 = vmatmul.mubr.f32.vlgmr.msra.gmra.mxu1 %v3707_v46 }
 0x6e0   : > { %27936 = vmatprep.subr.mxu1 %v31353_v13  ;;  %27900 = vmatpush3.msra.mxu0 %v31451_v17 }
 0x6e1   : > { %27937 = vmatpush3.msra.mxu1 %v31426_v10  ;;  %27901 = vmatprep.subr.mxu0 %v31353_v13 }
 0x6e2   : > { %27938 = vmatprep.subr.mxu1 %v31353_v13  ;;  %27902 = vmatpush3.msra.mxu0 %v31458_v19 }
 0x6e3   : > { %27939 = vmatpush3.msra.mxu1 %v31429_v11  ;;  %27903 = vmatprep.subr.mxu0 %v31353_v13 }
 0x6e4   : > { %27940 = vmatprep.subr.mxu1 %v31353_v13  ;;  %27904 = vmatpush3.msra.mxu0 %v31462_v20 }
 0x6e5   : > { %27941 = vmatpush3.msra.mxu1 %v31432_v12  ;;  %27905 = vmatprep.subr.mxu0 %v31353_v13 }
 0x6e6   : > { %27942 = vmatprep.subr.mxu1 %v31353_v13  ;;  %27906 = vmatpush3.msra.mxu0 %v31466_v21 }
 0x6e7   : > { %27907 = vmatprep.mubr.msk.f32.mxu0 %vm31354_vm0, %v31353_v13  ;;  %27943 = vmatpush3.msra.mxu1 %v31436_v14 }
 0x6e8   : > { %27908 = vmatmul.mubr.f32.vlgmr.msra.gmra.mxu0 %v3706_v45  ;;  %27923 = vmatprep.subr.mxu0 %v31353_v13 }
 0x6e9   : > { %27944 = vmatprep.subr.mxu1 %v31353_v13  ;;  %27924 = vmatpush3.msra.mxu0 %v31472_v22 }
 0x6ea   : > { %27945 = vmatpush3.msra.mxu1 %v31440_v15  ;;  %27946 = vmatprep.mubr.msk.f32.mxu1 %vm31354_vm0, %v31353_v13 }
 0x6eb   : > { %27925 = vmatprep.subr.mxu0 %v31353_v13  ;;  %27947 = vmatmul.mubr.f32.vlgmr.msra.gmra.mxu1 %v3705_v43 }
 0x6ec   : > { %27926 = vmatpush3.msra.mxu0 %v31475_v23  ;;  %27933 = vmatprep.mubr.msk.f32.mxu0 %vm31354_vm0, %v31353_v13 }
 0x6ed   : > { %27927 = vmatprep.subr.mxu0 %v31353_v13  ;;  %27962 = vmatprep.subr.mxu1 %v31353_v13 }
 0x6ee   : > { %27928 = vmatpush3.msra.mxu0 %v31481_v25  ;;  %27963 = vmatpush3.msra.mxu1 %v31499_v32 }
 0x6ef   : > { %27929 = vmatprep.subr.mxu0 %v31353_v13  ;;  %27964 = vmatprep.subr.mxu1 %v31353_v13 }
 0x6f0   : > { %27930 = vmatpush3.msra.mxu0 %v31484_v26  ;;  %27965 = vmatpush3.msra.mxu1 %v31501_v33 }
 0x6f1   : > { %27931 = vmatprep.subr.mxu0 %v31353_v13  ;;  %27966 = vmatprep.subr.mxu1 %v31353_v13 }
 0x6f2   : > { %27932 = vmatpush3.msra.mxu0 %v31493_v30  ;;  %27967 = vmatpush3.msra.mxu1 %v31508_v37 }
 0x6f3   : > { %27934 = vmatmul.mubr.f32.vlgmr.msra.gmra.mxu0 %v3705_v43  ;;  %27968 = vmatprep.subr.mxu1 %v31353_v13 }
 0x6f4   : > { %27969 = vmatpush3.msra.mxu1 %v31515_v40  ;;  %27949 = vmatprep.subr.mxu0 %v31353_v13 }
 0x6f5   : > { %27970 = vmatprep.subr.mxu1 %v31353_v13  ;;  %27950 = vmatpush3.msra.mxu0 %v31426_v10 }
 0x6f6   : > { %27971 = vmatpush3.msra.mxu1 %v31519_v41  ;;  %27951 = vmatprep.subr.mxu0 %v31353_v13 }
 0x6f7   : > { %27972 = vmatprep.mubr.msk.f32.mxu1 %vm31354_vm0, %v31353_v13  ;;  %27988 = vmatprep.subr.mxu1 %v31353_v13 }
 0x6f8   : > { %27952 = vmatpush3.msra.mxu0 %v31429_v11  ;;  %27959 = vmatprep.mubr.msk.f32.mxu0 %vm31354_vm0, %v31353_v13 }
 0x6f9   : > { %27953 = vmatprep.subr.mxu0 %v31353_v13 }
 0x6fa   : > { %27954 = vmatpush3.msra.mxu0 %v31432_v12 }
 0x6fb   : > { %27955 = vmatprep.subr.mxu0 %v31353_v13 }
 0x6fc   : > { %27956 = vmatpush3.msra.mxu0 %v31436_v14 }
 0x6fd   : > { %27957 = vmatprep.subr.mxu0 %v31353_v13 }
 0x6fe   : > { %27958 = vmatpush3.msra.mxu0 %v31440_v15 }
 0x6ff   : > { %27975 = vmatprep.subr.mxu0 %v31353_v13 }
 0x795   : > { %v3807_v49 = vpop.f32.mrf.mxu1 }
 0x797   : > { %v27896_v50 = vpop.f32.mrf.mxu1 }
 0x79d   : > { %v3711_v48 = vpop.f32.mrf.mxu0 }
 0x79e   : > { %v3808_v58 = vadd.f32 %v3807_v49, %v3711_v48 }
 0x79f   : > { %v3967_v51 = vpop.f32.mrf.mxu1  ;;  %v27883_v53 = vpop.f32.mrf.mxu0 }
 0x7a1   : > { %v27922_v54 = vpop.f32.mrf.mxu1 }
 0x7a8   : > { %v3889_v52 = vpop.f32.mrf.mxu0 }
 0x7a9   : > { %v3890_v59 = vadd.f32 %v3889_v52, %v3808_v58 }
 0x7aa   : > { %v27909_v55 = vpop.f32.mrf.mxu0 }
 0x7ab   : > { %v4129_v57 = vpop.f32.mrf.mxu1  ;;  %v3968_v61 = vadd.f32 %v3967_v51, %v3890_v59 }
 0x7ad   : > { %v27948_v56 = vpop.f32.mrf.mxu1 }
 0x7b3   : > { %v4053_v62 = vpop.f32.mrf.mxu0 }
 0x7b4   : > { %v4054_v60 = vadd.f32 %v4053_v62, %v3968_v61 }
 0x7b5   : > { %v27935_v63 = vpop.f32.mrf.mxu0 }
 0x7b6   : > { %v4130_v24 = vadd.f32 %v4129_v57, %v4054_v60 }
 0x7b8   : > { %v4133_v27 = vsub.f32 %v4130_v24, %v31388_v0 }
 0x7ba   : > { %v4134_v18 = vadd.f32 %v4133_v27, %v32092_v38 }
 0x7bc   : > { %v4135_v28 = vmax.f32 %v31403_v6, %v4134_v18 }
 0x7be   : > { %v4136_v29 = vmin.f32 %v31408_v7, %v4135_v28 }
 0x7c0   : > { %v4137_v31 = vsub.f32 %v4133_v27, %v4136_v29 }
 0x7c2   : > { %v32173_v8 = vadd.f32 %v4137_v31, %v32092_v38 }
 0x7c4   : > { %v4139_v34 = vsub.f32 %v4136_v29, %v32173_v8 }
 0x7c6   : > { %v4141_v35 = vsel %vm75_vm1, %v4139_v34, 0 }
 0x7c7   : > { %v4213_v36 = vand.u32 4294901760, %v4141_v35 }
 0x7c9   : > { %v4214_v39 = vsub.f32 %v4141_v35, %v4213_v36  ;;  %27973 = vmatmul.mubr.f32.vlgmr.msra.gmra.mxu1 %v4213_v36 }
 0x7ca   : > { %27989 = vmatpush3.msra.mxu1 %v31426_v10  ;;  %27998 = vmatprep.mubr.msk.f32.mxu1 %vm31354_vm0, %v31353_v13 }
 0x7cb   : > { %27990 = vmatprep.subr.mxu1 %v31353_v13  ;;  %v4215_v42 = vand.u32 4294901760, %v4214_v39 }
 0x7cc   : > { %27991 = vmatpush3.msra.mxu1 %v31429_v11 }
 0x7cd   : > { %27992 = vmatprep.subr.mxu1 %v31353_v13  ;;  %v4216_v38 = vsub.f32 %v4214_v39, %v4215_v42 }
 0x7ce   : > { %27993 = vmatpush3.msra.mxu1 %v31432_v12 }
 0x7cf   : > { %27994 = vmatprep.subr.mxu1 %v31353_v13  ;;  %v4217_v43 = vand.u32 4294901760, %v4216_v38 }
 0x7d0   : > { %27995 = vmatpush3.msra.mxu1 %v31436_v14 }
 0x7d1   : > { %27996 = vmatprep.subr.mxu1 %v31353_v13  ;;  %27960 = vmatmul.mubr.f32.vlgmr.msra.gmra.mxu0 %v4217_v43 }
 0x7d2   : > { %27976 = vmatpush3.msra.mxu0 %v31445_v16  ;;  %27997 = vmatpush3.msra.mxu1 %v31440_v15 }
 0x7d3   : > { %27977 = vmatprep.subr.mxu0 %v31353_v13  ;;  %27999 = vmatmul.mubr.f32.vlgmr.msra.gmra.mxu1 %v4215_v42 }
 0x7d4   : > { %28014 = vmatprep.subr.mxu1 %v31353_v13  ;;  %27978 = vmatpush3.msra.mxu0 %v31451_v17 }
 0x7d5   : > { %28015 = vmatpush3.msra.mxu1 %v31426_v10  ;;  %27979 = vmatprep.subr.mxu0 %v31353_v13 }
 0x7d6   : > { %28016 = vmatprep.subr.mxu1 %v31353_v13  ;;  %27980 = vmatpush3.msra.mxu0 %v31458_v19 }
 0x7d7   : > { %28017 = vmatpush3.msra.mxu1 %v31429_v11  ;;  %27981 = vmatprep.subr.mxu0 %v31353_v13 }
 0x7d8   : > { %28018 = vmatprep.subr.mxu1 %v31353_v13  ;;  %27982 = vmatpush3.msra.mxu0 %v31462_v20 }
 0x7d9   : > { %28019 = vmatpush3.msra.mxu1 %v31432_v12  ;;  %27983 = vmatprep.subr.mxu0 %v31353_v13 }
 0x7da   : > { %28020 = vmatprep.subr.mxu1 %v31353_v13  ;;  %27984 = vmatpush3.msra.mxu0 %v31466_v21 }
 0x7db   : > { %27985 = vmatprep.mubr.msk.f32.mxu0 %vm31354_vm0, %v31353_v13  ;;  %28021 = vmatpush3.msra.mxu1 %v31436_v14 }
 0x7dc   : > { %27986 = vmatmul.mubr.f32.vlgmr.msra.gmra.mxu0 %v4214_v39  ;;  %28001 = vmatprep.subr.mxu0 %v31353_v13 }
 0x7dd   : > { %28022 = vmatprep.subr.mxu1 %v31353_v13  ;;  %28002 = vmatpush3.msra.mxu0 %v31472_v22 }
 0x7de   : > { %28023 = vmatpush3.msra.mxu1 %v31440_v15  ;;  %28024 = vmatprep.mubr.msk.f32.mxu1 %vm31354_vm0, %v31353_v13 }
 0x7df   : > { %28003 = vmatprep.subr.mxu0 %v31353_v13  ;;  %28025 = vmatmul.mubr.f32.vlgmr.msra.gmra.mxu1 %v4213_v36 }
 0x7e0   : > { %28004 = vmatpush3.msra.mxu0 %v31475_v23  ;;  %28011 = vmatprep.mubr.msk.f32.mxu0 %vm31354_vm0, %v31353_v13 }
 0x7e1   : > { %28005 = vmatprep.subr.mxu0 %v31353_v13  ;;  %28040 = vmatprep.subr.mxu1 %v31353_v13 }
 0x7e2   : > { %28006 = vmatpush3.msra.mxu0 %v31481_v25  ;;  %28041 = vmatpush3.msra.mxu1 %v31499_v32 }
 0x7e3   : > { %28007 = vmatprep.subr.mxu0 %v31353_v13  ;;  %28042 = vmatprep.subr.mxu1 %v31353_v13 }
 0x7e4   : > { %28008 = vmatpush3.msra.mxu0 %v31484_v26  ;;  %28043 = vmatpush3.msra.mxu1 %v31501_v33 }
 0x7e5   : > { %28009 = vmatprep.subr.mxu0 %v31353_v13  ;;  %28044 = vmatprep.subr.mxu1 %v31353_v13 }
 0x7e6   : > { %28010 = vmatpush3.msra.mxu0 %v31493_v30  ;;  %28045 = vmatpush3.msra.mxu1 %v31508_v37 }
 0x7e7   : > { %28012 = vmatmul.mubr.f32.vlgmr.msra.gmra.mxu0 %v4213_v36  ;;  %28046 = vmatprep.subr.mxu1 %v31353_v13 }
 0x7e8   : > { %28047 = vmatpush3.msra.mxu1 %v31515_v40  ;;  %28027 = vmatprep.subr.mxu0 %v31353_v13 }
 0x7e9   : > { %28048 = vmatprep.subr.mxu1 %v31353_v13  ;;  %28028 = vmatpush3.msra.mxu0 %v31426_v10 }
 0x7ea   : > { %28049 = vmatpush3.msra.mxu1 %v31519_v41  ;;  %28029 = vmatprep.subr.mxu0 %v31353_v13 }
 0x7eb   : > { %28050 = vmatprep.mubr.msk.f32.mxu1 %vm31354_vm0, %v31353_v13  ;;  %28066 = vmatprep.subr.mxu1 %v31353_v13 }
 0x7ec   : > { %28030 = vmatpush3.msra.mxu0 %v31429_v11  ;;  %28037 = vmatprep.mubr.msk.f32.mxu0 %vm31354_vm0, %v31353_v13 }
 0x7ed   : > { %28031 = vmatprep.subr.mxu0 %v31353_v13 }
 0x7ee   : > { %28032 = vmatpush3.msra.mxu0 %v31432_v12 }
 0x7ef   : > { %28033 = vmatprep.subr.mxu0 %v31353_v13 }
 0x7f0   : > { %28034 = vmatpush3.msra.mxu0 %v31436_v14 }
 0x7f1   : > { %28035 = vmatprep.subr.mxu0 %v31353_v13 }
 0x7f2   : > { %28036 = vmatpush3.msra.mxu0 %v31440_v15 }
 0x7f3   : > { %28053 = vmatprep.subr.mxu0 %v31353_v13 }
 0x889   : > { %v4315_v45 = vpop.f32.mrf.mxu1 }
 0x88b   : > { %v27974_v46 = vpop.f32.mrf.mxu1 }
 0x891   : > { %v4219_v44 = vpop.f32.mrf.mxu0 }
 0x892   : > { %v4316_v54 = vadd.f32 %v4315_v45, %v4219_v44 }
 0x893   : > { %v4475_v47 = vpop.f32.mrf.mxu1  ;;  %v27961_v49 = vpop.f32.mrf.mxu0 }
 0x895   : > { %v28000_v50 = vpop.f32.mrf.mxu1 }
 0x89c   : > { %v4397_v48 = vpop.f32.mrf.mxu0 }
 0x89d   : > { %v4398_v55 = vadd.f32 %v4397_v48, %v4316_v54 }
 0x89e   : > { %v27987_v51 = vpop.f32.mrf.mxu0 }
 0x89f   : > { %v4637_v53 = vpop.f32.mrf.mxu1  ;;  %v4476_v57 = vadd.f32 %v4475_v47, %v4398_v55 }
 0x8a1   : > { %v28026_v52 = vpop.f32.mrf.mxu1 }
 0x8a7   : > { %v4561_v58 = vpop.f32.mrf.mxu0 }
 0x8a8   : > { %v4562_v56 = vadd.f32 %v4561_v58, %v4476_v57 }
 0x8a9   : > { %v28013_v59 = vpop.f32.mrf.mxu0 }
 0x8aa   : > { %v4638_v61 = vadd.f32 %v4637_v53, %v4562_v56 }
 0x8ac   : > { %v4641_v62 = vsub.f32 %v4638_v61, %v31388_v0 }
 0x8ae   : > { %v4642_v60 = vadd.f32 %v4641_v62, %v32173_v8 }
 0x8b0   : > { %v4643_v63 = vmax.f32 %v31403_v6, %v4642_v60 }
 0x8b2   : > { %v4644_v24 = vmin.f32 %v31408_v7, %v4643_v63 }
 0x8b4   : > { %v4645_v27 = vsub.f32 %v4641_v62, %v4644_v24 }
 0x8b6   : > { %v32254_v18 = vadd.f32 %v4645_v27, %v32173_v8 }
 0x8b8   : > { %v4647_v28 = vsub.f32 %v4644_v24, %v32254_v18 }
 0x8ba   : > { %v4649_v29 = vsel %vm75_vm1, %v4647_v28, 0 }
 0x8bb   : > { %v4721_v31 = vand.u32 4294901760, %v4649_v29 }
 0x8bd   : > { %v4722_v34 = vsub.f32 %v4649_v29, %v4721_v31  ;;  %28051 = vmatmul.mubr.f32.vlgmr.msra.gmra.mxu1 %v4721_v31 }
 0x8be   : > { %28067 = vmatpush3.msra.mxu1 %v31426_v10  ;;  %28076 = vmatprep.mubr.msk.f32.mxu1 %vm31354_vm0, %v31353_v13 }
 0x8bf   : > { %28068 = vmatprep.subr.mxu1 %v31353_v13  ;;  %v4723_v35 = vand.u32 4294901760, %v4722_v34 }
 0x8c0   : > { %28069 = vmatpush3.msra.mxu1 %v31429_v11 }
 0x8c1   : > { %28070 = vmatprep.subr.mxu1 %v31353_v13  ;;  %v4724_v8 = vsub.f32 %v4722_v34, %v4723_v35 }
 0x8c2   : > { %28071 = vmatpush3.msra.mxu1 %v31432_v12 }
 0x8c3   : > { %28072 = vmatprep.subr.mxu1 %v31353_v13  ;;  %v4725_v36 = vand.u32 4294901760, %v4724_v8 }
 0x8c4   : > { %28073 = vmatpush3.msra.mxu1 %v31436_v14 }
 0x8c5   : > { %28074 = vmatprep.subr.mxu1 %v31353_v13  ;;  %28038 = vmatmul.mubr.f32.vlgmr.msra.gmra.mxu0 %v4725_v36 }
 0x8c6   : > { %28054 = vmatpush3.msra.mxu0 %v31445_v16  ;;  %28075 = vmatpush3.msra.mxu1 %v31440_v15 }
 0x8c7   : > { %28055 = vmatprep.subr.mxu0 %v31353_v13  ;;  %28077 = vmatmul.mubr.f32.vlgmr.msra.gmra.mxu1 %v4723_v35 }
 0x8c8   : > { %28092 = vmatprep.subr.mxu1 %v31353_v13  ;;  %28056 = vmatpush3.msra.mxu0 %v31451_v17 }
 0x8c9   : > { %28093 = vmatpush3.msra.mxu1 %v31426_v10  ;;  %28057 = vmatprep.subr.mxu0 %v31353_v13 }
 0x8ca   : > { %28094 = vmatprep.subr.mxu1 %v31353_v13  ;;  %28058 = vmatpush3.msra.mxu0 %v31458_v19 }
 0x8cb   : > { %28095 = vmatpush3.msra.mxu1 %v31429_v11  ;;  %28059 = vmatprep.subr.mxu0 %v31353_v13 }
 0x8cc   : > { %28096 = vmatprep.subr.mxu1 %v31353_v13  ;;  %28060 = vmatpush3.msra.mxu0 %v31462_v20 }
 0x8cd   : > { %28097 = vmatpush3.msra.mxu1 %v31432_v12  ;;  %28061 = vmatprep.subr.mxu0 %v31353_v13 }
 0x8ce   : > { %28098 = vmatprep.subr.mxu1 %v31353_v13  ;;  %28062 = vmatpush3.msra.mxu0 %v31466_v21 }
 0x8cf   : > { %28063 = vmatprep.mubr.msk.f32.mxu0 %vm31354_vm0, %v31353_v13  ;;  %28099 = vmatpush3.msra.mxu1 %v31436_v14 }
 0x8d0   : > { %28064 = vmatmul.mubr.f32.vlgmr.msra.gmra.mxu0 %v4722_v34  ;;  %28079 = vmatprep.subr.mxu0 %v31353_v13 }
 0x8d1   : > { %28100 = vmatprep.subr.mxu1 %v31353_v13  ;;  %28080 = vmatpush3.msra.mxu0 %v31472_v22 }
 0x8d2   : > { %28101 = vmatpush3.msra.mxu1 %v31440_v15  ;;  %28102 = vmatprep.mubr.msk.f32.mxu1 %vm31354_vm0, %v31353_v13 }
 0x8d3   : > { %28081 = vmatprep.subr.mxu0 %v31353_v13  ;;  %28103 = vmatmul.mubr.f32.vlgmr.msra.gmra.mxu1 %v4721_v31 }
 0x8d4   : > { %28082 = vmatpush3.msra.mxu0 %v31475_v23  ;;  %28089 = vmatprep.mubr.msk.f32.mxu0 %vm31354_vm0, %v31353_v13 }
 0x8d5   : > { %28083 = vmatprep.subr.mxu0 %v31353_v13  ;;  %28118 = vmatprep.subr.mxu1 %v31353_v13 }
 0x8d6   : > { %28084 = vmatpush3.msra.mxu0 %v31481_v25  ;;  %28119 = vmatpush3.msra.mxu1 %v31499_v32 }
 0x8d7   : > { %28085 = vmatprep.subr.mxu0 %v31353_v13  ;;  %28120 = vmatprep.subr.mxu1 %v31353_v13 }
 0x8d8   : > { %28086 = vmatpush3.msra.mxu0 %v31484_v26  ;;  %28121 = vmatpush3.msra.mxu1 %v31501_v33 }
 0x8d9   : > { %28087 = vmatprep.subr.mxu0 %v31353_v13  ;;  %28122 = vmatprep.subr.mxu1 %v31353_v13 }
 0x8da   : > { %28088 = vmatpush3.msra.mxu0 %v31493_v30  ;;  %28123 = vmatpush3.msra.mxu1 %v31508_v37 }
 0x8db   : > { %28090 = vmatmul.mubr.f32.vlgmr.msra.gmra.mxu0 %v4721_v31  ;;  %28124 = vmatprep.subr.mxu1 %v31353_v13 }
 0x8dc   : > { %28125 = vmatpush3.msra.mxu1 %v31515_v40  ;;  %28105 = vmatprep.subr.mxu0 %v31353_v13 }
 0x8dd   : > { %28126 = vmatprep.subr.mxu1 %v31353_v13  ;;  %28106 = vmatpush3.msra.mxu0 %v31426_v10 }
 0x8de   : > { %28127 = vmatpush3.msra.mxu1 %v31519_v41  ;;  %28107 = vmatprep.subr.mxu0 %v31353_v13 }
 0x8df   : > { %28128 = vmatprep.mubr.msk.f32.mxu1 %vm31354_vm0, %v31353_v13  ;;  %28144 = vmatprep.subr.mxu1 %v31353_v13 }
 0x8e0   : > { %28108 = vmatpush3.msra.mxu0 %v31429_v11  ;;  %28115 = vmatprep.mubr.msk.f32.mxu0 %vm31354_vm0, %v31353_v13 }
 0x8e1   : > { %28109 = vmatprep.subr.mxu0 %v31353_v13 }
 0x8e2   : > { %28110 = vmatpush3.msra.mxu0 %v31432_v12 }
 0x8e3   : > { %28111 = vmatprep.subr.mxu0 %v31353_v13 }
 0x8e4   : > { %28112 = vmatpush3.msra.mxu0 %v31436_v14 }
 0x8e5   : > { %28113 = vmatprep.subr.mxu0 %v31353_v13 }
 0x8e6   : > { %28114 = vmatpush3.msra.mxu0 %v31440_v15 }
 0x8e7   : > { %28131 = vmatprep.subr.mxu0 %v31353_v13 }
 0x97d   : > { %v4823_v39 = vpop.f32.mrf.mxu1 }
 0x97f   : > { %v28052_v42 = vpop.f32.mrf.mxu1 }
 0x985   : > { %v4727_v38 = vpop.f32.mrf.mxu0 }
 0x986   : > { %v4824_v50 = vadd.f32 %v4823_v39, %v4727_v38 }
 0x987   : > { %v4983_v43 = vpop.f32.mrf.mxu1  ;;  %v28039_v45 = vpop.f32.mrf.mxu0 }
 0x989   : > { %v28078_v46 = vpop.f32.mrf.mxu1 }
 0x990   : > { %v4905_v44 = vpop.f32.mrf.mxu0 }
 0x991   : > { %v4906_v51 = vadd.f32 %v4905_v44, %v4824_v50 }
 0x992   : > { %v28065_v47 = vpop.f32.mrf.mxu0 }
 0x993   : > { %v5145_v49 = vpop.f32.mrf.mxu1  ;;  %v4984_v53 = vadd.f32 %v4983_v43, %v4906_v51 }
 0x995   : > { %v28104_v48 = vpop.f32.mrf.mxu1 }
 0x99b   : > { %v5069_v54 = vpop.f32.mrf.mxu0 }
 0x99c   : > { %v5070_v52 = vadd.f32 %v5069_v54, %v4984_v53 }
 0x99d   : > { %v28091_v55 = vpop.f32.mrf.mxu0 }
 0x99e   : > { %v5146_v57 = vadd.f32 %v5145_v49, %v5070_v52 }
 0x9a0   : > { %v5149_v58 = vsub.f32 %v5146_v57, %v31388_v0 }
 0x9a2   : > { %v5150_v56 = vadd.f32 %v5149_v58, %v32254_v18 }
 0x9a4   : > { %v5151_v59 = vmax.f32 %v31403_v6, %v5150_v56 }
 0x9a6   : > { %v5152_v61 = vmin.f32 %v31408_v7, %v5151_v59 }
 0x9a8   : > { %v5153_v62 = vsub.f32 %v5149_v58, %v5152_v61 }
 0x9aa   : > { %v32335_v60 = vadd.f32 %v5153_v62, %v32254_v18 }
 0x9ac   : > { %v5155_v63 = vsub.f32 %v5152_v61, %v32335_v60 }
 0x9ae   : > { %v5157_v24 = vsel %vm75_vm1, %v5155_v63, 0 }
 0x9af   : > { %v5229_v27 = vand.u32 4294901760, %v5157_v24 }
 0x9b1   : > { %v5230_v28 = vsub.f32 %v5157_v24, %v5229_v27  ;;  %28129 = vmatmul.mubr.f32.vlgmr.msra.gmra.mxu1 %v5229_v27 }
 0x9b2   : > { %28145 = vmatpush3.msra.mxu1 %v31426_v10  ;;  %28154 = vmatprep.mubr.msk.f32.mxu1 %vm31354_vm0, %v31353_v13 }
 0x9b3   : > { %28146 = vmatprep.subr.mxu1 %v31353_v13  ;;  %v5231_v29 = vand.u32 4294901760, %v5230_v28 }
 0x9b4   : > { %28147 = vmatpush3.msra.mxu1 %v31429_v11 }
 0x9b5   : > { %28148 = vmatprep.subr.mxu1 %v31353_v13  ;;  %v5232_v18 = vsub.f32 %v5230_v28, %v5231_v29 }
 0x9b6   : > { %28149 = vmatpush3.msra.mxu1 %v31432_v12 }
 0x9b7   : > { %28150 = vmatprep.subr.mxu1 %v31353_v13  ;;  %v5233_v31 = vand.u32 4294901760, %v5232_v18 }
 0x9b8   : > { %28151 = vmatpush3.msra.mxu1 %v31436_v14 }
 0x9b9   : > { %28152 = vmatprep.subr.mxu1 %v31353_v13  ;;  %28116 = vmatmul.mubr.f32.vlgmr.msra.gmra.mxu0 %v5233_v31 }
 0x9ba   : > { %28132 = vmatpush3.msra.mxu0 %v31445_v16  ;;  %28153 = vmatpush3.msra.mxu1 %v31440_v15 }
 0x9bb   : > { %28133 = vmatprep.subr.mxu0 %v31353_v13  ;;  %28155 = vmatmul.mubr.f32.vlgmr.msra.gmra.mxu1 %v5231_v29 }
 0x9bc   : > { %28170 = vmatprep.subr.mxu1 %v31353_v13  ;;  %28134 = vmatpush3.msra.mxu0 %v31451_v17 }
 0x9bd   : > { %28171 = vmatpush3.msra.mxu1 %v31426_v10  ;;  %28135 = vmatprep.subr.mxu0 %v31353_v13 }
 0x9be   : > { %28172 = vmatprep.subr.mxu1 %v31353_v13  ;;  %28136 = vmatpush3.msra.mxu0 %v31458_v19 }
 0x9bf   : > { %28173 = vmatpush3.msra.mxu1 %v31429_v11  ;;  %28137 = vmatprep.subr.mxu0 %v31353_v13 }
 0x9c0   : > { %28174 = vmatprep.subr.mxu1 %v31353_v13  ;;  %28138 = vmatpush3.msra.mxu0 %v31462_v20 }
 0x9c1   : > { %28175 = vmatpush3.msra.mxu1 %v31432_v12  ;;  %28139 = vmatprep.subr.mxu0 %v31353_v13 }
 0x9c2   : > { %28176 = vmatprep.subr.mxu1 %v31353_v13  ;;  %28140 = vmatpush3.msra.mxu0 %v31466_v21 }
 0x9c3   : > { %28141 = vmatprep.mubr.msk.f32.mxu0 %vm31354_vm0, %v31353_v13  ;;  %28177 = vmatpush3.msra.mxu1 %v31436_v14 }
 0x9c4   : > { %28142 = vmatmul.mubr.f32.vlgmr.msra.gmra.mxu0 %v5230_v28  ;;  %28157 = vmatprep.subr.mxu0 %v31353_v13 }
 0x9c5   : > { %28178 = vmatprep.subr.mxu1 %v31353_v13  ;;  %28158 = vmatpush3.msra.mxu0 %v31472_v22 }
 0x9c6   : > { %28179 = vmatpush3.msra.mxu1 %v31440_v15  ;;  %28180 = vmatprep.mubr.msk.f32.mxu1 %vm31354_vm0, %v31353_v13 }
 0x9c7   : > { %28159 = vmatprep.subr.mxu0 %v31353_v13  ;;  %28181 = vmatmul.mubr.f32.vlgmr.msra.gmra.mxu1 %v5229_v27 }
 0x9c8   : > { %28160 = vmatpush3.msra.mxu0 %v31475_v23  ;;  %28167 = vmatprep.mubr.msk.f32.mxu0 %vm31354_vm0, %v31353_v13 }
 0x9c9   : > { %28161 = vmatprep.subr.mxu0 %v31353_v13  ;;  %28196 = vmatprep.subr.mxu1 %v31353_v13 }
 0x9ca   : > { %28162 = vmatpush3.msra.mxu0 %v31481_v25  ;;  %28197 = vmatpush3.msra.mxu1 %v31499_v32 }
 0x9cb   : > { %28163 = vmatprep.subr.mxu0 %v31353_v13  ;;  %28198 = vmatprep.subr.mxu1 %v31353_v13 }
 0x9cc   : > { %28164 = vmatpush3.msra.mxu0 %v31484_v26  ;;  %28199 = vmatpush3.msra.mxu1 %v31501_v33 }
 0x9cd   : > { %28165 = vmatprep.subr.mxu0 %v31353_v13  ;;  %28200 = vmatprep.subr.mxu1 %v31353_v13 }
 0x9ce   : > { %28166 = vmatpush3.msra.mxu0 %v31493_v30  ;;  %28201 = vmatpush3.msra.mxu1 %v31508_v37 }
 0x9cf   : > { %28168 = vmatmul.mubr.f32.vlgmr.msra.gmra.mxu0 %v5229_v27  ;;  %28202 = vmatprep.subr.mxu1 %v31353_v13 }
 0x9d0   : > { %28203 = vmatpush3.msra.mxu1 %v31515_v40  ;;  %28183 = vmatprep.subr.mxu0 %v31353_v13 }
 0x9d1   : > { %28204 = vmatprep.subr.mxu1 %v31353_v13  ;;  %28184 = vmatpush3.msra.mxu0 %v31426_v10 }
 0x9d2   : > { %28205 = vmatpush3.msra.mxu1 %v31519_v41  ;;  %28185 = vmatprep.subr.mxu0 %v31353_v13 }
 0x9d3   : > { %28206 = vmatprep.mubr.msk.f32.mxu1 %vm31354_vm0, %v31353_v13  ;;  %28222 = vmatprep.subr.mxu1 %v31353_v13 }
 0x9d4   : > { %28186 = vmatpush3.msra.mxu0 %v31429_v11  ;;  %28193 = vmatprep.mubr.msk.f32.mxu0 %vm31354_vm0, %v31353_v13 }
 0x9d5   : > { %28187 = vmatprep.subr.mxu0 %v31353_v13 }
 0x9d6   : > { %28188 = vmatpush3.msra.mxu0 %v31432_v12 }
 0x9d7   : > { %28189 = vmatprep.subr.mxu0 %v31353_v13 }
 0x9d8   : > { %28190 = vmatpush3.msra.mxu0 %v31436_v14 }
 0x9d9   : > { %28191 = vmatprep.subr.mxu0 %v31353_v13 }
 0x9da   : > { %28192 = vmatpush3.msra.mxu0 %v31440_v15 }
 0x9db   : > { %28209 = vmatprep.subr.mxu0 %v31353_v13 }
 0xa71   : > { %v5331_v34 = vpop.f32.mrf.mxu1 }
 0xa73   : > { %v28130_v35 = vpop.f32.mrf.mxu1 }
 0xa79   : > { %v5235_v8 = vpop.f32.mrf.mxu0 }
 0xa7a   : > { %v5332_v46 = vadd.f32 %v5331_v34, %v5235_v8 }
 0xa7b   : > { %v5491_v36 = vpop.f32.mrf.mxu1  ;;  %v28117_v39 = vpop.f32.mrf.mxu0 }
 0xa7d   : > { %v28156_v42 = vpop.f32.mrf.mxu1 }
 0xa84   : > { %v5413_v38 = vpop.f32.mrf.mxu0 }
 0xa85   : > { %v5414_v47 = vadd.f32 %v5413_v38, %v5332_v46 }
 0xa86   : > { %v28143_v43 = vpop.f32.mrf.mxu0 }
 0xa87   : > { %v5653_v45 = vpop.f32.mrf.mxu1  ;;  %v5492_v49 = vadd.f32 %v5491_v36, %v5414_v47 }
 0xa89   : > { %v28182_v44 = vpop.f32.mrf.mxu1 }
 0xa8f   : > { %v5577_v50 = vpop.f32.mrf.mxu0 }
 0xa90   : > { %v5578_v48 = vadd.f32 %v5577_v50, %v5492_v49 }
 0xa91   : > { %v28169_v51 = vpop.f32.mrf.mxu0 }
 0xa92   : > { %v5654_v53 = vadd.f32 %v5653_v45, %v5578_v48 }
 0xa94   : > { %v5657_v54 = vsub.f32 %v5654_v53, %v31388_v0 }
 0xa96   : > { %v5658_v52 = vadd.f32 %v5657_v54, %v32335_v60 }
 0xa98   : > { %v5659_v55 = vmax.f32 %v31403_v6, %v5658_v52 }
 0xa9a   : > { %v5660_v57 = vmin.f32 %v31408_v7, %v5659_v55 }
 0xa9c   : > { %v5661_v58 = vsub.f32 %v5657_v54, %v5660_v57 }
 0xa9e   : > { %v32416_v56 = vadd.f32 %v5661_v58, %v32335_v60 }
 0xaa0   : > { %v5663_v59 = vsub.f32 %v5660_v57, %v32416_v56 }
 0xaa2   : > { %v5665_v61 = vsel %vm75_vm1, %v5663_v59, 0 }
 0xaa3   : > { %v5737_v62 = vand.u32 4294901760, %v5665_v61 }
 0xaa5   : > { %v5738_v63 = vsub.f32 %v5665_v61, %v5737_v62  ;;  %28207 = vmatmul.mubr.f32.vlgmr.msra.gmra.mxu1 %v5737_v62 }
 0xaa6   : > { %28223 = vmatpush3.msra.mxu1 %v31426_v10  ;;  %28232 = vmatprep.mubr.msk.f32.mxu1 %vm31354_vm0, %v31353_v13 }
 0xaa7   : > { %28224 = vmatprep.subr.mxu1 %v31353_v13  ;;  %v5739_v24 = vand.u32 4294901760, %v5738_v63 }
 0xaa8   : > { %28225 = vmatpush3.msra.mxu1 %v31429_v11 }
 0xaa9   : > { %28226 = vmatprep.subr.mxu1 %v31353_v13  ;;  %v5740_v60 = vsub.f32 %v5738_v63, %v5739_v24 }
 0xaaa   : > { %28227 = vmatpush3.msra.mxu1 %v31432_v12 }
 0xaab   : > { %28228 = vmatprep.subr.mxu1 %v31353_v13  ;;  %v5741_v27 = vand.u32 4294901760, %v5740_v60 }
 0xaac   : > { %28229 = vmatpush3.msra.mxu1 %v31436_v14 }
 0xaad   : > { %28230 = vmatprep.subr.mxu1 %v31353_v13  ;;  %28194 = vmatmul.mubr.f32.vlgmr.msra.gmra.mxu0 %v5741_v27 }
 0xaae   : > { %28210 = vmatpush3.msra.mxu0 %v31445_v16  ;;  %28231 = vmatpush3.msra.mxu1 %v31440_v15 }
 0xaaf   : > { %28211 = vmatprep.subr.mxu0 %v31353_v13  ;;  %28233 = vmatmul.mubr.f32.vlgmr.msra.gmra.mxu1 %v5739_v24 }
 0xab0   : > { %28248 = vmatprep.subr.mxu1 %v31353_v13  ;;  %28212 = vmatpush3.msra.mxu0 %v31451_v17 }
 0xab1   : > { %28249 = vmatpush3.msra.mxu1 %v31426_v10  ;;  %28213 = vmatprep.subr.mxu0 %v31353_v13 }
 0xab2   : > { %28250 = vmatprep.subr.mxu1 %v31353_v13  ;;  %28214 = vmatpush3.msra.mxu0 %v31458_v19 }
 0xab3   : > { %28251 = vmatpush3.msra.mxu1 %v31429_v11  ;;  %28215 = vmatprep.subr.mxu0 %v31353_v13 }
 0xab4   : > { %28252 = vmatprep.subr.mxu1 %v31353_v13  ;;  %28216 = vmatpush3.msra.mxu0 %v31462_v20 }
 0xab5   : > { %28253 = vmatpush3.msra.mxu1 %v31432_v12  ;;  %28217 = vmatprep.subr.mxu0 %v31353_v13 }
 0xab6   : > { %28254 = vmatprep.subr.mxu1 %v31353_v13  ;;  %28218 = vmatpush3.msra.mxu0 %v31466_v21 }
 0xab7   : > { %28219 = vmatprep.mubr.msk.f32.mxu0 %vm31354_vm0, %v31353_v13  ;;  %28255 = vmatpush3.msra.mxu1 %v31436_v14 }
 0xab8   : > { %28220 = vmatmul.mubr.f32.vlgmr.msra.gmra.mxu0 %v5738_v63  ;;  %28235 = vmatprep.subr.mxu0 %v31353_v13 }
 0xab9   : > { %28256 = vmatprep.subr.mxu1 %v31353_v13  ;;  %28236 = vmatpush3.msra.mxu0 %v31472_v22 }
 0xaba   : > { %28257 = vmatpush3.msra.mxu1 %v31440_v15  ;;  %28258 = vmatprep.mubr.msk.f32.mxu1 %vm31354_vm0, %v31353_v13 }
 0xabb   : > { %28237 = vmatprep.subr.mxu0 %v31353_v13  ;;  %28259 = vmatmul.mubr.f32.vlgmr.msra.gmra.mxu1 %v5737_v62 }
 0xabc   : > { %28238 = vmatpush3.msra.mxu0 %v31475_v23  ;;  %28245 = vmatprep.mubr.msk.f32.mxu0 %vm31354_vm0, %v31353_v13 }
 0xabd   : > { %28239 = vmatprep.subr.mxu0 %v31353_v13  ;;  %28274 = vmatprep.subr.mxu1 %v31353_v13 }
 0xabe   : > { %28240 = vmatpush3.msra.mxu0 %v31481_v25  ;;  %28275 = vmatpush3.msra.mxu1 %v31499_v32 }
 0xabf   : > { %28241 = vmatprep.subr.mxu0 %v31353_v13  ;;  %28276 = vmatprep.subr.mxu1 %v31353_v13 }
 0xac0   : > { %28242 = vmatpush3.msra.mxu0 %v31484_v26  ;;  %28277 = vmatpush3.msra.mxu1 %v31501_v33 }
 0xac1   : > { %28243 = vmatprep.subr.mxu0 %v31353_v13  ;;  %28278 = vmatprep.subr.mxu1 %v31353_v13 }
 0xac2   : > { %28244 = vmatpush3.msra.mxu0 %v31493_v30  ;;  %28279 = vmatpush3.msra.mxu1 %v31508_v37 }
 0xac3   : > { %28246 = vmatmul.mubr.f32.vlgmr.msra.gmra.mxu0 %v5737_v62  ;;  %28280 = vmatprep.subr.mxu1 %v31353_v13 }
 0xac4   : > { %28281 = vmatpush3.msra.mxu1 %v31515_v40  ;;  %28261 = vmatprep.subr.mxu0 %v31353_v13 }
 0xac5   : > { %28282 = vmatprep.subr.mxu1 %v31353_v13  ;;  %28262 = vmatpush3.msra.mxu0 %v31426_v10 }
 0xac6   : > { %28283 = vmatpush3.msra.mxu1 %v31519_v41  ;;  %28263 = vmatprep.subr.mxu0 %v31353_v13 }
 0xac7   : > { %28284 = vmatprep.mubr.msk.f32.mxu1 %vm31354_vm0, %v31353_v13  ;;  %28300 = vmatprep.subr.mxu1 %v31353_v13 }
 0xac8   : > { %28264 = vmatpush3.msra.mxu0 %v31429_v11  ;;  %28271 = vmatprep.mubr.msk.f32.mxu0 %vm31354_vm0, %v31353_v13 }
 0xac9   : > { %28265 = vmatprep.subr.mxu0 %v31353_v13 }
 0xaca   : > { %28266 = vmatpush3.msra.mxu0 %v31432_v12 }
 0xacb   : > { %28267 = vmatprep.subr.mxu0 %v31353_v13 }
 0xacc   : > { %28268 = vmatpush3.msra.mxu0 %v31436_v14 }
 0xacd   : > { %28269 = vmatprep.subr.mxu0 %v31353_v13 }
 0xace   : > { %28270 = vmatpush3.msra.mxu0 %v31440_v15 }
 0xacf   : > { %28287 = vmatprep.subr.mxu0 %v31353_v13 }
 0xb65   : > { %v5839_v28 = vpop.f32.mrf.mxu1 }
 0xb67   : > { %v28208_v29 = vpop.f32.mrf.mxu1 }
 0xb6d   : > { %v5743_v18 = vpop.f32.mrf.mxu0 }
 0xb6e   : > { %v5840_v42 = vadd.f32 %v5839_v28, %v5743_v18 }
 0xb6f   : > { %v5999_v31 = vpop.f32.mrf.mxu1  ;;  %v28195_v34 = vpop.f32.mrf.mxu0 }
 0xb71   : > { %v28234_v35 = vpop.f32.mrf.mxu1 }
 0xb78   : > { %v5921_v8 = vpop.f32.mrf.mxu0 }
 0xb79   : > { %v5922_v43 = vadd.f32 %v5921_v8, %v5840_v42 }
 0xb7a   : > { %v28221_v36 = vpop.f32.mrf.mxu0 }
 0xb7b   : > { %v6161_v39 = vpop.f32.mrf.mxu1  ;;  %v6000_v45 = vadd.f32 %v5999_v31, %v5922_v43 }
 0xb7d   : > { %v28260_v38 = vpop.f32.mrf.mxu1 }
 0xb83   : > { %v6085_v46 = vpop.f32.mrf.mxu0 }
 0xb84   : > { %v6086_v44 = vadd.f32 %v6085_v46, %v6000_v45 }
 0xb85   : > { %v28247_v47 = vpop.f32.mrf.mxu0 }
 0xb86   : > { %v6162_v49 = vadd.f32 %v6161_v39, %v6086_v44 }
 0xb88   : > { %v6165_v50 = vsub.f32 %v6162_v49, %v31388_v0 }
 0xb8a   : > { %v6166_v48 = vadd.f32 %v6165_v50, %v32416_v56 }
 0xb8c   : > { %v6167_v51 = vmax.f32 %v31403_v6, %v6166_v48 }
 0xb8e   : > { %v6168_v53 = vmin.f32 %v31408_v7, %v6167_v51 }
 0xb90   : > { %v6169_v54 = vsub.f32 %v6165_v50, %v6168_v53 }
 0xb92   : > { %v32497_v52 = vadd.f32 %v6169_v54, %v32416_v56 }
 0xb94   : > { %v6171_v55 = vsub.f32 %v6168_v53, %v32497_v52 }
 0xb96   : > { %v6173_v57 = vsel %vm75_vm1, %v6171_v55, 0 }
 0xb97   : > { %v6245_v58 = vand.u32 4294901760, %v6173_v57 }
 0xb99   : > { %v6246_v59 = vsub.f32 %v6173_v57, %v6245_v58  ;;  %28285 = vmatmul.mubr.f32.vlgmr.msra.gmra.mxu1 %v6245_v58 }
 0xb9a   : > { %28301 = vmatpush3.msra.mxu1 %v31426_v10  ;;  %28310 = vmatprep.mubr.msk.f32.mxu1 %vm31354_vm0, %v31353_v13 }
 0xb9b   : > { %28302 = vmatprep.subr.mxu1 %v31353_v13  ;;  %v6247_v61 = vand.u32 4294901760, %v6246_v59 }
 0xb9c   : > { %28303 = vmatpush3.msra.mxu1 %v31429_v11 }
 0xb9d   : > { %28304 = vmatprep.subr.mxu1 %v31353_v13  ;;  %v6248_v56 = vsub.f32 %v6246_v59, %v6247_v61 }
 0xb9e   : > { %28305 = vmatpush3.msra.mxu1 %v31432_v12 }
 0xb9f   : > { %28306 = vmatprep.subr.mxu1 %v31353_v13  ;;  %v6249_v62 = vand.u32 4294901760, %v6248_v56 }
 0xba0   : > { %28307 = vmatpush3.msra.mxu1 %v31436_v14 }
 0xba1   : > { %28308 = vmatprep.subr.mxu1 %v31353_v13  ;;  %28272 = vmatmul.mubr.f32.vlgmr.msra.gmra.mxu0 %v6249_v62 }
 0xba2   : > { %28288 = vmatpush3.msra.mxu0 %v31445_v16  ;;  %28309 = vmatpush3.msra.mxu1 %v31440_v15 }
 0xba3   : > { %28289 = vmatprep.subr.mxu0 %v31353_v13  ;;  %28311 = vmatmul.mubr.f32.vlgmr.msra.gmra.mxu1 %v6247_v61 }
 0xba4   : > { %28326 = vmatprep.subr.mxu1 %v31353_v13  ;;  %28290 = vmatpush3.msra.mxu0 %v31451_v17 }
 0xba5   : > { %28327 = vmatpush3.msra.mxu1 %v31426_v10  ;;  %28291 = vmatprep.subr.mxu0 %v31353_v13 }
 0xba6   : > { %28328 = vmatprep.subr.mxu1 %v31353_v13  ;;  %28292 = vmatpush3.msra.mxu0 %v31458_v19 }
 0xba7   : > { %28329 = vmatpush3.msra.mxu1 %v31429_v11  ;;  %28293 = vmatprep.subr.mxu0 %v31353_v13 }
 0xba8   : > { %28330 = vmatprep.subr.mxu1 %v31353_v13  ;;  %28294 = vmatpush3.msra.mxu0 %v31462_v20 }
 0xba9   : > { %28331 = vmatpush3.msra.mxu1 %v31432_v12  ;;  %28295 = vmatprep.subr.mxu0 %v31353_v13 }
 0xbaa   : > { %28332 = vmatprep.subr.mxu1 %v31353_v13  ;;  %28296 = vmatpush3.msra.mxu0 %v31466_v21 }
 0xbab   : > { %28297 = vmatprep.mubr.msk.f32.mxu0 %vm31354_vm0, %v31353_v13  ;;  %28333 = vmatpush3.msra.mxu1 %v31436_v14 }
 0xbac   : > { %28298 = vmatmul.mubr.f32.vlgmr.msra.gmra.mxu0 %v6246_v59  ;;  %28313 = vmatprep.subr.mxu0 %v31353_v13 }
 0xbad   : > { %28334 = vmatprep.subr.mxu1 %v31353_v13  ;;  %28314 = vmatpush3.msra.mxu0 %v31472_v22 }
 0xbae   : > { %28335 = vmatpush3.msra.mxu1 %v31440_v15  ;;  %28336 = vmatprep.mubr.msk.f32.mxu1 %vm31354_vm0, %v31353_v13 }
 0xbaf   : > { %28315 = vmatprep.subr.mxu0 %v31353_v13  ;;  %28337 = vmatmul.mubr.f32.vlgmr.msra.gmra.mxu1 %v6245_v58 }
 0xbb0   : > { %28316 = vmatpush3.msra.mxu0 %v31475_v23  ;;  %28323 = vmatprep.mubr.msk.f32.mxu0 %vm31354_vm0, %v31353_v13 }
 0xbb1   : > { %28317 = vmatprep.subr.mxu0 %v31353_v13  ;;  %28352 = vmatprep.subr.mxu1 %v31353_v13 }
 0xbb2   : > { %28318 = vmatpush3.msra.mxu0 %v31481_v25  ;;  %28353 = vmatpush3.msra.mxu1 %v31499_v32 }
 0xbb3   : > { %28319 = vmatprep.subr.mxu0 %v31353_v13  ;;  %28354 = vmatprep.subr.mxu1 %v31353_v13 }
 0xbb4   : > { %28320 = vmatpush3.msra.mxu0 %v31484_v26  ;;  %28355 = vmatpush3.msra.mxu1 %v31501_v33 }
 0xbb5   : > { %28321 = vmatprep.subr.mxu0 %v31353_v13  ;;  %28356 = vmatprep.subr.mxu1 %v31353_v13 }
 0xbb6   : > { %28322 = vmatpush3.msra.mxu0 %v31493_v30  ;;  %28357 = vmatpush3.msra.mxu1 %v31508_v37 }
 0xbb7   : > { %28324 = vmatmul.mubr.f32.vlgmr.msra.gmra.mxu0 %v6245_v58  ;;  %28358 = vmatprep.subr.mxu1 %v31353_v13 }
 0xbb8   : > { %28359 = vmatpush3.msra.mxu1 %v31515_v40  ;;  %28339 = vmatprep.subr.mxu0 %v31353_v13 }
 0xbb9   : > { %28360 = vmatprep.subr.mxu1 %v31353_v13  ;;  %28340 = vmatpush3.msra.mxu0 %v31426_v10 }
 0xbba   : > { %28361 = vmatpush3.msra.mxu1 %v31519_v41  ;;  %28341 = vmatprep.subr.mxu0 %v31353_v13 }
 0xbbb   : > { %28362 = vmatprep.mubr.msk.f32.mxu1 %vm31354_vm0, %v31353_v13  ;;  %28378 = vmatprep.subr.mxu1 %v31353_v13 }
 0xbbc   : > { %28342 = vmatpush3.msra.mxu0 %v31429_v11  ;;  %28349 = vmatprep.mubr.msk.f32.mxu0 %vm31354_vm0, %v31353_v13 }
 0xbbd   : > { %28343 = vmatprep.subr.mxu0 %v31353_v13 }
 0xbbe   : > { %28344 = vmatpush3.msra.mxu0 %v31432_v12 }
 0xbbf   : > { %28345 = vmatprep.subr.mxu0 %v31353_v13 }
 0xbc0   : > { %28346 = vmatpush3.msra.mxu0 %v31436_v14 }
 0xbc1   : > { %28347 = vmatprep.subr.mxu0 %v31353_v13 }
 0xbc2   : > { %28348 = vmatpush3.msra.mxu0 %v31440_v15 }
 0xbc3   : > { %28365 = vmatprep.subr.mxu0 %v31353_v13 }
 0xc59   : > { %v6347_v63 = vpop.f32.mrf.mxu1 }
 0xc5b   : > { %v28286_v24 = vpop.f32.mrf.mxu1 }
 0xc61   : > { %v6251_v60 = vpop.f32.mrf.mxu0 }
 0xc62   : > { %v6348_v35 = vadd.f32 %v6347_v63, %v6251_v60 }
 0xc63   : > { %v6507_v27 = vpop.f32.mrf.mxu1  ;;  %v28273_v28 = vpop.f32.mrf.mxu0 }
 0xc65   : > { %v28312_v29 = vpop.f32.mrf.mxu1 }
 0xc6c   : > { %v6429_v18 = vpop.f32.mrf.mxu0 }
 0xc6d   : > { %v6430_v36 = vadd.f32 %v6429_v18, %v6348_v35 }
 0xc6e   : > { %v28299_v31 = vpop.f32.mrf.mxu0 }
 0xc6f   : > { %v6669_v34 = vpop.f32.mrf.mxu1  ;;  %v6508_v39 = vadd.f32 %v6507_v27, %v6430_v36 }
 0xc71   : > { %v28338_v8 = vpop.f32.mrf.mxu1 }
 0xc77   : > { %v6593_v42 = vpop.f32.mrf.mxu0 }
 0xc78   : > { %v6594_v38 = vadd.f32 %v6593_v42, %v6508_v39 }
 0xc79   : > { %v28325_v43 = vpop.f32.mrf.mxu0 }
 0xc7a   : > { %v6670_v45 = vadd.f32 %v6669_v34, %v6594_v38 }
 0xc7c   : > { %v6673_v46 = vsub.f32 %v6670_v45, %v31388_v0 }
 0xc7e   : > { %v6674_v44 = vadd.f32 %v6673_v46, %v32497_v52 }
 0xc80   : > { %v6675_v47 = vmax.f32 %v31403_v6, %v6674_v44 }
 0xc82   : > { %v6676_v49 = vmin.f32 %v31408_v7, %v6675_v47 }
 0xc84   : > { %v6677_v50 = vsub.f32 %v6673_v46, %v6676_v49 }
 0xc86   : > { %v32578_v48 = vadd.f32 %v6677_v50, %v32497_v52 }
 0xc88   : > { %v6679_v51 = vsub.f32 %v6676_v49, %v32578_v48 }
 0xc8a   : > { %v6681_v53 = vsel %vm75_vm1, %v6679_v51, 0 }
 0xc8b   : > { %v6753_v54 = vand.u32 4294901760, %v6681_v53 }
 0xc8d   : > { %v6754_v55 = vsub.f32 %v6681_v53, %v6753_v54  ;;  %28363 = vmatmul.mubr.f32.vlgmr.msra.gmra.mxu1 %v6753_v54 }
 0xc8e   : > { %28379 = vmatpush3.msra.mxu1 %v31426_v10  ;;  %28388 = vmatprep.mubr.msk.f32.mxu1 %vm31354_vm0, %v31353_v13 }
 0xc8f   : > { %28380 = vmatprep.subr.mxu1 %v31353_v13  ;;  %v6755_v57 = vand.u32 4294901760, %v6754_v55 }
 0xc90   : > { %28381 = vmatpush3.msra.mxu1 %v31429_v11 }
 0xc91   : > { %28382 = vmatprep.subr.mxu1 %v31353_v13  ;;  %v6756_v52 = vsub.f32 %v6754_v55, %v6755_v57 }
 0xc92   : > { %28383 = vmatpush3.msra.mxu1 %v31432_v12 }
 0xc93   : > { %28384 = vmatprep.subr.mxu1 %v31353_v13  ;;  %v6757_v58 = vand.u32 4294901760, %v6756_v52 }
 0xc94   : > { %28385 = vmatpush3.msra.mxu1 %v31436_v14 }
 0xc95   : > { %28386 = vmatprep.subr.mxu1 %v31353_v13  ;;  %28350 = vmatmul.mubr.f32.vlgmr.msra.gmra.mxu0 %v6757_v58 }
 0xc96   : > { %28366 = vmatpush3.msra.mxu0 %v31445_v16  ;;  %28387 = vmatpush3.msra.mxu1 %v31440_v15 }
 0xc97   : > { %28367 = vmatprep.subr.mxu0 %v31353_v13  ;;  %28389 = vmatmul.mubr.f32.vlgmr.msra.gmra.mxu1 %v6755_v57 }
 0xc98   : > { %28404 = vmatprep.subr.mxu1 %v31353_v13  ;;  %28368 = vmatpush3.msra.mxu0 %v31451_v17 }
 0xc99   : > { %28405 = vmatpush3.msra.mxu1 %v31426_v10  ;;  %28369 = vmatprep.subr.mxu0 %v31353_v13 }
 0xc9a   : > { %28406 = vmatprep.subr.mxu1 %v31353_v13  ;;  %28370 = vmatpush3.msra.mxu0 %v31458_v19 }
 0xc9b   : > { %28407 = vmatpush3.msra.mxu1 %v31429_v11  ;;  %28371 = vmatprep.subr.mxu0 %v31353_v13 }
 0xc9c   : > { %28408 = vmatprep.subr.mxu1 %v31353_v13  ;;  %28372 = vmatpush3.msra.mxu0 %v31462_v20 }
 0xc9d   : > { %28409 = vmatpush3.msra.mxu1 %v31432_v12  ;;  %28373 = vmatprep.subr.mxu0 %v31353_v13 }
 0xc9e   : > { %28410 = vmatprep.subr.mxu1 %v31353_v13  ;;  %28374 = vmatpush3.msra.mxu0 %v31466_v21 }
 0xc9f   : > { %28375 = vmatprep.mubr.msk.f32.mxu0 %vm31354_vm0, %v31353_v13  ;;  %28411 = vmatpush3.msra.mxu1 %v31436_v14 }
 0xca0   : > { %28376 = vmatmul.mubr.f32.vlgmr.msra.gmra.mxu0 %v6754_v55  ;;  %28391 = vmatprep.subr.mxu0 %v31353_v13 }
 0xca1   : > { %28412 = vmatprep.subr.mxu1 %v31353_v13  ;;  %28392 = vmatpush3.msra.mxu0 %v31472_v22 }
 0xca2   : > { %28413 = vmatpush3.msra.mxu1 %v31440_v15  ;;  %28414 = vmatprep.mubr.msk.f32.mxu1 %vm31354_vm0, %v31353_v13 }
 0xca3   : > { %28393 = vmatprep.subr.mxu0 %v31353_v13  ;;  %28415 = vmatmul.mubr.f32.vlgmr.msra.gmra.mxu1 %v6753_v54 }
 0xca4   : > { %28394 = vmatpush3.msra.mxu0 %v31475_v23  ;;  %28401 = vmatprep.mubr.msk.f32.mxu0 %vm31354_vm0, %v31353_v13 }
 0xca5   : > { %28395 = vmatprep.subr.mxu0 %v31353_v13  ;;  %28430 = vmatprep.subr.mxu1 %v31353_v13 }
 0xca6   : > { %28396 = vmatpush3.msra.mxu0 %v31481_v25  ;;  %28431 = vmatpush3.msra.mxu1 %v31499_v32 }
 0xca7   : > { %28397 = vmatprep.subr.mxu0 %v31353_v13  ;;  %28432 = vmatprep.subr.mxu1 %v31353_v13 }
 0xca8   : > { %28398 = vmatpush3.msra.mxu0 %v31484_v26  ;;  %28433 = vmatpush3.msra.mxu1 %v31501_v33 }
 0xca9   : > { %28399 = vmatprep.subr.mxu0 %v31353_v13  ;;  %28434 = vmatprep.subr.mxu1 %v31353_v13 }
 0xcaa   : > { %28400 = vmatpush3.msra.mxu0 %v31493_v30  ;;  %28435 = vmatpush3.msra.mxu1 %v31508_v37 }
 0xcab   : > { %28402 = vmatmul.mubr.f32.vlgmr.msra.gmra.mxu0 %v6753_v54  ;;  %28436 = vmatprep.subr.mxu1 %v31353_v13 }
 0xcac   : > { %28437 = vmatpush3.msra.mxu1 %v31515_v40  ;;  %28417 = vmatprep.subr.mxu0 %v31353_v13 }
 0xcad   : > { %28438 = vmatprep.subr.mxu1 %v31353_v13  ;;  %28418 = vmatpush3.msra.mxu0 %v31426_v10 }
 0xcae   : > { %28439 = vmatpush3.msra.mxu1 %v31519_v41  ;;  %28419 = vmatprep.subr.mxu0 %v31353_v13 }
 0xcaf   : > { %28440 = vmatprep.mubr.msk.f32.mxu1 %vm31354_vm0, %v31353_v13  ;;  %28456 = vmatprep.subr.mxu1 %v31353_v13 }
 0xcb0   : > { %28420 = vmatpush3.msra.mxu0 %v31429_v11  ;;  %28427 = vmatprep.mubr.msk.f32.mxu0 %vm31354_vm0, %v31353_v13 }
 0xcb1   : > { %28421 = vmatprep.subr.mxu0 %v31353_v13 }
 0xcb2   : > { %28422 = vmatpush3.msra.mxu0 %v31432_v12 }
 0xcb3   : > { %28423 = vmatprep.subr.mxu0 %v31353_v13 }
 0xcb4   : > { %28424 = vmatpush3.msra.mxu0 %v31436_v14 }
 0xcb5   : > { %28425 = vmatprep.subr.mxu0 %v31353_v13 }
 0xcb6   : > { %28426 = vmatpush3.msra.mxu0 %v31440_v15 }
 0xcb7   : > { %28443 = vmatprep.subr.mxu0 %v31353_v13 }
 0xd4d   : > { %v6855_v59 = vpop.f32.mrf.mxu1 }
 0xd4f   : > { %v28364_v61 = vpop.f32.mrf.mxu1 }
 0xd55   : > { %v6759_v56 = vpop.f32.mrf.mxu0 }
 0xd56   : > { %v6856_v29 = vadd.f32 %v6855_v59, %v6759_v56 }
 0xd57   : > { %v7015_v62 = vpop.f32.mrf.mxu1  ;;  %v28351_v63 = vpop.f32.mrf.mxu0 }
 0xd59   : > { %v28390_v24 = vpop.f32.mrf.mxu1 }
 0xd60   : > { %v6937_v60 = vpop.f32.mrf.mxu0 }
 0xd61   : > { %v6938_v31 = vadd.f32 %v6937_v60, %v6856_v29 }
 0xd62   : > { %v28377_v27 = vpop.f32.mrf.mxu0 }
 0xd63   : > { %v7177_v28 = vpop.f32.mrf.mxu1  ;;  %v7016_v34 = vadd.f32 %v7015_v62, %v6938_v31 }
 0xd65   : > { %v28416_v18 = vpop.f32.mrf.mxu1 }
 0xd6b   : > { %v7101_v35 = vpop.f32.mrf.mxu0 }
 0xd6c   : > { %v7102_v8 = vadd.f32 %v7101_v35, %v7016_v34 }
 0xd6d   : > { %v28403_v36 = vpop.f32.mrf.mxu0 }
 0xd6e   : > { %v7178_v39 = vadd.f32 %v7177_v28, %v7102_v8 }
 0xd70   : > { %v7181_v42 = vsub.f32 %v7178_v39, %v31388_v0 }
 0xd72   : > { %v7182_v38 = vadd.f32 %v7181_v42, %v32578_v48 }
 0xd74   : > { %v7183_v43 = vmax.f32 %v31403_v6, %v7182_v38 }
 0xd76   : > { %v7184_v45 = vmin.f32 %v31408_v7, %v7183_v43 }
 0xd78   : > { %v7185_v46 = vsub.f32 %v7181_v42, %v7184_v45 }
 0xd7a   : > { %v32659_v44 = vadd.f32 %v7185_v46, %v32578_v48 }
 0xd7c   : > { %v7187_v47 = vsub.f32 %v7184_v45, %v32659_v44 }
 0xd7e   : > { %v7189_v49 = vsel %vm75_vm1, %v7187_v47, 0 }
 0xd7f   : > { %v7261_v50 = vand.u32 4294901760, %v7189_v49 }
 0xd81   : > { %v7262_v51 = vsub.f32 %v7189_v49, %v7261_v50  ;;  %28441 = vmatmul.mubr.f32.vlgmr.msra.gmra.mxu1 %v7261_v50 }
 0xd82   : > { %28457 = vmatpush3.msra.mxu1 %v31426_v10  ;;  %28466 = vmatprep.mubr.msk.f32.mxu1 %vm31354_vm0, %v31353_v13 }
 0xd83   : > { %28458 = vmatprep.subr.mxu1 %v31353_v13  ;;  %v7263_v53 = vand.u32 4294901760, %v7262_v51 }
 0xd84   : > { %28459 = vmatpush3.msra.mxu1 %v31429_v11 }
 0xd85   : > { %28460 = vmatprep.subr.mxu1 %v31353_v13  ;;  %v7264_v48 = vsub.f32 %v7262_v51, %v7263_v53 }
 0xd86   : > { %28461 = vmatpush3.msra.mxu1 %v31432_v12 }
 0xd87   : > { %28462 = vmatprep.subr.mxu1 %v31353_v13  ;;  %v7265_v54 = vand.u32 4294901760, %v7264_v48 }
 0xd88   : > { %28463 = vmatpush3.msra.mxu1 %v31436_v14 }
 0xd89   : > { %28464 = vmatprep.subr.mxu1 %v31353_v13  ;;  %28428 = vmatmul.mubr.f32.vlgmr.msra.gmra.mxu0 %v7265_v54 }
 0xd8a   : > { %28444 = vmatpush3.msra.mxu0 %v31445_v16  ;;  %28465 = vmatpush3.msra.mxu1 %v31440_v15 }
 0xd8b   : > { %28445 = vmatprep.subr.mxu0 %v31353_v13  ;;  %28467 = vmatmul.mubr.f32.vlgmr.msra.gmra.mxu1 %v7263_v53 }
 0xd8c   : > { %28482 = vmatprep.subr.mxu1 %v31353_v13  ;;  %28446 = vmatpush3.msra.mxu0 %v31451_v17 }
 0xd8d   : > { %28483 = vmatpush3.msra.mxu1 %v31426_v10  ;;  %28447 = vmatprep.subr.mxu0 %v31353_v13 }
 0xd8e   : > { %28484 = vmatprep.subr.mxu1 %v31353_v13  ;;  %28448 = vmatpush3.msra.mxu0 %v31458_v19 }
 0xd8f   : > { %28485 = vmatpush3.msra.mxu1 %v31429_v11  ;;  %28449 = vmatprep.subr.mxu0 %v31353_v13 }
 0xd90   : > { %28486 = vmatprep.subr.mxu1 %v31353_v13  ;;  %28450 = vmatpush3.msra.mxu0 %v31462_v20 }
 0xd91   : > { %28487 = vmatpush3.msra.mxu1 %v31432_v12  ;;  %28451 = vmatprep.subr.mxu0 %v31353_v13 }
 0xd92   : > { %28488 = vmatprep.subr.mxu1 %v31353_v13  ;;  %28452 = vmatpush3.msra.mxu0 %v31466_v21 }
 0xd93   : > { %28453 = vmatprep.mubr.msk.f32.mxu0 %vm31354_vm0, %v31353_v13  ;;  %28489 = vmatpush3.msra.mxu1 %v31436_v14 }
 0xd94   : > { %28454 = vmatmul.mubr.f32.vlgmr.msra.gmra.mxu0 %v7262_v51  ;;  %28469 = vmatprep.subr.mxu0 %v31353_v13 }
 0xd95   : > { %28490 = vmatprep.subr.mxu1 %v31353_v13  ;;  %28470 = vmatpush3.msra.mxu0 %v31472_v22 }
 0xd96   : > { %28491 = vmatpush3.msra.mxu1 %v31440_v15  ;;  %28492 = vmatprep.mubr.msk.f32.mxu1 %vm31354_vm0, %v31353_v13 }
 0xd97   : > { %28471 = vmatprep.subr.mxu0 %v31353_v13  ;;  %28493 = vmatmul.mubr.f32.vlgmr.msra.gmra.mxu1 %v7261_v50 }
 0xd98   : > { %28472 = vmatpush3.msra.mxu0 %v31475_v23  ;;  %28479 = vmatprep.mubr.msk.f32.mxu0 %vm31354_vm0, %v31353_v13 }
 0xd99   : > { %28473 = vmatprep.subr.mxu0 %v31353_v13  ;;  %28508 = vmatprep.subr.mxu1 %v31353_v13 }
 0xd9a   : > { %28474 = vmatpush3.msra.mxu0 %v31481_v25  ;;  %28509 = vmatpush3.msra.mxu1 %v31499_v32 }
 0xd9b   : > { %28475 = vmatprep.subr.mxu0 %v31353_v13  ;;  %28510 = vmatprep.subr.mxu1 %v31353_v13 }
 0xd9c   : > { %28476 = vmatpush3.msra.mxu0 %v31484_v26  ;;  %28511 = vmatpush3.msra.mxu1 %v31501_v33 }
 0xd9d   : > { %28477 = vmatprep.subr.mxu0 %v31353_v13  ;;  %28512 = vmatprep.subr.mxu1 %v31353_v13 }
 0xd9e   : > { %28478 = vmatpush3.msra.mxu0 %v31493_v30  ;;  %28513 = vmatpush3.msra.mxu1 %v31508_v37 }
 0xd9f   : > { %28480 = vmatmul.mubr.f32.vlgmr.msra.gmra.mxu0 %v7261_v50  ;;  %28514 = vmatprep.subr.mxu1 %v31353_v13 }
 0xda0   : > { %28515 = vmatpush3.msra.mxu1 %v31515_v40  ;;  %28495 = vmatprep.subr.mxu0 %v31353_v13 }
 0xda1   : > { %28516 = vmatprep.subr.mxu1 %v31353_v13  ;;  %28496 = vmatpush3.msra.mxu0 %v31426_v10 }
 0xda2   : > { %28517 = vmatpush3.msra.mxu1 %v31519_v41  ;;  %28497 = vmatprep.subr.mxu0 %v31353_v13 }
 0xda3   : > { %28518 = vmatprep.mubr.msk.f32.mxu1 %vm31354_vm0, %v31353_v13  ;;  %28534 = vmatprep.subr.mxu1 %v31353_v13 }
 0xda4   : > { %28498 = vmatpush3.msra.mxu0 %v31429_v11  ;;  %28505 = vmatprep.mubr.msk.f32.mxu0 %vm31354_vm0, %v31353_v13 }
 0xda5   : > { %28499 = vmatprep.subr.mxu0 %v31353_v13 }
 0xda6   : > { %28500 = vmatpush3.msra.mxu0 %v31432_v12 }
 0xda7   : > { %28501 = vmatprep.subr.mxu0 %v31353_v13 }
 0xda8   : > { %28502 = vmatpush3.msra.mxu0 %v31436_v14 }
 0xda9   : > { %28503 = vmatprep.subr.mxu0 %v31353_v13 }
 0xdaa   : > { %28504 = vmatpush3.msra.mxu0 %v31440_v15 }
 0xdab   : > { %28521 = vmatprep.subr.mxu0 %v31353_v13 }
 0xe41   : > { %v7363_v55 = vpop.f32.mrf.mxu1 }
 0xe43   : > { %v28442_v57 = vpop.f32.mrf.mxu1 }
 0xe49   : > { %v7267_v52 = vpop.f32.mrf.mxu0 }
 0xe4a   : > { %v7364_v24 = vadd.f32 %v7363_v55, %v7267_v52 }
 0xe4b   : > { %v7523_v58 = vpop.f32.mrf.mxu1  ;;  %v28429_v59 = vpop.f32.mrf.mxu0 }
 0xe4d   : > { %v28468_v61 = vpop.f32.mrf.mxu1 }
 0xe54   : > { %v7445_v56 = vpop.f32.mrf.mxu0 }
 0xe55   : > { %v7446_v27 = vadd.f32 %v7445_v56, %v7364_v24 }
 0xe56   : > { %v28455_v62 = vpop.f32.mrf.mxu0 }
 0xe57   : > { %v7685_v63 = vpop.f32.mrf.mxu1  ;;  %v7524_v28 = vadd.f32 %v7523_v58, %v7446_v27 }
 0xe59   : > { %v28494_v60 = vpop.f32.mrf.mxu1 }
 0xe5f   : > { %v7609_v29 = vpop.f32.mrf.mxu0 }
 0xe60   : > { %v7610_v18 = vadd.f32 %v7609_v29, %v7524_v28 }
 0xe61   : > { %v28481_v31 = vpop.f32.mrf.mxu0 }
 0xe62   : > { %v7686_v34 = vadd.f32 %v7685_v63, %v7610_v18 }
 0xe64   : > { %v7689_v35 = vsub.f32 %v7686_v34, %v31388_v0 }
 0xe66   : > { %v7690_v8 = vadd.f32 %v7689_v35, %v32659_v44 }
 0xe68   : > { %v7691_v36 = vmax.f32 %v31403_v6, %v7690_v8 }
 0xe6a   : > { %v7692_v39 = vmin.f32 %v31408_v7, %v7691_v36 }
 0xe6c   : > { %v7693_v42 = vsub.f32 %v7689_v35, %v7692_v39 }
 0xe6e   : > { %v32740_v38 = vadd.f32 %v7693_v42, %v32659_v44 }
 0xe70   : > { %v7695_v43 = vsub.f32 %v7692_v39, %v32740_v38 }
 0xe72   : > { %v7697_v45 = vsel %vm75_vm1, %v7695_v43, 0 }
 0xe73   : > { %v7769_v46 = vand.u32 4294901760, %v7697_v45 }
 0xe75   : > { %v7770_v47 = vsub.f32 %v7697_v45, %v7769_v46  ;;  %28519 = vmatmul.mubr.f32.vlgmr.msra.gmra.mxu1 %v7769_v46 }
 0xe76   : > { %28535 = vmatpush3.msra.mxu1 %v31426_v10  ;;  %28544 = vmatprep.mubr.msk.f32.mxu1 %vm31354_vm0, %v31353_v13 }
 0xe77   : > { %28536 = vmatprep.subr.mxu1 %v31353_v13  ;;  %v7771_v49 = vand.u32 4294901760, %v7770_v47 }
 0xe78   : > { %28537 = vmatpush3.msra.mxu1 %v31429_v11 }
 0xe79   : > { %28538 = vmatprep.subr.mxu1 %v31353_v13  ;;  %v7772_v44 = vsub.f32 %v7770_v47, %v7771_v49 }
 0xe7a   : > { %28539 = vmatpush3.msra.mxu1 %v31432_v12 }
 0xe7b   : > { %28540 = vmatprep.subr.mxu1 %v31353_v13  ;;  %v7773_v50 = vand.u32 4294901760, %v7772_v44 }
 0xe7c   : > { %28541 = vmatpush3.msra.mxu1 %v31436_v14 }
 0xe7d   : > { %28542 = vmatprep.subr.mxu1 %v31353_v13  ;;  %28506 = vmatmul.mubr.f32.vlgmr.msra.gmra.mxu0 %v7773_v50 }
 0xe7e   : > { %28522 = vmatpush3.msra.mxu0 %v31445_v16  ;;  %28543 = vmatpush3.msra.mxu1 %v31440_v15 }
 0xe7f   : > { %28523 = vmatprep.subr.mxu0 %v31353_v13  ;;  %28545 = vmatmul.mubr.f32.vlgmr.msra.gmra.mxu1 %v7771_v49 }
 0xe80   : > { %28560 = vmatprep.subr.mxu1 %v31353_v13  ;;  %28524 = vmatpush3.msra.mxu0 %v31451_v17 }
 0xe81   : > { %28561 = vmatpush3.msra.mxu1 %v31426_v10  ;;  %28525 = vmatprep.subr.mxu0 %v31353_v13 }
 0xe82   : > { %28562 = vmatprep.subr.mxu1 %v31353_v13  ;;  %28526 = vmatpush3.msra.mxu0 %v31458_v19 }
 0xe83   : > { %28563 = vmatpush3.msra.mxu1 %v31429_v11  ;;  %28527 = vmatprep.subr.mxu0 %v31353_v13 }
 0xe84   : > { %28564 = vmatprep.subr.mxu1 %v31353_v13  ;;  %28528 = vmatpush3.msra.mxu0 %v31462_v20 }
 0xe85   : > { %28565 = vmatpush3.msra.mxu1 %v31432_v12  ;;  %28529 = vmatprep.subr.mxu0 %v31353_v13 }
 0xe86   : > { %28566 = vmatprep.subr.mxu1 %v31353_v13  ;;  %28530 = vmatpush3.msra.mxu0 %v31466_v21 }
 0xe87   : > { %28531 = vmatprep.mubr.msk.f32.mxu0 %vm31354_vm0, %v31353_v13  ;;  %28567 = vmatpush3.msra.mxu1 %v31436_v14 }
 0xe88   : > { %28532 = vmatmul.mubr.f32.vlgmr.msra.gmra.mxu0 %v7770_v47  ;;  %28547 = vmatprep.subr.mxu0 %v31353_v13 }
 0xe89   : > { %28568 = vmatprep.subr.mxu1 %v31353_v13  ;;  %28548 = vmatpush3.msra.mxu0 %v31472_v22 }
 0xe8a   : > { %28569 = vmatpush3.msra.mxu1 %v31440_v15  ;;  %28570 = vmatprep.mubr.msk.f32.mxu1 %vm31354_vm0, %v31353_v13 }
 0xe8b   : > { %28549 = vmatprep.subr.mxu0 %v31353_v13  ;;  %28571 = vmatmul.mubr.f32.vlgmr.msra.gmra.mxu1 %v7769_v46 }
 0xe8c   : > { %28550 = vmatpush3.msra.mxu0 %v31475_v23  ;;  %28557 = vmatprep.mubr.msk.f32.mxu0 %vm31354_vm0, %v31353_v13 }
 0xe8d   : > { %28551 = vmatprep.subr.mxu0 %v31353_v13  ;;  %28586 = vmatprep.subr.mxu1 %v31353_v13 }
 0xe8e   : > { %28552 = vmatpush3.msra.mxu0 %v31481_v25  ;;  %28587 = vmatpush3.msra.mxu1 %v31499_v32 }
 0xe8f   : > { %28553 = vmatprep.subr.mxu0 %v31353_v13  ;;  %28588 = vmatprep.subr.mxu1 %v31353_v13 }
 0xe90   : > { %28554 = vmatpush3.msra.mxu0 %v31484_v26  ;;  %28589 = vmatpush3.msra.mxu1 %v31501_v33 }
 0xe91   : > { %28555 = vmatprep.subr.mxu0 %v31353_v13  ;;  %28590 = vmatprep.subr.mxu1 %v31353_v13 }
 0xe92   : > { %28556 = vmatpush3.msra.mxu0 %v31493_v30  ;;  %28591 = vmatpush3.msra.mxu1 %v31508_v37 }
 0xe93   : > { %28558 = vmatmul.mubr.f32.vlgmr.msra.gmra.mxu0 %v7769_v46  ;;  %28592 = vmatprep.subr.mxu1 %v31353_v13 }
 0xe94   : > { %28593 = vmatpush3.msra.mxu1 %v31515_v40  ;;  %28573 = vmatprep.subr.mxu0 %v31353_v13 }
 0xe95   : > { %28594 = vmatprep.subr.mxu1 %v31353_v13  ;;  %28574 = vmatpush3.msra.mxu0 %v31426_v10 }
 0xe96   : > { %28595 = vmatpush3.msra.mxu1 %v31519_v41  ;;  %28575 = vmatprep.subr.mxu0 %v31353_v13 }
 0xe97   : > { %28596 = vmatprep.mubr.msk.f32.mxu1 %vm31354_vm0, %v31353_v13  ;;  %28612 = vmatprep.subr.mxu1 %v31353_v13 }
 0xe98   : > { %28576 = vmatpush3.msra.mxu0 %v31429_v11  ;;  %28583 = vmatprep.mubr.msk.f32.mxu0 %vm31354_vm0, %v31353_v13 }
 0xe99   : > { %28577 = vmatprep.subr.mxu0 %v31353_v13 }
 0xe9a   : > { %28578 = vmatpush3.msra.mxu0 %v31432_v12 }
 0xe9b   : > { %28579 = vmatprep.subr.mxu0 %v31353_v13 }
 0xe9c   : > { %28580 = vmatpush3.msra.mxu0 %v31436_v14 }
 0xe9d   : > { %28581 = vmatprep.subr.mxu0 %v31353_v13 }
 0xe9e   : > { %28582 = vmatpush3.msra.mxu0 %v31440_v15 }
 0xe9f   : > { %28599 = vmatprep.subr.mxu0 %v31353_v13 }
 0xf35   : > { %v7871_v51 = vpop.f32.mrf.mxu1 }
 0xf37   : > { %v28520_v53 = vpop.f32.mrf.mxu1 }
 0xf3d   : > { %v7775_v48 = vpop.f32.mrf.mxu0 }
 0xf3e   : > { %v7872_v61 = vadd.f32 %v7871_v51, %v7775_v48 }
 0xf3f   : > { %v8031_v54 = vpop.f32.mrf.mxu1  ;;  %v28507_v55 = vpop.f32.mrf.mxu0 }
 0xf41   : > { %v28546_v57 = vpop.f32.mrf.mxu1 }
 0xf48   : > { %v7953_v52 = vpop.f32.mrf.mxu0 }
 0xf49   : > { %v7954_v62 = vadd.f32 %v7953_v52, %v7872_v61 }
 0xf4a   : > { %v28533_v58 = vpop.f32.mrf.mxu0 }
 0xf4b   : > { %v8193_v59 = vpop.f32.mrf.mxu1  ;;  %v8032_v63 = vadd.f32 %v8031_v54, %v7954_v62 }
 0xf4d   : > { %v28572_v56 = vpop.f32.mrf.mxu1 }
 0xf53   : > { %v8117_v24 = vpop.f32.mrf.mxu0 }
 0xf54   : > { %v8118_v60 = vadd.f32 %v8117_v24, %v8032_v63 }
 0xf55   : > { %v28559_v27 = vpop.f32.mrf.mxu0 }
 0xf56   : > { %v8194_v28 = vadd.f32 %v8193_v59, %v8118_v60 }
 0xf58   : > { %v8197_v29 = vsub.f32 %v8194_v28, %v31388_v0 }
 0xf5a   : > { %v8198_v18 = vadd.f32 %v8197_v29, %v32740_v38 }
 0xf5c   : > { %v8199_v31 = vmax.f32 %v31403_v6, %v8198_v18 }
 0xf5e   : > { %v8200_v34 = vmin.f32 %v31408_v7, %v8199_v31 }
 0xf60   : > { %v8201_v35 = vsub.f32 %v8197_v29, %v8200_v34 }
 0xf62   : > { %v32821_v8 = vadd.f32 %v8201_v35, %v32740_v38 }
 0xf64   : > { %v8203_v36 = vsub.f32 %v8200_v34, %v32821_v8 }
 0xf66   : > { %v8205_v39 = vsel %vm75_vm1, %v8203_v36, 0 }
 0xf67   : > { %v8277_v42 = vand.u32 4294901760, %v8205_v39 }
 0xf69   : > { %v8278_v43 = vsub.f32 %v8205_v39, %v8277_v42  ;;  %28597 = vmatmul.mubr.f32.vlgmr.msra.gmra.mxu1 %v8277_v42 }
 0xf6a   : > { %28613 = vmatpush3.msra.mxu1 %v31426_v10  ;;  %28622 = vmatprep.mubr.msk.f32.mxu1 %vm31354_vm0, %v31353_v13 }
 0xf6b   : > { %28614 = vmatprep.subr.mxu1 %v31353_v13  ;;  %v8279_v45 = vand.u32 4294901760, %v8278_v43 }
 0xf6c   : > { %28615 = vmatpush3.msra.mxu1 %v31429_v11 }
 0xf6d   : > { %28616 = vmatprep.subr.mxu1 %v31353_v13  ;;  %v8280_v38 = vsub.f32 %v8278_v43, %v8279_v45 }
 0xf6e   : > { %28617 = vmatpush3.msra.mxu1 %v31432_v12 }
 0xf6f   : > { %28618 = vmatprep.subr.mxu1 %v31353_v13  ;;  %v8281_v46 = vand.u32 4294901760, %v8280_v38 }
 0xf70   : > { %28619 = vmatpush3.msra.mxu1 %v31436_v14 }
 0xf71   : > { %28620 = vmatprep.subr.mxu1 %v31353_v13  ;;  %28584 = vmatmul.mubr.f32.vlgmr.msra.gmra.mxu0 %v8281_v46 }
 0xf72   : > { %28600 = vmatpush3.msra.mxu0 %v31445_v16  ;;  %28621 = vmatpush3.msra.mxu1 %v31440_v15 }
 0xf73   : > { %28601 = vmatprep.subr.mxu0 %v31353_v13  ;;  %28623 = vmatmul.mubr.f32.vlgmr.msra.gmra.mxu1 %v8279_v45 }
 0xf74   : > { %28638 = vmatprep.subr.mxu1 %v31353_v13  ;;  %28602 = vmatpush3.msra.mxu0 %v31451_v17 }
 0xf75   : > { %28639 = vmatpush3.msra.mxu1 %v31426_v10  ;;  %28603 = vmatprep.subr.mxu0 %v31353_v13 }
 0xf76   : > { %28640 = vmatprep.subr.mxu1 %v31353_v13  ;;  %28604 = vmatpush3.msra.mxu0 %v31458_v19 }
 0xf77   : > { %28641 = vmatpush3.msra.mxu1 %v31429_v11  ;;  %28605 = vmatprep.subr.mxu0 %v31353_v13 }
 0xf78   : > { %28642 = vmatprep.subr.mxu1 %v31353_v13  ;;  %28606 = vmatpush3.msra.mxu0 %v31462_v20 }
 0xf79   : > { %28643 = vmatpush3.msra.mxu1 %v31432_v12  ;;  %28607 = vmatprep.subr.mxu0 %v31353_v13 }
 0xf7a   : > { %28644 = vmatprep.subr.mxu1 %v31353_v13  ;;  %28608 = vmatpush3.msra.mxu0 %v31466_v21 }
 0xf7b   : > { %28609 = vmatprep.mubr.msk.f32.mxu0 %vm31354_vm0, %v31353_v13  ;;  %28645 = vmatpush3.msra.mxu1 %v31436_v14 }
 0xf7c   : > { %28610 = vmatmul.mubr.f32.vlgmr.msra.gmra.mxu0 %v8278_v43  ;;  %28625 = vmatprep.subr.mxu0 %v31353_v13 }
 0xf7d   : > { %28646 = vmatprep.subr.mxu1 %v31353_v13  ;;  %28626 = vmatpush3.msra.mxu0 %v31472_v22 }
 0xf7e   : > { %28647 = vmatpush3.msra.mxu1 %v31440_v15  ;;  %28648 = vmatprep.mubr.msk.f32.mxu1 %vm31354_vm0, %v31353_v13 }
 0xf7f   : > { %28627 = vmatprep.subr.mxu0 %v31353_v13  ;;  %28649 = vmatmul.mubr.f32.vlgmr.msra.gmra.mxu1 %v8277_v42 }
 0xf80   : > { %28628 = vmatpush3.msra.mxu0 %v31475_v23  ;;  %28635 = vmatprep.mubr.msk.f32.mxu0 %vm31354_vm0, %v31353_v13 }
 0xf81   : > { %28629 = vmatprep.subr.mxu0 %v31353_v13  ;;  %28664 = vmatprep.subr.mxu1 %v31353_v13 }
 0xf82   : > { %28630 = vmatpush3.msra.mxu0 %v31481_v25  ;;  %28665 = vmatpush3.msra.mxu1 %v31499_v32 }
 0xf83   : > { %28631 = vmatprep.subr.mxu0 %v31353_v13  ;;  %28666 = vmatprep.subr.mxu1 %v31353_v13 }
 0xf84   : > { %28632 = vmatpush3.msra.mxu0 %v31484_v26  ;;  %28667 = vmatpush3.msra.mxu1 %v31501_v33 }
 0xf85   : > { %28633 = vmatprep.subr.mxu0 %v31353_v13  ;;  %28668 = vmatprep.subr.mxu1 %v31353_v13 }
 0xf86   : > { %28634 = vmatpush3.msra.mxu0 %v31493_v30  ;;  %28669 = vmatpush3.msra.mxu1 %v31508_v37 }
 0xf87   : > { %28636 = vmatmul.mubr.f32.vlgmr.msra.gmra.mxu0 %v8277_v42  ;;  %28670 = vmatprep.subr.mxu1 %v31353_v13 }
 0xf88   : > { %28671 = vmatpush3.msra.mxu1 %v31515_v40  ;;  %28651 = vmatprep.subr.mxu0 %v31353_v13 }
 0xf89   : > { %28672 = vmatprep.subr.mxu1 %v31353_v13  ;;  %28652 = vmatpush3.msra.mxu0 %v31426_v10 }
 0xf8a   : > { %28673 = vmatpush3.msra.mxu1 %v31519_v41  ;;  %28653 = vmatprep.subr.mxu0 %v31353_v13 }
 0xf8b   : > { %28674 = vmatprep.mubr.msk.f32.mxu1 %vm31354_vm0, %v31353_v13  ;;  %28690 = vmatprep.subr.mxu1 %v31353_v13 }
 0xf8c   : > { %28654 = vmatpush3.msra.mxu0 %v31429_v11  ;;  %28661 = vmatprep.mubr.msk.f32.mxu0 %vm31354_vm0, %v31353_v13 }
 0xf8d   : > { %28655 = vmatprep.subr.mxu0 %v31353_v13 }
 0xf8e   : > { %28656 = vmatpush3.msra.mxu0 %v31432_v12 }
 0xf8f   : > { %28657 = vmatprep.subr.mxu0 %v31353_v13 }
 0xf90   : > { %28658 = vmatpush3.msra.mxu0 %v31436_v14 }
 0xf91   : > { %28659 = vmatprep.subr.mxu0 %v31353_v13 }
 0xf92   : > { %28660 = vmatpush3.msra.mxu0 %v31440_v15 }
 0xf93   : > { %28677 = vmatprep.subr.mxu0 %v31353_v13 }
0x1029   : > { %v8379_v47 = vpop.f32.mrf.mxu1 }
0x102b   : > { %v28598_v49 = vpop.f32.mrf.mxu1 }
0x1031   : > { %v8283_v44 = vpop.f32.mrf.mxu0 }
0x1032   : > { %v8380_v57 = vadd.f32 %v8379_v47, %v8283_v44 }
0x1033   : > { %v8539_v50 = vpop.f32.mrf.mxu1  ;;  %v28585_v51 = vpop.f32.mrf.mxu0 }
0x1035   : > { %v28624_v53 = vpop.f32.mrf.mxu1 }
0x103c   : > { %v8461_v48 = vpop.f32.mrf.mxu0 }
0x103d   : > { %v8462_v58 = vadd.f32 %v8461_v48, %v8380_v57 }
0x103e   : > { %v28611_v54 = vpop.f32.mrf.mxu0 }
0x103f   : > { %v8701_v55 = vpop.f32.mrf.mxu1  ;;  %v8540_v59 = vadd.f32 %v8539_v50, %v8462_v58 }
0x1041   : > { %v28650_v52 = vpop.f32.mrf.mxu1 }
0x1047   : > { %v8625_v61 = vpop.f32.mrf.mxu0 }
0x1048   : > { %v8626_v56 = vadd.f32 %v8625_v61, %v8540_v59 }
0x1049   : > { %v28637_v62 = vpop.f32.mrf.mxu0 }
0x104a   : > { %v8702_v63 = vadd.f32 %v8701_v55, %v8626_v56 }
0x104c   : > { %v8705_v24 = vsub.f32 %v8702_v63, %v31388_v0 }
0x104e   : > { %v8706_v60 = vadd.f32 %v8705_v24, %v32821_v8 }
0x1050   : > { %v8707_v27 = vmax.f32 %v31403_v6, %v8706_v60 }
0x1052   : > { %v8708_v28 = vmin.f32 %v31408_v7, %v8707_v27 }
0x1054   : > { %v8709_v29 = vsub.f32 %v8705_v24, %v8708_v28 }
0x1056   : > { %v32902_v18 = vadd.f32 %v8709_v29, %v32821_v8 }
0x1058   : > { %v8711_v31 = vsub.f32 %v8708_v28, %v32902_v18 }
0x105a   : > { %v8713_v34 = vsel %vm75_vm1, %v8711_v31, 0 }
0x105b   : > { %v8785_v35 = vand.u32 4294901760, %v8713_v34 }
0x105d   : > { %v8786_v36 = vsub.f32 %v8713_v34, %v8785_v35  ;;  %28675 = vmatmul.mubr.f32.vlgmr.msra.gmra.mxu1 %v8785_v35 }
0x105e   : > { %28691 = vmatpush3.msra.mxu1 %v31426_v10  ;;  %28700 = vmatprep.mubr.msk.f32.mxu1 %vm31354_vm0, %v31353_v13 }
0x105f   : > { %28692 = vmatprep.subr.mxu1 %v31353_v13  ;;  %v8787_v39 = vand.u32 4294901760, %v8786_v36 }
0x1060   : > { %28693 = vmatpush3.msra.mxu1 %v31429_v11 }
0x1061   : > { %28694 = vmatprep.subr.mxu1 %v31353_v13  ;;  %v8788_v8 = vsub.f32 %v8786_v36, %v8787_v39 }
0x1062   : > { %28695 = vmatpush3.msra.mxu1 %v31432_v12 }
0x1063   : > { %28696 = vmatprep.subr.mxu1 %v31353_v13  ;;  %v8789_v42 = vand.u32 4294901760, %v8788_v8 }
0x1064   : > { %28697 = vmatpush3.msra.mxu1 %v31436_v14 }
0x1065   : > { %28698 = vmatprep.subr.mxu1 %v31353_v13  ;;  %28662 = vmatmul.mubr.f32.vlgmr.msra.gmra.mxu0 %v8789_v42 }
0x1066   : > { %28678 = vmatpush3.msra.mxu0 %v31445_v16  ;;  %28699 = vmatpush3.msra.mxu1 %v31440_v15 }
0x1067   : > { %28679 = vmatprep.subr.mxu0 %v31353_v13  ;;  %28701 = vmatmul.mubr.f32.vlgmr.msra.gmra.mxu1 %v8787_v39 }
0x1068   : > { %28716 = vmatprep.subr.mxu1 %v31353_v13  ;;  %28680 = vmatpush3.msra.mxu0 %v31451_v17 }
0x1069   : > { %28717 = vmatpush3.msra.mxu1 %v31426_v10  ;;  %28681 = vmatprep.subr.mxu0 %v31353_v13 }
0x106a   : > { %28718 = vmatprep.subr.mxu1 %v31353_v13  ;;  %28682 = vmatpush3.msra.mxu0 %v31458_v19 }
0x106b   : > { %28719 = vmatpush3.msra.mxu1 %v31429_v11  ;;  %28683 = vmatprep.subr.mxu0 %v31353_v13 }
0x106c   : > { %28720 = vmatprep.subr.mxu1 %v31353_v13  ;;  %28684 = vmatpush3.msra.mxu0 %v31462_v20 }
0x106d   : > { %28721 = vmatpush3.msra.mxu1 %v31432_v12  ;;  %28685 = vmatprep.subr.mxu0 %v31353_v13 }
0x106e   : > { %28722 = vmatprep.subr.mxu1 %v31353_v13  ;;  %28686 = vmatpush3.msra.mxu0 %v31466_v21 }
0x106f   : > { %28687 = vmatprep.mubr.msk.f32.mxu0 %vm31354_vm0, %v31353_v13  ;;  %28723 = vmatpush3.msra.mxu1 %v31436_v14 }
0x1070   : > { %28688 = vmatmul.mubr.f32.vlgmr.msra.gmra.mxu0 %v8786_v36  ;;  %28703 = vmatprep.subr.mxu0 %v31353_v13 }
0x1071   : > { %28724 = vmatprep.subr.mxu1 %v31353_v13  ;;  %28704 = vmatpush3.msra.mxu0 %v31472_v22 }
0x1072   : > { %28725 = vmatpush3.msra.mxu1 %v31440_v15  ;;  %28726 = vmatprep.mubr.msk.f32.mxu1 %vm31354_vm0, %v31353_v13 }
0x1073   : > { %28705 = vmatprep.subr.mxu0 %v31353_v13  ;;  %28727 = vmatmul.mubr.f32.vlgmr.msra.gmra.mxu1 %v8785_v35 }
0x1074   : > { %28706 = vmatpush3.msra.mxu0 %v31475_v23  ;;  %28713 = vmatprep.mubr.msk.f32.mxu0 %vm31354_vm0, %v31353_v13 }
0x1075   : > { %28707 = vmatprep.subr.mxu0 %v31353_v13  ;;  %28742 = vmatprep.subr.mxu1 %v31353_v13 }
0x1076   : > { %28708 = vmatpush3.msra.mxu0 %v31481_v25  ;;  %28743 = vmatpush3.msra.mxu1 %v31499_v32 }
0x1077   : > { %28709 = vmatprep.subr.mxu0 %v31353_v13  ;;  %28744 = vmatprep.subr.mxu1 %v31353_v13 }
0x1078   : > { %28710 = vmatpush3.msra.mxu0 %v31484_v26  ;;  %28745 = vmatpush3.msra.mxu1 %v31501_v33 }
0x1079   : > { %28711 = vmatprep.subr.mxu0 %v31353_v13  ;;  %28746 = vmatprep.subr.mxu1 %v31353_v13 }
0x107a   : > { %28712 = vmatpush3.msra.mxu0 %v31493_v30  ;;  %28747 = vmatpush3.msra.mxu1 %v31508_v37 }
0x107b   : > { %28714 = vmatmul.mubr.f32.vlgmr.msra.gmra.mxu0 %v8785_v35  ;;  %28748 = vmatprep.subr.mxu1 %v31353_v13 }
0x107c   : > { %28749 = vmatpush3.msra.mxu1 %v31515_v40  ;;  %28729 = vmatprep.subr.mxu0 %v31353_v13 }
0x107d   : > { %28750 = vmatprep.subr.mxu1 %v31353_v13  ;;  %28730 = vmatpush3.msra.mxu0 %v31426_v10 }
0x107e   : > { %28751 = vmatpush3.msra.mxu1 %v31519_v41  ;;  %28731 = vmatprep.subr.mxu0 %v31353_v13 }
0x107f   : > { %28752 = vmatprep.mubr.msk.f32.mxu1 %vm31354_vm0, %v31353_v13  ;;  %28768 = vmatprep.subr.mxu1 %v31353_v13 }
0x1080   : > { %28732 = vmatpush3.msra.mxu0 %v31429_v11  ;;  %28739 = vmatprep.mubr.msk.f32.mxu0 %vm31354_vm0, %v31353_v13 }
0x1081   : > { %28733 = vmatprep.subr.mxu0 %v31353_v13 }
0x1082   : > { %28734 = vmatpush3.msra.mxu0 %v31432_v12 }
0x1083   : > { %28735 = vmatprep.subr.mxu0 %v31353_v13 }
0x1084   : > { %28736 = vmatpush3.msra.mxu0 %v31436_v14 }
0x1085   : > { %28737 = vmatprep.subr.mxu0 %v31353_v13 }
0x1086   : > { %28738 = vmatpush3.msra.mxu0 %v31440_v15 }
0x1087   : > { %28755 = vmatprep.subr.mxu0 %v31353_v13 }
0x111d   : > { %v8887_v43 = vpop.f32.mrf.mxu1 }
0x111f   : > { %v28676_v45 = vpop.f32.mrf.mxu1 }
0x1125   : > { %v8791_v38 = vpop.f32.mrf.mxu0 }
0x1126   : > { %v8888_v53 = vadd.f32 %v8887_v43, %v8791_v38 }
0x1127   : > { %v9047_v46 = vpop.f32.mrf.mxu1  ;;  %v28663_v47 = vpop.f32.mrf.mxu0 }
0x1129   : > { %v28702_v49 = vpop.f32.mrf.mxu1 }
0x1130   : > { %v8969_v44 = vpop.f32.mrf.mxu0 }
0x1131   : > { %v8970_v54 = vadd.f32 %v8969_v44, %v8888_v53 }
0x1132   : > { %v28689_v50 = vpop.f32.mrf.mxu0 }
0x1133   : > { %v9209_v51 = vpop.f32.mrf.mxu1  ;;  %v9048_v55 = vadd.f32 %v9047_v46, %v8970_v54 }
0x1135   : > { %v28728_v48 = vpop.f32.mrf.mxu1 }
0x113b   : > { %v9133_v57 = vpop.f32.mrf.mxu0 }
0x113c   : > { %v9134_v52 = vadd.f32 %v9133_v57, %v9048_v55 }
0x113d   : > { %v28715_v58 = vpop.f32.mrf.mxu0 }
0x113e   : > { %v9210_v59 = vadd.f32 %v9209_v51, %v9134_v52 }
0x1140   : > { %v9213_v61 = vsub.f32 %v9210_v59, %v31388_v0 }
0x1142   : > { %v9214_v56 = vadd.f32 %v9213_v61, %v32902_v18 }
0x1144   : > { %v9215_v62 = vmax.f32 %v31403_v6, %v9214_v56 }
0x1146   : > { %v9216_v63 = vmin.f32 %v31408_v7, %v9215_v62 }
0x1148   : > { %v9217_v24 = vsub.f32 %v9213_v61, %v9216_v63 }
0x114a   : > { %v32983_v60 = vadd.f32 %v9217_v24, %v32902_v18 }
0x114c   : > { %v9219_v27 = vsub.f32 %v9216_v63, %v32983_v60 }
0x114e   : > { %v9221_v28 = vsel %vm75_vm1, %v9219_v27, 0 }
0x114f   : > { %v9293_v29 = vand.u32 4294901760, %v9221_v28 }
0x1151   : > { %v9294_v31 = vsub.f32 %v9221_v28, %v9293_v29  ;;  %28753 = vmatmul.mubr.f32.vlgmr.msra.gmra.mxu1 %v9293_v29 }
0x1152   : > { %28769 = vmatpush3.msra.mxu1 %v31426_v10  ;;  %28778 = vmatprep.mubr.msk.f32.mxu1 %vm31354_vm0, %v31353_v13 }
0x1153   : > { %28770 = vmatprep.subr.mxu1 %v31353_v13  ;;  %v9295_v34 = vand.u32 4294901760, %v9294_v31 }
0x1154   : > { %28771 = vmatpush3.msra.mxu1 %v31429_v11 }
0x1155   : > { %28772 = vmatprep.subr.mxu1 %v31353_v13  ;;  %v9296_v18 = vsub.f32 %v9294_v31, %v9295_v34 }
0x1156   : > { %28773 = vmatpush3.msra.mxu1 %v31432_v12 }
0x1157   : > { %28774 = vmatprep.subr.mxu1 %v31353_v13  ;;  %v9297_v35 = vand.u32 4294901760, %v9296_v18 }
0x1158   : > { %28775 = vmatpush3.msra.mxu1 %v31436_v14 }
0x1159   : > { %28776 = vmatprep.subr.mxu1 %v31353_v13  ;;  %28740 = vmatmul.mubr.f32.vlgmr.msra.gmra.mxu0 %v9297_v35 }
0x115a   : > { %28756 = vmatpush3.msra.mxu0 %v31445_v16  ;;  %28777 = vmatpush3.msra.mxu1 %v31440_v15 }
0x115b   : > { %28757 = vmatprep.subr.mxu0 %v31353_v13  ;;  %28779 = vmatmul.mubr.f32.vlgmr.msra.gmra.mxu1 %v9295_v34 }
0x115c   : > { %28794 = vmatprep.subr.mxu1 %v31353_v13  ;;  %28758 = vmatpush3.msra.mxu0 %v31451_v17 }
0x115d   : > { %28795 = vmatpush3.msra.mxu1 %v31426_v10  ;;  %28759 = vmatprep.subr.mxu0 %v31353_v13 }
0x115e   : > { %28796 = vmatprep.subr.mxu1 %v31353_v13  ;;  %28760 = vmatpush3.msra.mxu0 %v31458_v19 }
0x115f   : > { %28797 = vmatpush3.msra.mxu1 %v31429_v11  ;;  %28761 = vmatprep.subr.mxu0 %v31353_v13 }
0x1160   : > { %28798 = vmatprep.subr.mxu1 %v31353_v13  ;;  %28762 = vmatpush3.msra.mxu0 %v31462_v20 }
0x1161   : > { %28799 = vmatpush3.msra.mxu1 %v31432_v12  ;;  %28763 = vmatprep.subr.mxu0 %v31353_v13 }
0x1162   : > { %28800 = vmatprep.subr.mxu1 %v31353_v13  ;;  %28764 = vmatpush3.msra.mxu0 %v31466_v21 }
0x1163   : > { %28765 = vmatprep.mubr.msk.f32.mxu0 %vm31354_vm0, %v31353_v13  ;;  %28801 = vmatpush3.msra.mxu1 %v31436_v14 }
0x1164   : > { %28766 = vmatmul.mubr.f32.vlgmr.msra.gmra.mxu0 %v9294_v31  ;;  %28781 = vmatprep.subr.mxu0 %v31353_v13 }
0x1165   : > { %28802 = vmatprep.subr.mxu1 %v31353_v13  ;;  %28782 = vmatpush3.msra.mxu0 %v31472_v22 }
0x1166   : > { %28803 = vmatpush3.msra.mxu1 %v31440_v15  ;;  %28804 = vmatprep.mubr.msk.f32.mxu1 %vm31354_vm0, %v31353_v13 }
0x1167   : > { %28783 = vmatprep.subr.mxu0 %v31353_v13  ;;  %28805 = vmatmul.mubr.f32.vlgmr.msra.gmra.mxu1 %v9293_v29 }
0x1168   : > { %28784 = vmatpush3.msra.mxu0 %v31475_v23  ;;  %28791 = vmatprep.mubr.msk.f32.mxu0 %vm31354_vm0, %v31353_v13 }
0x1169   : > { %28785 = vmatprep.subr.mxu0 %v31353_v13  ;;  %28820 = vmatprep.subr.mxu1 %v31353_v13 }
0x116a   : > { %28786 = vmatpush3.msra.mxu0 %v31481_v25  ;;  %28821 = vmatpush3.msra.mxu1 %v31499_v32 }
0x116b   : > { %28787 = vmatprep.subr.mxu0 %v31353_v13  ;;  %28822 = vmatprep.subr.mxu1 %v31353_v13 }
0x116c   : > { %28788 = vmatpush3.msra.mxu0 %v31484_v26  ;;  %28823 = vmatpush3.msra.mxu1 %v31501_v33 }
0x116d   : > { %28789 = vmatprep.subr.mxu0 %v31353_v13  ;;  %28824 = vmatprep.subr.mxu1 %v31353_v13 }
0x116e   : > { %28790 = vmatpush3.msra.mxu0 %v31493_v30  ;;  %28825 = vmatpush3.msra.mxu1 %v31508_v37 }
0x116f   : > { %28792 = vmatmul.mubr.f32.vlgmr.msra.gmra.mxu0 %v9293_v29  ;;  %28826 = vmatprep.subr.mxu1 %v31353_v13 }
0x1170   : > { %28827 = vmatpush3.msra.mxu1 %v31515_v40  ;;  %28807 = vmatprep.subr.mxu0 %v31353_v13 }
0x1171   : > { %28828 = vmatprep.subr.mxu1 %v31353_v13  ;;  %28808 = vmatpush3.msra.mxu0 %v31426_v10 }
0x1172   : > { %28829 = vmatpush3.msra.mxu1 %v31519_v41  ;;  %28809 = vmatprep.subr.mxu0 %v31353_v13 }
0x1173   : > { %28830 = vmatprep.mubr.msk.f32.mxu1 %vm31354_vm0, %v31353_v13  ;;  %28846 = vmatprep.subr.mxu1 %v31353_v13 }
0x1174   : > { %28810 = vmatpush3.msra.mxu0 %v31429_v11  ;;  %28817 = vmatprep.mubr.msk.f32.mxu0 %vm31354_vm0, %v31353_v13 }
0x1175   : > { %28811 = vmatprep.subr.mxu0 %v31353_v13 }
0x1176   : > { %28812 = vmatpush3.msra.mxu0 %v31432_v12 }
0x1177   : > { %28813 = vmatprep.subr.mxu0 %v31353_v13 }
0x1178   : > { %28814 = vmatpush3.msra.mxu0 %v31436_v14 }
0x1179   : > { %28815 = vmatprep.subr.mxu0 %v31353_v13 }
0x117a   : > { %28816 = vmatpush3.msra.mxu0 %v31440_v15 }
0x117b   : > { %28833 = vmatprep.subr.mxu0 %v31353_v13 }
0x1211   : > { %v9395_v36 = vpop.f32.mrf.mxu1 }
0x1213   : > { %v28754_v39 = vpop.f32.mrf.mxu1 }
0x1219   : > { %v9299_v8 = vpop.f32.mrf.mxu0 }
0x121a   : > { %v9396_v49 = vadd.f32 %v9395_v36, %v9299_v8 }
0x121b   : > { %v9555_v42 = vpop.f32.mrf.mxu1  ;;  %v28741_v43 = vpop.f32.mrf.mxu0 }
0x121d   : > { %v28780_v45 = vpop.f32.mrf.mxu1 }
0x1224   : > { %v9477_v38 = vpop.f32.mrf.mxu0 }
0x1225   : > { %v9478_v50 = vadd.f32 %v9477_v38, %v9396_v49 }
0x1226   : > { %v28767_v46 = vpop.f32.mrf.mxu0 }
0x1227   : > { %v9717_v47 = vpop.f32.mrf.mxu1  ;;  %v9556_v51 = vadd.f32 %v9555_v42, %v9478_v50 }
0x1229   : > { %v28806_v44 = vpop.f32.mrf.mxu1 }
0x122f   : > { %v9641_v53 = vpop.f32.mrf.mxu0 }
0x1230   : > { %v9642_v48 = vadd.f32 %v9641_v53, %v9556_v51 }
0x1231   : > { %v28793_v54 = vpop.f32.mrf.mxu0 }
0x1232   : > { %v9718_v55 = vadd.f32 %v9717_v47, %v9642_v48 }
0x1234   : > { %v9721_v57 = vsub.f32 %v9718_v55, %v31388_v0 }
0x1236   : > { %v9722_v52 = vadd.f32 %v9721_v57, %v32983_v60 }
0x1238   : > { %v9723_v58 = vmax.f32 %v31403_v6, %v9722_v52 }
0x123a   : > { %v9724_v59 = vmin.f32 %v31408_v7, %v9723_v58 }
0x123c   : > { %v9725_v61 = vsub.f32 %v9721_v57, %v9724_v59 }
0x123e   : > { %v33064_v56 = vadd.f32 %v9725_v61, %v32983_v60 }
0x1240   : > { %v9727_v62 = vsub.f32 %v9724_v59, %v33064_v56 }
0x1242   : > { %v9729_v63 = vsel %vm75_vm1, %v9727_v62, 0 }
0x1243   : > { %v9801_v24 = vand.u32 4294901760, %v9729_v63 }
0x1245   : > { %v9802_v27 = vsub.f32 %v9729_v63, %v9801_v24  ;;  %28831 = vmatmul.mubr.f32.vlgmr.msra.gmra.mxu1 %v9801_v24 }
0x1246   : > { %28847 = vmatpush3.msra.mxu1 %v31426_v10  ;;  %28856 = vmatprep.mubr.msk.f32.mxu1 %vm31354_vm0, %v31353_v13 }
0x1247   : > { %28848 = vmatprep.subr.mxu1 %v31353_v13  ;;  %v9803_v28 = vand.u32 4294901760, %v9802_v27 }
0x1248   : > { %28849 = vmatpush3.msra.mxu1 %v31429_v11 }
0x1249   : > { %28850 = vmatprep.subr.mxu1 %v31353_v13  ;;  %v9804_v60 = vsub.f32 %v9802_v27, %v9803_v28 }
0x124a   : > { %28851 = vmatpush3.msra.mxu1 %v31432_v12 }
0x124b   : > { %28852 = vmatprep.subr.mxu1 %v31353_v13  ;;  %v9805_v29 = vand.u32 4294901760, %v9804_v60 }
0x124c   : > { %28853 = vmatpush3.msra.mxu1 %v31436_v14 }
0x124d   : > { %28854 = vmatprep.subr.mxu1 %v31353_v13  ;;  %28818 = vmatmul.mubr.f32.vlgmr.msra.gmra.mxu0 %v9805_v29 }
0x124e   : > { %28834 = vmatpush3.msra.mxu0 %v31445_v16  ;;  %28855 = vmatpush3.msra.mxu1 %v31440_v15 }
0x124f   : > { %28835 = vmatprep.subr.mxu0 %v31353_v13  ;;  %28857 = vmatmul.mubr.f32.vlgmr.msra.gmra.mxu1 %v9803_v28 }
0x1250   : > { %28872 = vmatprep.subr.mxu1 %v31353_v13  ;;  %28836 = vmatpush3.msra.mxu0 %v31451_v17 }
0x1251   : > { %28873 = vmatpush3.msra.mxu1 %v31426_v10  ;;  %28837 = vmatprep.subr.mxu0 %v31353_v13 }
0x1252   : > { %28874 = vmatprep.subr.mxu1 %v31353_v13  ;;  %28838 = vmatpush3.msra.mxu0 %v31458_v19 }
0x1253   : > { %28875 = vmatpush3.msra.mxu1 %v31429_v11  ;;  %28839 = vmatprep.subr.mxu0 %v31353_v13 }
0x1254   : > { %28876 = vmatprep.subr.mxu1 %v31353_v13  ;;  %28840 = vmatpush3.msra.mxu0 %v31462_v20 }
0x1255   : > { %28877 = vmatpush3.msra.mxu1 %v31432_v12  ;;  %28841 = vmatprep.subr.mxu0 %v31353_v13 }
0x1256   : > { %28878 = vmatprep.subr.mxu1 %v31353_v13  ;;  %28842 = vmatpush3.msra.mxu0 %v31466_v21 }
0x1257   : > { %28843 = vmatprep.mubr.msk.f32.mxu0 %vm31354_vm0, %v31353_v13  ;;  %28879 = vmatpush3.msra.mxu1 %v31436_v14 }
0x1258   : > { %28844 = vmatmul.mubr.f32.vlgmr.msra.gmra.mxu0 %v9802_v27  ;;  %28859 = vmatprep.subr.mxu0 %v31353_v13 }
0x1259   : > { %28880 = vmatprep.subr.mxu1 %v31353_v13  ;;  %28860 = vmatpush3.msra.mxu0 %v31472_v22 }
0x125a   : > { %28881 = vmatpush3.msra.mxu1 %v31440_v15  ;;  %28882 = vmatprep.mubr.msk.f32.mxu1 %vm31354_vm0, %v31353_v13 }
0x125b   : > { %28861 = vmatprep.subr.mxu0 %v31353_v13  ;;  %28883 = vmatmul.mubr.f32.vlgmr.msra.gmra.mxu1 %v9801_v24 }
0x125c   : > { %28862 = vmatpush3.msra.mxu0 %v31475_v23  ;;  %28869 = vmatprep.mubr.msk.f32.mxu0 %vm31354_vm0, %v31353_v13 }
0x125d   : > { %28863 = vmatprep.subr.mxu0 %v31353_v13  ;;  %28898 = vmatprep.subr.mxu1 %v31353_v13 }
0x125e   : > { %28864 = vmatpush3.msra.mxu0 %v31481_v25  ;;  %28899 = vmatpush3.msra.mxu1 %v31499_v32 }
0x125f   : > { %28865 = vmatprep.subr.mxu0 %v31353_v13  ;;  %28900 = vmatprep.subr.mxu1 %v31353_v13 }
0x1260   : > { %28866 = vmatpush3.msra.mxu0 %v31484_v26  ;;  %28901 = vmatpush3.msra.mxu1 %v31501_v33 }
0x1261   : > { %28867 = vmatprep.subr.mxu0 %v31353_v13  ;;  %28902 = vmatprep.subr.mxu1 %v31353_v13 }
0x1262   : > { %28868 = vmatpush3.msra.mxu0 %v31493_v30  ;;  %28903 = vmatpush3.msra.mxu1 %v31508_v37 }
0x1263   : > { %28870 = vmatmul.mubr.f32.vlgmr.msra.gmra.mxu0 %v9801_v24  ;;  %28904 = vmatprep.subr.mxu1 %v31353_v13 }
0x1264   : > { %28905 = vmatpush3.msra.mxu1 %v31515_v40  ;;  %28885 = vmatprep.subr.mxu0 %v31353_v13 }
0x1265   : > { %28906 = vmatprep.subr.mxu1 %v31353_v13  ;;  %28886 = vmatpush3.msra.mxu0 %v31426_v10 }
0x1266   : > { %28907 = vmatpush3.msra.mxu1 %v31519_v41  ;;  %28887 = vmatprep.subr.mxu0 %v31353_v13 }
0x1267   : > { %28908 = vmatprep.mubr.msk.f32.mxu1 %vm31354_vm0, %v31353_v13  ;;  %28924 = vmatprep.subr.mxu1 %v31353_v13 }
0x1268   : > { %28888 = vmatpush3.msra.mxu0 %v31429_v11  ;;  %28895 = vmatprep.mubr.msk.f32.mxu0 %vm31354_vm0, %v31353_v13 }
0x1269   : > { %28889 = vmatprep.subr.mxu0 %v31353_v13 }
0x126a   : > { %28890 = vmatpush3.msra.mxu0 %v31432_v12 }
0x126b   : > { %28891 = vmatprep.subr.mxu0 %v31353_v13 }
0x126c   : > { %28892 = vmatpush3.msra.mxu0 %v31436_v14 }
0x126d   : > { %28893 = vmatprep.subr.mxu0 %v31353_v13 }
0x126e   : > { %28894 = vmatpush3.msra.mxu0 %v31440_v15 }
0x126f   : > { %28911 = vmatprep.subr.mxu0 %v31353_v13 }
0x1305   : > { %v9903_v31 = vpop.f32.mrf.mxu1 }
0x1307   : > { %v28832_v34 = vpop.f32.mrf.mxu1 }
0x130d   : > { %v9807_v18 = vpop.f32.mrf.mxu0 }
0x130e   : > { %v9904_v45 = vadd.f32 %v9903_v31, %v9807_v18 }
0x130f   : > { %v10063_v35 = vpop.f32.mrf.mxu1  ;;  %v28819_v36 = vpop.f32.mrf.mxu0 }
0x1311   : > { %v28858_v39 = vpop.f32.mrf.mxu1 }
0x1318   : > { %v9985_v8 = vpop.f32.mrf.mxu0 }
0x1319   : > { %v9986_v46 = vadd.f32 %v9985_v8, %v9904_v45 }
0x131a   : > { %v28845_v42 = vpop.f32.mrf.mxu0 }
0x131b   : > { %v10225_v43 = vpop.f32.mrf.mxu1  ;;  %v10064_v47 = vadd.f32 %v10063_v35, %v9986_v46 }
0x131d   : > { %v28884_v38 = vpop.f32.mrf.mxu1 }
0x1323   : > { %v10149_v49 = vpop.f32.mrf.mxu0 }
0x1324   : > { %v10150_v44 = vadd.f32 %v10149_v49, %v10064_v47 }
0x1325   : > { %v28871_v50 = vpop.f32.mrf.mxu0 }
0x1326   : > { %v10226_v51 = vadd.f32 %v10225_v43, %v10150_v44 }
0x1328   : > { %v10229_v53 = vsub.f32 %v10226_v51, %v31388_v0 }
0x132a   : > { %v10230_v48 = vadd.f32 %v10229_v53, %v33064_v56 }
0x132c   : > { %v10231_v54 = vmax.f32 %v31403_v6, %v10230_v48 }
0x132e   : > { %v10232_v55 = vmin.f32 %v31408_v7, %v10231_v54 }
0x1330   : > { %v10233_v57 = vsub.f32 %v10229_v53, %v10232_v55 }
0x1332   : > { %v33145_v52 = vadd.f32 %v10233_v57, %v33064_v56 }
0x1334   : > { %v10235_v58 = vsub.f32 %v10232_v55, %v33145_v52 }
0x1336   : > { %v10237_v59 = vsel %vm75_vm1, %v10235_v58, 0 }
0x1337   : > { %v10309_v61 = vand.u32 4294901760, %v10237_v59 }
0x1339   : > { %v10310_v62 = vsub.f32 %v10237_v59, %v10309_v61  ;;  %28909 = vmatmul.mubr.f32.vlgmr.msra.gmra.mxu1 %v10309_v61 }
0x133a   : > { %28925 = vmatpush3.msra.mxu1 %v31426_v10  ;;  %28934 = vmatprep.mubr.msk.f32.mxu1 %vm31354_vm0, %v31353_v13 }
0x133b   : > { %28926 = vmatprep.subr.mxu1 %v31353_v13  ;;  %v10311_v63 = vand.u32 4294901760, %v10310_v62 }
0x133c   : > { %28927 = vmatpush3.msra.mxu1 %v31429_v11 }
0x133d   : > { %28928 = vmatprep.subr.mxu1 %v31353_v13  ;;  %v10312_v56 = vsub.f32 %v10310_v62, %v10311_v63 }
0x133e   : > { %28929 = vmatpush3.msra.mxu1 %v31432_v12 }
0x133f   : > { %28930 = vmatprep.subr.mxu1 %v31353_v13  ;;  %v10313_v24 = vand.u32 4294901760, %v10312_v56 }
0x1340   : > { %28931 = vmatpush3.msra.mxu1 %v31436_v14 }
0x1341   : > { %28932 = vmatprep.subr.mxu1 %v31353_v13  ;;  %28896 = vmatmul.mubr.f32.vlgmr.msra.gmra.mxu0 %v10313_v24 }
0x1342   : > { %28912 = vmatpush3.msra.mxu0 %v31445_v16  ;;  %28933 = vmatpush3.msra.mxu1 %v31440_v15 }
0x1343   : > { %28913 = vmatprep.subr.mxu0 %v31353_v13  ;;  %28935 = vmatmul.mubr.f32.vlgmr.msra.gmra.mxu1 %v10311_v63 }
0x1344   : > { %28950 = vmatprep.subr.mxu1 %v31353_v13  ;;  %28914 = vmatpush3.msra.mxu0 %v31451_v17 }
0x1345   : > { %28951 = vmatpush3.msra.mxu1 %v31426_v10  ;;  %28915 = vmatprep.subr.mxu0 %v31353_v13 }
0x1346   : > { %28952 = vmatprep.subr.mxu1 %v31353_v13  ;;  %28916 = vmatpush3.msra.mxu0 %v31458_v19 }
0x1347   : > { %28953 = vmatpush3.msra.mxu1 %v31429_v11  ;;  %28917 = vmatprep.subr.mxu0 %v31353_v13 }
0x1348   : > { %28954 = vmatprep.subr.mxu1 %v31353_v13  ;;  %28918 = vmatpush3.msra.mxu0 %v31462_v20 }
0x1349   : > { %28955 = vmatpush3.msra.mxu1 %v31432_v12  ;;  %28919 = vmatprep.subr.mxu0 %v31353_v13 }
0x134a   : > { %28956 = vmatprep.subr.mxu1 %v31353_v13  ;;  %28920 = vmatpush3.msra.mxu0 %v31466_v21 }
0x134b   : > { %28921 = vmatprep.mubr.msk.f32.mxu0 %vm31354_vm0, %v31353_v13  ;;  %28957 = vmatpush3.msra.mxu1 %v31436_v14 }
0x134c   : > { %28922 = vmatmul.mubr.f32.vlgmr.msra.gmra.mxu0 %v10310_v62  ;;  %28937 = vmatprep.subr.mxu0 %v31353_v13 }
0x134d   : > { %28958 = vmatprep.subr.mxu1 %v31353_v13  ;;  %28938 = vmatpush3.msra.mxu0 %v31472_v22 }
0x134e   : > { %28959 = vmatpush3.msra.mxu1 %v31440_v15  ;;  %28960 = vmatprep.mubr.msk.f32.mxu1 %vm31354_vm0, %v31353_v13 }
0x134f   : > { %28939 = vmatprep.subr.mxu0 %v31353_v13  ;;  %28961 = vmatmul.mubr.f32.vlgmr.msra.gmra.mxu1 %v10309_v61 }
0x1350   : > { %28940 = vmatpush3.msra.mxu0 %v31475_v23  ;;  %28947 = vmatprep.mubr.msk.f32.mxu0 %vm31354_vm0, %v31353_v13 }
0x1351   : > { %28941 = vmatprep.subr.mxu0 %v31353_v13  ;;  %28976 = vmatprep.subr.mxu1 %v31353_v13 }
0x1352   : > { %28942 = vmatpush3.msra.mxu0 %v31481_v25  ;;  %28977 = vmatpush3.msra.mxu1 %v31499_v32 }
0x1353   : > { %28943 = vmatprep.subr.mxu0 %v31353_v13  ;;  %28978 = vmatprep.subr.mxu1 %v31353_v13 }
0x1354   : > { %28944 = vmatpush3.msra.mxu0 %v31484_v26  ;;  %28979 = vmatpush3.msra.mxu1 %v31501_v33 }
0x1355   : > { %28945 = vmatprep.subr.mxu0 %v31353_v13  ;;  %28980 = vmatprep.subr.mxu1 %v31353_v13 }
0x1356   : > { %28946 = vmatpush3.msra.mxu0 %v31493_v30  ;;  %28981 = vmatpush3.msra.mxu1 %v31508_v37 }
0x1357   : > { %28948 = vmatmul.mubr.f32.vlgmr.msra.gmra.mxu0 %v10309_v61  ;;  %28982 = vmatprep.subr.mxu1 %v31353_v13 }
0x1358   : > { %28983 = vmatpush3.msra.mxu1 %v31515_v40  ;;  %28963 = vmatprep.subr.mxu0 %v31353_v13 }
0x1359   : > { %28984 = vmatprep.subr.mxu1 %v31353_v13  ;;  %28964 = vmatpush3.msra.mxu0 %v31426_v10 }
0x135a   : > { %28985 = vmatpush3.msra.mxu1 %v31519_v41  ;;  %28965 = vmatprep.subr.mxu0 %v31353_v13 }
0x135b   : > { %28986 = vmatprep.mubr.msk.f32.mxu1 %vm31354_vm0, %v31353_v13  ;;  %29002 = vmatprep.subr.mxu1 %v31353_v13 }
0x135c   : > { %28966 = vmatpush3.msra.mxu0 %v31429_v11  ;;  %28973 = vmatprep.mubr.msk.f32.mxu0 %vm31354_vm0, %v31353_v13 }
0x135d   : > { %28967 = vmatprep.subr.mxu0 %v31353_v13 }
0x135e   : > { %28968 = vmatpush3.msra.mxu0 %v31432_v12 }
0x135f   : > { %28969 = vmatprep.subr.mxu0 %v31353_v13 }
0x1360   : > { %28970 = vmatpush3.msra.mxu0 %v31436_v14 }
0x1361   : > { %28971 = vmatprep.subr.mxu0 %v31353_v13 }
0x1362   : > { %28972 = vmatpush3.msra.mxu0 %v31440_v15 }
0x1363   : > { %28989 = vmatprep.subr.mxu0 %v31353_v13 }
0x13f9   : > { %v10411_v27 = vpop.f32.mrf.mxu1 }
0x13fb   : > { %v28910_v28 = vpop.f32.mrf.mxu1 }
0x1401   : > { %v10315_v60 = vpop.f32.mrf.mxu0 }
0x1402   : > { %v10412_v39 = vadd.f32 %v10411_v27, %v10315_v60 }
0x1403   : > { %v10571_v29 = vpop.f32.mrf.mxu1  ;;  %v28897_v31 = vpop.f32.mrf.mxu0 }
0x1405   : > { %v28936_v34 = vpop.f32.mrf.mxu1 }
0x140c   : > { %v10493_v18 = vpop.f32.mrf.mxu0 }
0x140d   : > { %v10494_v42 = vadd.f32 %v10493_v18, %v10412_v39 }
0x140e   : > { %v28923_v35 = vpop.f32.mrf.mxu0 }
0x140f   : > { %v10733_v36 = vpop.f32.mrf.mxu1  ;;  %v10572_v43 = vadd.f32 %v10571_v29, %v10494_v42 }
0x1411   : > { %v28962_v8 = vpop.f32.mrf.mxu1 }
0x1417   : > { %v10657_v45 = vpop.f32.mrf.mxu0 }
0x1418   : > { %v10658_v38 = vadd.f32 %v10657_v45, %v10572_v43 }
0x1419   : > { %v28949_v46 = vpop.f32.mrf.mxu0 }
0x141a   : > { %v10734_v47 = vadd.f32 %v10733_v36, %v10658_v38 }
0x141c   : > { %v10737_v49 = vsub.f32 %v10734_v47, %v31388_v0 }
0x141e   : > { %v10738_v44 = vadd.f32 %v10737_v49, %v33145_v52 }
0x1420   : > { %v10739_v50 = vmax.f32 %v31403_v6, %v10738_v44 }
0x1422   : > { %v10740_v51 = vmin.f32 %v31408_v7, %v10739_v50 }
0x1424   : > { %v10741_v53 = vsub.f32 %v10737_v49, %v10740_v51 }
0x1426   : > { %v33226_v48 = vadd.f32 %v10741_v53, %v33145_v52 }
0x1428   : > { %v10743_v54 = vsub.f32 %v10740_v51, %v33226_v48 }
0x142a   : > { %v10745_v55 = vsel %vm75_vm1, %v10743_v54, 0 }
0x142b   : > { %v10817_v57 = vand.u32 4294901760, %v10745_v55 }
0x142d   : > { %v10818_v58 = vsub.f32 %v10745_v55, %v10817_v57  ;;  %28987 = vmatmul.mubr.f32.vlgmr.msra.gmra.mxu1 %v10817_v57 }
0x142e   : > { %29003 = vmatpush3.msra.mxu1 %v31426_v10  ;;  %29012 = vmatprep.mubr.msk.f32.mxu1 %vm31354_vm0, %v31353_v13 }
0x142f   : > { %29004 = vmatprep.subr.mxu1 %v31353_v13  ;;  %v10819_v59 = vand.u32 4294901760, %v10818_v58 }
0x1430   : > { %29005 = vmatpush3.msra.mxu1 %v31429_v11 }
0x1431   : > { %29006 = vmatprep.subr.mxu1 %v31353_v13  ;;  %v10820_v52 = vsub.f32 %v10818_v58, %v10819_v59 }
0x1432   : > { %29007 = vmatpush3.msra.mxu1 %v31432_v12 }
0x1433   : > { %29008 = vmatprep.subr.mxu1 %v31353_v13  ;;  %v10821_v61 = vand.u32 4294901760, %v10820_v52 }
0x1434   : > { %29009 = vmatpush3.msra.mxu1 %v31436_v14 }
0x1435   : > { %29010 = vmatprep.subr.mxu1 %v31353_v13  ;;  %28974 = vmatmul.mubr.f32.vlgmr.msra.gmra.mxu0 %v10821_v61 }
0x1436   : > { %28990 = vmatpush3.msra.mxu0 %v31445_v16  ;;  %29011 = vmatpush3.msra.mxu1 %v31440_v15 }
0x1437   : > { %28991 = vmatprep.subr.mxu0 %v31353_v13  ;;  %29013 = vmatmul.mubr.f32.vlgmr.msra.gmra.mxu1 %v10819_v59 }
0x1438   : > { %29028 = vmatprep.subr.mxu1 %v31353_v13  ;;  %28992 = vmatpush3.msra.mxu0 %v31451_v17 }
0x1439   : > { %29029 = vmatpush3.msra.mxu1 %v31426_v10  ;;  %28993 = vmatprep.subr.mxu0 %v31353_v13 }
0x143a   : > { %29030 = vmatprep.subr.mxu1 %v31353_v13  ;;  %28994 = vmatpush3.msra.mxu0 %v31458_v19 }
0x143b   : > { %29031 = vmatpush3.msra.mxu1 %v31429_v11  ;;  %28995 = vmatprep.subr.mxu0 %v31353_v13 }
0x143c   : > { %29032 = vmatprep.subr.mxu1 %v31353_v13  ;;  %28996 = vmatpush3.msra.mxu0 %v31462_v20 }
0x143d   : > { %29033 = vmatpush3.msra.mxu1 %v31432_v12  ;;  %28997 = vmatprep.subr.mxu0 %v31353_v13 }
0x143e   : > { %29034 = vmatprep.subr.mxu1 %v31353_v13  ;;  %28998 = vmatpush3.msra.mxu0 %v31466_v21 }
0x143f   : > { %28999 = vmatprep.mubr.msk.f32.mxu0 %vm31354_vm0, %v31353_v13  ;;  %29035 = vmatpush3.msra.mxu1 %v31436_v14 }
0x1440   : > { %29000 = vmatmul.mubr.f32.vlgmr.msra.gmra.mxu0 %v10818_v58  ;;  %29015 = vmatprep.subr.mxu0 %v31353_v13 }
0x1441   : > { %29036 = vmatprep.subr.mxu1 %v31353_v13  ;;  %29016 = vmatpush3.msra.mxu0 %v31472_v22 }
0x1442   : > { %29037 = vmatpush3.msra.mxu1 %v31440_v15  ;;  %29038 = vmatprep.mubr.msk.f32.mxu1 %vm31354_vm0, %v31353_v13 }
0x1443   : > { %29017 = vmatprep.subr.mxu0 %v31353_v13  ;;  %29039 = vmatmul.mubr.f32.vlgmr.msra.gmra.mxu1 %v10817_v57 }
0x1444   : > { %29018 = vmatpush3.msra.mxu0 %v31475_v23  ;;  %29025 = vmatprep.mubr.msk.f32.mxu0 %vm31354_vm0, %v31353_v13 }
0x1445   : > { %29019 = vmatprep.subr.mxu0 %v31353_v13  ;;  %29054 = vmatprep.subr.mxu1 %v31353_v13 }
0x1446   : > { %29020 = vmatpush3.msra.mxu0 %v31481_v25  ;;  %29055 = vmatpush3.msra.mxu1 %v31499_v32 }
0x1447   : > { %29021 = vmatprep.subr.mxu0 %v31353_v13  ;;  %29056 = vmatprep.subr.mxu1 %v31353_v13 }
0x1448   : > { %29022 = vmatpush3.msra.mxu0 %v31484_v26  ;;  %29057 = vmatpush3.msra.mxu1 %v31501_v33 }
0x1449   : > { %29023 = vmatprep.subr.mxu0 %v31353_v13  ;;  %29058 = vmatprep.subr.mxu1 %v31353_v13 }
0x144a   : > { %29024 = vmatpush3.msra.mxu0 %v31493_v30  ;;  %29059 = vmatpush3.msra.mxu1 %v31508_v37 }
0x144b   : > { %29026 = vmatmul.mubr.f32.vlgmr.msra.gmra.mxu0 %v10817_v57  ;;  %29060 = vmatprep.subr.mxu1 %v31353_v13 }
0x144c   : > { %29061 = vmatpush3.msra.mxu1 %v31515_v40  ;;  %29041 = vmatprep.subr.mxu0 %v31353_v13 }
0x144d   : > { %29062 = vmatprep.subr.mxu1 %v31353_v13  ;;  %29042 = vmatpush3.msra.mxu0 %v31426_v10 }
0x144e   : > { %29063 = vmatpush3.msra.mxu1 %v31519_v41  ;;  %29043 = vmatprep.subr.mxu0 %v31353_v13 }
0x144f   : > { %29064 = vmatprep.mubr.msk.f32.mxu1 %vm31354_vm0, %v31353_v13  ;;  %29080 = vmatprep.subr.mxu1 %v31353_v13 }
0x1450   : > { %29044 = vmatpush3.msra.mxu0 %v31429_v11  ;;  %29051 = vmatprep.mubr.msk.f32.mxu0 %vm31354_vm0, %v31353_v13 }
0x1451   : > { %29045 = vmatprep.subr.mxu0 %v31353_v13 }
0x1452   : > { %29046 = vmatpush3.msra.mxu0 %v31432_v12 }
0x1453   : > { %29047 = vmatprep.subr.mxu0 %v31353_v13 }
0x1454   : > { %29048 = vmatpush3.msra.mxu0 %v31436_v14 }
0x1455   : > { %29049 = vmatprep.subr.mxu0 %v31353_v13 }
0x1456   : > { %29050 = vmatpush3.msra.mxu0 %v31440_v15 }
0x1457   : > { %29067 = vmatprep.subr.mxu0 %v31353_v13 }
0x14ed   : > { %v10919_v62 = vpop.f32.mrf.mxu1 }
0x14ef   : > { %v28988_v63 = vpop.f32.mrf.mxu1 }
0x14f5   : > { %v10823_v56 = vpop.f32.mrf.mxu0 }
0x14f6   : > { %v10920_v34 = vadd.f32 %v10919_v62, %v10823_v56 }
0x14f7   : > { %v11079_v24 = vpop.f32.mrf.mxu1  ;;  %v28975_v27 = vpop.f32.mrf.mxu0 }
0x14f9   : > { %v29014_v28 = vpop.f32.mrf.mxu1 }
0x1500   : > { %v11001_v60 = vpop.f32.mrf.mxu0 }
0x1501   : > { %v11002_v35 = vadd.f32 %v11001_v60, %v10920_v34 }
0x1502   : > { %v29001_v29 = vpop.f32.mrf.mxu0 }
0x1503   : > { %v11241_v31 = vpop.f32.mrf.mxu1  ;;  %v11080_v36 = vadd.f32 %v11079_v24, %v11002_v35 }
0x1505   : > { %v29040_v18 = vpop.f32.mrf.mxu1 }
0x150b   : > { %v11165_v39 = vpop.f32.mrf.mxu0 }
0x150c   : > { %v11166_v8 = vadd.f32 %v11165_v39, %v11080_v36 }
0x150d   : > { %v29027_v42 = vpop.f32.mrf.mxu0 }
0x150e   : > { %v11242_v43 = vadd.f32 %v11241_v31, %v11166_v8 }
0x1510   : > { %v11245_v45 = vsub.f32 %v11242_v43, %v31388_v0 }
0x1512   : > { %v11246_v38 = vadd.f32 %v11245_v45, %v33226_v48 }
0x1514   : > { %v11247_v46 = vmax.f32 %v31403_v6, %v11246_v38 }
0x1516   : > { %v11248_v47 = vmin.f32 %v31408_v7, %v11247_v46 }
0x1518   : > { %v11249_v49 = vsub.f32 %v11245_v45, %v11248_v47 }
0x151a   : > { %v33307_v44 = vadd.f32 %v11249_v49, %v33226_v48 }
0x151c   : > { %v11251_v50 = vsub.f32 %v11248_v47, %v33307_v44 }
0x151e   : > { %v11253_v51 = vsel %vm75_vm1, %v11251_v50, 0 }
0x151f   : > { %v11325_v53 = vand.u32 4294901760, %v11253_v51 }
0x1521   : > { %v11326_v54 = vsub.f32 %v11253_v51, %v11325_v53  ;;  %29065 = vmatmul.mubr.f32.vlgmr.msra.gmra.mxu1 %v11325_v53 }
0x1522   : > { %29081 = vmatpush3.msra.mxu1 %v31426_v10  ;;  %29090 = vmatprep.mubr.msk.f32.mxu1 %vm31354_vm0, %v31353_v13 }
0x1523   : > { %29082 = vmatprep.subr.mxu1 %v31353_v13  ;;  %v11327_v55 = vand.u32 4294901760, %v11326_v54 }
0x1524   : > { %29083 = vmatpush3.msra.mxu1 %v31429_v11 }
0x1525   : > { %29084 = vmatprep.subr.mxu1 %v31353_v13  ;;  %v11328_v48 = vsub.f32 %v11326_v54, %v11327_v55 }
0x1526   : > { %29085 = vmatpush3.msra.mxu1 %v31432_v12 }
0x1527   : > { %29086 = vmatprep.subr.mxu1 %v31353_v13  ;;  %v11329_v57 = vand.u32 4294901760, %v11328_v48 }
0x1528   : > { %29087 = vmatpush3.msra.mxu1 %v31436_v14 }
0x1529   : > { %29088 = vmatprep.subr.mxu1 %v31353_v13  ;;  %29052 = vmatmul.mubr.f32.vlgmr.msra.gmra.mxu0 %v11329_v57 }
0x152a   : > { %29068 = vmatpush3.msra.mxu0 %v31445_v16  ;;  %29089 = vmatpush3.msra.mxu1 %v31440_v15 }
0x152b   : > { %29069 = vmatprep.subr.mxu0 %v31353_v13  ;;  %29091 = vmatmul.mubr.f32.vlgmr.msra.gmra.mxu1 %v11327_v55 }
0x152c   : > { %29106 = vmatprep.subr.mxu1 %v31353_v13  ;;  %29070 = vmatpush3.msra.mxu0 %v31451_v17 }
0x152d   : > { %29107 = vmatpush3.msra.mxu1 %v31426_v10  ;;  %29071 = vmatprep.subr.mxu0 %v31353_v13 }
0x152e   : > { %29108 = vmatprep.subr.mxu1 %v31353_v13  ;;  %29072 = vmatpush3.msra.mxu0 %v31458_v19 }
0x152f   : > { %29109 = vmatpush3.msra.mxu1 %v31429_v11  ;;  %29073 = vmatprep.subr.mxu0 %v31353_v13 }
0x1530   : > { %29110 = vmatprep.subr.mxu1 %v31353_v13  ;;  %29074 = vmatpush3.msra.mxu0 %v31462_v20 }
0x1531   : > { %29111 = vmatpush3.msra.mxu1 %v31432_v12  ;;  %29075 = vmatprep.subr.mxu0 %v31353_v13 }
0x1532   : > { %29112 = vmatprep.subr.mxu1 %v31353_v13  ;;  %29076 = vmatpush3.msra.mxu0 %v31466_v21 }
0x1533   : > { %29077 = vmatprep.mubr.msk.f32.mxu0 %vm31354_vm0, %v31353_v13  ;;  %29113 = vmatpush3.msra.mxu1 %v31436_v14 }
0x1534   : > { %29078 = vmatmul.mubr.f32.vlgmr.msra.gmra.mxu0 %v11326_v54  ;;  %29093 = vmatprep.subr.mxu0 %v31353_v13 }
0x1535   : > { %29114 = vmatprep.subr.mxu1 %v31353_v13  ;;  %29094 = vmatpush3.msra.mxu0 %v31472_v22 }
0x1536   : > { %29115 = vmatpush3.msra.mxu1 %v31440_v15  ;;  %29116 = vmatprep.mubr.msk.f32.mxu1 %vm31354_vm0, %v31353_v13 }
0x1537   : > { %29095 = vmatprep.subr.mxu0 %v31353_v13  ;;  %29117 = vmatmul.mubr.f32.vlgmr.msra.gmra.mxu1 %v11325_v53 }
0x1538   : > { %29096 = vmatpush3.msra.mxu0 %v31475_v23  ;;  %29103 = vmatprep.mubr.msk.f32.mxu0 %vm31354_vm0, %v31353_v13 }
0x1539   : > { %29097 = vmatprep.subr.mxu0 %v31353_v13  ;;  %29132 = vmatprep.subr.mxu1 %v31353_v13 }
0x153a   : > { %29098 = vmatpush3.msra.mxu0 %v31481_v25  ;;  %29133 = vmatpush3.msra.mxu1 %v31499_v32 }
0x153b   : > { %29099 = vmatprep.subr.mxu0 %v31353_v13  ;;  %29134 = vmatprep.subr.mxu1 %v31353_v13 }
0x153c   : > { %29100 = vmatpush3.msra.mxu0 %v31484_v26  ;;  %29135 = vmatpush3.msra.mxu1 %v31501_v33 }
0x153d   : > { %29101 = vmatprep.subr.mxu0 %v31353_v13  ;;  %29136 = vmatprep.subr.mxu1 %v31353_v13 }
0x153e   : > { %29102 = vmatpush3.msra.mxu0 %v31493_v30  ;;  %29137 = vmatpush3.msra.mxu1 %v31508_v37 }
0x153f   : > { %29104 = vmatmul.mubr.f32.vlgmr.msra.gmra.mxu0 %v11325_v53  ;;  %29138 = vmatprep.subr.mxu1 %v31353_v13 }
0x1540   : > { %29139 = vmatpush3.msra.mxu1 %v31515_v40  ;;  %29119 = vmatprep.subr.mxu0 %v31353_v13 }
0x1541   : > { %29140 = vmatprep.subr.mxu1 %v31353_v13  ;;  %29120 = vmatpush3.msra.mxu0 %v31426_v10 }
0x1542   : > { %29141 = vmatpush3.msra.mxu1 %v31519_v41  ;;  %29121 = vmatprep.subr.mxu0 %v31353_v13 }
0x1543   : > { %29142 = vmatprep.mubr.msk.f32.mxu1 %vm31354_vm0, %v31353_v13  ;;  %29158 = vmatprep.subr.mxu1 %v31353_v13 }
0x1544   : > { %29122 = vmatpush3.msra.mxu0 %v31429_v11  ;;  %29129 = vmatprep.mubr.msk.f32.mxu0 %vm31354_vm0, %v31353_v13 }
0x1545   : > { %29123 = vmatprep.subr.mxu0 %v31353_v13 }
0x1546   : > { %29124 = vmatpush3.msra.mxu0 %v31432_v12 }
0x1547   : > { %29125 = vmatprep.subr.mxu0 %v31353_v13 }
0x1548   : > { %29126 = vmatpush3.msra.mxu0 %v31436_v14 }
0x1549   : > { %29127 = vmatprep.subr.mxu0 %v31353_v13 }
0x154a   : > { %29128 = vmatpush3.msra.mxu0 %v31440_v15 }
0x154b   : > { %29145 = vmatprep.subr.mxu0 %v31353_v13 }
0x15e1   : > { %v11427_v58 = vpop.f32.mrf.mxu1 }
0x15e3   : > { %v29066_v59 = vpop.f32.mrf.mxu1 }
0x15e9   : > { %v11331_v52 = vpop.f32.mrf.mxu0 }
0x15ea   : > { %v11428_v28 = vadd.f32 %v11427_v58, %v11331_v52 }
0x15eb   : > { %v11587_v61 = vpop.f32.mrf.mxu1  ;;  %v29053_v62 = vpop.f32.mrf.mxu0 }
0x15ed   : > { %v29092_v63 = vpop.f32.mrf.mxu1 }
0x15f4   : > { %v11509_v56 = vpop.f32.mrf.mxu0 }
0x15f5   : > { %v11510_v29 = vadd.f32 %v11509_v56, %v11428_v28 }
0x15f6   : > { %v29079_v24 = vpop.f32.mrf.mxu0 }
0x15f7   : > { %v11749_v27 = vpop.f32.mrf.mxu1  ;;  %v11588_v31 = vadd.f32 %v11587_v61, %v11510_v29 }
0x15f9   : > { %v29118_v60 = vpop.f32.mrf.mxu1 }
0x15ff   : > { %v11673_v34 = vpop.f32.mrf.mxu0 }
0x1600   : > { %v11674_v18 = vadd.f32 %v11673_v34, %v11588_v31 }
0x1601   : > { %v29105_v35 = vpop.f32.mrf.mxu0 }
0x1602   : > { %v11750_v36 = vadd.f32 %v11749_v27, %v11674_v18 }
0x1604   : > { %v11753_v39 = vsub.f32 %v11750_v36, %v31388_v0 }
0x1606   : > { %v11754_v8 = vadd.f32 %v11753_v39, %v33307_v44 }
0x1608   : > { %v11755_v42 = vmax.f32 %v31403_v6, %v11754_v8 }
0x160a   : > { %v11756_v43 = vmin.f32 %v31408_v7, %v11755_v42 }
0x160c   : > { %v11757_v45 = vsub.f32 %v11753_v39, %v11756_v43 }
0x160e   : > { %v33388_v38 = vadd.f32 %v11757_v45, %v33307_v44 }
0x1610   : > { %v11759_v46 = vsub.f32 %v11756_v43, %v33388_v38 }
0x1612   : > { %v11761_v47 = vsel %vm75_vm1, %v11759_v46, 0 }
0x1613   : > { %v11833_v49 = vand.u32 4294901760, %v11761_v47 }
0x1615   : > { %v11834_v50 = vsub.f32 %v11761_v47, %v11833_v49  ;;  %29143 = vmatmul.mubr.f32.vlgmr.msra.gmra.mxu1 %v11833_v49 }
0x1616   : > { %29159 = vmatpush3.msra.mxu1 %v31426_v10  ;;  %29168 = vmatprep.mubr.msk.f32.mxu1 %vm31354_vm0, %v31353_v13 }
0x1617   : > { %29160 = vmatprep.subr.mxu1 %v31353_v13  ;;  %v11835_v51 = vand.u32 4294901760, %v11834_v50 }
0x1618   : > { %29161 = vmatpush3.msra.mxu1 %v31429_v11 }
0x1619   : > { %29162 = vmatprep.subr.mxu1 %v31353_v13  ;;  %v11836_v44 = vsub.f32 %v11834_v50, %v11835_v51 }
0x161a   : > { %29163 = vmatpush3.msra.mxu1 %v31432_v12 }
0x161b   : > { %29164 = vmatprep.subr.mxu1 %v31353_v13  ;;  %v11837_v53 = vand.u32 4294901760, %v11836_v44 }
0x161c   : > { %29165 = vmatpush3.msra.mxu1 %v31436_v14 }
0x161d   : > { %29166 = vmatprep.subr.mxu1 %v31353_v13  ;;  %29130 = vmatmul.mubr.f32.vlgmr.msra.gmra.mxu0 %v11837_v53 }
0x161e   : > { %29146 = vmatpush3.msra.mxu0 %v31445_v16  ;;  %29167 = vmatpush3.msra.mxu1 %v31440_v15 }
0x161f   : > { %29147 = vmatprep.subr.mxu0 %v31353_v13  ;;  %29169 = vmatmul.mubr.f32.vlgmr.msra.gmra.mxu1 %v11835_v51 }
0x1620   : > { %29184 = vmatprep.subr.mxu1 %v31353_v13  ;;  %29148 = vmatpush3.msra.mxu0 %v31451_v17 }
0x1621   : > { %29185 = vmatpush3.msra.mxu1 %v31426_v10  ;;  %29149 = vmatprep.subr.mxu0 %v31353_v13 }
0x1622   : > { %29186 = vmatprep.subr.mxu1 %v31353_v13  ;;  %29150 = vmatpush3.msra.mxu0 %v31458_v19 }
0x1623   : > { %29187 = vmatpush3.msra.mxu1 %v31429_v11  ;;  %29151 = vmatprep.subr.mxu0 %v31353_v13 }
0x1624   : > { %29188 = vmatprep.subr.mxu1 %v31353_v13  ;;  %29152 = vmatpush3.msra.mxu0 %v31462_v20 }
0x1625   : > { %29189 = vmatpush3.msra.mxu1 %v31432_v12  ;;  %29153 = vmatprep.subr.mxu0 %v31353_v13 }
0x1626   : > { %29190 = vmatprep.subr.mxu1 %v31353_v13  ;;  %29154 = vmatpush3.msra.mxu0 %v31466_v21 }
0x1627   : > { %29155 = vmatprep.mubr.msk.f32.mxu0 %vm31354_vm0, %v31353_v13  ;;  %29191 = vmatpush3.msra.mxu1 %v31436_v14 }
0x1628   : > { %29156 = vmatmul.mubr.f32.vlgmr.msra.gmra.mxu0 %v11834_v50  ;;  %29171 = vmatprep.subr.mxu0 %v31353_v13 }
0x1629   : > { %29192 = vmatprep.subr.mxu1 %v31353_v13  ;;  %29172 = vmatpush3.msra.mxu0 %v31472_v22 }
0x162a   : > { %29193 = vmatpush3.msra.mxu1 %v31440_v15  ;;  %29194 = vmatprep.mubr.msk.f32.mxu1 %vm31354_vm0, %v31353_v13 }
0x162b   : > { %29173 = vmatprep.subr.mxu0 %v31353_v13  ;;  %29195 = vmatmul.mubr.f32.vlgmr.msra.gmra.mxu1 %v11833_v49 }
0x162c   : > { %29174 = vmatpush3.msra.mxu0 %v31475_v23  ;;  %29181 = vmatprep.mubr.msk.f32.mxu0 %vm31354_vm0, %v31353_v13 }
0x162d   : > { %29175 = vmatprep.subr.mxu0 %v31353_v13  ;;  %29210 = vmatprep.subr.mxu1 %v31353_v13 }
0x162e   : > { %29176 = vmatpush3.msra.mxu0 %v31481_v25  ;;  %29211 = vmatpush3.msra.mxu1 %v31499_v32 }
0x162f   : > { %29177 = vmatprep.subr.mxu0 %v31353_v13  ;;  %29212 = vmatprep.subr.mxu1 %v31353_v13 }
0x1630   : > { %29178 = vmatpush3.msra.mxu0 %v31484_v26  ;;  %29213 = vmatpush3.msra.mxu1 %v31501_v33 }
0x1631   : > { %29179 = vmatprep.subr.mxu0 %v31353_v13  ;;  %29214 = vmatprep.subr.mxu1 %v31353_v13 }
0x1632   : > { %29180 = vmatpush3.msra.mxu0 %v31493_v30  ;;  %29215 = vmatpush3.msra.mxu1 %v31508_v37 }
0x1633   : > { %29182 = vmatmul.mubr.f32.vlgmr.msra.gmra.mxu0 %v11833_v49  ;;  %29216 = vmatprep.subr.mxu1 %v31353_v13 }
0x1634   : > { %29217 = vmatpush3.msra.mxu1 %v31515_v40  ;;  %29197 = vmatprep.subr.mxu0 %v31353_v13 }
0x1635   : > { %29218 = vmatprep.subr.mxu1 %v31353_v13  ;;  %29198 = vmatpush3.msra.mxu0 %v31426_v10 }
0x1636   : > { %29219 = vmatpush3.msra.mxu1 %v31519_v41  ;;  %29199 = vmatprep.subr.mxu0 %v31353_v13 }
0x1637   : > { %29220 = vmatprep.mubr.msk.f32.mxu1 %vm31354_vm0, %v31353_v13  ;;  %29236 = vmatprep.subr.mxu1 %v31353_v13 }
0x1638   : > { %29200 = vmatpush3.msra.mxu0 %v31429_v11  ;;  %29207 = vmatprep.mubr.msk.f32.mxu0 %vm31354_vm0, %v31353_v13 }
0x1639   : > { %29201 = vmatprep.subr.mxu0 %v31353_v13 }
0x163a   : > { %29202 = vmatpush3.msra.mxu0 %v31432_v12 }
0x163b   : > { %29203 = vmatprep.subr.mxu0 %v31353_v13 }
0x163c   : > { %29204 = vmatpush3.msra.mxu0 %v31436_v14 }
0x163d   : > { %29205 = vmatprep.subr.mxu0 %v31353_v13 }
0x163e   : > { %29206 = vmatpush3.msra.mxu0 %v31440_v15 }
0x163f   : > { %29223 = vmatprep.subr.mxu0 %v31353_v13 }
0x16d5   : > { %v11935_v54 = vpop.f32.mrf.mxu1 }
0x16d7   : > { %v29144_v55 = vpop.f32.mrf.mxu1 }
0x16dd   : > { %v11839_v48 = vpop.f32.mrf.mxu0 }
0x16de   : > { %v11936_v63 = vadd.f32 %v11935_v54, %v11839_v48 }
0x16df   : > { %v12095_v57 = vpop.f32.mrf.mxu1  ;;  %v29131_v58 = vpop.f32.mrf.mxu0 }
0x16e1   : > { %v29170_v59 = vpop.f32.mrf.mxu1 }
0x16e8   : > { %v12017_v52 = vpop.f32.mrf.mxu0 }
0x16e9   : > { %v12018_v24 = vadd.f32 %v12017_v52, %v11936_v63 }
0x16ea   : > { %v29157_v61 = vpop.f32.mrf.mxu0 }
0x16eb   : > { %v12257_v62 = vpop.f32.mrf.mxu1  ;;  %v12096_v27 = vadd.f32 %v12095_v57, %v12018_v24 }
0x16ed   : > { %v29196_v56 = vpop.f32.mrf.mxu1 }
0x16f3   : > { %v12181_v28 = vpop.f32.mrf.mxu0 }
0x16f4   : > { %v12182_v60 = vadd.f32 %v12181_v28, %v12096_v27 }
0x16f5   : > { %v29183_v29 = vpop.f32.mrf.mxu0 }
0x16f6   : > { %v12258_v31 = vadd.f32 %v12257_v62, %v12182_v60 }
0x16f8   : > { %v12261_v34 = vsub.f32 %v12258_v31, %v31388_v0 }
0x16fa   : > { %v12262_v18 = vadd.f32 %v12261_v34, %v33388_v38 }
0x16fc   : > { %v12263_v35 = vmax.f32 %v31403_v6, %v12262_v18 }
0x16fe   : > { %v12264_v36 = vmin.f32 %v31408_v7, %v12263_v35 }
0x1700   : > { %v12265_v39 = vsub.f32 %v12261_v34, %v12264_v36 }
0x1702   : > { %v33469_v8 = vadd.f32 %v12265_v39, %v33388_v38 }
0x1704   : > { %v12267_v42 = vsub.f32 %v12264_v36, %v33469_v8 }
0x1706   : > { %v12269_v43 = vsel %vm75_vm1, %v12267_v42, 0 }
0x1707   : > { %v12341_v45 = vand.u32 4294901760, %v12269_v43 }
0x1709   : > { %v12342_v46 = vsub.f32 %v12269_v43, %v12341_v45  ;;  %29221 = vmatmul.mubr.f32.vlgmr.msra.gmra.mxu1 %v12341_v45 }
0x170a   : > { %29237 = vmatpush3.msra.mxu1 %v31426_v10  ;;  %29246 = vmatprep.mubr.msk.f32.mxu1 %vm31354_vm0, %v31353_v13 }
0x170b   : > { %29238 = vmatprep.subr.mxu1 %v31353_v13  ;;  %v12343_v47 = vand.u32 4294901760, %v12342_v46 }
0x170c   : > { %29239 = vmatpush3.msra.mxu1 %v31429_v11 }
0x170d   : > { %29240 = vmatprep.subr.mxu1 %v31353_v13  ;;  %v12344_v38 = vsub.f32 %v12342_v46, %v12343_v47 }
0x170e   : > { %29241 = vmatpush3.msra.mxu1 %v31432_v12 }
0x170f   : > { %29242 = vmatprep.subr.mxu1 %v31353_v13  ;;  %v12345_v49 = vand.u32 4294901760, %v12344_v38 }
0x1710   : > { %29243 = vmatpush3.msra.mxu1 %v31436_v14 }
0x1711   : > { %29244 = vmatprep.subr.mxu1 %v31353_v13  ;;  %29208 = vmatmul.mubr.f32.vlgmr.msra.gmra.mxu0 %v12345_v49 }
0x1712   : > { %29224 = vmatpush3.msra.mxu0 %v31445_v16  ;;  %29245 = vmatpush3.msra.mxu1 %v31440_v15 }
0x1713   : > { %29225 = vmatprep.subr.mxu0 %v31353_v13  ;;  %29247 = vmatmul.mubr.f32.vlgmr.msra.gmra.mxu1 %v12343_v47 }
0x1714   : > { %29262 = vmatprep.subr.mxu1 %v31353_v13  ;;  %29226 = vmatpush3.msra.mxu0 %v31451_v17 }
0x1715   : > { %29263 = vmatpush3.msra.mxu1 %v31426_v10  ;;  %29227 = vmatprep.subr.mxu0 %v31353_v13 }
0x1716   : > { %29264 = vmatprep.subr.mxu1 %v31353_v13  ;;  %29228 = vmatpush3.msra.mxu0 %v31458_v19 }
0x1717   : > { %29265 = vmatpush3.msra.mxu1 %v31429_v11  ;;  %29229 = vmatprep.subr.mxu0 %v31353_v13 }
0x1718   : > { %29266 = vmatprep.subr.mxu1 %v31353_v13  ;;  %29230 = vmatpush3.msra.mxu0 %v31462_v20 }
0x1719   : > { %29267 = vmatpush3.msra.mxu1 %v31432_v12  ;;  %29231 = vmatprep.subr.mxu0 %v31353_v13 }
0x171a   : > { %29268 = vmatprep.subr.mxu1 %v31353_v13  ;;  %29232 = vmatpush3.msra.mxu0 %v31466_v21 }
0x171b   : > { %29233 = vmatprep.mubr.msk.f32.mxu0 %vm31354_vm0, %v31353_v13  ;;  %29269 = vmatpush3.msra.mxu1 %v31436_v14 }
0x171c   : > { %29234 = vmatmul.mubr.f32.vlgmr.msra.gmra.mxu0 %v12342_v46  ;;  %29249 = vmatprep.subr.mxu0 %v31353_v13 }
0x171d   : > { %29270 = vmatprep.subr.mxu1 %v31353_v13  ;;  %29250 = vmatpush3.msra.mxu0 %v31472_v22 }
0x171e   : > { %29271 = vmatpush3.msra.mxu1 %v31440_v15  ;;  %29272 = vmatprep.mubr.msk.f32.mxu1 %vm31354_vm0, %v31353_v13 }
0x171f   : > { %29251 = vmatprep.subr.mxu0 %v31353_v13  ;;  %29273 = vmatmul.mubr.f32.vlgmr.msra.gmra.mxu1 %v12341_v45 }
0x1720   : > { %29252 = vmatpush3.msra.mxu0 %v31475_v23  ;;  %29259 = vmatprep.mubr.msk.f32.mxu0 %vm31354_vm0, %v31353_v13 }
0x1721   : > { %29253 = vmatprep.subr.mxu0 %v31353_v13  ;;  %29288 = vmatprep.subr.mxu1 %v31353_v13 }
0x1722   : > { %29254 = vmatpush3.msra.mxu0 %v31481_v25  ;;  %29289 = vmatpush3.msra.mxu1 %v31499_v32 }
0x1723   : > { %29255 = vmatprep.subr.mxu0 %v31353_v13  ;;  %29290 = vmatprep.subr.mxu1 %v31353_v13 }
0x1724   : > { %29256 = vmatpush3.msra.mxu0 %v31484_v26  ;;  %29291 = vmatpush3.msra.mxu1 %v31501_v33 }
0x1725   : > { %29257 = vmatprep.subr.mxu0 %v31353_v13  ;;  %29292 = vmatprep.subr.mxu1 %v31353_v13 }
0x1726   : > { %29258 = vmatpush3.msra.mxu0 %v31493_v30  ;;  %29293 = vmatpush3.msra.mxu1 %v31508_v37 }
0x1727   : > { %29260 = vmatmul.mubr.f32.vlgmr.msra.gmra.mxu0 %v12341_v45  ;;  %29294 = vmatprep.subr.mxu1 %v31353_v13 }
0x1728   : > { %29295 = vmatpush3.msra.mxu1 %v31515_v40  ;;  %29275 = vmatprep.subr.mxu0 %v31353_v13 }
0x1729   : > { %29296 = vmatprep.subr.mxu1 %v31353_v13  ;;  %29276 = vmatpush3.msra.mxu0 %v31426_v10 }
0x172a   : > { %29297 = vmatpush3.msra.mxu1 %v31519_v41  ;;  %29277 = vmatprep.subr.mxu0 %v31353_v13 }
0x172b   : > { %29298 = vmatprep.mubr.msk.f32.mxu1 %vm31354_vm0, %v31353_v13  ;;  %29314 = vmatprep.subr.mxu1 %v31353_v13 }
0x172c   : > { %29278 = vmatpush3.msra.mxu0 %v31429_v11  ;;  %29285 = vmatprep.mubr.msk.f32.mxu0 %vm31354_vm0, %v31353_v13 }
0x172d   : > { %29279 = vmatprep.subr.mxu0 %v31353_v13 }
0x172e   : > { %29280 = vmatpush3.msra.mxu0 %v31432_v12 }
0x172f   : > { %29281 = vmatprep.subr.mxu0 %v31353_v13 }
0x1730   : > { %29282 = vmatpush3.msra.mxu0 %v31436_v14 }
0x1731   : > { %29283 = vmatprep.subr.mxu0 %v31353_v13 }
0x1732   : > { %29284 = vmatpush3.msra.mxu0 %v31440_v15 }
0x1733   : > { %29301 = vmatprep.subr.mxu0 %v31353_v13 }
0x17c9   : > { %v12443_v50 = vpop.f32.mrf.mxu1 }
0x17cb   : > { %v29222_v51 = vpop.f32.mrf.mxu1 }
0x17d1   : > { %v12347_v44 = vpop.f32.mrf.mxu0 }
0x17d2   : > { %v12444_v59 = vadd.f32 %v12443_v50, %v12347_v44 }
0x17d3   : > { %v12603_v53 = vpop.f32.mrf.mxu1  ;;  %v29209_v54 = vpop.f32.mrf.mxu0 }
0x17d5   : > { %v29248_v55 = vpop.f32.mrf.mxu1 }
0x17dc   : > { %v12525_v48 = vpop.f32.mrf.mxu0 }
0x17dd   : > { %v12526_v61 = vadd.f32 %v12525_v48, %v12444_v59 }
0x17de   : > { %v29235_v57 = vpop.f32.mrf.mxu0 }
0x17df   : > { %v12765_v58 = vpop.f32.mrf.mxu1  ;;  %v12604_v62 = vadd.f32 %v12603_v53, %v12526_v61 }
0x17e1   : > { %v29274_v52 = vpop.f32.mrf.mxu1 }
0x17e7   : > { %v12689_v63 = vpop.f32.mrf.mxu0 }
0x17e8   : > { %v12690_v56 = vadd.f32 %v12689_v63, %v12604_v62 }
0x17e9   : > { %v29261_v24 = vpop.f32.mrf.mxu0 }
0x17ea   : > { %v12766_v27 = vadd.f32 %v12765_v58, %v12690_v56 }
0x17ec   : > { %v12769_v28 = vsub.f32 %v12766_v27, %v31388_v0 }
0x17ee   : > { %v12770_v60 = vadd.f32 %v12769_v28, %v33469_v8 }
0x17f0   : > { %v12771_v29 = vmax.f32 %v31403_v6, %v12770_v60 }
0x17f2   : > { %v12772_v31 = vmin.f32 %v31408_v7, %v12771_v29 }
0x17f4   : > { %v12773_v34 = vsub.f32 %v12769_v28, %v12772_v31 }
0x17f6   : > { %v33550_v18 = vadd.f32 %v12773_v34, %v33469_v8 }
0x17f8   : > { %v12775_v35 = vsub.f32 %v12772_v31, %v33550_v18 }
0x17fa   : > { %v12777_v36 = vsel %vm75_vm1, %v12775_v35, 0 }
0x17fb   : > { %v12849_v39 = vand.u32 4294901760, %v12777_v36 }
0x17fd   : > { %v12850_v42 = vsub.f32 %v12777_v36, %v12849_v39  ;;  %29299 = vmatmul.mubr.f32.vlgmr.msra.gmra.mxu1 %v12849_v39 }
0x17fe   : > { %29315 = vmatpush3.msra.mxu1 %v31426_v10  ;;  %29324 = vmatprep.mubr.msk.f32.mxu1 %vm31354_vm0, %v31353_v13 }
0x17ff   : > { %29316 = vmatprep.subr.mxu1 %v31353_v13  ;;  %v12851_v43 = vand.u32 4294901760, %v12850_v42 }
0x1800   : > { %29317 = vmatpush3.msra.mxu1 %v31429_v11 }
0x1801   : > { %29318 = vmatprep.subr.mxu1 %v31353_v13  ;;  %v12852_v8 = vsub.f32 %v12850_v42, %v12851_v43 }
0x1802   : > { %29319 = vmatpush3.msra.mxu1 %v31432_v12 }
0x1803   : > { %29320 = vmatprep.subr.mxu1 %v31353_v13  ;;  %v12853_v45 = vand.u32 4294901760, %v12852_v8 }
0x1804   : > { %29321 = vmatpush3.msra.mxu1 %v31436_v14 }
0x1805   : > { %29322 = vmatprep.subr.mxu1 %v31353_v13  ;;  %29286 = vmatmul.mubr.f32.vlgmr.msra.gmra.mxu0 %v12853_v45 }
0x1806   : > { %29302 = vmatpush3.msra.mxu0 %v31445_v16  ;;  %29323 = vmatpush3.msra.mxu1 %v31440_v15 }
0x1807   : > { %29303 = vmatprep.subr.mxu0 %v31353_v13  ;;  %29325 = vmatmul.mubr.f32.vlgmr.msra.gmra.mxu1 %v12851_v43 }
0x1808   : > { %29340 = vmatprep.subr.mxu1 %v31353_v13  ;;  %29304 = vmatpush3.msra.mxu0 %v31451_v17 }
0x1809   : > { %29341 = vmatpush3.msra.mxu1 %v31426_v10  ;;  %29305 = vmatprep.subr.mxu0 %v31353_v13 }
0x180a   : > { %29342 = vmatprep.subr.mxu1 %v31353_v13  ;;  %29306 = vmatpush3.msra.mxu0 %v31458_v19 }
0x180b   : > { %29343 = vmatpush3.msra.mxu1 %v31429_v11  ;;  %29307 = vmatprep.subr.mxu0 %v31353_v13 }
0x180c   : > { %29344 = vmatprep.subr.mxu1 %v31353_v13  ;;  %29308 = vmatpush3.msra.mxu0 %v31462_v20 }
0x180d   : > { %29345 = vmatpush3.msra.mxu1 %v31432_v12  ;;  %29309 = vmatprep.subr.mxu0 %v31353_v13 }
0x180e   : > { %29346 = vmatprep.subr.mxu1 %v31353_v13  ;;  %29310 = vmatpush3.msra.mxu0 %v31466_v21 }
0x180f   : > { %29311 = vmatprep.mubr.msk.f32.mxu0 %vm31354_vm0, %v31353_v13  ;;  %29347 = vmatpush3.msra.mxu1 %v31436_v14 }
0x1810   : > { %29312 = vmatmul.mubr.f32.vlgmr.msra.gmra.mxu0 %v12850_v42  ;;  %29327 = vmatprep.subr.mxu0 %v31353_v13 }
0x1811   : > { %29348 = vmatprep.subr.mxu1 %v31353_v13  ;;  %29328 = vmatpush3.msra.mxu0 %v31472_v22 }
0x1812   : > { %29349 = vmatpush3.msra.mxu1 %v31440_v15  ;;  %29350 = vmatprep.mubr.msk.f32.mxu1 %vm31354_vm0, %v31353_v13 }
0x1813   : > { %29329 = vmatprep.subr.mxu0 %v31353_v13  ;;  %29351 = vmatmul.mubr.f32.vlgmr.msra.gmra.mxu1 %v12849_v39 }
0x1814   : > { %29330 = vmatpush3.msra.mxu0 %v31475_v23  ;;  %29337 = vmatprep.mubr.msk.f32.mxu0 %vm31354_vm0, %v31353_v13 }
0x1815   : > { %29331 = vmatprep.subr.mxu0 %v31353_v13  ;;  %29366 = vmatprep.subr.mxu1 %v31353_v13 }
0x1816   : > { %29332 = vmatpush3.msra.mxu0 %v31481_v25  ;;  %29367 = vmatpush3.msra.mxu1 %v31499_v32 }
0x1817   : > { %29333 = vmatprep.subr.mxu0 %v31353_v13  ;;  %29368 = vmatprep.subr.mxu1 %v31353_v13 }
0x1818   : > { %29334 = vmatpush3.msra.mxu0 %v31484_v26  ;;  %29369 = vmatpush3.msra.mxu1 %v31501_v33 }
0x1819   : > { %29335 = vmatprep.subr.mxu0 %v31353_v13  ;;  %29370 = vmatprep.subr.mxu1 %v31353_v13 }
0x181a   : > { %29336 = vmatpush3.msra.mxu0 %v31493_v30  ;;  %29371 = vmatpush3.msra.mxu1 %v31508_v37 }
0x181b   : > { %29338 = vmatmul.mubr.f32.vlgmr.msra.gmra.mxu0 %v12849_v39  ;;  %29372 = vmatprep.subr.mxu1 %v31353_v13 }
0x181c   : > { %29373 = vmatpush3.msra.mxu1 %v31515_v40  ;;  %29353 = vmatprep.subr.mxu0 %v31353_v13 }
0x181d   : > { %29374 = vmatprep.subr.mxu1 %v31353_v13  ;;  %29354 = vmatpush3.msra.mxu0 %v31426_v10 }
0x181e   : > { %29375 = vmatpush3.msra.mxu1 %v31519_v41  ;;  %29355 = vmatprep.subr.mxu0 %v31353_v13 }
0x181f   : > { %29376 = vmatprep.mubr.msk.f32.mxu1 %vm31354_vm0, %v31353_v13  ;;  %29392 = vmatprep.subr.mxu1 %v31353_v13 }
0x1820   : > { %29356 = vmatpush3.msra.mxu0 %v31429_v11  ;;  %29363 = vmatprep.mubr.msk.f32.mxu0 %vm31354_vm0, %v31353_v13 }
0x1821   : > { %29357 = vmatprep.subr.mxu0 %v31353_v13 }
0x1822   : > { %29358 = vmatpush3.msra.mxu0 %v31432_v12 }
0x1823   : > { %29359 = vmatprep.subr.mxu0 %v31353_v13 }
0x1824   : > { %29360 = vmatpush3.msra.mxu0 %v31436_v14 }
0x1825   : > { %29361 = vmatprep.subr.mxu0 %v31353_v13 }
0x1826   : > { %29362 = vmatpush3.msra.mxu0 %v31440_v15 }
0x1827   : > { %29379 = vmatprep.subr.mxu0 %v31353_v13 }
0x18bd   : > { %v12951_v46 = vpop.f32.mrf.mxu1 }
0x18bf   : > { %v29300_v47 = vpop.f32.mrf.mxu1 }
0x18c5   : > { %v12855_v38 = vpop.f32.mrf.mxu0 }
0x18c6   : > { %v12952_v55 = vadd.f32 %v12951_v46, %v12855_v38 }
0x18c7   : > { %v13111_v49 = vpop.f32.mrf.mxu1  ;;  %v29287_v50 = vpop.f32.mrf.mxu0 }
0x18c9   : > { %v29326_v51 = vpop.f32.mrf.mxu1 }
0x18d0   : > { %v13033_v44 = vpop.f32.mrf.mxu0 }
0x18d1   : > { %v13034_v57 = vadd.f32 %v13033_v44, %v12952_v55 }
0x18d2   : > { %v29313_v53 = vpop.f32.mrf.mxu0 }
0x18d3   : > { %v13273_v54 = vpop.f32.mrf.mxu1  ;;  %v13112_v58 = vadd.f32 %v13111_v49, %v13034_v57 }
0x18d5   : > { %v29352_v48 = vpop.f32.mrf.mxu1 }
0x18db   : > { %v13197_v59 = vpop.f32.mrf.mxu0 }
0x18dc   : > { %v13198_v52 = vadd.f32 %v13197_v59, %v13112_v58 }
0x18dd   : > { %v29339_v61 = vpop.f32.mrf.mxu0 }
0x18de   : > { %v13274_v62 = vadd.f32 %v13273_v54, %v13198_v52 }
0x18e0   : > { %v13277_v63 = vsub.f32 %v13274_v62, %v31388_v0 }
0x18e2   : > { %v13278_v56 = vadd.f32 %v13277_v63, %v33550_v18 }
0x18e4   : > { %v13279_v24 = vmax.f32 %v31403_v6, %v13278_v56 }
0x18e6   : > { %v13280_v27 = vmin.f32 %v31408_v7, %v13279_v24 }
0x18e8   : > { %v13281_v28 = vsub.f32 %v13277_v63, %v13280_v27 }
0x18ea   : > { %v33631_v60 = vadd.f32 %v13281_v28, %v33550_v18 }
0x18ec   : > { %v13283_v29 = vsub.f32 %v13280_v27, %v33631_v60 }
0x18ee   : > { %v13285_v31 = vsel %vm75_vm1, %v13283_v29, 0 }
0x18ef   : > { %v13357_v34 = vand.u32 4294901760, %v13285_v31 }
0x18f1   : > { %v13358_v35 = vsub.f32 %v13285_v31, %v13357_v34  ;;  %29377 = vmatmul.mubr.f32.vlgmr.msra.gmra.mxu1 %v13357_v34 }
0x18f2   : > { %29393 = vmatpush3.msra.mxu1 %v31426_v10  ;;  %29402 = vmatprep.mubr.msk.f32.mxu1 %vm31354_vm0, %v31353_v13 }
0x18f3   : > { %29394 = vmatprep.subr.mxu1 %v31353_v13  ;;  %v13359_v36 = vand.u32 4294901760, %v13358_v35 }
0x18f4   : > { %29395 = vmatpush3.msra.mxu1 %v31429_v11 }
0x18f5   : > { %29396 = vmatprep.subr.mxu1 %v31353_v13  ;;  %v13360_v18 = vsub.f32 %v13358_v35, %v13359_v36 }
0x18f6   : > { %29397 = vmatpush3.msra.mxu1 %v31432_v12 }
0x18f7   : > { %29398 = vmatprep.subr.mxu1 %v31353_v13  ;;  %v13361_v39 = vand.u32 4294901760, %v13360_v18 }
0x18f8   : > { %29399 = vmatpush3.msra.mxu1 %v31436_v14 }
0x18f9   : > { %29400 = vmatprep.subr.mxu1 %v31353_v13  ;;  %29364 = vmatmul.mubr.f32.vlgmr.msra.gmra.mxu0 %v13361_v39 }
0x18fa   : > { %29380 = vmatpush3.msra.mxu0 %v31445_v16  ;;  %29401 = vmatpush3.msra.mxu1 %v31440_v15 }
0x18fb   : > { %29381 = vmatprep.subr.mxu0 %v31353_v13  ;;  %29403 = vmatmul.mubr.f32.vlgmr.msra.gmra.mxu1 %v13359_v36 }
0x18fc   : > { %29418 = vmatprep.subr.mxu1 %v31353_v13  ;;  %29382 = vmatpush3.msra.mxu0 %v31451_v17 }
0x18fd   : > { %29419 = vmatpush3.msra.mxu1 %v31426_v10  ;;  %29383 = vmatprep.subr.mxu0 %v31353_v13 }
0x18fe   : > { %29420 = vmatprep.subr.mxu1 %v31353_v13  ;;  %29384 = vmatpush3.msra.mxu0 %v31458_v19 }
0x18ff   : > { %29421 = vmatpush3.msra.mxu1 %v31429_v11  ;;  %29385 = vmatprep.subr.mxu0 %v31353_v13 }
0x1900   : > { %29422 = vmatprep.subr.mxu1 %v31353_v13  ;;  %29386 = vmatpush3.msra.mxu0 %v31462_v20 }
0x1901   : > { %29423 = vmatpush3.msra.mxu1 %v31432_v12  ;;  %29387 = vmatprep.subr.mxu0 %v31353_v13 }
0x1902   : > { %29424 = vmatprep.subr.mxu1 %v31353_v13  ;;  %29388 = vmatpush3.msra.mxu0 %v31466_v21 }
0x1903   : > { %29389 = vmatprep.mubr.msk.f32.mxu0 %vm31354_vm0, %v31353_v13  ;;  %29425 = vmatpush3.msra.mxu1 %v31436_v14 }
0x1904   : > { %29390 = vmatmul.mubr.f32.vlgmr.msra.gmra.mxu0 %v13358_v35  ;;  %29405 = vmatprep.subr.mxu0 %v31353_v13 }
0x1905   : > { %29426 = vmatprep.subr.mxu1 %v31353_v13  ;;  %29406 = vmatpush3.msra.mxu0 %v31472_v22 }
0x1906   : > { %29427 = vmatpush3.msra.mxu1 %v31440_v15  ;;  %29428 = vmatprep.mubr.msk.f32.mxu1 %vm31354_vm0, %v31353_v13 }
0x1907   : > { %29407 = vmatprep.subr.mxu0 %v31353_v13  ;;  %29429 = vmatmul.mubr.f32.vlgmr.msra.gmra.mxu1 %v13357_v34 }
0x1908   : > { %29408 = vmatpush3.msra.mxu0 %v31475_v23  ;;  %29415 = vmatprep.mubr.msk.f32.mxu0 %vm31354_vm0, %v31353_v13 }
0x1909   : > { %29409 = vmatprep.subr.mxu0 %v31353_v13  ;;  %29444 = vmatprep.subr.mxu1 %v31353_v13 }
0x190a   : > { %29410 = vmatpush3.msra.mxu0 %v31481_v25  ;;  %29445 = vmatpush3.msra.mxu1 %v31499_v32 }
0x190b   : > { %29411 = vmatprep.subr.mxu0 %v31353_v13  ;;  %29446 = vmatprep.subr.mxu1 %v31353_v13 }
0x190c   : > { %29412 = vmatpush3.msra.mxu0 %v31484_v26  ;;  %29447 = vmatpush3.msra.mxu1 %v31501_v33 }
0x190d   : > { %29413 = vmatprep.subr.mxu0 %v31353_v13  ;;  %29448 = vmatprep.subr.mxu1 %v31353_v13 }
0x190e   : > { %29414 = vmatpush3.msra.mxu0 %v31493_v30  ;;  %29449 = vmatpush3.msra.mxu1 %v31508_v37 }
0x190f   : > { %29416 = vmatmul.mubr.f32.vlgmr.msra.gmra.mxu0 %v13357_v34  ;;  %29450 = vmatprep.subr.mxu1 %v31353_v13 }
0x1910   : > { %29451 = vmatpush3.msra.mxu1 %v31515_v40  ;;  %29431 = vmatprep.subr.mxu0 %v31353_v13 }
0x1911   : > { %29452 = vmatprep.subr.mxu1 %v31353_v13  ;;  %29432 = vmatpush3.msra.mxu0 %v31426_v10 }
0x1912   : > { %29453 = vmatpush3.msra.mxu1 %v31519_v41  ;;  %29433 = vmatprep.subr.mxu0 %v31353_v13 }
0x1913   : > { %29454 = vmatprep.mubr.msk.f32.mxu1 %vm31354_vm0, %v31353_v13  ;;  %29470 = vmatprep.subr.mxu1 %v31353_v13 }
0x1914   : > { %29434 = vmatpush3.msra.mxu0 %v31429_v11  ;;  %29441 = vmatprep.mubr.msk.f32.mxu0 %vm31354_vm0, %v31353_v13 }
0x1915   : > { %29435 = vmatprep.subr.mxu0 %v31353_v13 }
0x1916   : > { %29436 = vmatpush3.msra.mxu0 %v31432_v12 }
0x1917   : > { %29437 = vmatprep.subr.mxu0 %v31353_v13 }
0x1918   : > { %29438 = vmatpush3.msra.mxu0 %v31436_v14 }
0x1919   : > { %29439 = vmatprep.subr.mxu0 %v31353_v13 }
0x191a   : > { %29440 = vmatpush3.msra.mxu0 %v31440_v15 }
0x191b   : > { %29457 = vmatprep.subr.mxu0 %v31353_v13 }
0x19b1   : > { %v13459_v42 = vpop.f32.mrf.mxu1 }
0x19b3   : > { %v29378_v43 = vpop.f32.mrf.mxu1 }
0x19b9   : > { %v13363_v8 = vpop.f32.mrf.mxu0 }
0x19ba   : > { %v13460_v51 = vadd.f32 %v13459_v42, %v13363_v8 }
0x19bb   : > { %v13619_v45 = vpop.f32.mrf.mxu1  ;;  %v29365_v46 = vpop.f32.mrf.mxu0 }
0x19bd   : > { %v29404_v47 = vpop.f32.mrf.mxu1 }
0x19c4   : > { %v13541_v38 = vpop.f32.mrf.mxu0 }
0x19c5   : > { %v13542_v53 = vadd.f32 %v13541_v38, %v13460_v51 }
0x19c6   : > { %v29391_v49 = vpop.f32.mrf.mxu0 }
0x19c7   : > { %v13781_v50 = vpop.f32.mrf.mxu1  ;;  %v13620_v54 = vadd.f32 %v13619_v45, %v13542_v53 }
0x19c9   : > { %v29430_v44 = vpop.f32.mrf.mxu1 }
0x19cf   : > { %v13705_v55 = vpop.f32.mrf.mxu0 }
0x19d0   : > { %v13706_v48 = vadd.f32 %v13705_v55, %v13620_v54 }
0x19d1   : > { %v29417_v57 = vpop.f32.mrf.mxu0 }
0x19d2   : > { %v13782_v58 = vadd.f32 %v13781_v50, %v13706_v48 }
0x19d4   : > { %v13785_v59 = vsub.f32 %v13782_v58, %v31388_v0 }
0x19d6   : > { %v13786_v52 = vadd.f32 %v13785_v59, %v33631_v60 }
0x19d8   : > { %v13787_v61 = vmax.f32 %v31403_v6, %v13786_v52 }
0x19da   : > { %v13788_v62 = vmin.f32 %v31408_v7, %v13787_v61 }
0x19dc   : > { %v13789_v63 = vsub.f32 %v13785_v59, %v13788_v62 }
0x19de   : > { %v33712_v56 = vadd.f32 %v13789_v63, %v33631_v60 }
0x19e0   : > { %v13791_v24 = vsub.f32 %v13788_v62, %v33712_v56 }
0x19e2   : > { %v13793_v27 = vsel %vm75_vm1, %v13791_v24, 0 }
0x19e3   : > { %v13865_v28 = vand.u32 4294901760, %v13793_v27 }
0x19e5   : > { %v13866_v29 = vsub.f32 %v13793_v27, %v13865_v28  ;;  %29455 = vmatmul.mubr.f32.vlgmr.msra.gmra.mxu1 %v13865_v28 }
0x19e6   : > { %29471 = vmatpush3.msra.mxu1 %v31426_v10  ;;  %29480 = vmatprep.mubr.msk.f32.mxu1 %vm31354_vm0, %v31353_v13 }
0x19e7   : > { %29472 = vmatprep.subr.mxu1 %v31353_v13  ;;  %v13867_v31 = vand.u32 4294901760, %v13866_v29 }
0x19e8   : > { %29473 = vmatpush3.msra.mxu1 %v31429_v11 }
0x19e9   : > { %29474 = vmatprep.subr.mxu1 %v31353_v13  ;;  %v13868_v60 = vsub.f32 %v13866_v29, %v13867_v31 }
0x19ea   : > { %29475 = vmatpush3.msra.mxu1 %v31432_v12 }
0x19eb   : > { %29476 = vmatprep.subr.mxu1 %v31353_v13  ;;  %v13869_v34 = vand.u32 4294901760, %v13868_v60 }
0x19ec   : > { %29477 = vmatpush3.msra.mxu1 %v31436_v14 }
0x19ed   : > { %29478 = vmatprep.subr.mxu1 %v31353_v13  ;;  %29442 = vmatmul.mubr.f32.vlgmr.msra.gmra.mxu0 %v13869_v34 }
0x19ee   : > { %29458 = vmatpush3.msra.mxu0 %v31445_v16  ;;  %29479 = vmatpush3.msra.mxu1 %v31440_v15 }
0x19ef   : > { %29459 = vmatprep.subr.mxu0 %v31353_v13  ;;  %29481 = vmatmul.mubr.f32.vlgmr.msra.gmra.mxu1 %v13867_v31 }
0x19f0   : > { %29496 = vmatprep.subr.mxu1 %v31353_v13  ;;  %29460 = vmatpush3.msra.mxu0 %v31451_v17 }
0x19f1   : > { %29497 = vmatpush3.msra.mxu1 %v31426_v10  ;;  %29461 = vmatprep.subr.mxu0 %v31353_v13 }
0x19f2   : > { %29498 = vmatprep.subr.mxu1 %v31353_v13  ;;  %29462 = vmatpush3.msra.mxu0 %v31458_v19 }
0x19f3   : > { %29499 = vmatpush3.msra.mxu1 %v31429_v11  ;;  %29463 = vmatprep.subr.mxu0 %v31353_v13 }
0x19f4   : > { %29500 = vmatprep.subr.mxu1 %v31353_v13  ;;  %29464 = vmatpush3.msra.mxu0 %v31462_v20 }
0x19f5   : > { %29501 = vmatpush3.msra.mxu1 %v31432_v12  ;;  %29465 = vmatprep.subr.mxu0 %v31353_v13 }
0x19f6   : > { %29502 = vmatprep.subr.mxu1 %v31353_v13  ;;  %29466 = vmatpush3.msra.mxu0 %v31466_v21 }
0x19f7   : > { %29467 = vmatprep.mubr.msk.f32.mxu0 %vm31354_vm0, %v31353_v13  ;;  %29503 = vmatpush3.msra.mxu1 %v31436_v14 }
0x19f8   : > { %29468 = vmatmul.mubr.f32.vlgmr.msra.gmra.mxu0 %v13866_v29  ;;  %29483 = vmatprep.subr.mxu0 %v31353_v13 }
0x19f9   : > { %29504 = vmatprep.subr.mxu1 %v31353_v13  ;;  %29484 = vmatpush3.msra.mxu0 %v31472_v22 }
0x19fa   : > { %29505 = vmatpush3.msra.mxu1 %v31440_v15  ;;  %29506 = vmatprep.mubr.msk.f32.mxu1 %vm31354_vm0, %v31353_v13 }
0x19fb   : > { %29485 = vmatprep.subr.mxu0 %v31353_v13  ;;  %29507 = vmatmul.mubr.f32.vlgmr.msra.gmra.mxu1 %v13865_v28 }
0x19fc   : > { %29486 = vmatpush3.msra.mxu0 %v31475_v23  ;;  %29493 = vmatprep.mubr.msk.f32.mxu0 %vm31354_vm0, %v31353_v13 }
0x19fd   : > { %29487 = vmatprep.subr.mxu0 %v31353_v13  ;;  %29522 = vmatprep.subr.mxu1 %v31353_v13 }
0x19fe   : > { %29488 = vmatpush3.msra.mxu0 %v31481_v25  ;;  %29523 = vmatpush3.msra.mxu1 %v31499_v32 }
0x19ff   : > { %29489 = vmatprep.subr.mxu0 %v31353_v13  ;;  %29524 = vmatprep.subr.mxu1 %v31353_v13 }
0x1a00   : > { %29490 = vmatpush3.msra.mxu0 %v31484_v26  ;;  %29525 = vmatpush3.msra.mxu1 %v31501_v33 }
0x1a01   : > { %29491 = vmatprep.subr.mxu0 %v31353_v13  ;;  %29526 = vmatprep.subr.mxu1 %v31353_v13 }
0x1a02   : > { %29492 = vmatpush3.msra.mxu0 %v31493_v30  ;;  %29527 = vmatpush3.msra.mxu1 %v31508_v37 }
0x1a03   : > { %29494 = vmatmul.mubr.f32.vlgmr.msra.gmra.mxu0 %v13865_v28  ;;  %29528 = vmatprep.subr.mxu1 %v31353_v13 }
0x1a04   : > { %29529 = vmatpush3.msra.mxu1 %v31515_v40  ;;  %29509 = vmatprep.subr.mxu0 %v31353_v13 }
0x1a05   : > { %29530 = vmatprep.subr.mxu1 %v31353_v13  ;;  %29510 = vmatpush3.msra.mxu0 %v31426_v10 }
0x1a06   : > { %29531 = vmatpush3.msra.mxu1 %v31519_v41  ;;  %29511 = vmatprep.subr.mxu0 %v31353_v13 }
0x1a07   : > { %29532 = vmatprep.mubr.msk.f32.mxu1 %vm31354_vm0, %v31353_v13  ;;  %29548 = vmatprep.subr.mxu1 %v31353_v13 }
0x1a08   : > { %29512 = vmatpush3.msra.mxu0 %v31429_v11  ;;  %29519 = vmatprep.mubr.msk.f32.mxu0 %vm31354_vm0, %v31353_v13 }
0x1a09   : > { %29513 = vmatprep.subr.mxu0 %v31353_v13 }
0x1a0a   : > { %29514 = vmatpush3.msra.mxu0 %v31432_v12 }
0x1a0b   : > { %29515 = vmatprep.subr.mxu0 %v31353_v13 }
0x1a0c   : > { %29516 = vmatpush3.msra.mxu0 %v31436_v14 }
0x1a0d   : > { %29517 = vmatprep.subr.mxu0 %v31353_v13 }
0x1a0e   : > { %29518 = vmatpush3.msra.mxu0 %v31440_v15 }
0x1a0f   : > { %29535 = vmatprep.subr.mxu0 %v31353_v13 }
0x1aa5   : > { %v13967_v35 = vpop.f32.mrf.mxu1 }
0x1aa7   : > { %v29456_v36 = vpop.f32.mrf.mxu1 }
0x1aad   : > { %v13871_v18 = vpop.f32.mrf.mxu0 }
0x1aae   : > { %v13968_v47 = vadd.f32 %v13967_v35, %v13871_v18 }
0x1aaf   : > { %v14127_v39 = vpop.f32.mrf.mxu1  ;;  %v29443_v42 = vpop.f32.mrf.mxu0 }
0x1ab1   : > { %v29482_v43 = vpop.f32.mrf.mxu1 }
0x1ab8   : > { %v14049_v8 = vpop.f32.mrf.mxu0 }
0x1ab9   : > { %v14050_v49 = vadd.f32 %v14049_v8, %v13968_v47 }
0x1aba   : > { %v29469_v45 = vpop.f32.mrf.mxu0 }
0x1abb   : > { %v14289_v46 = vpop.f32.mrf.mxu1  ;;  %v14128_v50 = vadd.f32 %v14127_v39, %v14050_v49 }
0x1abd   : > { %v29508_v38 = vpop.f32.mrf.mxu1 }
0x1ac3   : > { %v14213_v51 = vpop.f32.mrf.mxu0 }
0x1ac4   : > { %v14214_v44 = vadd.f32 %v14213_v51, %v14128_v50 }
0x1ac5   : > { %v29495_v53 = vpop.f32.mrf.mxu0 }
0x1ac6   : > { %v14290_v54 = vadd.f32 %v14289_v46, %v14214_v44 }
0x1ac8   : > { %v14293_v55 = vsub.f32 %v14290_v54, %v31388_v0 }
0x1aca   : > { %v14294_v48 = vadd.f32 %v14293_v55, %v33712_v56 }
0x1acc   : > { %v14295_v57 = vmax.f32 %v31403_v6, %v14294_v48 }
0x1ace   : > { %v14296_v58 = vmin.f32 %v31408_v7, %v14295_v57 }
0x1ad0   : > { %v14297_v59 = vsub.f32 %v14293_v55, %v14296_v58 }
0x1ad2   : > { %v33793_v52 = vadd.f32 %v14297_v59, %v33712_v56 }
0x1ad4   : > { %v14299_v61 = vsub.f32 %v14296_v58, %v33793_v52 }
0x1ad6   : > { %v14301_v62 = vsel %vm75_vm1, %v14299_v61, 0 }
0x1ad7   : > { %v14373_v63 = vand.u32 4294901760, %v14301_v62 }
0x1ad9   : > { %v14374_v24 = vsub.f32 %v14301_v62, %v14373_v63  ;;  %29533 = vmatmul.mubr.f32.vlgmr.msra.gmra.mxu1 %v14373_v63 }
0x1ada   : > { %29549 = vmatpush3.msra.mxu1 %v31426_v10  ;;  %29558 = vmatprep.mubr.msk.f32.mxu1 %vm31354_vm0, %v31353_v13 }
0x1adb   : > { %29550 = vmatprep.subr.mxu1 %v31353_v13  ;;  %v14375_v27 = vand.u32 4294901760, %v14374_v24 }
0x1adc   : > { %29551 = vmatpush3.msra.mxu1 %v31429_v11 }
0x1add   : > { %29552 = vmatprep.subr.mxu1 %v31353_v13  ;;  %v14376_v56 = vsub.f32 %v14374_v24, %v14375_v27 }
0x1ade   : > { %29553 = vmatpush3.msra.mxu1 %v31432_v12 }
0x1adf   : > { %29554 = vmatprep.subr.mxu1 %v31353_v13  ;;  %v14377_v28 = vand.u32 4294901760, %v14376_v56 }
0x1ae0   : > { %29555 = vmatpush3.msra.mxu1 %v31436_v14 }
0x1ae1   : > { %29556 = vmatprep.subr.mxu1 %v31353_v13  ;;  %29520 = vmatmul.mubr.f32.vlgmr.msra.gmra.mxu0 %v14377_v28 }
0x1ae2   : > { %29536 = vmatpush3.msra.mxu0 %v31445_v16  ;;  %29557 = vmatpush3.msra.mxu1 %v31440_v15 }
0x1ae3   : > { %29537 = vmatprep.subr.mxu0 %v31353_v13  ;;  %29559 = vmatmul.mubr.f32.vlgmr.msra.gmra.mxu1 %v14375_v27 }
0x1ae4   : > { %29574 = vmatprep.subr.mxu1 %v31353_v13  ;;  %29538 = vmatpush3.msra.mxu0 %v31451_v17 }
0x1ae5   : > { %29575 = vmatpush3.msra.mxu1 %v31426_v10  ;;  %29539 = vmatprep.subr.mxu0 %v31353_v13 }
0x1ae6   : > { %29576 = vmatprep.subr.mxu1 %v31353_v13  ;;  %29540 = vmatpush3.msra.mxu0 %v31458_v19 }
0x1ae7   : > { %29577 = vmatpush3.msra.mxu1 %v31429_v11  ;;  %29541 = vmatprep.subr.mxu0 %v31353_v13 }
0x1ae8   : > { %29578 = vmatprep.subr.mxu1 %v31353_v13  ;;  %29542 = vmatpush3.msra.mxu0 %v31462_v20 }
0x1ae9   : > { %29579 = vmatpush3.msra.mxu1 %v31432_v12  ;;  %29543 = vmatprep.subr.mxu0 %v31353_v13 }
0x1aea   : > { %29580 = vmatprep.subr.mxu1 %v31353_v13  ;;  %29544 = vmatpush3.msra.mxu0 %v31466_v21 }
0x1aeb   : > { %29545 = vmatprep.mubr.msk.f32.mxu0 %vm31354_vm0, %v31353_v13  ;;  %29581 = vmatpush3.msra.mxu1 %v31436_v14 }
0x1aec   : > { %29546 = vmatmul.mubr.f32.vlgmr.msra.gmra.mxu0 %v14374_v24  ;;  %29561 = vmatprep.subr.mxu0 %v31353_v13 }
0x1aed   : > { %29582 = vmatprep.subr.mxu1 %v31353_v13  ;;  %29562 = vmatpush3.msra.mxu0 %v31472_v22 }
0x1aee   : > { %29583 = vmatpush3.msra.mxu1 %v31440_v15  ;;  %29584 = vmatprep.mubr.msk.f32.mxu1 %vm31354_vm0, %v31353_v13 }
0x1aef   : > { %29563 = vmatprep.subr.mxu0 %v31353_v13  ;;  %29585 = vmatmul.mubr.f32.vlgmr.msra.gmra.mxu1 %v14373_v63 }
0x1af0   : > { %29564 = vmatpush3.msra.mxu0 %v31475_v23  ;;  %29571 = vmatprep.mubr.msk.f32.mxu0 %vm31354_vm0, %v31353_v13 }
0x1af1   : > { %29565 = vmatprep.subr.mxu0 %v31353_v13  ;;  %29600 = vmatprep.subr.mxu1 %v31353_v13 }
0x1af2   : > { %29566 = vmatpush3.msra.mxu0 %v31481_v25  ;;  %29601 = vmatpush3.msra.mxu1 %v31499_v32 }
0x1af3   : > { %29567 = vmatprep.subr.mxu0 %v31353_v13  ;;  %29602 = vmatprep.subr.mxu1 %v31353_v13 }
0x1af4   : > { %29568 = vmatpush3.msra.mxu0 %v31484_v26  ;;  %29603 = vmatpush3.msra.mxu1 %v31501_v33 }
0x1af5   : > { %29569 = vmatprep.subr.mxu0 %v31353_v13  ;;  %29604 = vmatprep.subr.mxu1 %v31353_v13 }
0x1af6   : > { %29570 = vmatpush3.msra.mxu0 %v31493_v30  ;;  %29605 = vmatpush3.msra.mxu1 %v31508_v37 }
0x1af7   : > { %29572 = vmatmul.mubr.f32.vlgmr.msra.gmra.mxu0 %v14373_v63  ;;  %29606 = vmatprep.subr.mxu1 %v31353_v13 }
0x1af8   : > { %29607 = vmatpush3.msra.mxu1 %v31515_v40  ;;  %29587 = vmatprep.subr.mxu0 %v31353_v13 }
0x1af9   : > { %29608 = vmatprep.subr.mxu1 %v31353_v13  ;;  %29588 = vmatpush3.msra.mxu0 %v31426_v10 }
0x1afa   : > { %29609 = vmatpush3.msra.mxu1 %v31519_v41  ;;  %29589 = vmatprep.subr.mxu0 %v31353_v13 }
0x1afb   : > { %29610 = vmatprep.mubr.msk.f32.mxu1 %vm31354_vm0, %v31353_v13  ;;  %29626 = vmatprep.subr.mxu1 %v31353_v13 }
0x1afc   : > { %29590 = vmatpush3.msra.mxu0 %v31429_v11  ;;  %29597 = vmatprep.mubr.msk.f32.mxu0 %vm31354_vm0, %v31353_v13 }
0x1afd   : > { %29591 = vmatprep.subr.mxu0 %v31353_v13 }
0x1afe   : > { %29592 = vmatpush3.msra.mxu0 %v31432_v12 }
0x1aff   : > { %29593 = vmatprep.subr.mxu0 %v31353_v13 }
0x1b00   : > { %29594 = vmatpush3.msra.mxu0 %v31436_v14 }
0x1b01   : > { %29595 = vmatprep.subr.mxu0 %v31353_v13 }
0x1b02   : > { %29596 = vmatpush3.msra.mxu0 %v31440_v15 }
0x1b03   : > { %29613 = vmatprep.subr.mxu0 %v31353_v13 }
0x1b99   : > { %v14475_v29 = vpop.f32.mrf.mxu1 }
0x1b9b   : > { %v29534_v31 = vpop.f32.mrf.mxu1 }
0x1ba1   : > { %v14379_v60 = vpop.f32.mrf.mxu0 }
0x1ba2   : > { %v14476_v43 = vadd.f32 %v14475_v29, %v14379_v60 }
0x1ba3   : > { %v14635_v34 = vpop.f32.mrf.mxu1  ;;  %v29521_v35 = vpop.f32.mrf.mxu0 }
0x1ba5   : > { %v29560_v36 = vpop.f32.mrf.mxu1 }
0x1bac   : > { %v14557_v18 = vpop.f32.mrf.mxu0 }
0x1bad   : > { %v14558_v45 = vadd.f32 %v14557_v18, %v14476_v43 }
0x1bae   : > { %v29547_v39 = vpop.f32.mrf.mxu0 }
0x1baf   : > { %v14797_v42 = vpop.f32.mrf.mxu1  ;;  %v14636_v46 = vadd.f32 %v14635_v34, %v14558_v45 }
0x1bb1   : > { %v29586_v8 = vpop.f32.mrf.mxu1 }
0x1bb7   : > { %v14721_v47 = vpop.f32.mrf.mxu0 }
0x1bb8   : > { %v14722_v38 = vadd.f32 %v14721_v47, %v14636_v46 }
0x1bb9   : > { %v29573_v49 = vpop.f32.mrf.mxu0 }
0x1bba   : > { %v14798_v50 = vadd.f32 %v14797_v42, %v14722_v38 }
0x1bbc   : > { %v14801_v51 = vsub.f32 %v14798_v50, %v31388_v0 }
0x1bbe   : > { %v14802_v44 = vadd.f32 %v14801_v51, %v33793_v52 }
0x1bc0   : > { %v14803_v53 = vmax.f32 %v31403_v6, %v14802_v44 }
0x1bc2   : > { %v14804_v54 = vmin.f32 %v31408_v7, %v14803_v53 }
0x1bc4   : > { %v14805_v55 = vsub.f32 %v14801_v51, %v14804_v54 }
0x1bc6   : > { %v33874_v48 = vadd.f32 %v14805_v55, %v33793_v52 }
0x1bc8   : > { %v14807_v57 = vsub.f32 %v14804_v54, %v33874_v48 }
0x1bca   : > { %v14809_v58 = vsel %vm75_vm1, %v14807_v57, 0 }
0x1bcb   : > { %v14881_v59 = vand.u32 4294901760, %v14809_v58 }
0x1bcd   : > { %v14882_v61 = vsub.f32 %v14809_v58, %v14881_v59  ;;  %29611 = vmatmul.mubr.f32.vlgmr.msra.gmra.mxu1 %v14881_v59 }
0x1bce   : > { %29627 = vmatpush3.msra.mxu1 %v31426_v10  ;;  %29636 = vmatprep.mubr.msk.f32.mxu1 %vm31354_vm0, %v31353_v13 }
0x1bcf   : > { %29628 = vmatprep.subr.mxu1 %v31353_v13  ;;  %v14883_v62 = vand.u32 4294901760, %v14882_v61 }
0x1bd0   : > { %29629 = vmatpush3.msra.mxu1 %v31429_v11 }
0x1bd1   : > { %29630 = vmatprep.subr.mxu1 %v31353_v13  ;;  %v14884_v52 = vsub.f32 %v14882_v61, %v14883_v62 }
0x1bd2   : > { %29631 = vmatpush3.msra.mxu1 %v31432_v12 }
0x1bd3   : > { %29632 = vmatprep.subr.mxu1 %v31353_v13  ;;  %v14885_v63 = vand.u32 4294901760, %v14884_v52 }
0x1bd4   : > { %29633 = vmatpush3.msra.mxu1 %v31436_v14 }
0x1bd5   : > { %29634 = vmatprep.subr.mxu1 %v31353_v13  ;;  %29598 = vmatmul.mubr.f32.vlgmr.msra.gmra.mxu0 %v14885_v63 }
0x1bd6   : > { %29614 = vmatpush3.msra.mxu0 %v31445_v16  ;;  %29635 = vmatpush3.msra.mxu1 %v31440_v15 }
0x1bd7   : > { %29615 = vmatprep.subr.mxu0 %v31353_v13  ;;  %29637 = vmatmul.mubr.f32.vlgmr.msra.gmra.mxu1 %v14883_v62 }
0x1bd8   : > { %29652 = vmatprep.subr.mxu1 %v31353_v13  ;;  %29616 = vmatpush3.msra.mxu0 %v31451_v17 }
0x1bd9   : > { %29653 = vmatpush3.msra.mxu1 %v31426_v10  ;;  %29617 = vmatprep.subr.mxu0 %v31353_v13 }
0x1bda   : > { %29654 = vmatprep.subr.mxu1 %v31353_v13  ;;  %29618 = vmatpush3.msra.mxu0 %v31458_v19 }
0x1bdb   : > { %29655 = vmatpush3.msra.mxu1 %v31429_v11  ;;  %29619 = vmatprep.subr.mxu0 %v31353_v13 }
0x1bdc   : > { %29656 = vmatprep.subr.mxu1 %v31353_v13  ;;  %29620 = vmatpush3.msra.mxu0 %v31462_v20 }
0x1bdd   : > { %29657 = vmatpush3.msra.mxu1 %v31432_v12  ;;  %29621 = vmatprep.subr.mxu0 %v31353_v13 }
0x1bde   : > { %29658 = vmatprep.subr.mxu1 %v31353_v13  ;;  %29622 = vmatpush3.msra.mxu0 %v31466_v21 }
0x1bdf   : > { %29623 = vmatprep.mubr.msk.f32.mxu0 %vm31354_vm0, %v31353_v13  ;;  %29659 = vmatpush3.msra.mxu1 %v31436_v14 }
0x1be0   : > { %29624 = vmatmul.mubr.f32.vlgmr.msra.gmra.mxu0 %v14882_v61  ;;  %29639 = vmatprep.subr.mxu0 %v31353_v13 }
0x1be1   : > { %29660 = vmatprep.subr.mxu1 %v31353_v13  ;;  %29640 = vmatpush3.msra.mxu0 %v31472_v22 }
0x1be2   : > { %29661 = vmatpush3.msra.mxu1 %v31440_v15  ;;  %29662 = vmatprep.mubr.msk.f32.mxu1 %vm31354_vm0, %v31353_v13 }
0x1be3   : > { %29641 = vmatprep.subr.mxu0 %v31353_v13  ;;  %29663 = vmatmul.mubr.f32.vlgmr.msra.gmra.mxu1 %v14881_v59 }
0x1be4   : > { %29642 = vmatpush3.msra.mxu0 %v31475_v23  ;;  %29649 = vmatprep.mubr.msk.f32.mxu0 %vm31354_vm0, %v31353_v13 }
0x1be5   : > { %29643 = vmatprep.subr.mxu0 %v31353_v13  ;;  %29678 = vmatprep.subr.mxu1 %v31353_v13 }
0x1be6   : > { %29644 = vmatpush3.msra.mxu0 %v31481_v25  ;;  %29679 = vmatpush3.msra.mxu1 %v31499_v32 }
0x1be7   : > { %29645 = vmatprep.subr.mxu0 %v31353_v13  ;;  %29680 = vmatprep.subr.mxu1 %v31353_v13 }
0x1be8   : > { %29646 = vmatpush3.msra.mxu0 %v31484_v26  ;;  %29681 = vmatpush3.msra.mxu1 %v31501_v33 }
0x1be9   : > { %29647 = vmatprep.subr.mxu0 %v31353_v13  ;;  %29682 = vmatprep.subr.mxu1 %v31353_v13 }
0x1bea   : > { %29648 = vmatpush3.msra.mxu0 %v31493_v30  ;;  %29683 = vmatpush3.msra.mxu1 %v31508_v37 }
0x1beb   : > { %29650 = vmatmul.mubr.f32.vlgmr.msra.gmra.mxu0 %v14881_v59  ;;  %29684 = vmatprep.subr.mxu1 %v31353_v13 }
0x1bec   : > { %29685 = vmatpush3.msra.mxu1 %v31515_v40  ;;  %29665 = vmatprep.subr.mxu0 %v31353_v13 }
0x1bed   : > { %29686 = vmatprep.subr.mxu1 %v31353_v13  ;;  %29666 = vmatpush3.msra.mxu0 %v31426_v10 }
0x1bee   : > { %29687 = vmatpush3.msra.mxu1 %v31519_v41  ;;  %29667 = vmatprep.subr.mxu0 %v31353_v13 }
0x1bef   : > { %29688 = vmatprep.mubr.msk.f32.mxu1 %vm31354_vm0, %v31353_v13  ;;  %29704 = vmatprep.subr.mxu1 %v31353_v13 }
0x1bf0   : > { %29668 = vmatpush3.msra.mxu0 %v31429_v11  ;;  %29675 = vmatprep.mubr.msk.f32.mxu0 %vm31354_vm0, %v31353_v13 }
0x1bf1   : > { %29669 = vmatprep.subr.mxu0 %v31353_v13 }
0x1bf2   : > { %29670 = vmatpush3.msra.mxu0 %v31432_v12 }
0x1bf3   : > { %29671 = vmatprep.subr.mxu0 %v31353_v13 }
0x1bf4   : > { %29672 = vmatpush3.msra.mxu0 %v31436_v14 }
0x1bf5   : > { %29673 = vmatprep.subr.mxu0 %v31353_v13 }
0x1bf6   : > { %29674 = vmatpush3.msra.mxu0 %v31440_v15 }
0x1bf7   : > { %29691 = vmatprep.subr.mxu0 %v31353_v13 }
0x1c8d   : > { %v14983_v24 = vpop.f32.mrf.mxu1 }
0x1c8f   : > { %v29612_v27 = vpop.f32.mrf.mxu1 }
0x1c95   : > { %v14887_v56 = vpop.f32.mrf.mxu0 }
0x1c96   : > { %v14984_v36 = vadd.f32 %v14983_v24, %v14887_v56 }
0x1c97   : > { %v15143_v28 = vpop.f32.mrf.mxu1  ;;  %v29599_v29 = vpop.f32.mrf.mxu0 }
0x1c99   : > { %v29638_v31 = vpop.f32.mrf.mxu1 }
0x1ca0   : > { %v15065_v60 = vpop.f32.mrf.mxu0 }
0x1ca1   : > { %v15066_v39 = vadd.f32 %v15065_v60, %v14984_v36 }
0x1ca2   : > { %v29625_v34 = vpop.f32.mrf.mxu0 }
0x1ca3   : > { %v15305_v35 = vpop.f32.mrf.mxu1  ;;  %v15144_v42 = vadd.f32 %v15143_v28, %v15066_v39 }
0x1ca5   : > { %v29664_v18 = vpop.f32.mrf.mxu1 }
0x1cab   : > { %v15229_v43 = vpop.f32.mrf.mxu0 }
0x1cac   : > { %v15230_v8 = vadd.f32 %v15229_v43, %v15144_v42 }
0x1cad   : > { %v29651_v45 = vpop.f32.mrf.mxu0 }
0x1cae   : > { %v15306_v46 = vadd.f32 %v15305_v35, %v15230_v8 }
0x1cb0   : > { %v15309_v47 = vsub.f32 %v15306_v46, %v31388_v0 }
0x1cb2   : > { %v15310_v38 = vadd.f32 %v15309_v47, %v33874_v48 }
0x1cb4   : > { %v15311_v49 = vmax.f32 %v31403_v6, %v15310_v38 }
0x1cb6   : > { %v15312_v50 = vmin.f32 %v31408_v7, %v15311_v49 }
0x1cb8   : > { %v15313_v51 = vsub.f32 %v15309_v47, %v15312_v50 }
0x1cba   : > { %v33955_v44 = vadd.f32 %v15313_v51, %v33874_v48 }
0x1cbc   : > { %v15315_v53 = vsub.f32 %v15312_v50, %v33955_v44 }
0x1cbe   : > { %v15317_v54 = vsel %vm75_vm1, %v15315_v53, 0 }
0x1cbf   : > { %v15389_v55 = vand.u32 4294901760, %v15317_v54 }
0x1cc1   : > { %v15390_v57 = vsub.f32 %v15317_v54, %v15389_v55  ;;  %29689 = vmatmul.mubr.f32.vlgmr.msra.gmra.mxu1 %v15389_v55 }
0x1cc2   : > { %29705 = vmatpush3.msra.mxu1 %v31426_v10  ;;  %29714 = vmatprep.mubr.msk.f32.mxu1 %vm31354_vm0, %v31353_v13 }
0x1cc3   : > { %29706 = vmatprep.subr.mxu1 %v31353_v13  ;;  %v15391_v58 = vand.u32 4294901760, %v15390_v57 }
0x1cc4   : > { %29707 = vmatpush3.msra.mxu1 %v31429_v11 }
0x1cc5   : > { %29708 = vmatprep.subr.mxu1 %v31353_v13  ;;  %v15392_v48 = vsub.f32 %v15390_v57, %v15391_v58 }
0x1cc6   : > { %29709 = vmatpush3.msra.mxu1 %v31432_v12 }
0x1cc7   : > { %29710 = vmatprep.subr.mxu1 %v31353_v13  ;;  %v15393_v59 = vand.u32 4294901760, %v15392_v48 }
0x1cc8   : > { %29711 = vmatpush3.msra.mxu1 %v31436_v14 }
0x1cc9   : > { %29712 = vmatprep.subr.mxu1 %v31353_v13  ;;  %29676 = vmatmul.mubr.f32.vlgmr.msra.gmra.mxu0 %v15393_v59 }
0x1cca   : > { %29692 = vmatpush3.msra.mxu0 %v31445_v16  ;;  %29713 = vmatpush3.msra.mxu1 %v31440_v15 }
0x1ccb   : > { %29693 = vmatprep.subr.mxu0 %v31353_v13  ;;  %29715 = vmatmul.mubr.f32.vlgmr.msra.gmra.mxu1 %v15391_v58 }
0x1ccc   : > { %29730 = vmatprep.subr.mxu1 %v31353_v13  ;;  %29694 = vmatpush3.msra.mxu0 %v31451_v17 }
0x1ccd   : > { %29731 = vmatpush3.msra.mxu1 %v31426_v10  ;;  %29695 = vmatprep.subr.mxu0 %v31353_v13 }
0x1cce   : > { %29732 = vmatprep.subr.mxu1 %v31353_v13  ;;  %29696 = vmatpush3.msra.mxu0 %v31458_v19 }
0x1ccf   : > { %29733 = vmatpush3.msra.mxu1 %v31429_v11  ;;  %29697 = vmatprep.subr.mxu0 %v31353_v13 }
0x1cd0   : > { %29734 = vmatprep.subr.mxu1 %v31353_v13  ;;  %29698 = vmatpush3.msra.mxu0 %v31462_v20 }
0x1cd1   : > { %29735 = vmatpush3.msra.mxu1 %v31432_v12  ;;  %29699 = vmatprep.subr.mxu0 %v31353_v13 }
0x1cd2   : > { %29736 = vmatprep.subr.mxu1 %v31353_v13  ;;  %29700 = vmatpush3.msra.mxu0 %v31466_v21 }
0x1cd3   : > { %29701 = vmatprep.mubr.msk.f32.mxu0 %vm31354_vm0, %v31353_v13  ;;  %29737 = vmatpush3.msra.mxu1 %v31436_v14 }
0x1cd4   : > { %29702 = vmatmul.mubr.f32.vlgmr.msra.gmra.mxu0 %v15390_v57  ;;  %29717 = vmatprep.subr.mxu0 %v31353_v13 }
0x1cd5   : > { %29738 = vmatprep.subr.mxu1 %v31353_v13  ;;  %29718 = vmatpush3.msra.mxu0 %v31472_v22 }
0x1cd6   : > { %29739 = vmatpush3.msra.mxu1 %v31440_v15  ;;  %29740 = vmatprep.mubr.msk.f32.mxu1 %vm31354_vm0, %v31353_v13 }
0x1cd7   : > { %29719 = vmatprep.subr.mxu0 %v31353_v13  ;;  %29741 = vmatmul.mubr.f32.vlgmr.msra.gmra.mxu1 %v15389_v55 }
0x1cd8   : > { %29720 = vmatpush3.msra.mxu0 %v31475_v23  ;;  %29727 = vmatprep.mubr.msk.f32.mxu0 %vm31354_vm0, %v31353_v13 }
0x1cd9   : > { %29721 = vmatprep.subr.mxu0 %v31353_v13  ;;  %29756 = vmatprep.subr.mxu1 %v31353_v13 }
0x1cda   : > { %29722 = vmatpush3.msra.mxu0 %v31481_v25  ;;  %29757 = vmatpush3.msra.mxu1 %v31499_v32 }
0x1cdb   : > { %29723 = vmatprep.subr.mxu0 %v31353_v13  ;;  %29758 = vmatprep.subr.mxu1 %v31353_v13 }
0x1cdc   : > { %29724 = vmatpush3.msra.mxu0 %v31484_v26  ;;  %29759 = vmatpush3.msra.mxu1 %v31501_v33 }
0x1cdd   : > { %29725 = vmatprep.subr.mxu0 %v31353_v13  ;;  %29760 = vmatprep.subr.mxu1 %v31353_v13 }
0x1cde   : > { %29726 = vmatpush3.msra.mxu0 %v31493_v30  ;;  %29761 = vmatpush3.msra.mxu1 %v31508_v37 }
0x1cdf   : > { %29728 = vmatmul.mubr.f32.vlgmr.msra.gmra.mxu0 %v15389_v55  ;;  %29762 = vmatprep.subr.mxu1 %v31353_v13 }
0x1ce0   : > { %29763 = vmatpush3.msra.mxu1 %v31515_v40  ;;  %29743 = vmatprep.subr.mxu0 %v31353_v13 }
0x1ce1   : > { %29764 = vmatprep.subr.mxu1 %v31353_v13  ;;  %29744 = vmatpush3.msra.mxu0 %v31426_v10 }
0x1ce2   : > { %29765 = vmatpush3.msra.mxu1 %v31519_v41  ;;  %29745 = vmatprep.subr.mxu0 %v31353_v13 }
0x1ce3   : > { %29766 = vmatprep.mubr.msk.f32.mxu1 %vm31354_vm0, %v31353_v13  ;;  %29782 = vmatprep.subr.mxu1 %v31353_v13 }
0x1ce4   : > { %29746 = vmatpush3.msra.mxu0 %v31429_v11  ;;  %29753 = vmatprep.mubr.msk.f32.mxu0 %vm31354_vm0, %v31353_v13 }
0x1ce5   : > { %29747 = vmatprep.subr.mxu0 %v31353_v13 }
0x1ce6   : > { %29748 = vmatpush3.msra.mxu0 %v31432_v12 }
0x1ce7   : > { %29749 = vmatprep.subr.mxu0 %v31353_v13 }
0x1ce8   : > { %29750 = vmatpush3.msra.mxu0 %v31436_v14 }
0x1ce9   : > { %29751 = vmatprep.subr.mxu0 %v31353_v13 }
0x1cea   : > { %29752 = vmatpush3.msra.mxu0 %v31440_v15 }
0x1ceb   : > { %29769 = vmatprep.subr.mxu0 %v31353_v13 }
0x1d81   : > { %v15491_v61 = vpop.f32.mrf.mxu1 }
0x1d83   : > { %v29690_v62 = vpop.f32.mrf.mxu1 }
0x1d89   : > { %v15395_v52 = vpop.f32.mrf.mxu0 }
0x1d8a   : > { %v15492_v31 = vadd.f32 %v15491_v61, %v15395_v52 }
0x1d8b   : > { %v15651_v63 = vpop.f32.mrf.mxu1  ;;  %v29677_v24 = vpop.f32.mrf.mxu0 }
0x1d8d   : > { %v29716_v27 = vpop.f32.mrf.mxu1 }
0x1d94   : > { %v15573_v56 = vpop.f32.mrf.mxu0 }
0x1d95   : > { %v15574_v34 = vadd.f32 %v15573_v56, %v15492_v31 }
0x1d96   : > { %v29703_v28 = vpop.f32.mrf.mxu0 }
0x1d97   : > { %v15813_v29 = vpop.f32.mrf.mxu1  ;;  %v15652_v35 = vadd.f32 %v15651_v63, %v15574_v34 }
0x1d99   : > { %v29742_v60 = vpop.f32.mrf.mxu1 }
0x1d9f   : > { %v15737_v36 = vpop.f32.mrf.mxu0 }
0x1da0   : > { %v15738_v18 = vadd.f32 %v15737_v36, %v15652_v35 }
0x1da1   : > { %v29729_v39 = vpop.f32.mrf.mxu0 }
0x1da2   : > { %v15814_v42 = vadd.f32 %v15813_v29, %v15738_v18 }
0x1da4   : > { %v15817_v43 = vsub.f32 %v15814_v42, %v31388_v0 }
0x1da6   : > { %v15818_v8 = vadd.f32 %v15817_v43, %v33955_v44 }
0x1da8   : > { %v15819_v45 = vmax.f32 %v31403_v6, %v15818_v8 }
0x1daa   : > { %v15820_v46 = vmin.f32 %v31408_v7, %v15819_v45 }
0x1dac   : > { %v15821_v47 = vsub.f32 %v15817_v43, %v15820_v46 }
0x1dae   : > { %v34036_v38 = vadd.f32 %v15821_v47, %v33955_v44 }
0x1db0   : > { %v15823_v49 = vsub.f32 %v15820_v46, %v34036_v38 }
0x1db2   : > { %v15825_v50 = vsel %vm75_vm1, %v15823_v49, 0 }
0x1db3   : > { %v15897_v51 = vand.u32 4294901760, %v15825_v50 }
0x1db5   : > { %v15898_v53 = vsub.f32 %v15825_v50, %v15897_v51  ;;  %29767 = vmatmul.mubr.f32.vlgmr.msra.gmra.mxu1 %v15897_v51 }
0x1db6   : > { %29783 = vmatpush3.msra.mxu1 %v31426_v10  ;;  %29792 = vmatprep.mubr.msk.f32.mxu1 %vm31354_vm0, %v31353_v13 }
0x1db7   : > { %29784 = vmatprep.subr.mxu1 %v31353_v13  ;;  %v15899_v54 = vand.u32 4294901760, %v15898_v53 }
0x1db8   : > { %29785 = vmatpush3.msra.mxu1 %v31429_v11 }
0x1db9   : > { %29786 = vmatprep.subr.mxu1 %v31353_v13  ;;  %v15900_v44 = vsub.f32 %v15898_v53, %v15899_v54 }
0x1dba   : > { %29787 = vmatpush3.msra.mxu1 %v31432_v12 }
0x1dbb   : > { %29788 = vmatprep.subr.mxu1 %v31353_v13  ;;  %v15901_v55 = vand.u32 4294901760, %v15900_v44 }
0x1dbc   : > { %29789 = vmatpush3.msra.mxu1 %v31436_v14 }
0x1dbd   : > { %29790 = vmatprep.subr.mxu1 %v31353_v13  ;;  %29754 = vmatmul.mubr.f32.vlgmr.msra.gmra.mxu0 %v15901_v55 }
0x1dbe   : > { %29770 = vmatpush3.msra.mxu0 %v31445_v16  ;;  %29791 = vmatpush3.msra.mxu1 %v31440_v15 }
0x1dbf   : > { %29771 = vmatprep.subr.mxu0 %v31353_v13  ;;  %29793 = vmatmul.mubr.f32.vlgmr.msra.gmra.mxu1 %v15899_v54 }
0x1dc0   : > { %29808 = vmatprep.subr.mxu1 %v31353_v13  ;;  %29772 = vmatpush3.msra.mxu0 %v31451_v17 }
0x1dc1   : > { %29809 = vmatpush3.msra.mxu1 %v31426_v10  ;;  %29773 = vmatprep.subr.mxu0 %v31353_v13 }
0x1dc2   : > { %29810 = vmatprep.subr.mxu1 %v31353_v13  ;;  %29774 = vmatpush3.msra.mxu0 %v31458_v19 }
0x1dc3   : > { %29811 = vmatpush3.msra.mxu1 %v31429_v11  ;;  %29775 = vmatprep.subr.mxu0 %v31353_v13 }
0x1dc4   : > { %29812 = vmatprep.subr.mxu1 %v31353_v13  ;;  %29776 = vmatpush3.msra.mxu0 %v31462_v20 }
0x1dc5   : > { %29813 = vmatpush3.msra.mxu1 %v31432_v12  ;;  %29777 = vmatprep.subr.mxu0 %v31353_v13 }
0x1dc6   : > { %29814 = vmatprep.subr.mxu1 %v31353_v13  ;;  %29778 = vmatpush3.msra.mxu0 %v31466_v21 }
0x1dc7   : > { %29779 = vmatprep.mubr.msk.f32.mxu0 %vm31354_vm0, %v31353_v13  ;;  %29815 = vmatpush3.msra.mxu1 %v31436_v14 }
0x1dc8   : > { %29780 = vmatmul.mubr.f32.vlgmr.msra.gmra.mxu0 %v15898_v53  ;;  %29795 = vmatprep.subr.mxu0 %v31353_v13 }
0x1dc9   : > { %29816 = vmatprep.subr.mxu1 %v31353_v13  ;;  %29796 = vmatpush3.msra.mxu0 %v31472_v22 }
0x1dca   : > { %29817 = vmatpush3.msra.mxu1 %v31440_v15  ;;  %29818 = vmatprep.mubr.msk.f32.mxu1 %vm31354_vm0, %v31353_v13 }
0x1dcb   : > { %29797 = vmatprep.subr.mxu0 %v31353_v13  ;;  %29819 = vmatmul.mubr.f32.vlgmr.msra.gmra.mxu1 %v15897_v51 }
0x1dcc   : > { %29798 = vmatpush3.msra.mxu0 %v31475_v23  ;;  %29805 = vmatprep.mubr.msk.f32.mxu0 %vm31354_vm0, %v31353_v13 }
0x1dcd   : > { %29799 = vmatprep.subr.mxu0 %v31353_v13  ;;  %29834 = vmatprep.subr.mxu1 %v31353_v13 }
0x1dce   : > { %29800 = vmatpush3.msra.mxu0 %v31481_v25  ;;  %29835 = vmatpush3.msra.mxu1 %v31499_v32 }
0x1dcf   : > { %29801 = vmatprep.subr.mxu0 %v31353_v13  ;;  %29836 = vmatprep.subr.mxu1 %v31353_v13 }
0x1dd0   : > { %29802 = vmatpush3.msra.mxu0 %v31484_v26  ;;  %29837 = vmatpush3.msra.mxu1 %v31501_v33 }
0x1dd1   : > { %29803 = vmatprep.subr.mxu0 %v31353_v13  ;;  %29838 = vmatprep.subr.mxu1 %v31353_v13 }
0x1dd2   : > { %29804 = vmatpush3.msra.mxu0 %v31493_v30  ;;  %29839 = vmatpush3.msra.mxu1 %v31508_v37 }
0x1dd3   : > { %29806 = vmatmul.mubr.f32.vlgmr.msra.gmra.mxu0 %v15897_v51  ;;  %29840 = vmatprep.subr.mxu1 %v31353_v13 }
0x1dd4   : > { %29841 = vmatpush3.msra.mxu1 %v31515_v40  ;;  %29821 = vmatprep.subr.mxu0 %v31353_v13 }
0x1dd5   : > { %29842 = vmatprep.subr.mxu1 %v31353_v13  ;;  %29822 = vmatpush3.msra.mxu0 %v31426_v10 }
0x1dd6   : > { %29843 = vmatpush3.msra.mxu1 %v31519_v41  ;;  %29823 = vmatprep.subr.mxu0 %v31353_v13 }
0x1dd7   : > { %29844 = vmatprep.mubr.msk.f32.mxu1 %vm31354_vm0, %v31353_v13  ;;  %29860 = vmatprep.subr.mxu1 %v31353_v13 }
0x1dd8   : > { %29824 = vmatpush3.msra.mxu0 %v31429_v11  ;;  %29831 = vmatprep.mubr.msk.f32.mxu0 %vm31354_vm0, %v31353_v13 }
0x1dd9   : > { %29825 = vmatprep.subr.mxu0 %v31353_v13 }
0x1dda   : > { %29826 = vmatpush3.msra.mxu0 %v31432_v12 }
0x1ddb   : > { %29827 = vmatprep.subr.mxu0 %v31353_v13 }
0x1ddc   : > { %29828 = vmatpush3.msra.mxu0 %v31436_v14 }
0x1ddd   : > { %29829 = vmatprep.subr.mxu0 %v31353_v13 }
0x1dde   : > { %29830 = vmatpush3.msra.mxu0 %v31440_v15 }
0x1ddf   : > { %29847 = vmatprep.subr.mxu0 %v31353_v13 }
0x1e75   : > { %v15999_v57 = vpop.f32.mrf.mxu1 }
0x1e77   : > { %v29768_v58 = vpop.f32.mrf.mxu1 }
0x1e7d   : > { %v15903_v48 = vpop.f32.mrf.mxu0 }
0x1e7e   : > { %v16000_v27 = vadd.f32 %v15999_v57, %v15903_v48 }
0x1e7f   : > { %v16159_v59 = vpop.f32.mrf.mxu1  ;;  %v29755_v61 = vpop.f32.mrf.mxu0 }
0x1e81   : > { %v29794_v62 = vpop.f32.mrf.mxu1 }
0x1e88   : > { %v16081_v52 = vpop.f32.mrf.mxu0 }
0x1e89   : > { %v16082_v28 = vadd.f32 %v16081_v52, %v16000_v27 }
0x1e8a   : > { %v29781_v63 = vpop.f32.mrf.mxu0 }
0x1e8b   : > { %v16321_v24 = vpop.f32.mrf.mxu1  ;;  %v16160_v29 = vadd.f32 %v16159_v59, %v16082_v28 }
0x1e8d   : > { %v29820_v56 = vpop.f32.mrf.mxu1 }
0x1e93   : > { %v16245_v31 = vpop.f32.mrf.mxu0 }
0x1e94   : > { %v16246_v60 = vadd.f32 %v16245_v31, %v16160_v29 }
0x1e95   : > { %v29807_v34 = vpop.f32.mrf.mxu0 }
0x1e96   : > { %v16322_v35 = vadd.f32 %v16321_v24, %v16246_v60 }
0x1e98   : > { %v16325_v36 = vsub.f32 %v16322_v35, %v31388_v0 }
0x1e9a   : > { %v16326_v18 = vadd.f32 %v16325_v36, %v34036_v38 }
0x1e9c   : > { %v16327_v39 = vmax.f32 %v31403_v6, %v16326_v18 }
0x1e9e   : > { %v16328_v42 = vmin.f32 %v31408_v7, %v16327_v39 }
0x1ea0   : > { %v16329_v43 = vsub.f32 %v16325_v36, %v16328_v42 }
0x1ea2   : > { %v34117_v8 = vadd.f32 %v16329_v43, %v34036_v38 }
0x1ea4   : > { %v16331_v45 = vsub.f32 %v16328_v42, %v34117_v8 }
0x1ea6   : > { %v16333_v46 = vsel %vm75_vm1, %v16331_v45, 0 }
0x1ea7   : > { %v16405_v47 = vand.u32 4294901760, %v16333_v46 }
0x1ea9   : > { %v16406_v49 = vsub.f32 %v16333_v46, %v16405_v47  ;;  %29845 = vmatmul.mubr.f32.vlgmr.msra.gmra.mxu1 %v16405_v47 }
0x1eaa   : > { %29861 = vmatpush3.msra.mxu1 %v31426_v10  ;;  %29870 = vmatprep.mubr.msk.f32.mxu1 %vm31354_vm0, %v31353_v13 }
0x1eab   : > { %29862 = vmatprep.subr.mxu1 %v31353_v13  ;;  %v16407_v50 = vand.u32 4294901760, %v16406_v49 }
0x1eac   : > { %29863 = vmatpush3.msra.mxu1 %v31429_v11 }
0x1ead   : > { %29864 = vmatprep.subr.mxu1 %v31353_v13  ;;  %v16408_v38 = vsub.f32 %v16406_v49, %v16407_v50 }
0x1eae   : > { %29865 = vmatpush3.msra.mxu1 %v31432_v12 }
0x1eaf   : > { %29866 = vmatprep.subr.mxu1 %v31353_v13  ;;  %v16409_v51 = vand.u32 4294901760, %v16408_v38 }
0x1eb0   : > { %29867 = vmatpush3.msra.mxu1 %v31436_v14 }
0x1eb1   : > { %29868 = vmatprep.subr.mxu1 %v31353_v13  ;;  %29832 = vmatmul.mubr.f32.vlgmr.msra.gmra.mxu0 %v16409_v51 }
0x1eb2   : > { %29848 = vmatpush3.msra.mxu0 %v31445_v16  ;;  %29869 = vmatpush3.msra.mxu1 %v31440_v15 }
0x1eb3   : > { %29849 = vmatprep.subr.mxu0 %v31353_v13  ;;  %29871 = vmatmul.mubr.f32.vlgmr.msra.gmra.mxu1 %v16407_v50 }
0x1eb4   : > { %29886 = vmatprep.subr.mxu1 %v31353_v13  ;;  %29850 = vmatpush3.msra.mxu0 %v31451_v17 }
0x1eb5   : > { %29887 = vmatpush3.msra.mxu1 %v31426_v10  ;;  %29851 = vmatprep.subr.mxu0 %v31353_v13 }
0x1eb6   : > { %29888 = vmatprep.subr.mxu1 %v31353_v13  ;;  %29852 = vmatpush3.msra.mxu0 %v31458_v19 }
0x1eb7   : > { %29889 = vmatpush3.msra.mxu1 %v31429_v11  ;;  %29853 = vmatprep.subr.mxu0 %v31353_v13 }
0x1eb8   : > { %29890 = vmatprep.subr.mxu1 %v31353_v13  ;;  %29854 = vmatpush3.msra.mxu0 %v31462_v20 }
0x1eb9   : > { %29891 = vmatpush3.msra.mxu1 %v31432_v12  ;;  %29855 = vmatprep.subr.mxu0 %v31353_v13 }
0x1eba   : > { %29892 = vmatprep.subr.mxu1 %v31353_v13  ;;  %29856 = vmatpush3.msra.mxu0 %v31466_v21 }
0x1ebb   : > { %29857 = vmatprep.mubr.msk.f32.mxu0 %vm31354_vm0, %v31353_v13  ;;  %29893 = vmatpush3.msra.mxu1 %v31436_v14 }
0x1ebc   : > { %29858 = vmatmul.mubr.f32.vlgmr.msra.gmra.mxu0 %v16406_v49  ;;  %29873 = vmatprep.subr.mxu0 %v31353_v13 }
0x1ebd   : > { %29894 = vmatprep.subr.mxu1 %v31353_v13  ;;  %29874 = vmatpush3.msra.mxu0 %v31472_v22 }
0x1ebe   : > { %29895 = vmatpush3.msra.mxu1 %v31440_v15  ;;  %29896 = vmatprep.mubr.msk.f32.mxu1 %vm31354_vm0, %v31353_v13 }
0x1ebf   : > { %29875 = vmatprep.subr.mxu0 %v31353_v13  ;;  %29897 = vmatmul.mubr.f32.vlgmr.msra.gmra.mxu1 %v16405_v47 }
0x1ec0   : > { %29876 = vmatpush3.msra.mxu0 %v31475_v23  ;;  %29883 = vmatprep.mubr.msk.f32.mxu0 %vm31354_vm0, %v31353_v13 }
0x1ec1   : > { %29877 = vmatprep.subr.mxu0 %v31353_v13  ;;  %29912 = vmatprep.subr.mxu1 %v31353_v13 }
0x1ec2   : > { %29878 = vmatpush3.msra.mxu0 %v31481_v25  ;;  %29913 = vmatpush3.msra.mxu1 %v31499_v32 }
0x1ec3   : > { %29879 = vmatprep.subr.mxu0 %v31353_v13  ;;  %29914 = vmatprep.subr.mxu1 %v31353_v13 }
0x1ec4   : > { %29880 = vmatpush3.msra.mxu0 %v31484_v26  ;;  %29915 = vmatpush3.msra.mxu1 %v31501_v33 }
0x1ec5   : > { %29881 = vmatprep.subr.mxu0 %v31353_v13  ;;  %29916 = vmatprep.subr.mxu1 %v31353_v13 }
0x1ec6   : > { %29882 = vmatpush3.msra.mxu0 %v31493_v30  ;;  %29917 = vmatpush3.msra.mxu1 %v31508_v37 }
0x1ec7   : > { %29884 = vmatmul.mubr.f32.vlgmr.msra.gmra.mxu0 %v16405_v47  ;;  %29918 = vmatprep.subr.mxu1 %v31353_v13 }
0x1ec8   : > { %29919 = vmatpush3.msra.mxu1 %v31515_v40  ;;  %29899 = vmatprep.subr.mxu0 %v31353_v13 }
0x1ec9   : > { %29920 = vmatprep.subr.mxu1 %v31353_v13  ;;  %29900 = vmatpush3.msra.mxu0 %v31426_v10 }
0x1eca   : > { %29921 = vmatpush3.msra.mxu1 %v31519_v41  ;;  %29901 = vmatprep.subr.mxu0 %v31353_v13 }
0x1ecb   : > { %29922 = vmatprep.mubr.msk.f32.mxu1 %vm31354_vm0, %v31353_v13  ;;  %29938 = vmatprep.subr.mxu1 %v31353_v13 }
0x1ecc   : > { %29902 = vmatpush3.msra.mxu0 %v31429_v11  ;;  %29909 = vmatprep.mubr.msk.f32.mxu0 %vm31354_vm0, %v31353_v13 }
0x1ecd   : > { %29903 = vmatprep.subr.mxu0 %v31353_v13 }
0x1ece   : > { %29904 = vmatpush3.msra.mxu0 %v31432_v12 }
0x1ecf   : > { %29905 = vmatprep.subr.mxu0 %v31353_v13 }
0x1ed0   : > { %29906 = vmatpush3.msra.mxu0 %v31436_v14 }
0x1ed1   : > { %29907 = vmatprep.subr.mxu0 %v31353_v13 }
0x1ed2   : > { %29908 = vmatpush3.msra.mxu0 %v31440_v15 }
0x1ed3   : > { %29925 = vmatprep.subr.mxu0 %v31353_v13 }
0x1f69   : > { %v16507_v53 = vpop.f32.mrf.mxu1 }
0x1f6b   : > { %v29846_v54 = vpop.f32.mrf.mxu1 }
0x1f71   : > { %v16411_v44 = vpop.f32.mrf.mxu0 }
0x1f72   : > { %v16508_v62 = vadd.f32 %v16507_v53, %v16411_v44 }
0x1f73   : > { %v16667_v55 = vpop.f32.mrf.mxu1  ;;  %v29833_v57 = vpop.f32.mrf.mxu0 }
0x1f75   : > { %v29872_v58 = vpop.f32.mrf.mxu1 }
0x1f7c   : > { %v16589_v48 = vpop.f32.mrf.mxu0 }
0x1f7d   : > { %v16590_v63 = vadd.f32 %v16589_v48, %v16508_v62 }
0x1f7e   : > { %v29859_v59 = vpop.f32.mrf.mxu0 }
0x1f7f   : > { %v16829_v61 = vpop.f32.mrf.mxu1  ;;  %v16668_v24 = vadd.f32 %v16667_v55, %v16590_v63 }
0x1f81   : > { %v29898_v52 = vpop.f32.mrf.mxu1 }
0x1f87   : > { %v16753_v27 = vpop.f32.mrf.mxu0 }
0x1f88   : > { %v16754_v56 = vadd.f32 %v16753_v27, %v16668_v24 }
0x1f89   : > { %v29885_v28 = vpop.f32.mrf.mxu0 }
0x1f8a   : > { %v16830_v29 = vadd.f32 %v16829_v61, %v16754_v56 }
0x1f8c   : > { %v16833_v31 = vsub.f32 %v16830_v29, %v31388_v0 }
0x1f8e   : > { %v16834_v60 = vadd.f32 %v16833_v31, %v34117_v8 }
0x1f90   : > { %v16835_v34 = vmax.f32 %v31403_v6, %v16834_v60 }
0x1f92   : > { %v16836_v35 = vmin.f32 %v31408_v7, %v16835_v34 }
0x1f94   : > { %v16837_v36 = vsub.f32 %v16833_v31, %v16836_v35 }
0x1f96   : > { %v34198_v18 = vadd.f32 %v16837_v36, %v34117_v8 }
0x1f98   : > { %v16839_v39 = vsub.f32 %v16836_v35, %v34198_v18 }
0x1f9a   : > { %v16841_v42 = vsel %vm75_vm1, %v16839_v39, 0 }
0x1f9b   : > { %v16913_v43 = vand.u32 4294901760, %v16841_v42 }
0x1f9d   : > { %v16914_v45 = vsub.f32 %v16841_v42, %v16913_v43  ;;  %29923 = vmatmul.mubr.f32.vlgmr.msra.gmra.mxu1 %v16913_v43 }
0x1f9e   : > { %29939 = vmatpush3.msra.mxu1 %v31426_v10  ;;  %29948 = vmatprep.mubr.msk.f32.mxu1 %vm31354_vm0, %v31353_v13 }
0x1f9f   : > { %29940 = vmatprep.subr.mxu1 %v31353_v13  ;;  %v16915_v46 = vand.u32 4294901760, %v16914_v45 }
0x1fa0   : > { %29941 = vmatpush3.msra.mxu1 %v31429_v11 }
0x1fa1   : > { %29942 = vmatprep.subr.mxu1 %v31353_v13  ;;  %v16916_v8 = vsub.f32 %v16914_v45, %v16915_v46 }
0x1fa2   : > { %29943 = vmatpush3.msra.mxu1 %v31432_v12 }
0x1fa3   : > { %29944 = vmatprep.subr.mxu1 %v31353_v13  ;;  %v16917_v47 = vand.u32 4294901760, %v16916_v8 }
0x1fa4   : > { %29945 = vmatpush3.msra.mxu1 %v31436_v14 }
0x1fa5   : > { %29946 = vmatprep.subr.mxu1 %v31353_v13  ;;  %29910 = vmatmul.mubr.f32.vlgmr.msra.gmra.mxu0 %v16917_v47 }
0x1fa6   : > { %29926 = vmatpush3.msra.mxu0 %v31445_v16  ;;  %29947 = vmatpush3.msra.mxu1 %v31440_v15 }
0x1fa7   : > { %29927 = vmatprep.subr.mxu0 %v31353_v13  ;;  %29949 = vmatmul.mubr.f32.vlgmr.msra.gmra.mxu1 %v16915_v46 }
0x1fa8   : > { %29964 = vmatprep.subr.mxu1 %v31353_v13  ;;  %29928 = vmatpush3.msra.mxu0 %v31451_v17 }
0x1fa9   : > { %29965 = vmatpush3.msra.mxu1 %v31426_v10  ;;  %29929 = vmatprep.subr.mxu0 %v31353_v13 }
0x1faa   : > { %29966 = vmatprep.subr.mxu1 %v31353_v13  ;;  %29930 = vmatpush3.msra.mxu0 %v31458_v19 }
0x1fab   : > { %29967 = vmatpush3.msra.mxu1 %v31429_v11  ;;  %29931 = vmatprep.subr.mxu0 %v31353_v13 }
0x1fac   : > { %29968 = vmatprep.subr.mxu1 %v31353_v13  ;;  %29932 = vmatpush3.msra.mxu0 %v31462_v20 }
0x1fad   : > { %29969 = vmatpush3.msra.mxu1 %v31432_v12  ;;  %29933 = vmatprep.subr.mxu0 %v31353_v13 }
0x1fae   : > { %29970 = vmatprep.subr.mxu1 %v31353_v13  ;;  %29934 = vmatpush3.msra.mxu0 %v31466_v21 }
0x1faf   : > { %29935 = vmatprep.mubr.msk.f32.mxu0 %vm31354_vm0, %v31353_v13  ;;  %29971 = vmatpush3.msra.mxu1 %v31436_v14 }
0x1fb0   : > { %29936 = vmatmul.mubr.f32.vlgmr.msra.gmra.mxu0 %v16914_v45  ;;  %29951 = vmatprep.subr.mxu0 %v31353_v13 }
0x1fb1   : > { %29972 = vmatprep.subr.mxu1 %v31353_v13  ;;  %29952 = vmatpush3.msra.mxu0 %v31472_v22 }
0x1fb2   : > { %29973 = vmatpush3.msra.mxu1 %v31440_v15  ;;  %29974 = vmatprep.mubr.msk.f32.mxu1 %vm31354_vm0, %v31353_v13 }
0x1fb3   : > { %29953 = vmatprep.subr.mxu0 %v31353_v13  ;;  %29975 = vmatmul.mubr.f32.vlgmr.msra.gmra.mxu1 %v16913_v43 }
0x1fb4   : > { %29954 = vmatpush3.msra.mxu0 %v31475_v23  ;;  %29961 = vmatprep.mubr.msk.f32.mxu0 %vm31354_vm0, %v31353_v13 }
0x1fb5   : > { %29955 = vmatprep.subr.mxu0 %v31353_v13  ;;  %29990 = vmatprep.subr.mxu1 %v31353_v13 }
0x1fb6   : > { %29956 = vmatpush3.msra.mxu0 %v31481_v25  ;;  %29991 = vmatpush3.msra.mxu1 %v31499_v32 }
0x1fb7   : > { %29957 = vmatprep.subr.mxu0 %v31353_v13  ;;  %29992 = vmatprep.subr.mxu1 %v31353_v13 }
0x1fb8   : > { %29958 = vmatpush3.msra.mxu0 %v31484_v26  ;;  %29993 = vmatpush3.msra.mxu1 %v31501_v33 }
0x1fb9   : > { %29959 = vmatprep.subr.mxu0 %v31353_v13  ;;  %29994 = vmatprep.subr.mxu1 %v31353_v13 }
0x1fba   : > { %29960 = vmatpush3.msra.mxu0 %v31493_v30  ;;  %29995 = vmatpush3.msra.mxu1 %v31508_v37 }
0x1fbb   : > { %29962 = vmatmul.mubr.f32.vlgmr.msra.gmra.mxu0 %v16913_v43  ;;  %29996 = vmatprep.subr.mxu1 %v31353_v13 }
0x1fbc   : > { %29997 = vmatpush3.msra.mxu1 %v31515_v40  ;;  %29977 = vmatprep.subr.mxu0 %v31353_v13 }
0x1fbd   : > { %29998 = vmatprep.subr.mxu1 %v31353_v13  ;;  %29978 = vmatpush3.msra.mxu0 %v31426_v10 }
0x1fbe   : > { %29999 = vmatpush3.msra.mxu1 %v31519_v41  ;;  %29979 = vmatprep.subr.mxu0 %v31353_v13 }
0x1fbf   : > { %30000 = vmatprep.mubr.msk.f32.mxu1 %vm31354_vm0, %v31353_v13  ;;  %30016 = vmatprep.subr.mxu1 %v31353_v13 }
0x1fc0   : > { %29980 = vmatpush3.msra.mxu0 %v31429_v11  ;;  %29987 = vmatprep.mubr.msk.f32.mxu0 %vm31354_vm0, %v31353_v13 }
0x1fc1   : > { %29981 = vmatprep.subr.mxu0 %v31353_v13 }
0x1fc2   : > { %29982 = vmatpush3.msra.mxu0 %v31432_v12 }
0x1fc3   : > { %29983 = vmatprep.subr.mxu0 %v31353_v13 }
0x1fc4   : > { %29984 = vmatpush3.msra.mxu0 %v31436_v14 }
0x1fc5   : > { %29985 = vmatprep.subr.mxu0 %v31353_v13 }
0x1fc6   : > { %29986 = vmatpush3.msra.mxu0 %v31440_v15 }
0x1fc7   : > { %30003 = vmatprep.subr.mxu0 %v31353_v13 }
0x205d   : > { %v17015_v49 = vpop.f32.mrf.mxu1 }
0x205f   : > { %v29924_v50 = vpop.f32.mrf.mxu1 }
0x2065   : > { %v16919_v38 = vpop.f32.mrf.mxu0 }
0x2066   : > { %v17016_v58 = vadd.f32 %v17015_v49, %v16919_v38 }
0x2067   : > { %v17175_v51 = vpop.f32.mrf.mxu1  ;;  %v29911_v53 = vpop.f32.mrf.mxu0 }
0x2069   : > { %v29950_v54 = vpop.f32.mrf.mxu1 }
0x2070   : > { %v17097_v44 = vpop.f32.mrf.mxu0 }
0x2071   : > { %v17098_v59 = vadd.f32 %v17097_v44, %v17016_v58 }
0x2072   : > { %v29937_v55 = vpop.f32.mrf.mxu0 }
0x2073   : > { %v17337_v57 = vpop.f32.mrf.mxu1  ;;  %v17176_v61 = vadd.f32 %v17175_v51, %v17098_v59 }
0x2075   : > { %v29976_v48 = vpop.f32.mrf.mxu1 }
0x207b   : > { %v17261_v62 = vpop.f32.mrf.mxu0 }
0x207c   : > { %v17262_v52 = vadd.f32 %v17261_v62, %v17176_v61 }
0x207d   : > { %v29963_v63 = vpop.f32.mrf.mxu0 }
0x207e   : > { %v17338_v24 = vadd.f32 %v17337_v57, %v17262_v52 }
0x2080   : > { %v17341_v27 = vsub.f32 %v17338_v24, %v31388_v0 }
0x2082   : > { %v17342_v56 = vadd.f32 %v17341_v27, %v34198_v18 }
0x2084   : > { %v17343_v28 = vmax.f32 %v31403_v6, %v17342_v56 }
0x2086   : > { %v17344_v29 = vmin.f32 %v31408_v7, %v17343_v28 }
0x2088   : > { %v17345_v31 = vsub.f32 %v17341_v27, %v17344_v29 }
0x208a   : > { %v34279_v60 = vadd.f32 %v17345_v31, %v34198_v18 }
0x208c   : > { %v17347_v34 = vsub.f32 %v17344_v29, %v34279_v60 }
0x208e   : > { %v17349_v35 = vsel %vm75_vm1, %v17347_v34, 0 }
0x208f   : > { %v17421_v36 = vand.u32 4294901760, %v17349_v35 }
0x2091   : > { %v17422_v39 = vsub.f32 %v17349_v35, %v17421_v36  ;;  %30001 = vmatmul.mubr.f32.vlgmr.msra.gmra.mxu1 %v17421_v36 }
0x2092   : > { %30017 = vmatpush3.msra.mxu1 %v31426_v10  ;;  %30026 = vmatprep.mubr.msk.f32.mxu1 %vm31354_vm0, %v31353_v13 }
0x2093   : > { %30018 = vmatprep.subr.mxu1 %v31353_v13  ;;  %v17423_v42 = vand.u32 4294901760, %v17422_v39 }
0x2094   : > { %30019 = vmatpush3.msra.mxu1 %v31429_v11 }
0x2095   : > { %30020 = vmatprep.subr.mxu1 %v31353_v13  ;;  %v17424_v18 = vsub.f32 %v17422_v39, %v17423_v42 }
0x2096   : > { %30021 = vmatpush3.msra.mxu1 %v31432_v12 }
0x2097   : > { %30022 = vmatprep.subr.mxu1 %v31353_v13  ;;  %v17425_v43 = vand.u32 4294901760, %v17424_v18 }
0x2098   : > { %30023 = vmatpush3.msra.mxu1 %v31436_v14 }
0x2099   : > { %30024 = vmatprep.subr.mxu1 %v31353_v13  ;;  %29988 = vmatmul.mubr.f32.vlgmr.msra.gmra.mxu0 %v17425_v43 }
0x209a   : > { %30004 = vmatpush3.msra.mxu0 %v31445_v16  ;;  %30025 = vmatpush3.msra.mxu1 %v31440_v15 }
0x209b   : > { %30005 = vmatprep.subr.mxu0 %v31353_v13  ;;  %30027 = vmatmul.mubr.f32.vlgmr.msra.gmra.mxu1 %v17423_v42 }
0x209c   : > { %30042 = vmatprep.subr.mxu1 %v31353_v13  ;;  %30006 = vmatpush3.msra.mxu0 %v31451_v17 }
0x209d   : > { %30043 = vmatpush3.msra.mxu1 %v31426_v10  ;;  %30007 = vmatprep.subr.mxu0 %v31353_v13 }
0x209e   : > { %30044 = vmatprep.subr.mxu1 %v31353_v13  ;;  %30008 = vmatpush3.msra.mxu0 %v31458_v19 }
0x209f   : > { %30045 = vmatpush3.msra.mxu1 %v31429_v11  ;;  %30009 = vmatprep.subr.mxu0 %v31353_v13 }
0x20a0   : > { %30046 = vmatprep.subr.mxu1 %v31353_v13  ;;  %30010 = vmatpush3.msra.mxu0 %v31462_v20 }
0x20a1   : > { %30047 = vmatpush3.msra.mxu1 %v31432_v12  ;;  %30011 = vmatprep.subr.mxu0 %v31353_v13 }
0x20a2   : > { %30048 = vmatprep.subr.mxu1 %v31353_v13  ;;  %30012 = vmatpush3.msra.mxu0 %v31466_v21 }
0x20a3   : > { %30013 = vmatprep.mubr.msk.f32.mxu0 %vm31354_vm0, %v31353_v13  ;;  %30049 = vmatpush3.msra.mxu1 %v31436_v14 }
0x20a4   : > { %30014 = vmatmul.mubr.f32.vlgmr.msra.gmra.mxu0 %v17422_v39  ;;  %30029 = vmatprep.subr.mxu0 %v31353_v13 }
0x20a5   : > { %30050 = vmatprep.subr.mxu1 %v31353_v13  ;;  %30030 = vmatpush3.msra.mxu0 %v31472_v22 }
0x20a6   : > { %30051 = vmatpush3.msra.mxu1 %v31440_v15  ;;  %30052 = vmatprep.mubr.msk.f32.mxu1 %vm31354_vm0, %v31353_v13 }
0x20a7   : > { %30031 = vmatprep.subr.mxu0 %v31353_v13  ;;  %30053 = vmatmul.mubr.f32.vlgmr.msra.gmra.mxu1 %v17421_v36 }
0x20a8   : > { %30032 = vmatpush3.msra.mxu0 %v31475_v23  ;;  %30039 = vmatprep.mubr.msk.f32.mxu0 %vm31354_vm0, %v31353_v13 }
0x20a9   : > { %30033 = vmatprep.subr.mxu0 %v31353_v13  ;;  %30068 = vmatprep.subr.mxu1 %v31353_v13 }
0x20aa   : > { %30034 = vmatpush3.msra.mxu0 %v31481_v25  ;;  %30069 = vmatpush3.msra.mxu1 %v31499_v32 }
0x20ab   : > { %30035 = vmatprep.subr.mxu0 %v31353_v13  ;;  %30070 = vmatprep.subr.mxu1 %v31353_v13 }
0x20ac   : > { %30036 = vmatpush3.msra.mxu0 %v31484_v26  ;;  %30071 = vmatpush3.msra.mxu1 %v31501_v33 }
0x20ad   : > { %30037 = vmatprep.subr.mxu0 %v31353_v13  ;;  %30072 = vmatprep.subr.mxu1 %v31353_v13 }
0x20ae   : > { %30038 = vmatpush3.msra.mxu0 %v31493_v30  ;;  %30073 = vmatpush3.msra.mxu1 %v31508_v37 }
0x20af   : > { %30040 = vmatmul.mubr.f32.vlgmr.msra.gmra.mxu0 %v17421_v36  ;;  %30074 = vmatprep.subr.mxu1 %v31353_v13 }
0x20b0   : > { %30075 = vmatpush3.msra.mxu1 %v31515_v40  ;;  %30055 = vmatprep.subr.mxu0 %v31353_v13 }
0x20b1   : > { %30076 = vmatprep.subr.mxu1 %v31353_v13  ;;  %30056 = vmatpush3.msra.mxu0 %v31426_v10 }
0x20b2   : > { %30077 = vmatpush3.msra.mxu1 %v31519_v41  ;;  %30057 = vmatprep.subr.mxu0 %v31353_v13 }
0x20b3   : > { %30078 = vmatprep.mubr.msk.f32.mxu1 %vm31354_vm0, %v31353_v13  ;;  %30094 = vmatprep.subr.mxu1 %v31353_v13 }
0x20b4   : > { %30058 = vmatpush3.msra.mxu0 %v31429_v11  ;;  %30065 = vmatprep.mubr.msk.f32.mxu0 %vm31354_vm0, %v31353_v13 }
0x20b5   : > { %30059 = vmatprep.subr.mxu0 %v31353_v13 }
0x20b6   : > { %30060 = vmatpush3.msra.mxu0 %v31432_v12 }
0x20b7   : > { %30061 = vmatprep.subr.mxu0 %v31353_v13 }
0x20b8   : > { %30062 = vmatpush3.msra.mxu0 %v31436_v14 }
0x20b9   : > { %30063 = vmatprep.subr.mxu0 %v31353_v13 }
0x20ba   : > { %30064 = vmatpush3.msra.mxu0 %v31440_v15 }
0x20bb   : > { %30081 = vmatprep.subr.mxu0 %v31353_v13 }
0x2151   : > { %v17523_v45 = vpop.f32.mrf.mxu1 }
0x2153   : > { %v30002_v46 = vpop.f32.mrf.mxu1 }
0x2159   : > { %v17427_v8 = vpop.f32.mrf.mxu0 }
0x215a   : > { %v17524_v54 = vadd.f32 %v17523_v45, %v17427_v8 }
0x215b   : > { %v17683_v47 = vpop.f32.mrf.mxu1  ;;  %v29989_v49 = vpop.f32.mrf.mxu0 }
0x215d   : > { %v30028_v50 = vpop.f32.mrf.mxu1 }
0x2164   : > { %v17605_v38 = vpop.f32.mrf.mxu0 }
0x2165   : > { %v17606_v55 = vadd.f32 %v17605_v38, %v17524_v54 }
0x2166   : > { %v30015_v51 = vpop.f32.mrf.mxu0 }
0x2167   : > { %v17845_v53 = vpop.f32.mrf.mxu1  ;;  %v17684_v57 = vadd.f32 %v17683_v47, %v17606_v55 }
0x2169   : > { %v30054_v44 = vpop.f32.mrf.mxu1 }
0x216f   : > { %v17769_v58 = vpop.f32.mrf.mxu0 }
0x2170   : > { %v17770_v48 = vadd.f32 %v17769_v58, %v17684_v57 }
0x2171   : > { %v30041_v59 = vpop.f32.mrf.mxu0 }
0x2172   : > { %v17846_v61 = vadd.f32 %v17845_v53, %v17770_v48 }
0x2174   : > { %v17849_v62 = vsub.f32 %v17846_v61, %v31388_v0 }
0x2176   : > { %v17850_v52 = vadd.f32 %v17849_v62, %v34279_v60 }
0x2178   : > { %v17851_v63 = vmax.f32 %v31403_v6, %v17850_v52 }
0x217a   : > { %v17852_v24 = vmin.f32 %v31408_v7, %v17851_v63 }
0x217c   : > { %v17853_v27 = vsub.f32 %v17849_v62, %v17852_v24 }
0x217e   : > { %v34360_v56 = vadd.f32 %v17853_v27, %v34279_v60 }
0x2180   : > { %v17855_v28 = vsub.f32 %v17852_v24, %v34360_v56 }
0x2182   : > { %v17857_v29 = vsel %vm75_vm1, %v17855_v28, 0 }
0x2183   : > { %v17929_v31 = vand.u32 4294901760, %v17857_v29 }
0x2185   : > { %v17930_v34 = vsub.f32 %v17857_v29, %v17929_v31  ;;  %30079 = vmatmul.mubr.f32.vlgmr.msra.gmra.mxu1 %v17929_v31 }
0x2186   : > { %30095 = vmatpush3.msra.mxu1 %v31426_v10  ;;  %30104 = vmatprep.mubr.msk.f32.mxu1 %vm31354_vm0, %v31353_v13 }
0x2187   : > { %30096 = vmatprep.subr.mxu1 %v31353_v13  ;;  %v17931_v35 = vand.u32 4294901760, %v17930_v34 }
0x2188   : > { %30097 = vmatpush3.msra.mxu1 %v31429_v11 }
0x2189   : > { %30098 = vmatprep.subr.mxu1 %v31353_v13  ;;  %v17932_v60 = vsub.f32 %v17930_v34, %v17931_v35 }
0x218a   : > { %30099 = vmatpush3.msra.mxu1 %v31432_v12 }
0x218b   : > { %30100 = vmatprep.subr.mxu1 %v31353_v13  ;;  %v17933_v36 = vand.u32 4294901760, %v17932_v60 }
0x218c   : > { %30101 = vmatpush3.msra.mxu1 %v31436_v14 }
0x218d   : > { %30102 = vmatprep.subr.mxu1 %v31353_v13  ;;  %30066 = vmatmul.mubr.f32.vlgmr.msra.gmra.mxu0 %v17933_v36 }
0x218e   : > { %30082 = vmatpush3.msra.mxu0 %v31445_v16  ;;  %30103 = vmatpush3.msra.mxu1 %v31440_v15 }
0x218f   : > { %30083 = vmatprep.subr.mxu0 %v31353_v13  ;;  %30105 = vmatmul.mubr.f32.vlgmr.msra.gmra.mxu1 %v17931_v35 }
0x2190   : > { %30120 = vmatprep.subr.mxu1 %v31353_v13  ;;  %30084 = vmatpush3.msra.mxu0 %v31451_v17 }
0x2191   : > { %30121 = vmatpush3.msra.mxu1 %v31426_v10  ;;  %30085 = vmatprep.subr.mxu0 %v31353_v13 }
0x2192   : > { %30122 = vmatprep.subr.mxu1 %v31353_v13  ;;  %30086 = vmatpush3.msra.mxu0 %v31458_v19 }
0x2193   : > { %30123 = vmatpush3.msra.mxu1 %v31429_v11  ;;  %30087 = vmatprep.subr.mxu0 %v31353_v13 }
0x2194   : > { %30124 = vmatprep.subr.mxu1 %v31353_v13  ;;  %30088 = vmatpush3.msra.mxu0 %v31462_v20 }
0x2195   : > { %30125 = vmatpush3.msra.mxu1 %v31432_v12  ;;  %30089 = vmatprep.subr.mxu0 %v31353_v13 }
0x2196   : > { %30126 = vmatprep.subr.mxu1 %v31353_v13  ;;  %30090 = vmatpush3.msra.mxu0 %v31466_v21 }
0x2197   : > { %30091 = vmatprep.mubr.msk.f32.mxu0 %vm31354_vm0, %v31353_v13  ;;  %30127 = vmatpush3.msra.mxu1 %v31436_v14 }
0x2198   : > { %30092 = vmatmul.mubr.f32.vlgmr.msra.gmra.mxu0 %v17930_v34  ;;  %30107 = vmatprep.subr.mxu0 %v31353_v13 }
0x2199   : > { %30128 = vmatprep.subr.mxu1 %v31353_v13  ;;  %30108 = vmatpush3.msra.mxu0 %v31472_v22 }
0x219a   : > { %30129 = vmatpush3.msra.mxu1 %v31440_v15  ;;  %30130 = vmatprep.mubr.msk.f32.mxu1 %vm31354_vm0, %v31353_v13 }
0x219b   : > { %30109 = vmatprep.subr.mxu0 %v31353_v13  ;;  %30131 = vmatmul.mubr.f32.vlgmr.msra.gmra.mxu1 %v17929_v31 }
0x219c   : > { %30110 = vmatpush3.msra.mxu0 %v31475_v23  ;;  %30117 = vmatprep.mubr.msk.f32.mxu0 %vm31354_vm0, %v31353_v13 }
0x219d   : > { %30111 = vmatprep.subr.mxu0 %v31353_v13  ;;  %30146 = vmatprep.subr.mxu1 %v31353_v13 }
0x219e   : > { %30112 = vmatpush3.msra.mxu0 %v31481_v25  ;;  %30147 = vmatpush3.msra.mxu1 %v31499_v32 }
0x219f   : > { %30113 = vmatprep.subr.mxu0 %v31353_v13  ;;  %30148 = vmatprep.subr.mxu1 %v31353_v13 }
0x21a0   : > { %30114 = vmatpush3.msra.mxu0 %v31484_v26  ;;  %30149 = vmatpush3.msra.mxu1 %v31501_v33 }
0x21a1   : > { %30115 = vmatprep.subr.mxu0 %v31353_v13  ;;  %30150 = vmatprep.subr.mxu1 %v31353_v13 }
0x21a2   : > { %30116 = vmatpush3.msra.mxu0 %v31493_v30  ;;  %30151 = vmatpush3.msra.mxu1 %v31508_v37 }
0x21a3   : > { %30118 = vmatmul.mubr.f32.vlgmr.msra.gmra.mxu0 %v17929_v31  ;;  %30152 = vmatprep.subr.mxu1 %v31353_v13 }
0x21a4   : > { %30153 = vmatpush3.msra.mxu1 %v31515_v40  ;;  %30133 = vmatprep.subr.mxu0 %v31353_v13 }
0x21a5   : > { %30154 = vmatprep.subr.mxu1 %v31353_v13  ;;  %30134 = vmatpush3.msra.mxu0 %v31426_v10 }
0x21a6   : > { %30155 = vmatpush3.msra.mxu1 %v31519_v41  ;;  %30135 = vmatprep.subr.mxu0 %v31353_v13 }
0x21a7   : > { %30156 = vmatprep.mubr.msk.f32.mxu1 %vm31354_vm0, %v31353_v13  ;;  %30172 = vmatprep.subr.mxu1 %v31353_v13 }
0x21a8   : > { %30136 = vmatpush3.msra.mxu0 %v31429_v11  ;;  %30143 = vmatprep.mubr.msk.f32.mxu0 %vm31354_vm0, %v31353_v13 }
0x21a9   : > { %30137 = vmatprep.subr.mxu0 %v31353_v13 }
0x21aa   : > { %30138 = vmatpush3.msra.mxu0 %v31432_v12 }
0x21ab   : > { %30139 = vmatprep.subr.mxu0 %v31353_v13 }
0x21ac   : > { %30140 = vmatpush3.msra.mxu0 %v31436_v14 }
0x21ad   : > { %30141 = vmatprep.subr.mxu0 %v31353_v13 }
0x21ae   : > { %30142 = vmatpush3.msra.mxu0 %v31440_v15 }
0x21af   : > { %30159 = vmatprep.subr.mxu0 %v31353_v13 }
0x2245   : > { %v18031_v39 = vpop.f32.mrf.mxu1 }
0x2247   : > { %v30080_v42 = vpop.f32.mrf.mxu1 }
0x224d   : > { %v17935_v18 = vpop.f32.mrf.mxu0 }
0x224e   : > { %v18032_v50 = vadd.f32 %v18031_v39, %v17935_v18 }
0x224f   : > { %v18191_v43 = vpop.f32.mrf.mxu1  ;;  %v30067_v45 = vpop.f32.mrf.mxu0 }
0x2251   : > { %v30106_v46 = vpop.f32.mrf.mxu1 }
0x2258   : > { %v18113_v8 = vpop.f32.mrf.mxu0 }
0x2259   : > { %v18114_v51 = vadd.f32 %v18113_v8, %v18032_v50 }
0x225a   : > { %v30093_v47 = vpop.f32.mrf.mxu0 }
0x225b   : > { %v18353_v49 = vpop.f32.mrf.mxu1  ;;  %v18192_v53 = vadd.f32 %v18191_v43, %v18114_v51 }
0x225d   : > { %v30132_v38 = vpop.f32.mrf.mxu1 }
0x2263   : > { %v18277_v54 = vpop.f32.mrf.mxu0 }
0x2264   : > { %v18278_v44 = vadd.f32 %v18277_v54, %v18192_v53 }
0x2265   : > { %v30119_v55 = vpop.f32.mrf.mxu0 }
0x2266   : > { %v18354_v57 = vadd.f32 %v18353_v49, %v18278_v44 }
0x2268   : > { %v18357_v58 = vsub.f32 %v18354_v57, %v31388_v0 }
0x226a   : > { %v18358_v48 = vadd.f32 %v18357_v58, %v34360_v56 }
0x226c   : > { %v18359_v59 = vmax.f32 %v31403_v6, %v18358_v48 }
0x226e   : > { %v18360_v61 = vmin.f32 %v31408_v7, %v18359_v59 }
0x2270   : > { %v18361_v62 = vsub.f32 %v18357_v58, %v18360_v61 }
0x2272   : > { %v34441_v52 = vadd.f32 %v18361_v62, %v34360_v56 }
0x2274   : > { %v18363_v63 = vsub.f32 %v18360_v61, %v34441_v52 }
0x2276   : > { %v18365_v24 = vsel %vm75_vm1, %v18363_v63, 0 }
0x2277   : > { %v18437_v27 = vand.u32 4294901760, %v18365_v24 }
0x2279   : > { %v18438_v28 = vsub.f32 %v18365_v24, %v18437_v27  ;;  %30157 = vmatmul.mubr.f32.vlgmr.msra.gmra.mxu1 %v18437_v27 }
0x227a   : > { %30173 = vmatpush3.msra.mxu1 %v31426_v10  ;;  %30182 = vmatprep.mubr.msk.f32.mxu1 %vm31354_vm0, %v31353_v13 }
0x227b   : > { %30174 = vmatprep.subr.mxu1 %v31353_v13  ;;  %v18439_v29 = vand.u32 4294901760, %v18438_v28 }
0x227c   : > { %30175 = vmatpush3.msra.mxu1 %v31429_v11 }
0x227d   : > { %30176 = vmatprep.subr.mxu1 %v31353_v13  ;;  %v18440_v56 = vsub.f32 %v18438_v28, %v18439_v29 }
0x227e   : > { %30177 = vmatpush3.msra.mxu1 %v31432_v12 }
0x227f   : > { %30178 = vmatprep.subr.mxu1 %v31353_v13  ;;  %v18441_v31 = vand.u32 4294901760, %v18440_v56 }
0x2280   : > { %30179 = vmatpush3.msra.mxu1 %v31436_v14 }
0x2281   : > { %30180 = vmatprep.subr.mxu1 %v31353_v13  ;;  %30144 = vmatmul.mubr.f32.vlgmr.msra.gmra.mxu0 %v18441_v31 }
0x2282   : > { %30160 = vmatpush3.msra.mxu0 %v31445_v16  ;;  %30181 = vmatpush3.msra.mxu1 %v31440_v15 }
0x2283   : > { %30161 = vmatprep.subr.mxu0 %v31353_v13  ;;  %30183 = vmatmul.mubr.f32.vlgmr.msra.gmra.mxu1 %v18439_v29 }
0x2284   : > { %30198 = vmatprep.subr.mxu1 %v31353_v13  ;;  %30162 = vmatpush3.msra.mxu0 %v31451_v17 }
0x2285   : > { %30199 = vmatpush3.msra.mxu1 %v31426_v10  ;;  %30163 = vmatprep.subr.mxu0 %v31353_v13 }
0x2286   : > { %30200 = vmatprep.subr.mxu1 %v31353_v13  ;;  %30164 = vmatpush3.msra.mxu0 %v31458_v19 }
0x2287   : > { %30201 = vmatpush3.msra.mxu1 %v31429_v11  ;;  %30165 = vmatprep.subr.mxu0 %v31353_v13 }
0x2288   : > { %30202 = vmatprep.subr.mxu1 %v31353_v13  ;;  %30166 = vmatpush3.msra.mxu0 %v31462_v20 }
0x2289   : > { %30203 = vmatpush3.msra.mxu1 %v31432_v12  ;;  %30167 = vmatprep.subr.mxu0 %v31353_v13 }
0x228a   : > { %30204 = vmatprep.subr.mxu1 %v31353_v13  ;;  %30168 = vmatpush3.msra.mxu0 %v31466_v21 }
0x228b   : > { %30169 = vmatprep.mubr.msk.f32.mxu0 %vm31354_vm0, %v31353_v13  ;;  %30205 = vmatpush3.msra.mxu1 %v31436_v14 }
0x228c   : > { %30170 = vmatmul.mubr.f32.vlgmr.msra.gmra.mxu0 %v18438_v28  ;;  %30185 = vmatprep.subr.mxu0 %v31353_v13 }
0x228d   : > { %30206 = vmatprep.subr.mxu1 %v31353_v13  ;;  %30186 = vmatpush3.msra.mxu0 %v31472_v22 }
0x228e   : > { %30207 = vmatpush3.msra.mxu1 %v31440_v15  ;;  %30208 = vmatprep.mubr.msk.f32.mxu1 %vm31354_vm0, %v31353_v13 }
0x228f   : > { %30187 = vmatprep.subr.mxu0 %v31353_v13  ;;  %30209 = vmatmul.mubr.f32.vlgmr.msra.gmra.mxu1 %v18437_v27 }
0x2290   : > { %30188 = vmatpush3.msra.mxu0 %v31475_v23  ;;  %30195 = vmatprep.mubr.msk.f32.mxu0 %vm31354_vm0, %v31353_v13 }
0x2291   : > { %30189 = vmatprep.subr.mxu0 %v31353_v13  ;;  %30224 = vmatprep.subr.mxu1 %v31353_v13 }
0x2292   : > { %30190 = vmatpush3.msra.mxu0 %v31481_v25  ;;  %30225 = vmatpush3.msra.mxu1 %v31499_v32 }
0x2293   : > { %30191 = vmatprep.subr.mxu0 %v31353_v13  ;;  %30226 = vmatprep.subr.mxu1 %v31353_v13 }
0x2294   : > { %30192 = vmatpush3.msra.mxu0 %v31484_v26  ;;  %30227 = vmatpush3.msra.mxu1 %v31501_v33 }
0x2295   : > { %30193 = vmatprep.subr.mxu0 %v31353_v13  ;;  %30228 = vmatprep.subr.mxu1 %v31353_v13 }
0x2296   : > { %30194 = vmatpush3.msra.mxu0 %v31493_v30  ;;  %30229 = vmatpush3.msra.mxu1 %v31508_v37 }
0x2297   : > { %30196 = vmatmul.mubr.f32.vlgmr.msra.gmra.mxu0 %v18437_v27  ;;  %30230 = vmatprep.subr.mxu1 %v31353_v13 }
0x2298   : > { %30231 = vmatpush3.msra.mxu1 %v31515_v40  ;;  %30211 = vmatprep.subr.mxu0 %v31353_v13 }
0x2299   : > { %30232 = vmatprep.subr.mxu1 %v31353_v13  ;;  %30212 = vmatpush3.msra.mxu0 %v31426_v10 }
0x229a   : > { %30233 = vmatpush3.msra.mxu1 %v31519_v41  ;;  %30213 = vmatprep.subr.mxu0 %v31353_v13 }
0x229b   : > { %30234 = vmatprep.mubr.msk.f32.mxu1 %vm31354_vm0, %v31353_v13  ;;  %30250 = vmatprep.subr.mxu1 %v31353_v13 }
0x229c   : > { %30214 = vmatpush3.msra.mxu0 %v31429_v11  ;;  %30221 = vmatprep.mubr.msk.f32.mxu0 %vm31354_vm0, %v31353_v13 }
0x229d   : > { %30215 = vmatprep.subr.mxu0 %v31353_v13 }
0x229e   : > { %30216 = vmatpush3.msra.mxu0 %v31432_v12 }
0x229f   : > { %30217 = vmatprep.subr.mxu0 %v31353_v13 }
0x22a0   : > { %30218 = vmatpush3.msra.mxu0 %v31436_v14 }
0x22a1   : > { %30219 = vmatprep.subr.mxu0 %v31353_v13 }
0x22a2   : > { %30220 = vmatpush3.msra.mxu0 %v31440_v15 }
0x22a3   : > { %30237 = vmatprep.subr.mxu0 %v31353_v13 }
0x2339   : > { %v18539_v34 = vpop.f32.mrf.mxu1 }
0x233b   : > { %v30158_v35 = vpop.f32.mrf.mxu1 }
0x2341   : > { %v18443_v60 = vpop.f32.mrf.mxu0 }
0x2342   : > { %v18540_v46 = vadd.f32 %v18539_v34, %v18443_v60 }
0x2343   : > { %v18699_v36 = vpop.f32.mrf.mxu1  ;;  %v30145_v39 = vpop.f32.mrf.mxu0 }
0x2345   : > { %v30184_v42 = vpop.f32.mrf.mxu1 }
0x234c   : > { %v18621_v18 = vpop.f32.mrf.mxu0 }
0x234d   : > { %v18622_v47 = vadd.f32 %v18621_v18, %v18540_v46 }
0x234e   : > { %v30171_v43 = vpop.f32.mrf.mxu0 }
0x234f   : > { %v18861_v45 = vpop.f32.mrf.mxu1  ;;  %v18700_v49 = vadd.f32 %v18699_v36, %v18622_v47 }
0x2351   : > { %v30210_v8 = vpop.f32.mrf.mxu1 }
0x2357   : > { %v18785_v50 = vpop.f32.mrf.mxu0 }
0x2358   : > { %v18786_v38 = vadd.f32 %v18785_v50, %v18700_v49 }
0x2359   : > { %v30197_v51 = vpop.f32.mrf.mxu0 }
0x235a   : > { %v18862_v53 = vadd.f32 %v18861_v45, %v18786_v38 }
0x235c   : > { %v18865_v54 = vsub.f32 %v18862_v53, %v31388_v0 }
0x235e   : > { %v18866_v44 = vadd.f32 %v18865_v54, %v34441_v52 }
0x2360   : > { %v18867_v55 = vmax.f32 %v31403_v6, %v18866_v44 }
0x2362   : > { %v18868_v57 = vmin.f32 %v31408_v7, %v18867_v55 }
0x2364   : > { %v18869_v58 = vsub.f32 %v18865_v54, %v18868_v57 }
0x2366   : > { %v34522_v48 = vadd.f32 %v18869_v58, %v34441_v52 }
0x2368   : > { %v18871_v59 = vsub.f32 %v18868_v57, %v34522_v48 }
0x236a   : > { %v18873_v61 = vsel %vm75_vm1, %v18871_v59, 0 }
0x236b   : > { %v18945_v62 = vand.u32 4294901760, %v18873_v61 }
0x236d   : > { %v18946_v63 = vsub.f32 %v18873_v61, %v18945_v62  ;;  %30235 = vmatmul.mubr.f32.vlgmr.msra.gmra.mxu1 %v18945_v62 }
0x236e   : > { %30251 = vmatpush3.msra.mxu1 %v31426_v10  ;;  %30260 = vmatprep.mubr.msk.f32.mxu1 %vm31354_vm0, %v31353_v13 }
0x236f   : > { %30252 = vmatprep.subr.mxu1 %v31353_v13  ;;  %v18947_v24 = vand.u32 4294901760, %v18946_v63 }
0x2370   : > { %30253 = vmatpush3.msra.mxu1 %v31429_v11 }
0x2371   : > { %30254 = vmatprep.subr.mxu1 %v31353_v13  ;;  %v18948_v52 = vsub.f32 %v18946_v63, %v18947_v24 }
0x2372   : > { %30255 = vmatpush3.msra.mxu1 %v31432_v12 }
0x2373   : > { %30256 = vmatprep.subr.mxu1 %v31353_v13  ;;  %v18949_v27 = vand.u32 4294901760, %v18948_v52 }
0x2374   : > { %30257 = vmatpush3.msra.mxu1 %v31436_v14 }
0x2375   : > { %30258 = vmatprep.subr.mxu1 %v31353_v13  ;;  %30222 = vmatmul.mubr.f32.vlgmr.msra.gmra.mxu0 %v18949_v27 }
0x2376   : > { %30238 = vmatpush3.msra.mxu0 %v31445_v16  ;;  %30259 = vmatpush3.msra.mxu1 %v31440_v15 }
0x2377   : > { %30239 = vmatprep.subr.mxu0 %v31353_v13  ;;  %30261 = vmatmul.mubr.f32.vlgmr.msra.gmra.mxu1 %v18947_v24 }
0x2378   : > { %30276 = vmatprep.subr.mxu1 %v31353_v13  ;;  %30240 = vmatpush3.msra.mxu0 %v31451_v17 }
0x2379   : > { %30277 = vmatpush3.msra.mxu1 %v31426_v10  ;;  %30241 = vmatprep.subr.mxu0 %v31353_v13 }
0x237a   : > { %30278 = vmatprep.subr.mxu1 %v31353_v13  ;;  %30242 = vmatpush3.msra.mxu0 %v31458_v19 }
0x237b   : > { %30279 = vmatpush3.msra.mxu1 %v31429_v11  ;;  %30243 = vmatprep.subr.mxu0 %v31353_v13 }
0x237c   : > { %30280 = vmatprep.subr.mxu1 %v31353_v13  ;;  %30244 = vmatpush3.msra.mxu0 %v31462_v20 }
0x237d   : > { %30281 = vmatpush3.msra.mxu1 %v31432_v12  ;;  %30245 = vmatprep.subr.mxu0 %v31353_v13 }
0x237e   : > { %30282 = vmatprep.subr.mxu1 %v31353_v13  ;;  %30246 = vmatpush3.msra.mxu0 %v31466_v21 }
0x237f   : > { %30247 = vmatprep.mubr.msk.f32.mxu0 %vm31354_vm0, %v31353_v13  ;;  %30283 = vmatpush3.msra.mxu1 %v31436_v14 }
0x2380   : > { %30248 = vmatmul.mubr.f32.vlgmr.msra.gmra.mxu0 %v18946_v63  ;;  %30263 = vmatprep.subr.mxu0 %v31353_v13 }
0x2381   : > { %30284 = vmatprep.subr.mxu1 %v31353_v13  ;;  %30264 = vmatpush3.msra.mxu0 %v31472_v22 }
0x2382   : > { %30285 = vmatpush3.msra.mxu1 %v31440_v15  ;;  %30286 = vmatprep.mubr.msk.f32.mxu1 %vm31354_vm0, %v31353_v13 }
0x2383   : > { %30265 = vmatprep.subr.mxu0 %v31353_v13  ;;  %30287 = vmatmul.mubr.f32.vlgmr.msra.gmra.mxu1 %v18945_v62 }
0x2384   : > { %30266 = vmatpush3.msra.mxu0 %v31475_v23  ;;  %30273 = vmatprep.mubr.msk.f32.mxu0 %vm31354_vm0, %v31353_v13 }
0x2385   : > { %30267 = vmatprep.subr.mxu0 %v31353_v13  ;;  %30302 = vmatprep.subr.mxu1 %v31353_v13 }
0x2386   : > { %30268 = vmatpush3.msra.mxu0 %v31481_v25  ;;  %30303 = vmatpush3.msra.mxu1 %v31499_v32 }
0x2387   : > { %30269 = vmatprep.subr.mxu0 %v31353_v13  ;;  %30304 = vmatprep.subr.mxu1 %v31353_v13 }
0x2388   : > { %30270 = vmatpush3.msra.mxu0 %v31484_v26  ;;  %30305 = vmatpush3.msra.mxu1 %v31501_v33 }
0x2389   : > { %30271 = vmatprep.subr.mxu0 %v31353_v13  ;;  %30306 = vmatprep.subr.mxu1 %v31353_v13 }
0x238a   : > { %30272 = vmatpush3.msra.mxu0 %v31493_v30  ;;  %30307 = vmatpush3.msra.mxu1 %v31508_v37 }
0x238b   : > { %30274 = vmatmul.mubr.f32.vlgmr.msra.gmra.mxu0 %v18945_v62  ;;  %30308 = vmatprep.subr.mxu1 %v31353_v13 }
0x238c   : > { %30309 = vmatpush3.msra.mxu1 %v31515_v40  ;;  %30289 = vmatprep.subr.mxu0 %v31353_v13 }
0x238d   : > { %30310 = vmatprep.subr.mxu1 %v31353_v13  ;;  %30290 = vmatpush3.msra.mxu0 %v31426_v10 }
0x238e   : > { %30311 = vmatpush3.msra.mxu1 %v31519_v41  ;;  %30291 = vmatprep.subr.mxu0 %v31353_v13 }
0x238f   : > { %30312 = vmatprep.mubr.msk.f32.mxu1 %vm31354_vm0, %v31353_v13  ;;  %30328 = vmatprep.subr.mxu1 %v31353_v13 }
0x2390   : > { %30292 = vmatpush3.msra.mxu0 %v31429_v11  ;;  %30299 = vmatprep.mubr.msk.f32.mxu0 %vm31354_vm0, %v31353_v13 }
0x2391   : > { %30293 = vmatprep.subr.mxu0 %v31353_v13 }
0x2392   : > { %30294 = vmatpush3.msra.mxu0 %v31432_v12 }
0x2393   : > { %30295 = vmatprep.subr.mxu0 %v31353_v13 }
0x2394   : > { %30296 = vmatpush3.msra.mxu0 %v31436_v14 }
0x2395   : > { %30297 = vmatprep.subr.mxu0 %v31353_v13 }
0x2396   : > { %30298 = vmatpush3.msra.mxu0 %v31440_v15 }
0x2397   : > { %30315 = vmatprep.subr.mxu0 %v31353_v13 }
0x242d   : > { %v19047_v28 = vpop.f32.mrf.mxu1 }
0x242f   : > { %v30236_v29 = vpop.f32.mrf.mxu1 }
0x2435   : > { %v18951_v56 = vpop.f32.mrf.mxu0 }
0x2436   : > { %v19048_v42 = vadd.f32 %v19047_v28, %v18951_v56 }
0x2437   : > { %v19207_v31 = vpop.f32.mrf.mxu1  ;;  %v30223_v34 = vpop.f32.mrf.mxu0 }
0x2439   : > { %v30262_v35 = vpop.f32.mrf.mxu1 }
0x2440   : > { %v19129_v60 = vpop.f32.mrf.mxu0 }
0x2441   : > { %v19130_v43 = vadd.f32 %v19129_v60, %v19048_v42 }
0x2442   : > { %v30249_v36 = vpop.f32.mrf.mxu0 }
0x2443   : > { %v19369_v39 = vpop.f32.mrf.mxu1  ;;  %v19208_v45 = vadd.f32 %v19207_v31, %v19130_v43 }
0x2445   : > { %v30288_v18 = vpop.f32.mrf.mxu1 }
0x244b   : > { %v19293_v46 = vpop.f32.mrf.mxu0 }
0x244c   : > { %v19294_v8 = vadd.f32 %v19293_v46, %v19208_v45 }
0x244d   : > { %v30275_v47 = vpop.f32.mrf.mxu0 }
0x244e   : > { %v19370_v49 = vadd.f32 %v19369_v39, %v19294_v8 }
0x2450   : > { %v19373_v50 = vsub.f32 %v19370_v49, %v31388_v0 }
0x2452   : > { %v19374_v38 = vadd.f32 %v19373_v50, %v34522_v48 }
0x2454   : > { %v19375_v51 = vmax.f32 %v31403_v6, %v19374_v38 }
0x2456   : > { %v19376_v53 = vmin.f32 %v31408_v7, %v19375_v51 }
0x2458   : > { %v19377_v54 = vsub.f32 %v19373_v50, %v19376_v53 }
0x245a   : > { %v34603_v44 = vadd.f32 %v19377_v54, %v34522_v48 }
0x245c   : > { %v19379_v55 = vsub.f32 %v19376_v53, %v34603_v44 }
0x245e   : > { %v19381_v57 = vsel %vm75_vm1, %v19379_v55, 0 }
0x245f   : > { %v19453_v58 = vand.u32 4294901760, %v19381_v57 }
0x2461   : > { %v19454_v59 = vsub.f32 %v19381_v57, %v19453_v58  ;;  %30313 = vmatmul.mubr.f32.vlgmr.msra.gmra.mxu1 %v19453_v58 }
0x2462   : > { %30329 = vmatpush3.msra.mxu1 %v31426_v10  ;;  %30338 = vmatprep.mubr.msk.f32.mxu1 %vm31354_vm0, %v31353_v13 }
0x2463   : > { %30330 = vmatprep.subr.mxu1 %v31353_v13  ;;  %v19455_v61 = vand.u32 4294901760, %v19454_v59 }
0x2464   : > { %30331 = vmatpush3.msra.mxu1 %v31429_v11 }
0x2465   : > { %30332 = vmatprep.subr.mxu1 %v31353_v13  ;;  %v19456_v48 = vsub.f32 %v19454_v59, %v19455_v61 }
0x2466   : > { %30333 = vmatpush3.msra.mxu1 %v31432_v12 }
0x2467   : > { %30334 = vmatprep.subr.mxu1 %v31353_v13  ;;  %v19457_v62 = vand.u32 4294901760, %v19456_v48 }
0x2468   : > { %30335 = vmatpush3.msra.mxu1 %v31436_v14 }
0x2469   : > { %30336 = vmatprep.subr.mxu1 %v31353_v13  ;;  %30300 = vmatmul.mubr.f32.vlgmr.msra.gmra.mxu0 %v19457_v62 }
0x246a   : > { %30316 = vmatpush3.msra.mxu0 %v31445_v16  ;;  %30337 = vmatpush3.msra.mxu1 %v31440_v15 }
0x246b   : > { %30317 = vmatprep.subr.mxu0 %v31353_v13  ;;  %30339 = vmatmul.mubr.f32.vlgmr.msra.gmra.mxu1 %v19455_v61 }
0x246c   : > { %30354 = vmatprep.subr.mxu1 %v31353_v13  ;;  %30318 = vmatpush3.msra.mxu0 %v31451_v17 }
0x246d   : > { %30355 = vmatpush3.msra.mxu1 %v31426_v10  ;;  %30319 = vmatprep.subr.mxu0 %v31353_v13 }
0x246e   : > { %30356 = vmatprep.subr.mxu1 %v31353_v13  ;;  %30320 = vmatpush3.msra.mxu0 %v31458_v19 }
0x246f   : > { %30357 = vmatpush3.msra.mxu1 %v31429_v11  ;;  %30321 = vmatprep.subr.mxu0 %v31353_v13 }
0x2470   : > { %30358 = vmatprep.subr.mxu1 %v31353_v13  ;;  %30322 = vmatpush3.msra.mxu0 %v31462_v20 }
0x2471   : > { %30359 = vmatpush3.msra.mxu1 %v31432_v12  ;;  %30323 = vmatprep.subr.mxu0 %v31353_v13 }
0x2472   : > { %30360 = vmatprep.subr.mxu1 %v31353_v13  ;;  %30324 = vmatpush3.msra.mxu0 %v31466_v21 }
0x2473   : > { %30325 = vmatprep.mubr.msk.f32.mxu0 %vm31354_vm0, %v31353_v13  ;;  %30361 = vmatpush3.msra.mxu1 %v31436_v14 }
0x2474   : > { %30326 = vmatmul.mubr.f32.vlgmr.msra.gmra.mxu0 %v19454_v59  ;;  %30341 = vmatprep.subr.mxu0 %v31353_v13 }
0x2475   : > { %30362 = vmatprep.subr.mxu1 %v31353_v13  ;;  %30342 = vmatpush3.msra.mxu0 %v31472_v22 }
0x2476   : > { %30363 = vmatpush3.msra.mxu1 %v31440_v15  ;;  %30364 = vmatprep.mubr.msk.f32.mxu1 %vm31354_vm0, %v31353_v13 }
0x2477   : > { %30343 = vmatprep.subr.mxu0 %v31353_v13  ;;  %30365 = vmatmul.mubr.f32.vlgmr.msra.gmra.mxu1 %v19453_v58 }
0x2478   : > { %30344 = vmatpush3.msra.mxu0 %v31475_v23  ;;  %30351 = vmatprep.mubr.msk.f32.mxu0 %vm31354_vm0, %v31353_v13 }
0x2479   : > { %30345 = vmatprep.subr.mxu0 %v31353_v13  ;;  %30380 = vmatprep.subr.mxu1 %v31353_v13 }
0x247a   : > { %30346 = vmatpush3.msra.mxu0 %v31481_v25  ;;  %30381 = vmatpush3.msra.mxu1 %v31499_v32 }
0x247b   : > { %30347 = vmatprep.subr.mxu0 %v31353_v13  ;;  %30382 = vmatprep.subr.mxu1 %v31353_v13 }
0x247c   : > { %30348 = vmatpush3.msra.mxu0 %v31484_v26  ;;  %30383 = vmatpush3.msra.mxu1 %v31501_v33 }
0x247d   : > { %30349 = vmatprep.subr.mxu0 %v31353_v13  ;;  %30384 = vmatprep.subr.mxu1 %v31353_v13 }
0x247e   : > { %30350 = vmatpush3.msra.mxu0 %v31493_v30  ;;  %30385 = vmatpush3.msra.mxu1 %v31508_v37 }
0x247f   : > { %30352 = vmatmul.mubr.f32.vlgmr.msra.gmra.mxu0 %v19453_v58  ;;  %30386 = vmatprep.subr.mxu1 %v31353_v13 }
0x2480   : > { %30387 = vmatpush3.msra.mxu1 %v31515_v40  ;;  %30367 = vmatprep.subr.mxu0 %v31353_v13 }
0x2481   : > { %30388 = vmatprep.subr.mxu1 %v31353_v13  ;;  %30368 = vmatpush3.msra.mxu0 %v31426_v10 }
0x2482   : > { %30389 = vmatpush3.msra.mxu1 %v31519_v41  ;;  %30369 = vmatprep.subr.mxu0 %v31353_v13 }
0x2483   : > { %30390 = vmatprep.mubr.msk.f32.mxu1 %vm31354_vm0, %v31353_v13  ;;  %30406 = vmatprep.subr.mxu1 %v31353_v13 }
0x2484   : > { %30370 = vmatpush3.msra.mxu0 %v31429_v11  ;;  %30377 = vmatprep.mubr.msk.f32.mxu0 %vm31354_vm0, %v31353_v13 }
0x2485   : > { %30371 = vmatprep.subr.mxu0 %v31353_v13 }
0x2486   : > { %30372 = vmatpush3.msra.mxu0 %v31432_v12 }
0x2487   : > { %30373 = vmatprep.subr.mxu0 %v31353_v13 }
0x2488   : > { %30374 = vmatpush3.msra.mxu0 %v31436_v14 }
0x2489   : > { %30375 = vmatprep.subr.mxu0 %v31353_v13 }
0x248a   : > { %30376 = vmatpush3.msra.mxu0 %v31440_v15 }
0x248b   : > { %30393 = vmatprep.subr.mxu0 %v31353_v13 }
0x2521   : > { %v19555_v63 = vpop.f32.mrf.mxu1 }
0x2523   : > { %v30314_v24 = vpop.f32.mrf.mxu1 }
0x2529   : > { %v19459_v52 = vpop.f32.mrf.mxu0 }
0x252a   : > { %v19556_v35 = vadd.f32 %v19555_v63, %v19459_v52 }
0x252b   : > { %v19715_v27 = vpop.f32.mrf.mxu1  ;;  %v30301_v28 = vpop.f32.mrf.mxu0 }
0x252d   : > { %v30340_v29 = vpop.f32.mrf.mxu1 }
0x2534   : > { %v19637_v56 = vpop.f32.mrf.mxu0 }
0x2535   : > { %v19638_v36 = vadd.f32 %v19637_v56, %v19556_v35 }
0x2536   : > { %v30327_v31 = vpop.f32.mrf.mxu0 }
0x2537   : > { %v19877_v34 = vpop.f32.mrf.mxu1  ;;  %v19716_v39 = vadd.f32 %v19715_v27, %v19638_v36 }
0x2539   : > { %v30366_v60 = vpop.f32.mrf.mxu1 }
0x253f   : > { %v19801_v42 = vpop.f32.mrf.mxu0 }
0x2540   : > { %v19802_v18 = vadd.f32 %v19801_v42, %v19716_v39 }
0x2541   : > { %v30353_v43 = vpop.f32.mrf.mxu0 }
0x2542   : > { %v19878_v45 = vadd.f32 %v19877_v34, %v19802_v18 }
0x2544   : > { %v19881_v46 = vsub.f32 %v19878_v45, %v31388_v0 }
0x2546   : > { %v19882_v8 = vadd.f32 %v19881_v46, %v34603_v44 }
0x2548   : > { %v19883_v47 = vmax.f32 %v31403_v6, %v19882_v8 }
0x254a   : > { %v19884_v49 = vmin.f32 %v31408_v7, %v19883_v47 }
0x254c   : > { %v19885_v50 = vsub.f32 %v19881_v46, %v19884_v49 }
0x254e   : > { %v34684_v38 = vadd.f32 %v19885_v50, %v34603_v44 }
0x2550   : > { %v19887_v51 = vsub.f32 %v19884_v49, %v34684_v38 }
0x2552   : > { %v19889_v53 = vsel %vm75_vm1, %v19887_v51, 0 }
0x2553   : > { %v19961_v54 = vand.u32 4294901760, %v19889_v53 }
0x2555   : > { %v19962_v55 = vsub.f32 %v19889_v53, %v19961_v54  ;;  %30391 = vmatmul.mubr.f32.vlgmr.msra.gmra.mxu1 %v19961_v54 }
0x2556   : > { %30407 = vmatpush3.msra.mxu1 %v31426_v10  ;;  %30416 = vmatprep.mubr.msk.f32.mxu1 %vm31354_vm0, %v31353_v13 }
0x2557   : > { %30408 = vmatprep.subr.mxu1 %v31353_v13  ;;  %v19963_v57 = vand.u32 4294901760, %v19962_v55 }
0x2558   : > { %30409 = vmatpush3.msra.mxu1 %v31429_v11 }
0x2559   : > { %30410 = vmatprep.subr.mxu1 %v31353_v13  ;;  %v19964_v44 = vsub.f32 %v19962_v55, %v19963_v57 }
0x255a   : > { %30411 = vmatpush3.msra.mxu1 %v31432_v12 }
0x255b   : > { %30412 = vmatprep.subr.mxu1 %v31353_v13  ;;  %v19965_v58 = vand.u32 4294901760, %v19964_v44 }
0x255c   : > { %30413 = vmatpush3.msra.mxu1 %v31436_v14 }
0x255d   : > { %30414 = vmatprep.subr.mxu1 %v31353_v13  ;;  %30378 = vmatmul.mubr.f32.vlgmr.msra.gmra.mxu0 %v19965_v58 }
0x255e   : > { %30394 = vmatpush3.msra.mxu0 %v31445_v16  ;;  %30415 = vmatpush3.msra.mxu1 %v31440_v15 }
0x255f   : > { %30395 = vmatprep.subr.mxu0 %v31353_v13  ;;  %30417 = vmatmul.mubr.f32.vlgmr.msra.gmra.mxu1 %v19963_v57 }
0x2560   : > { %30432 = vmatprep.subr.mxu1 %v31353_v13  ;;  %30396 = vmatpush3.msra.mxu0 %v31451_v17 }
0x2561   : > { %30433 = vmatpush3.msra.mxu1 %v31426_v10  ;;  %30397 = vmatprep.subr.mxu0 %v31353_v13 }
0x2562   : > { %30434 = vmatprep.subr.mxu1 %v31353_v13  ;;  %30398 = vmatpush3.msra.mxu0 %v31458_v19 }
0x2563   : > { %30435 = vmatpush3.msra.mxu1 %v31429_v11  ;;  %30399 = vmatprep.subr.mxu0 %v31353_v13 }
0x2564   : > { %30436 = vmatprep.subr.mxu1 %v31353_v13  ;;  %30400 = vmatpush3.msra.mxu0 %v31462_v20 }
0x2565   : > { %30437 = vmatpush3.msra.mxu1 %v31432_v12  ;;  %30401 = vmatprep.subr.mxu0 %v31353_v13 }
0x2566   : > { %30438 = vmatprep.subr.mxu1 %v31353_v13  ;;  %30402 = vmatpush3.msra.mxu0 %v31466_v21 }
0x2567   : > { %30403 = vmatprep.mubr.msk.f32.mxu0 %vm31354_vm0, %v31353_v13  ;;  %30439 = vmatpush3.msra.mxu1 %v31436_v14 }
0x2568   : > { %30404 = vmatmul.mubr.f32.vlgmr.msra.gmra.mxu0 %v19962_v55  ;;  %30419 = vmatprep.subr.mxu0 %v31353_v13 }
0x2569   : > { %30440 = vmatprep.subr.mxu1 %v31353_v13  ;;  %30420 = vmatpush3.msra.mxu0 %v31472_v22 }
0x256a   : > { %30441 = vmatpush3.msra.mxu1 %v31440_v15  ;;  %30442 = vmatprep.mubr.msk.f32.mxu1 %vm31354_vm0, %v31353_v13 }
0x256b   : > { %30421 = vmatprep.subr.mxu0 %v31353_v13  ;;  %30443 = vmatmul.mubr.f32.vlgmr.msra.gmra.mxu1 %v19961_v54 }
0x256c   : > { %30422 = vmatpush3.msra.mxu0 %v31475_v23  ;;  %30429 = vmatprep.mubr.msk.f32.mxu0 %vm31354_vm0, %v31353_v13 }
0x256d   : > { %30423 = vmatprep.subr.mxu0 %v31353_v13  ;;  %30458 = vmatprep.subr.mxu1 %v31353_v13 }
0x256e   : > { %30424 = vmatpush3.msra.mxu0 %v31481_v25  ;;  %30459 = vmatpush3.msra.mxu1 %v31499_v32 }
0x256f   : > { %30425 = vmatprep.subr.mxu0 %v31353_v13  ;;  %30460 = vmatprep.subr.mxu1 %v31353_v13 }
0x2570   : > { %30426 = vmatpush3.msra.mxu0 %v31484_v26  ;;  %30461 = vmatpush3.msra.mxu1 %v31501_v33 }
0x2571   : > { %30427 = vmatprep.subr.mxu0 %v31353_v13  ;;  %30462 = vmatprep.subr.mxu1 %v31353_v13 }
0x2572   : > { %30428 = vmatpush3.msra.mxu0 %v31493_v30  ;;  %30463 = vmatpush3.msra.mxu1 %v31508_v37 }
0x2573   : > { %30430 = vmatmul.mubr.f32.vlgmr.msra.gmra.mxu0 %v19961_v54  ;;  %30464 = vmatprep.subr.mxu1 %v31353_v13 }
0x2574   : > { %30465 = vmatpush3.msra.mxu1 %v31515_v40  ;;  %30445 = vmatprep.subr.mxu0 %v31353_v13 }
0x2575   : > { %30466 = vmatprep.subr.mxu1 %v31353_v13  ;;  %30446 = vmatpush3.msra.mxu0 %v31426_v10 }
0x2576   : > { %30467 = vmatpush3.msra.mxu1 %v31519_v41  ;;  %30447 = vmatprep.subr.mxu0 %v31353_v13 }
0x2577   : > { %30468 = vmatprep.mubr.msk.f32.mxu1 %vm31354_vm0, %v31353_v13  ;;  %30484 = vmatprep.subr.mxu1 %v31353_v13 }
0x2578   : > { %30448 = vmatpush3.msra.mxu0 %v31429_v11  ;;  %30455 = vmatprep.mubr.msk.f32.mxu0 %vm31354_vm0, %v31353_v13 }
0x2579   : > { %30449 = vmatprep.subr.mxu0 %v31353_v13 }
0x257a   : > { %30450 = vmatpush3.msra.mxu0 %v31432_v12 }
0x257b   : > { %30451 = vmatprep.subr.mxu0 %v31353_v13 }
0x257c   : > { %30452 = vmatpush3.msra.mxu0 %v31436_v14 }
0x257d   : > { %30453 = vmatprep.subr.mxu0 %v31353_v13 }
0x257e   : > { %30454 = vmatpush3.msra.mxu0 %v31440_v15 }
0x257f   : > { %30471 = vmatprep.subr.mxu0 %v31353_v13 }
0x2615   : > { %v20063_v59 = vpop.f32.mrf.mxu1 }
0x2617   : > { %v30392_v61 = vpop.f32.mrf.mxu1 }
0x261d   : > { %v19967_v48 = vpop.f32.mrf.mxu0 }
0x261e   : > { %v20064_v29 = vadd.f32 %v20063_v59, %v19967_v48 }
0x261f   : > { %v20223_v62 = vpop.f32.mrf.mxu1  ;;  %v30379_v63 = vpop.f32.mrf.mxu0 }
0x2621   : > { %v30418_v24 = vpop.f32.mrf.mxu1 }
0x2628   : > { %v20145_v52 = vpop.f32.mrf.mxu0 }
0x2629   : > { %v20146_v31 = vadd.f32 %v20145_v52, %v20064_v29 }
0x262a   : > { %v30405_v27 = vpop.f32.mrf.mxu0 }
0x262b   : > { %v20385_v28 = vpop.f32.mrf.mxu1  ;;  %v20224_v34 = vadd.f32 %v20223_v62, %v20146_v31 }
0x262d   : > { %v30444_v56 = vpop.f32.mrf.mxu1 }
0x2633   : > { %v20309_v35 = vpop.f32.mrf.mxu0 }
0x2634   : > { %v20310_v60 = vadd.f32 %v20309_v35, %v20224_v34 }
0x2635   : > { %v30431_v36 = vpop.f32.mrf.mxu0 }
0x2636   : > { %v20386_v39 = vadd.f32 %v20385_v28, %v20310_v60 }
0x2638   : > { %v20389_v42 = vsub.f32 %v20386_v39, %v31388_v0 }
0x263a   : > { %v20390_v18 = vadd.f32 %v20389_v42, %v34684_v38 }
0x263c   : > { %v20391_v43 = vmax.f32 %v31403_v6, %v20390_v18 }
0x263e   : > { %v20392_v45 = vmin.f32 %v31408_v7, %v20391_v43 }
0x2640   : > { %v20393_v46 = vsub.f32 %v20389_v42, %v20392_v45 }
0x2642   : > { %v34765_v8 = vadd.f32 %v20393_v46, %v34684_v38 }
0x2644   : > { %v20395_v47 = vsub.f32 %v20392_v45, %v34765_v8 }
0x2646   : > { %v20397_v49 = vsel %vm75_vm1, %v20395_v47, 0 }
0x2647   : > { %v20469_v50 = vand.u32 4294901760, %v20397_v49 }
0x2649   : > { %v20470_v51 = vsub.f32 %v20397_v49, %v20469_v50  ;;  %30469 = vmatmul.mubr.f32.vlgmr.msra.gmra.mxu1 %v20469_v50 }
0x264a   : > { %30485 = vmatpush3.msra.mxu1 %v31426_v10  ;;  %30494 = vmatprep.mubr.msk.f32.mxu1 %vm31354_vm0, %v31353_v13 }
0x264b   : > { %30486 = vmatprep.subr.mxu1 %v31353_v13  ;;  %v20471_v53 = vand.u32 4294901760, %v20470_v51 }
0x264c   : > { %30487 = vmatpush3.msra.mxu1 %v31429_v11 }
0x264d   : > { %30488 = vmatprep.subr.mxu1 %v31353_v13  ;;  %v20472_v38 = vsub.f32 %v20470_v51, %v20471_v53 }
0x264e   : > { %30489 = vmatpush3.msra.mxu1 %v31432_v12 }
0x264f   : > { %30490 = vmatprep.subr.mxu1 %v31353_v13  ;;  %v20473_v54 = vand.u32 4294901760, %v20472_v38 }
0x2650   : > { %30491 = vmatpush3.msra.mxu1 %v31436_v14 }
0x2651   : > { %30492 = vmatprep.subr.mxu1 %v31353_v13  ;;  %30456 = vmatmul.mubr.f32.vlgmr.msra.gmra.mxu0 %v20473_v54 }
0x2652   : > { %30472 = vmatpush3.msra.mxu0 %v31445_v16  ;;  %30493 = vmatpush3.msra.mxu1 %v31440_v15 }
0x2653   : > { %30473 = vmatprep.subr.mxu0 %v31353_v13  ;;  %30495 = vmatmul.mubr.f32.vlgmr.msra.gmra.mxu1 %v20471_v53 }
0x2654   : > { %30510 = vmatprep.subr.mxu1 %v31353_v13  ;;  %30474 = vmatpush3.msra.mxu0 %v31451_v17 }
0x2655   : > { %30511 = vmatpush3.msra.mxu1 %v31426_v10  ;;  %30475 = vmatprep.subr.mxu0 %v31353_v13 }
0x2656   : > { %30512 = vmatprep.subr.mxu1 %v31353_v13  ;;  %30476 = vmatpush3.msra.mxu0 %v31458_v19 }
0x2657   : > { %30513 = vmatpush3.msra.mxu1 %v31429_v11  ;;  %30477 = vmatprep.subr.mxu0 %v31353_v13 }
0x2658   : > { %30514 = vmatprep.subr.mxu1 %v31353_v13  ;;  %30478 = vmatpush3.msra.mxu0 %v31462_v20 }
0x2659   : > { %30515 = vmatpush3.msra.mxu1 %v31432_v12  ;;  %30479 = vmatprep.subr.mxu0 %v31353_v13 }
0x265a   : > { %30516 = vmatprep.subr.mxu1 %v31353_v13  ;;  %30480 = vmatpush3.msra.mxu0 %v31466_v21 }
0x265b   : > { %30481 = vmatprep.mubr.msk.f32.mxu0 %vm31354_vm0, %v31353_v13  ;;  %30517 = vmatpush3.msra.mxu1 %v31436_v14 }
0x265c   : > { %30482 = vmatmul.mubr.f32.vlgmr.msra.gmra.mxu0 %v20470_v51  ;;  %30497 = vmatprep.subr.mxu0 %v31353_v13 }
0x265d   : > { %30518 = vmatprep.subr.mxu1 %v31353_v13  ;;  %30498 = vmatpush3.msra.mxu0 %v31472_v22 }
0x265e   : > { %30519 = vmatpush3.msra.mxu1 %v31440_v15  ;;  %30520 = vmatprep.mubr.msk.f32.mxu1 %vm31354_vm0, %v31353_v13 }
0x265f   : > { %30499 = vmatprep.subr.mxu0 %v31353_v13  ;;  %30521 = vmatmul.mubr.f32.vlgmr.msra.gmra.mxu1 %v20469_v50 }
0x2660   : > { %30500 = vmatpush3.msra.mxu0 %v31475_v23  ;;  %30507 = vmatprep.mubr.msk.f32.mxu0 %vm31354_vm0, %v31353_v13 }
0x2661   : > { %30501 = vmatprep.subr.mxu0 %v31353_v13  ;;  %30536 = vmatprep.subr.mxu1 %v31353_v13 }
0x2662   : > { %30502 = vmatpush3.msra.mxu0 %v31481_v25  ;;  %30537 = vmatpush3.msra.mxu1 %v31499_v32 }
0x2663   : > { %30503 = vmatprep.subr.mxu0 %v31353_v13  ;;  %30538 = vmatprep.subr.mxu1 %v31353_v13 }
0x2664   : > { %30504 = vmatpush3.msra.mxu0 %v31484_v26  ;;  %30539 = vmatpush3.msra.mxu1 %v31501_v33 }
0x2665   : > { %30505 = vmatprep.subr.mxu0 %v31353_v13  ;;  %30540 = vmatprep.subr.mxu1 %v31353_v13 }
0x2666   : > { %30506 = vmatpush3.msra.mxu0 %v31493_v30  ;;  %30541 = vmatpush3.msra.mxu1 %v31508_v37 }
0x2667   : > { %30508 = vmatmul.mubr.f32.vlgmr.msra.gmra.mxu0 %v20469_v50  ;;  %30542 = vmatprep.subr.mxu1 %v31353_v13 }
0x2668   : > { %30543 = vmatpush3.msra.mxu1 %v31515_v40  ;;  %30523 = vmatprep.subr.mxu0 %v31353_v13 }
0x2669   : > { %30544 = vmatprep.subr.mxu1 %v31353_v13  ;;  %30524 = vmatpush3.msra.mxu0 %v31426_v10 }
0x266a   : > { %30545 = vmatpush3.msra.mxu1 %v31519_v41  ;;  %30525 = vmatprep.subr.mxu0 %v31353_v13 }
0x266b   : > { %30546 = vmatprep.mubr.msk.f32.mxu1 %vm31354_vm0, %v31353_v13  ;;  %30562 = vmatprep.subr.mxu1 %v31353_v13 }
0x266c   : > { %30526 = vmatpush3.msra.mxu0 %v31429_v11  ;;  %30533 = vmatprep.mubr.msk.f32.mxu0 %vm31354_vm0, %v31353_v13 }
0x266d   : > { %30527 = vmatprep.subr.mxu0 %v31353_v13 }
0x266e   : > { %30528 = vmatpush3.msra.mxu0 %v31432_v12 }
0x266f   : > { %30529 = vmatprep.subr.mxu0 %v31353_v13 }
0x2670   : > { %30530 = vmatpush3.msra.mxu0 %v31436_v14 }
0x2671   : > { %30531 = vmatprep.subr.mxu0 %v31353_v13 }
0x2672   : > { %30532 = vmatpush3.msra.mxu0 %v31440_v15 }
0x2673   : > { %30549 = vmatprep.subr.mxu0 %v31353_v13 }
0x2709   : > { %v20571_v55 = vpop.f32.mrf.mxu1 }
0x270b   : > { %v30470_v57 = vpop.f32.mrf.mxu1 }
0x2711   : > { %v20475_v44 = vpop.f32.mrf.mxu0 }
0x2712   : > { %v20572_v24 = vadd.f32 %v20571_v55, %v20475_v44 }
0x2713   : > { %v20731_v58 = vpop.f32.mrf.mxu1  ;;  %v30457_v59 = vpop.f32.mrf.mxu0 }
0x2715   : > { %v30496_v61 = vpop.f32.mrf.mxu1 }
0x271c   : > { %v20653_v48 = vpop.f32.mrf.mxu0 }
0x271d   : > { %v20654_v27 = vadd.f32 %v20653_v48, %v20572_v24 }
0x271e   : > { %v30483_v62 = vpop.f32.mrf.mxu0 }
0x271f   : > { %v20893_v63 = vpop.f32.mrf.mxu1  ;;  %v20732_v28 = vadd.f32 %v20731_v58, %v20654_v27 }
0x2721   : > { %v30522_v52 = vpop.f32.mrf.mxu1 }
0x2727   : > { %v20817_v29 = vpop.f32.mrf.mxu0 }
0x2728   : > { %v20818_v56 = vadd.f32 %v20817_v29, %v20732_v28 }
0x2729   : > { %v30509_v31 = vpop.f32.mrf.mxu0 }
0x272a   : > { %v20894_v34 = vadd.f32 %v20893_v63, %v20818_v56 }
0x272c   : > { %v20897_v35 = vsub.f32 %v20894_v34, %v31388_v0 }
0x272e   : > { %v20898_v60 = vadd.f32 %v20897_v35, %v34765_v8 }
0x2730   : > { %v20899_v36 = vmax.f32 %v31403_v6, %v20898_v60 }
0x2732   : > { %v20900_v39 = vmin.f32 %v31408_v7, %v20899_v36 }
0x2734   : > { %v20901_v42 = vsub.f32 %v20897_v35, %v20900_v39 }
0x2736   : > { %v34846_v18 = vadd.f32 %v20901_v42, %v34765_v8 }
0x2738   : > { %v20903_v43 = vsub.f32 %v20900_v39, %v34846_v18 }
0x273a   : > { %v20905_v45 = vsel %vm75_vm1, %v20903_v43, 0 }
0x273b   : > { %v20977_v46 = vand.u32 4294901760, %v20905_v45 }
0x273d   : > { %v20978_v47 = vsub.f32 %v20905_v45, %v20977_v46  ;;  %30547 = vmatmul.mubr.f32.vlgmr.msra.gmra.mxu1 %v20977_v46 }
0x273e   : > { %30563 = vmatpush3.msra.mxu1 %v31426_v10  ;;  %30572 = vmatprep.mubr.msk.f32.mxu1 %vm31354_vm0, %v31353_v13 }
0x273f   : > { %30564 = vmatprep.subr.mxu1 %v31353_v13  ;;  %v20979_v49 = vand.u32 4294901760, %v20978_v47 }
0x2740   : > { %30565 = vmatpush3.msra.mxu1 %v31429_v11 }
0x2741   : > { %30566 = vmatprep.subr.mxu1 %v31353_v13  ;;  %v20980_v8 = vsub.f32 %v20978_v47, %v20979_v49 }
0x2742   : > { %30567 = vmatpush3.msra.mxu1 %v31432_v12 }
0x2743   : > { %30568 = vmatprep.subr.mxu1 %v31353_v13  ;;  %v20981_v50 = vand.u32 4294901760, %v20980_v8 }
0x2744   : > { %30569 = vmatpush3.msra.mxu1 %v31436_v14 }
0x2745   : > { %30570 = vmatprep.subr.mxu1 %v31353_v13  ;;  %30534 = vmatmul.mubr.f32.vlgmr.msra.gmra.mxu0 %v20981_v50 }
0x2746   : > { %30550 = vmatpush3.msra.mxu0 %v31445_v16  ;;  %30571 = vmatpush3.msra.mxu1 %v31440_v15 }
0x2747   : > { %30551 = vmatprep.subr.mxu0 %v31353_v13  ;;  %30573 = vmatmul.mubr.f32.vlgmr.msra.gmra.mxu1 %v20979_v49 }
0x2748   : > { %30588 = vmatprep.subr.mxu1 %v31353_v13  ;;  %30552 = vmatpush3.msra.mxu0 %v31451_v17 }
0x2749   : > { %30589 = vmatpush3.msra.mxu1 %v31426_v10  ;;  %30553 = vmatprep.subr.mxu0 %v31353_v13 }
0x274a   : > { %30590 = vmatprep.subr.mxu1 %v31353_v13  ;;  %30554 = vmatpush3.msra.mxu0 %v31458_v19 }
0x274b   : > { %30591 = vmatpush3.msra.mxu1 %v31429_v11  ;;  %30555 = vmatprep.subr.mxu0 %v31353_v13 }
0x274c   : > { %30592 = vmatprep.subr.mxu1 %v31353_v13  ;;  %30556 = vmatpush3.msra.mxu0 %v31462_v20 }
0x274d   : > { %30593 = vmatpush3.msra.mxu1 %v31432_v12  ;;  %30557 = vmatprep.subr.mxu0 %v31353_v13 }
0x274e   : > { %30594 = vmatprep.subr.mxu1 %v31353_v13  ;;  %30558 = vmatpush3.msra.mxu0 %v31466_v21 }
0x274f   : > { %30559 = vmatprep.mubr.msk.f32.mxu0 %vm31354_vm0, %v31353_v13  ;;  %30595 = vmatpush3.msra.mxu1 %v31436_v14 }
0x2750   : > { %30560 = vmatmul.mubr.f32.vlgmr.msra.gmra.mxu0 %v20978_v47  ;;  %30575 = vmatprep.subr.mxu0 %v31353_v13 }
0x2751   : > { %30596 = vmatprep.subr.mxu1 %v31353_v13  ;;  %30576 = vmatpush3.msra.mxu0 %v31472_v22 }
0x2752   : > { %30597 = vmatpush3.msra.mxu1 %v31440_v15  ;;  %30598 = vmatprep.mubr.msk.f32.mxu1 %vm31354_vm0, %v31353_v13 }
0x2753   : > { %30577 = vmatprep.subr.mxu0 %v31353_v13  ;;  %30599 = vmatmul.mubr.f32.vlgmr.msra.gmra.mxu1 %v20977_v46 }
0x2754   : > { %30578 = vmatpush3.msra.mxu0 %v31475_v23  ;;  %30585 = vmatprep.mubr.msk.f32.mxu0 %vm31354_vm0, %v31353_v13 }
0x2755   : > { %30579 = vmatprep.subr.mxu0 %v31353_v13  ;;  %30614 = vmatprep.subr.mxu1 %v31353_v13 }
0x2756   : > { %30580 = vmatpush3.msra.mxu0 %v31481_v25  ;;  %30615 = vmatpush3.msra.mxu1 %v31499_v32 }
0x2757   : > { %30581 = vmatprep.subr.mxu0 %v31353_v13  ;;  %30616 = vmatprep.subr.mxu1 %v31353_v13 }
0x2758   : > { %30582 = vmatpush3.msra.mxu0 %v31484_v26  ;;  %30617 = vmatpush3.msra.mxu1 %v31501_v33 }
0x2759   : > { %30583 = vmatprep.subr.mxu0 %v31353_v13  ;;  %30618 = vmatprep.subr.mxu1 %v31353_v13 }
0x275a   : > { %30584 = vmatpush3.msra.mxu0 %v31493_v30  ;;  %30619 = vmatpush3.msra.mxu1 %v31508_v37 }
0x275b   : > { %30586 = vmatmul.mubr.f32.vlgmr.msra.gmra.mxu0 %v20977_v46  ;;  %30620 = vmatprep.subr.mxu1 %v31353_v13 }
0x275c   : > { %30621 = vmatpush3.msra.mxu1 %v31515_v40  ;;  %30601 = vmatprep.subr.mxu0 %v31353_v13 }
0x275d   : > { %30622 = vmatprep.subr.mxu1 %v31353_v13  ;;  %30602 = vmatpush3.msra.mxu0 %v31426_v10 }
0x275e   : > { %30623 = vmatpush3.msra.mxu1 %v31519_v41  ;;  %30603 = vmatprep.subr.mxu0 %v31353_v13 }
0x275f   : > { %30624 = vmatprep.mubr.msk.f32.mxu1 %vm31354_vm0, %v31353_v13  ;;  %30640 = vmatprep.subr.mxu1 %v31353_v13 }
0x2760   : > { %30604 = vmatpush3.msra.mxu0 %v31429_v11  ;;  %30611 = vmatprep.mubr.msk.f32.mxu0 %vm31354_vm0, %v31353_v13 }
0x2761   : > { %30605 = vmatprep.subr.mxu0 %v31353_v13 }
0x2762   : > { %30606 = vmatpush3.msra.mxu0 %v31432_v12 }
0x2763   : > { %30607 = vmatprep.subr.mxu0 %v31353_v13 }
0x2764   : > { %30608 = vmatpush3.msra.mxu0 %v31436_v14 }
0x2765   : > { %30609 = vmatprep.subr.mxu0 %v31353_v13 }
0x2766   : > { %30610 = vmatpush3.msra.mxu0 %v31440_v15 }
0x2767   : > { %30627 = vmatprep.subr.mxu0 %v31353_v13 }
0x27fd   : > { %v21079_v51 = vpop.f32.mrf.mxu1 }
0x27ff   : > { %v30548_v53 = vpop.f32.mrf.mxu1 }
0x2805   : > { %v20983_v38 = vpop.f32.mrf.mxu0 }
0x2806   : > { %v21080_v61 = vadd.f32 %v21079_v51, %v20983_v38 }
0x2807   : > { %v21239_v54 = vpop.f32.mrf.mxu1  ;;  %v30535_v55 = vpop.f32.mrf.mxu0 }
0x2809   : > { %v30574_v57 = vpop.f32.mrf.mxu1 }
0x2810   : > { %v21161_v44 = vpop.f32.mrf.mxu0 }
0x2811   : > { %v21162_v62 = vadd.f32 %v21161_v44, %v21080_v61 }
0x2812   : > { %v30561_v58 = vpop.f32.mrf.mxu0 }
0x2813   : > { %v21401_v59 = vpop.f32.mrf.mxu1  ;;  %v21240_v63 = vadd.f32 %v21239_v54, %v21162_v62 }
0x2815   : > { %v30600_v48 = vpop.f32.mrf.mxu1 }
0x281b   : > { %v21325_v24 = vpop.f32.mrf.mxu0 }
0x281c   : > { %v21326_v52 = vadd.f32 %v21325_v24, %v21240_v63 }
0x281d   : > { %v30587_v27 = vpop.f32.mrf.mxu0 }
0x281e   : > { %v21402_v28 = vadd.f32 %v21401_v59, %v21326_v52 }
0x2820   : > { %v21405_v29 = vsub.f32 %v21402_v28, %v31388_v0 }
0x2822   : > { %v21406_v56 = vadd.f32 %v21405_v29, %v34846_v18 }
0x2824   : > { %v21407_v31 = vmax.f32 %v31403_v6, %v21406_v56 }
0x2826   : > { %v21408_v34 = vmin.f32 %v31408_v7, %v21407_v31 }
0x2828   : > { %v21409_v35 = vsub.f32 %v21405_v29, %v21408_v34 }
0x282a   : > { %v34927_v60 = vadd.f32 %v21409_v35, %v34846_v18 }
0x282c   : > { %v21411_v36 = vsub.f32 %v21408_v34, %v34927_v60 }
0x282e   : > { %v21413_v39 = vsel %vm75_vm1, %v21411_v36, 0 }
0x282f   : > { %v21485_v42 = vand.u32 4294901760, %v21413_v39 }
0x2831   : > { %v21486_v43 = vsub.f32 %v21413_v39, %v21485_v42  ;;  %30625 = vmatmul.mubr.f32.vlgmr.msra.gmra.mxu1 %v21485_v42 }
0x2832   : > { %30641 = vmatpush3.msra.mxu1 %v31426_v10  ;;  %30650 = vmatprep.mubr.msk.f32.mxu1 %vm31354_vm0, %v31353_v13 }
0x2833   : > { %30642 = vmatprep.subr.mxu1 %v31353_v13  ;;  %v21487_v45 = vand.u32 4294901760, %v21486_v43 }
0x2834   : > { %30643 = vmatpush3.msra.mxu1 %v31429_v11 }
0x2835   : > { %30644 = vmatprep.subr.mxu1 %v31353_v13  ;;  %v21488_v18 = vsub.f32 %v21486_v43, %v21487_v45 }
0x2836   : > { %30645 = vmatpush3.msra.mxu1 %v31432_v12 }
0x2837   : > { %30646 = vmatprep.subr.mxu1 %v31353_v13  ;;  %v21489_v46 = vand.u32 4294901760, %v21488_v18 }
0x2838   : > { %30647 = vmatpush3.msra.mxu1 %v31436_v14 }
0x2839   : > { %30648 = vmatprep.subr.mxu1 %v31353_v13  ;;  %30612 = vmatmul.mubr.f32.vlgmr.msra.gmra.mxu0 %v21489_v46 }
0x283a   : > { %30628 = vmatpush3.msra.mxu0 %v31445_v16  ;;  %30649 = vmatpush3.msra.mxu1 %v31440_v15 }
0x283b   : > { %30629 = vmatprep.subr.mxu0 %v31353_v13  ;;  %30651 = vmatmul.mubr.f32.vlgmr.msra.gmra.mxu1 %v21487_v45 }
0x283c   : > { %30666 = vmatprep.subr.mxu1 %v31353_v13  ;;  %30630 = vmatpush3.msra.mxu0 %v31451_v17 }
0x283d   : > { %30667 = vmatpush3.msra.mxu1 %v31426_v10  ;;  %30631 = vmatprep.subr.mxu0 %v31353_v13 }
0x283e   : > { %30668 = vmatprep.subr.mxu1 %v31353_v13  ;;  %30632 = vmatpush3.msra.mxu0 %v31458_v19 }
0x283f   : > { %30669 = vmatpush3.msra.mxu1 %v31429_v11  ;;  %30633 = vmatprep.subr.mxu0 %v31353_v13 }
0x2840   : > { %30670 = vmatprep.subr.mxu1 %v31353_v13  ;;  %30634 = vmatpush3.msra.mxu0 %v31462_v20 }
0x2841   : > { %30671 = vmatpush3.msra.mxu1 %v31432_v12  ;;  %30635 = vmatprep.subr.mxu0 %v31353_v13 }
0x2842   : > { %30672 = vmatprep.subr.mxu1 %v31353_v13  ;;  %30636 = vmatpush3.msra.mxu0 %v31466_v21 }
0x2843   : > { %30637 = vmatprep.mubr.msk.f32.mxu0 %vm31354_vm0, %v31353_v13  ;;  %30673 = vmatpush3.msra.mxu1 %v31436_v14 }
0x2844   : > { %30638 = vmatmul.mubr.f32.vlgmr.msra.gmra.mxu0 %v21486_v43  ;;  %30653 = vmatprep.subr.mxu0 %v31353_v13 }
0x2845   : > { %30674 = vmatprep.subr.mxu1 %v31353_v13  ;;  %30654 = vmatpush3.msra.mxu0 %v31472_v22 }
0x2846   : > { %30675 = vmatpush3.msra.mxu1 %v31440_v15  ;;  %30676 = vmatprep.mubr.msk.f32.mxu1 %vm31354_vm0, %v31353_v13 }
0x2847   : > { %30655 = vmatprep.subr.mxu0 %v31353_v13  ;;  %30677 = vmatmul.mubr.f32.vlgmr.msra.gmra.mxu1 %v21485_v42 }
0x2848   : > { %30656 = vmatpush3.msra.mxu0 %v31475_v23  ;;  %30663 = vmatprep.mubr.msk.f32.mxu0 %vm31354_vm0, %v31353_v13 }
0x2849   : > { %30657 = vmatprep.subr.mxu0 %v31353_v13  ;;  %30692 = vmatprep.subr.mxu1 %v31353_v13 }
0x284a   : > { %30658 = vmatpush3.msra.mxu0 %v31481_v25  ;;  %30693 = vmatpush3.msra.mxu1 %v31499_v32 }
0x284b   : > { %30659 = vmatprep.subr.mxu0 %v31353_v13  ;;  %30694 = vmatprep.subr.mxu1 %v31353_v13 }
0x284c   : > { %30660 = vmatpush3.msra.mxu0 %v31484_v26  ;;  %30695 = vmatpush3.msra.mxu1 %v31501_v33 }
0x284d   : > { %30661 = vmatprep.subr.mxu0 %v31353_v13  ;;  %30696 = vmatprep.subr.mxu1 %v31353_v13 }
0x284e   : > { %30662 = vmatpush3.msra.mxu0 %v31493_v30  ;;  %30697 = vmatpush3.msra.mxu1 %v31508_v37 }
0x284f   : > { %30664 = vmatmul.mubr.f32.vlgmr.msra.gmra.mxu0 %v21485_v42  ;;  %30698 = vmatprep.subr.mxu1 %v31353_v13 }
0x2850   : > { %30699 = vmatpush3.msra.mxu1 %v31515_v40  ;;  %30679 = vmatprep.subr.mxu0 %v31353_v13 }
0x2851   : > { %30700 = vmatprep.subr.mxu1 %v31353_v13  ;;  %30680 = vmatpush3.msra.mxu0 %v31426_v10 }
0x2852   : > { %30701 = vmatpush3.msra.mxu1 %v31519_v41  ;;  %30681 = vmatprep.subr.mxu0 %v31353_v13 }
0x2853   : > { %30702 = vmatprep.mubr.msk.f32.mxu1 %vm31354_vm0, %v31353_v13  ;;  %30718 = vmatprep.subr.mxu1 %v31353_v13 }
0x2854   : > { %30682 = vmatpush3.msra.mxu0 %v31429_v11  ;;  %30689 = vmatprep.mubr.msk.f32.mxu0 %vm31354_vm0, %v31353_v13 }
0x2855   : > { %30683 = vmatprep.subr.mxu0 %v31353_v13 }
0x2856   : > { %30684 = vmatpush3.msra.mxu0 %v31432_v12 }
0x2857   : > { %30685 = vmatprep.subr.mxu0 %v31353_v13 }
0x2858   : > { %30686 = vmatpush3.msra.mxu0 %v31436_v14 }
0x2859   : > { %30687 = vmatprep.subr.mxu0 %v31353_v13 }
0x285a   : > { %30688 = vmatpush3.msra.mxu0 %v31440_v15 }
0x285b   : > { %30705 = vmatprep.subr.mxu0 %v31353_v13 }
0x28f1   : > { %v21587_v47 = vpop.f32.mrf.mxu1 }
0x28f3   : > { %v30626_v49 = vpop.f32.mrf.mxu1 }
0x28f9   : > { %v21491_v8 = vpop.f32.mrf.mxu0 }
0x28fa   : > { %v21588_v57 = vadd.f32 %v21587_v47, %v21491_v8 }
0x28fb   : > { %v21747_v50 = vpop.f32.mrf.mxu1  ;;  %v30613_v51 = vpop.f32.mrf.mxu0 }
0x28fd   : > { %v30652_v53 = vpop.f32.mrf.mxu1 }
0x2904   : > { %v21669_v38 = vpop.f32.mrf.mxu0 }
0x2905   : > { %v21670_v58 = vadd.f32 %v21669_v38, %v21588_v57 }
0x2906   : > { %v30639_v54 = vpop.f32.mrf.mxu0 }
0x2907   : > { %v21909_v55 = vpop.f32.mrf.mxu1  ;;  %v21748_v59 = vadd.f32 %v21747_v50, %v21670_v58 }
0x2909   : > { %v30678_v44 = vpop.f32.mrf.mxu1 }
0x290f   : > { %v21833_v61 = vpop.f32.mrf.mxu0 }
0x2910   : > { %v21834_v48 = vadd.f32 %v21833_v61, %v21748_v59 }
0x2911   : > { %v30665_v62 = vpop.f32.mrf.mxu0 }
0x2912   : > { %v21910_v63 = vadd.f32 %v21909_v55, %v21834_v48 }
0x2914   : > { %v21913_v24 = vsub.f32 %v21910_v63, %v31388_v0 }
0x2916   : > { %v21914_v52 = vadd.f32 %v21913_v24, %v34927_v60 }
0x2918   : > { %v21915_v27 = vmax.f32 %v31403_v6, %v21914_v52 }
0x291a   : > { %v21916_v28 = vmin.f32 %v31408_v7, %v21915_v27 }
0x291c   : > { %v21917_v29 = vsub.f32 %v21913_v24, %v21916_v28 }
0x291e   : > { %v35008_v56 = vadd.f32 %v21917_v29, %v34927_v60 }
0x2920   : > { %v21919_v31 = vsub.f32 %v21916_v28, %v35008_v56 }
0x2922   : > { %v21921_v34 = vsel %vm75_vm1, %v21919_v31, 0 }
0x2923   : > { %v21993_v35 = vand.u32 4294901760, %v21921_v34 }
0x2925   : > { %v21994_v36 = vsub.f32 %v21921_v34, %v21993_v35  ;;  %30703 = vmatmul.mubr.f32.vlgmr.msra.gmra.mxu1 %v21993_v35 }
0x2926   : > { %30719 = vmatpush3.msra.mxu1 %v31426_v10  ;;  %30728 = vmatprep.mubr.msk.f32.mxu1 %vm31354_vm0, %v31353_v13 }
0x2927   : > { %30720 = vmatprep.subr.mxu1 %v31353_v13  ;;  %v21995_v39 = vand.u32 4294901760, %v21994_v36 }
0x2928   : > { %30721 = vmatpush3.msra.mxu1 %v31429_v11 }
0x2929   : > { %30722 = vmatprep.subr.mxu1 %v31353_v13  ;;  %v21996_v60 = vsub.f32 %v21994_v36, %v21995_v39 }
0x292a   : > { %30723 = vmatpush3.msra.mxu1 %v31432_v12 }
0x292b   : > { %30724 = vmatprep.subr.mxu1 %v31353_v13  ;;  %v21997_v42 = vand.u32 4294901760, %v21996_v60 }
0x292c   : > { %30725 = vmatpush3.msra.mxu1 %v31436_v14 }
0x292d   : > { %30726 = vmatprep.subr.mxu1 %v31353_v13  ;;  %30690 = vmatmul.mubr.f32.vlgmr.msra.gmra.mxu0 %v21997_v42 }
0x292e   : > { %30706 = vmatpush3.msra.mxu0 %v31445_v16  ;;  %30727 = vmatpush3.msra.mxu1 %v31440_v15 }
0x292f   : > { %30707 = vmatprep.subr.mxu0 %v31353_v13  ;;  %30729 = vmatmul.mubr.f32.vlgmr.msra.gmra.mxu1 %v21995_v39 }
0x2930   : > { %30744 = vmatprep.subr.mxu1 %v31353_v13  ;;  %30708 = vmatpush3.msra.mxu0 %v31451_v17 }
0x2931   : > { %30745 = vmatpush3.msra.mxu1 %v31426_v10  ;;  %30709 = vmatprep.subr.mxu0 %v31353_v13 }
0x2932   : > { %30746 = vmatprep.subr.mxu1 %v31353_v13  ;;  %30710 = vmatpush3.msra.mxu0 %v31458_v19 }
0x2933   : > { %30747 = vmatpush3.msra.mxu1 %v31429_v11  ;;  %30711 = vmatprep.subr.mxu0 %v31353_v13 }
0x2934   : > { %30748 = vmatprep.subr.mxu1 %v31353_v13  ;;  %30712 = vmatpush3.msra.mxu0 %v31462_v20 }
0x2935   : > { %30749 = vmatpush3.msra.mxu1 %v31432_v12  ;;  %30713 = vmatprep.subr.mxu0 %v31353_v13 }
0x2936   : > { %30750 = vmatprep.subr.mxu1 %v31353_v13  ;;  %30714 = vmatpush3.msra.mxu0 %v31466_v21 }
0x2937   : > { %30715 = vmatprep.mubr.msk.f32.mxu0 %vm31354_vm0, %v31353_v13  ;;  %30751 = vmatpush3.msra.mxu1 %v31436_v14 }
0x2938   : > { %30716 = vmatmul.mubr.f32.vlgmr.msra.gmra.mxu0 %v21994_v36  ;;  %30731 = vmatprep.subr.mxu0 %v31353_v13 }
0x2939   : > { %30752 = vmatprep.subr.mxu1 %v31353_v13  ;;  %30732 = vmatpush3.msra.mxu0 %v31472_v22 }
0x293a   : > { %30753 = vmatpush3.msra.mxu1 %v31440_v15  ;;  %30754 = vmatprep.mubr.msk.f32.mxu1 %vm31354_vm0, %v31353_v13 }
0x293b   : > { %30733 = vmatprep.subr.mxu0 %v31353_v13  ;;  %30755 = vmatmul.mubr.f32.vlgmr.msra.gmra.mxu1 %v21993_v35 }
0x293c   : > { %30734 = vmatpush3.msra.mxu0 %v31475_v23  ;;  %30741 = vmatprep.mubr.msk.f32.mxu0 %vm31354_vm0, %v31353_v13 }
0x293d   : > { %30735 = vmatprep.subr.mxu0 %v31353_v13  ;;  %30770 = vmatprep.subr.mxu1 %v31353_v13 }
0x293e   : > { %30736 = vmatpush3.msra.mxu0 %v31481_v25  ;;  %30771 = vmatpush3.msra.mxu1 %v31499_v32 }
0x293f   : > { %30737 = vmatprep.subr.mxu0 %v31353_v13  ;;  %30772 = vmatprep.subr.mxu1 %v31353_v13 }
0x2940   : > { %30738 = vmatpush3.msra.mxu0 %v31484_v26  ;;  %30773 = vmatpush3.msra.mxu1 %v31501_v33 }
0x2941   : > { %30739 = vmatprep.subr.mxu0 %v31353_v13  ;;  %30774 = vmatprep.subr.mxu1 %v31353_v13 }
0x2942   : > { %30740 = vmatpush3.msra.mxu0 %v31493_v30  ;;  %30775 = vmatpush3.msra.mxu1 %v31508_v37 }
0x2943   : > { %30742 = vmatmul.mubr.f32.vlgmr.msra.gmra.mxu0 %v21993_v35  ;;  %30776 = vmatprep.subr.mxu1 %v31353_v13 }
0x2944   : > { %30777 = vmatpush3.msra.mxu1 %v31515_v40  ;;  %30757 = vmatprep.subr.mxu0 %v31353_v13 }
0x2945   : > { %30778 = vmatprep.subr.mxu1 %v31353_v13  ;;  %30758 = vmatpush3.msra.mxu0 %v31426_v10 }
0x2946   : > { %30779 = vmatpush3.msra.mxu1 %v31519_v41  ;;  %30759 = vmatprep.subr.mxu0 %v31353_v13 }
0x2947   : > { %30780 = vmatprep.mubr.msk.f32.mxu1 %vm31354_vm0, %v31353_v13  ;;  %30796 = vmatprep.subr.mxu1 %v31353_v13 }
0x2948   : > { %30760 = vmatpush3.msra.mxu0 %v31429_v11  ;;  %30767 = vmatprep.mubr.msk.f32.mxu0 %vm31354_vm0, %v31353_v13 }
0x2949   : > { %30761 = vmatprep.subr.mxu0 %v31353_v13 }
0x294a   : > { %30762 = vmatpush3.msra.mxu0 %v31432_v12 }
0x294b   : > { %30763 = vmatprep.subr.mxu0 %v31353_v13 }
0x294c   : > { %30764 = vmatpush3.msra.mxu0 %v31436_v14 }
0x294d   : > { %30765 = vmatprep.subr.mxu0 %v31353_v13 }
0x294e   : > { %30766 = vmatpush3.msra.mxu0 %v31440_v15 }
0x294f   : > { %30783 = vmatprep.subr.mxu0 %v31353_v13 }
0x29e5   : > { %v22095_v43 = vpop.f32.mrf.mxu1 }
0x29e7   : > { %v30704_v45 = vpop.f32.mrf.mxu1 }
0x29ed   : > { %v21999_v18 = vpop.f32.mrf.mxu0 }
0x29ee   : > { %v22096_v53 = vadd.f32 %v22095_v43, %v21999_v18 }
0x29ef   : > { %v22255_v46 = vpop.f32.mrf.mxu1  ;;  %v30691_v47 = vpop.f32.mrf.mxu0 }
0x29f1   : > { %v30730_v49 = vpop.f32.mrf.mxu1 }
0x29f8   : > { %v22177_v8 = vpop.f32.mrf.mxu0 }
0x29f9   : > { %v22178_v54 = vadd.f32 %v22177_v8, %v22096_v53 }
0x29fa   : > { %v30717_v50 = vpop.f32.mrf.mxu0 }
0x29fb   : > { %v22417_v51 = vpop.f32.mrf.mxu1  ;;  %v22256_v55 = vadd.f32 %v22255_v46, %v22178_v54 }
0x29fd   : > { %v30756_v38 = vpop.f32.mrf.mxu1 }
0x2a03   : > { %v22341_v57 = vpop.f32.mrf.mxu0 }
0x2a04   : > { %v22342_v44 = vadd.f32 %v22341_v57, %v22256_v55 }
0x2a05   : > { %v30743_v58 = vpop.f32.mrf.mxu0 }
0x2a06   : > { %v22418_v59 = vadd.f32 %v22417_v51, %v22342_v44 }
0x2a08   : > { %v22421_v61 = vsub.f32 %v22418_v59, %v31388_v0 }
0x2a0a   : > { %v22422_v48 = vadd.f32 %v22421_v61, %v35008_v56 }
0x2a0c   : > { %v22423_v62 = vmax.f32 %v31403_v6, %v22422_v48 }
0x2a0e   : > { %v22424_v63 = vmin.f32 %v31408_v7, %v22423_v62 }
0x2a10   : > { %v22425_v24 = vsub.f32 %v22421_v61, %v22424_v63 }
0x2a12   : > { %v35089_v52 = vadd.f32 %v22425_v24, %v35008_v56 }
0x2a14   : > { %v22427_v27 = vsub.f32 %v22424_v63, %v35089_v52 }
0x2a16   : > { %v22429_v28 = vsel %vm75_vm1, %v22427_v27, 0 }
0x2a17   : > { %v22501_v29 = vand.u32 4294901760, %v22429_v28 }
0x2a19   : > { %v22502_v31 = vsub.f32 %v22429_v28, %v22501_v29  ;;  %30781 = vmatmul.mubr.f32.vlgmr.msra.gmra.mxu1 %v22501_v29 }
0x2a1a   : > { %30797 = vmatpush3.msra.mxu1 %v31426_v10  ;;  %30806 = vmatprep.mubr.msk.f32.mxu1 %vm31354_vm0, %v31353_v13 }
0x2a1b   : > { %30798 = vmatprep.subr.mxu1 %v31353_v13  ;;  %v22503_v34 = vand.u32 4294901760, %v22502_v31 }
0x2a1c   : > { %30799 = vmatpush3.msra.mxu1 %v31429_v11 }
0x2a1d   : > { %30800 = vmatprep.subr.mxu1 %v31353_v13  ;;  %v22504_v56 = vsub.f32 %v22502_v31, %v22503_v34 }
0x2a1e   : > { %30801 = vmatpush3.msra.mxu1 %v31432_v12 }
0x2a1f   : > { %30802 = vmatprep.subr.mxu1 %v31353_v13  ;;  %v22505_v35 = vand.u32 4294901760, %v22504_v56 }
0x2a20   : > { %30803 = vmatpush3.msra.mxu1 %v31436_v14 }
0x2a21   : > { %30804 = vmatprep.subr.mxu1 %v31353_v13  ;;  %30768 = vmatmul.mubr.f32.vlgmr.msra.gmra.mxu0 %v22505_v35 }
0x2a22   : > { %30784 = vmatpush3.msra.mxu0 %v31445_v16  ;;  %30805 = vmatpush3.msra.mxu1 %v31440_v15 }
0x2a23   : > { %30785 = vmatprep.subr.mxu0 %v31353_v13  ;;  %30807 = vmatmul.mubr.f32.vlgmr.msra.gmra.mxu1 %v22503_v34 }
0x2a24   : > { %30822 = vmatprep.subr.mxu1 %v31353_v13  ;;  %30786 = vmatpush3.msra.mxu0 %v31451_v17 }
0x2a25   : > { %30823 = vmatpush3.msra.mxu1 %v31426_v10  ;;  %30787 = vmatprep.subr.mxu0 %v31353_v13 }
0x2a26   : > { %30824 = vmatprep.subr.mxu1 %v31353_v13  ;;  %30788 = vmatpush3.msra.mxu0 %v31458_v19 }
0x2a27   : > { %30825 = vmatpush3.msra.mxu1 %v31429_v11  ;;  %30789 = vmatprep.subr.mxu0 %v31353_v13 }
0x2a28   : > { %30826 = vmatprep.subr.mxu1 %v31353_v13  ;;  %30790 = vmatpush3.msra.mxu0 %v31462_v20 }
0x2a29   : > { %30827 = vmatpush3.msra.mxu1 %v31432_v12  ;;  %30791 = vmatprep.subr.mxu0 %v31353_v13 }
0x2a2a   : > { %30828 = vmatprep.subr.mxu1 %v31353_v13  ;;  %30792 = vmatpush3.msra.mxu0 %v31466_v21 }
0x2a2b   : > { %30793 = vmatprep.mubr.msk.f32.mxu0 %vm31354_vm0, %v31353_v13  ;;  %30829 = vmatpush3.msra.mxu1 %v31436_v14 }
0x2a2c   : > { %30794 = vmatmul.mubr.f32.vlgmr.msra.gmra.mxu0 %v22502_v31  ;;  %30809 = vmatprep.subr.mxu0 %v31353_v13 }
0x2a2d   : > { %30830 = vmatprep.subr.mxu1 %v31353_v13  ;;  %30810 = vmatpush3.msra.mxu0 %v31472_v22 }
0x2a2e   : > { %30831 = vmatpush3.msra.mxu1 %v31440_v15  ;;  %30832 = vmatprep.mubr.msk.f32.mxu1 %vm31354_vm0, %v31353_v13 }
0x2a2f   : > { %30811 = vmatprep.subr.mxu0 %v31353_v13  ;;  %30833 = vmatmul.mubr.f32.vlgmr.msra.gmra.mxu1 %v22501_v29 }
0x2a30   : > { %30812 = vmatpush3.msra.mxu0 %v31475_v23  ;;  %30819 = vmatprep.mubr.msk.f32.mxu0 %vm31354_vm0, %v31353_v13 }
0x2a31   : > { %30813 = vmatprep.subr.mxu0 %v31353_v13  ;;  %30848 = vmatprep.subr.mxu1 %v31353_v13 }
0x2a32   : > { %30814 = vmatpush3.msra.mxu0 %v31481_v25  ;;  %30849 = vmatpush3.msra.mxu1 %v31499_v32 }
0x2a33   : > { %30815 = vmatprep.subr.mxu0 %v31353_v13  ;;  %30850 = vmatprep.subr.mxu1 %v31353_v13 }
0x2a34   : > { %30816 = vmatpush3.msra.mxu0 %v31484_v26  ;;  %30851 = vmatpush3.msra.mxu1 %v31501_v33 }
0x2a35   : > { %30817 = vmatprep.subr.mxu0 %v31353_v13  ;;  %30852 = vmatprep.subr.mxu1 %v31353_v13 }
0x2a36   : > { %30818 = vmatpush3.msra.mxu0 %v31493_v30  ;;  %30853 = vmatpush3.msra.mxu1 %v31508_v37 }
0x2a37   : > { %30820 = vmatmul.mubr.f32.vlgmr.msra.gmra.mxu0 %v22501_v29  ;;  %30854 = vmatprep.subr.mxu1 %v31353_v13 }
0x2a38   : > { %30855 = vmatpush3.msra.mxu1 %v31515_v40  ;;  %30835 = vmatprep.subr.mxu0 %v31353_v13 }
0x2a39   : > { %30856 = vmatprep.subr.mxu1 %v31353_v13  ;;  %30836 = vmatpush3.msra.mxu0 %v31426_v10 }
0x2a3a   : > { %30857 = vmatpush3.msra.mxu1 %v31519_v41  ;;  %30837 = vmatprep.subr.mxu0 %v31353_v13 }
0x2a3b   : > { %30858 = vmatprep.mubr.msk.f32.mxu1 %vm31354_vm0, %v31353_v13  ;;  %30874 = vmatprep.subr.mxu1 %v31353_v13 }
0x2a3c   : > { %30838 = vmatpush3.msra.mxu0 %v31429_v11  ;;  %30845 = vmatprep.mubr.msk.f32.mxu0 %vm31354_vm0, %v31353_v13 }
0x2a3d   : > { %30839 = vmatprep.subr.mxu0 %v31353_v13 }
0x2a3e   : > { %30840 = vmatpush3.msra.mxu0 %v31432_v12 }
0x2a3f   : > { %30841 = vmatprep.subr.mxu0 %v31353_v13 }
0x2a40   : > { %30842 = vmatpush3.msra.mxu0 %v31436_v14 }
0x2a41   : > { %30843 = vmatprep.subr.mxu0 %v31353_v13 }
0x2a42   : > { %30844 = vmatpush3.msra.mxu0 %v31440_v15 }
0x2a43   : > { %30861 = vmatprep.subr.mxu0 %v31353_v13 }
0x2ad9   : > { %v22603_v36 = vpop.f32.mrf.mxu1 }
0x2adb   : > { %v30782_v39 = vpop.f32.mrf.mxu1 }
0x2ae1   : > { %v22507_v60 = vpop.f32.mrf.mxu0 }
0x2ae2   : > { %v22604_v49 = vadd.f32 %v22603_v36, %v22507_v60 }
0x2ae3   : > { %v22763_v42 = vpop.f32.mrf.mxu1  ;;  %v30769_v43 = vpop.f32.mrf.mxu0 }
0x2ae5   : > { %v30808_v45 = vpop.f32.mrf.mxu1 }
0x2aec   : > { %v22685_v18 = vpop.f32.mrf.mxu0 }
0x2aed   : > { %v22686_v50 = vadd.f32 %v22685_v18, %v22604_v49 }
0x2aee   : > { %v30795_v46 = vpop.f32.mrf.mxu0 }
0x2aef   : > { %v22925_v47 = vpop.f32.mrf.mxu1  ;;  %v22764_v51 = vadd.f32 %v22763_v42, %v22686_v50 }
0x2af1   : > { %v30834_v8 = vpop.f32.mrf.mxu1 }
0x2af7   : > { %v22849_v53 = vpop.f32.mrf.mxu0 }
0x2af8   : > { %v22850_v38 = vadd.f32 %v22849_v53, %v22764_v51 }
0x2af9   : > { %v30821_v54 = vpop.f32.mrf.mxu0 }
0x2afa   : > { %v22926_v55 = vadd.f32 %v22925_v47, %v22850_v38 }
0x2afc   : > { %v22929_v57 = vsub.f32 %v22926_v55, %v31388_v0 }
0x2afe   : > { %v22930_v44 = vadd.f32 %v22929_v57, %v35089_v52 }
0x2b00   : > { %v22931_v58 = vmax.f32 %v31403_v6, %v22930_v44 }
0x2b02   : > { %v22932_v59 = vmin.f32 %v31408_v7, %v22931_v58 }
0x2b04   : > { %v22933_v61 = vsub.f32 %v22929_v57, %v22932_v59 }
0x2b06   : > { %v35170_v48 = vadd.f32 %v22933_v61, %v35089_v52 }
0x2b08   : > { %v22935_v62 = vsub.f32 %v22932_v59, %v35170_v48 }
0x2b0a   : > { %v22937_v63 = vsel %vm75_vm1, %v22935_v62, 0 }
0x2b0b   : > { %v23009_v24 = vand.u32 4294901760, %v22937_v63 }
0x2b0d   : > { %v23010_v27 = vsub.f32 %v22937_v63, %v23009_v24  ;;  %30859 = vmatmul.mubr.f32.vlgmr.msra.gmra.mxu1 %v23009_v24 }
0x2b0e   : > { %30875 = vmatpush3.msra.mxu1 %v31426_v10  ;;  %30884 = vmatprep.mubr.msk.f32.mxu1 %vm31354_vm0, %v31353_v13 }
0x2b0f   : > { %30876 = vmatprep.subr.mxu1 %v31353_v13  ;;  %v23011_v28 = vand.u32 4294901760, %v23010_v27 }
0x2b10   : > { %30877 = vmatpush3.msra.mxu1 %v31429_v11 }
0x2b11   : > { %30878 = vmatprep.subr.mxu1 %v31353_v13  ;;  %v23012_v52 = vsub.f32 %v23010_v27, %v23011_v28 }
0x2b12   : > { %30879 = vmatpush3.msra.mxu1 %v31432_v12 }
0x2b13   : > { %30880 = vmatprep.subr.mxu1 %v31353_v13  ;;  %v23013_v29 = vand.u32 4294901760, %v23012_v52 }
0x2b14   : > { %30881 = vmatpush3.msra.mxu1 %v31436_v14 }
0x2b15   : > { %30882 = vmatprep.subr.mxu1 %v31353_v13  ;;  %30846 = vmatmul.mubr.f32.vlgmr.msra.gmra.mxu0 %v23013_v29 }
0x2b16   : > { %30862 = vmatpush3.msra.mxu0 %v31445_v16  ;;  %30883 = vmatpush3.msra.mxu1 %v31440_v15 }
0x2b17   : > { %30863 = vmatprep.subr.mxu0 %v31353_v13  ;;  %30885 = vmatmul.mubr.f32.vlgmr.msra.gmra.mxu1 %v23011_v28 }
0x2b18   : > { %30900 = vmatprep.subr.mxu1 %v31353_v13  ;;  %30864 = vmatpush3.msra.mxu0 %v31451_v17 }
0x2b19   : > { %30901 = vmatpush3.msra.mxu1 %v31426_v10  ;;  %30865 = vmatprep.subr.mxu0 %v31353_v13 }
0x2b1a   : > { %30902 = vmatprep.subr.mxu1 %v31353_v13  ;;  %30866 = vmatpush3.msra.mxu0 %v31458_v19 }
0x2b1b   : > { %30903 = vmatpush3.msra.mxu1 %v31429_v11  ;;  %30867 = vmatprep.subr.mxu0 %v31353_v13 }
0x2b1c   : > { %30904 = vmatprep.subr.mxu1 %v31353_v13  ;;  %30868 = vmatpush3.msra.mxu0 %v31462_v20 }
0x2b1d   : > { %30905 = vmatpush3.msra.mxu1 %v31432_v12  ;;  %30869 = vmatprep.subr.mxu0 %v31353_v13 }
0x2b1e   : > { %30906 = vmatprep.subr.mxu1 %v31353_v13  ;;  %30870 = vmatpush3.msra.mxu0 %v31466_v21 }
0x2b1f   : > { %30871 = vmatprep.mubr.msk.f32.mxu0 %vm31354_vm0, %v31353_v13  ;;  %30907 = vmatpush3.msra.mxu1 %v31436_v14 }
0x2b20   : > { %30872 = vmatmul.mubr.f32.vlgmr.msra.gmra.mxu0 %v23010_v27  ;;  %30887 = vmatprep.subr.mxu0 %v31353_v13 }
0x2b21   : > { %30908 = vmatprep.subr.mxu1 %v31353_v13  ;;  %30888 = vmatpush3.msra.mxu0 %v31472_v22 }
0x2b22   : > { %30909 = vmatpush3.msra.mxu1 %v31440_v15  ;;  %30910 = vmatprep.mubr.msk.f32.mxu1 %vm31354_vm0, %v31353_v13 }
0x2b23   : > { %30889 = vmatprep.subr.mxu0 %v31353_v13  ;;  %30911 = vmatmul.mubr.f32.vlgmr.msra.gmra.mxu1 %v23009_v24 }
0x2b24   : > { %30890 = vmatpush3.msra.mxu0 %v31475_v23  ;;  %30897 = vmatprep.mubr.msk.f32.mxu0 %vm31354_vm0, %v31353_v13 }
0x2b25   : > { %30891 = vmatprep.subr.mxu0 %v31353_v13  ;;  %30926 = vmatprep.subr.mxu1 %v31353_v13 }
0x2b26   : > { %30892 = vmatpush3.msra.mxu0 %v31481_v25  ;;  %30927 = vmatpush3.msra.mxu1 %v31499_v32 }
0x2b27   : > { %30893 = vmatprep.subr.mxu0 %v31353_v13  ;;  %30928 = vmatprep.subr.mxu1 %v31353_v13 }
0x2b28   : > { %30894 = vmatpush3.msra.mxu0 %v31484_v26  ;;  %30929 = vmatpush3.msra.mxu1 %v31501_v33 }
0x2b29   : > { %30895 = vmatprep.subr.mxu0 %v31353_v13  ;;  %30930 = vmatprep.subr.mxu1 %v31353_v13 }
0x2b2a   : > { %30896 = vmatpush3.msra.mxu0 %v31493_v30  ;;  %30931 = vmatpush3.msra.mxu1 %v31508_v37 }
0x2b2b   : > { %30898 = vmatmul.mubr.f32.vlgmr.msra.gmra.mxu0 %v23009_v24  ;;  %30932 = vmatprep.subr.mxu1 %v31353_v13 }
0x2b2c   : > { %30933 = vmatpush3.msra.mxu1 %v31515_v40  ;;  %30913 = vmatprep.subr.mxu0 %v31353_v13 }
0x2b2d   : > { %30934 = vmatprep.subr.mxu1 %v31353_v13  ;;  %30914 = vmatpush3.msra.mxu0 %v31426_v10 }
0x2b2e   : > { %30935 = vmatpush3.msra.mxu1 %v31519_v41  ;;  %30915 = vmatprep.subr.mxu0 %v31353_v13 }
0x2b2f   : > { %30936 = vmatprep.mubr.msk.f32.mxu1 %vm31354_vm0, %v31353_v13  ;;  %30952 = vmatprep.subr.mxu1 %v31353_v13 }
0x2b30   : > { %30916 = vmatpush3.msra.mxu0 %v31429_v11  ;;  %30923 = vmatprep.mubr.msk.f32.mxu0 %vm31354_vm0, %v31353_v13 }
0x2b31   : > { %30917 = vmatprep.subr.mxu0 %v31353_v13 }
0x2b32   : > { %30918 = vmatpush3.msra.mxu0 %v31432_v12 }
0x2b33   : > { %30919 = vmatprep.subr.mxu0 %v31353_v13 }
0x2b34   : > { %30920 = vmatpush3.msra.mxu0 %v31436_v14 }
0x2b35   : > { %30921 = vmatprep.subr.mxu0 %v31353_v13 }
0x2b36   : > { %30922 = vmatpush3.msra.mxu0 %v31440_v15 }
0x2b37   : > { %30939 = vmatprep.subr.mxu0 %v31353_v13 }
0x2bcd   : > { %v23111_v31 = vpop.f32.mrf.mxu1 }
0x2bcf   : > { %v30860_v34 = vpop.f32.mrf.mxu1 }
0x2bd5   : > { %v23015_v56 = vpop.f32.mrf.mxu0 }
0x2bd6   : > { %v23112_v45 = vadd.f32 %v23111_v31, %v23015_v56 }
0x2bd7   : > { %v23271_v35 = vpop.f32.mrf.mxu1  ;;  %v30847_v36 = vpop.f32.mrf.mxu0 }
0x2bd9   : > { %v30886_v39 = vpop.f32.mrf.mxu1 }
0x2be0   : > { %v23193_v60 = vpop.f32.mrf.mxu0 }
0x2be1   : > { %v23194_v46 = vadd.f32 %v23193_v60, %v23112_v45 }
0x2be2   : > { %v30873_v42 = vpop.f32.mrf.mxu0 }
0x2be3   : > { %v23433_v43 = vpop.f32.mrf.mxu1  ;;  %v23272_v47 = vadd.f32 %v23271_v35, %v23194_v46 }
0x2be5   : > { %v30912_v18 = vpop.f32.mrf.mxu1 }
0x2beb   : > { %v23357_v49 = vpop.f32.mrf.mxu0 }
0x2bec   : > { %v23358_v8 = vadd.f32 %v23357_v49, %v23272_v47 }
0x2bed   : > { %v30899_v50 = vpop.f32.mrf.mxu0 }
0x2bee   : > { %v23434_v51 = vadd.f32 %v23433_v43, %v23358_v8 }
0x2bf0   : > { %v23437_v53 = vsub.f32 %v23434_v51, %v31388_v0 }
0x2bf2   : > { %v23438_v38 = vadd.f32 %v23437_v53, %v35170_v48 }
0x2bf4   : > { %v23439_v54 = vmax.f32 %v31403_v6, %v23438_v38 }
0x2bf6   : > { %v23440_v55 = vmin.f32 %v31408_v7, %v23439_v54 }
0x2bf8   : > { %v23441_v57 = vsub.f32 %v23437_v53, %v23440_v55 }
0x2bfa   : > { %v35251_v44 = vadd.f32 %v23441_v57, %v35170_v48 }
0x2bfc   : > { %v23443_v58 = vsub.f32 %v23440_v55, %v35251_v44 }
0x2bfe   : > { %v23445_v59 = vsel %vm75_vm1, %v23443_v58, 0 }
0x2bff   : > { %v23517_v61 = vand.u32 4294901760, %v23445_v59 }
0x2c01   : > { %v23518_v62 = vsub.f32 %v23445_v59, %v23517_v61  ;;  %30937 = vmatmul.mubr.f32.vlgmr.msra.gmra.mxu1 %v23517_v61 }
0x2c02   : > { %30953 = vmatpush3.msra.mxu1 %v31426_v10  ;;  %30962 = vmatprep.mubr.msk.f32.mxu1 %vm31354_vm0, %v31353_v13 }
0x2c03   : > { %30954 = vmatprep.subr.mxu1 %v31353_v13  ;;  %v23519_v63 = vand.u32 4294901760, %v23518_v62 }
0x2c04   : > { %30955 = vmatpush3.msra.mxu1 %v31429_v11 }
0x2c05   : > { %30956 = vmatprep.subr.mxu1 %v31353_v13  ;;  %v23520_v48 = vsub.f32 %v23518_v62, %v23519_v63 }
0x2c06   : > { %30957 = vmatpush3.msra.mxu1 %v31432_v12 }
0x2c07   : > { %30958 = vmatprep.subr.mxu1 %v31353_v13  ;;  %v23521_v24 = vand.u32 4294901760, %v23520_v48 }
0x2c08   : > { %30959 = vmatpush3.msra.mxu1 %v31436_v14 }
0x2c09   : > { %30960 = vmatprep.subr.mxu1 %v31353_v13  ;;  %30924 = vmatmul.mubr.f32.vlgmr.msra.gmra.mxu0 %v23521_v24 }
0x2c0a   : > { %30940 = vmatpush3.msra.mxu0 %v31445_v16  ;;  %30961 = vmatpush3.msra.mxu1 %v31440_v15 }
0x2c0b   : > { %30941 = vmatprep.subr.mxu0 %v31353_v13  ;;  %30963 = vmatmul.mubr.f32.vlgmr.msra.gmra.mxu1 %v23519_v63 }
0x2c0c   : > { %30978 = vmatprep.subr.mxu1 %v31353_v13  ;;  %30942 = vmatpush3.msra.mxu0 %v31451_v17 }
0x2c0d   : > { %30979 = vmatpush3.msra.mxu1 %v31426_v10  ;;  %30943 = vmatprep.subr.mxu0 %v31353_v13 }
0x2c0e   : > { %30980 = vmatprep.subr.mxu1 %v31353_v13  ;;  %30944 = vmatpush3.msra.mxu0 %v31458_v19 }
0x2c0f   : > { %30981 = vmatpush3.msra.mxu1 %v31429_v11  ;;  %30945 = vmatprep.subr.mxu0 %v31353_v13 }
0x2c10   : > { %30982 = vmatprep.subr.mxu1 %v31353_v13  ;;  %30946 = vmatpush3.msra.mxu0 %v31462_v20 }
0x2c11   : > { %30983 = vmatpush3.msra.mxu1 %v31432_v12  ;;  %30947 = vmatprep.subr.mxu0 %v31353_v13 }
0x2c12   : > { %30984 = vmatprep.subr.mxu1 %v31353_v13  ;;  %30948 = vmatpush3.msra.mxu0 %v31466_v21 }
0x2c13   : > { %30949 = vmatprep.mubr.msk.f32.mxu0 %vm31354_vm0, %v31353_v13  ;;  %30985 = vmatpush3.msra.mxu1 %v31436_v14 }
0x2c14   : > { %30950 = vmatmul.mubr.f32.vlgmr.msra.gmra.mxu0 %v23518_v62  ;;  %30965 = vmatprep.subr.mxu0 %v31353_v13 }
0x2c15   : > { %30986 = vmatprep.subr.mxu1 %v31353_v13  ;;  %30966 = vmatpush3.msra.mxu0 %v31472_v22 }
0x2c16   : > { %30987 = vmatpush3.msra.mxu1 %v31440_v15  ;;  %30988 = vmatprep.mubr.msk.f32.mxu1 %vm31354_vm0, %v31353_v13 }
0x2c17   : > { %30967 = vmatprep.subr.mxu0 %v31353_v13  ;;  %30989 = vmatmul.mubr.f32.vlgmr.msra.gmra.mxu1 %v23517_v61 }
0x2c18   : > { %30968 = vmatpush3.msra.mxu0 %v31475_v23  ;;  %30975 = vmatprep.mubr.msk.f32.mxu0 %vm31354_vm0, %v31353_v13 }
0x2c19   : > { %30969 = vmatprep.subr.mxu0 %v31353_v13  ;;  %31004 = vmatprep.subr.mxu1 %v31353_v13 }
0x2c1a   : > { %30970 = vmatpush3.msra.mxu0 %v31481_v25  ;;  %31005 = vmatpush3.msra.mxu1 %v31499_v32 }
0x2c1b   : > { %30971 = vmatprep.subr.mxu0 %v31353_v13  ;;  %31006 = vmatprep.subr.mxu1 %v31353_v13 }
0x2c1c   : > { %30972 = vmatpush3.msra.mxu0 %v31484_v26  ;;  %31007 = vmatpush3.msra.mxu1 %v31501_v33 }
0x2c1d   : > { %30973 = vmatprep.subr.mxu0 %v31353_v13  ;;  %31008 = vmatprep.subr.mxu1 %v31353_v13 }
0x2c1e   : > { %30974 = vmatpush3.msra.mxu0 %v31493_v30  ;;  %31009 = vmatpush3.msra.mxu1 %v31508_v37 }
0x2c1f   : > { %30976 = vmatmul.mubr.f32.vlgmr.msra.gmra.mxu0 %v23517_v61  ;;  %31010 = vmatprep.subr.mxu1 %v31353_v13 }
0x2c20   : > { %31011 = vmatpush3.msra.mxu1 %v31515_v40  ;;  %30991 = vmatprep.subr.mxu0 %v31353_v13 }
0x2c21   : > { %31012 = vmatprep.subr.mxu1 %v31353_v13  ;;  %30992 = vmatpush3.msra.mxu0 %v31426_v10 }
0x2c22   : > { %31013 = vmatpush3.msra.mxu1 %v31519_v41  ;;  %30993 = vmatprep.subr.mxu0 %v31353_v13 }
0x2c23   : > { %31014 = vmatprep.mubr.msk.f32.mxu1 %vm31354_vm0, %v31353_v13  ;;  %31030 = vmatprep.subr.mxu1 %v31353_v13 }
0x2c24   : > { %30994 = vmatpush3.msra.mxu0 %v31429_v11  ;;  %31001 = vmatprep.mubr.msk.f32.mxu0 %vm31354_vm0, %v31353_v13 }
0x2c25   : > { %30995 = vmatprep.subr.mxu0 %v31353_v13 }
0x2c26   : > { %30996 = vmatpush3.msra.mxu0 %v31432_v12 }
0x2c27   : > { %30997 = vmatprep.subr.mxu0 %v31353_v13 }
0x2c28   : > { %30998 = vmatpush3.msra.mxu0 %v31436_v14 }
0x2c29   : > { %30999 = vmatprep.subr.mxu0 %v31353_v13 }
0x2c2a   : > { %31000 = vmatpush3.msra.mxu0 %v31440_v15 }
0x2c2b   : > { %31017 = vmatprep.subr.mxu0 %v31353_v13 }
0x2cc1   : > { %v23619_v27 = vpop.f32.mrf.mxu1 }
0x2cc3   : > { %v30938_v28 = vpop.f32.mrf.mxu1 }
0x2cc9   : > { %v23523_v52 = vpop.f32.mrf.mxu0 }
0x2cca   : > { %v23620_v39 = vadd.f32 %v23619_v27, %v23523_v52 }
0x2ccb   : > { %v23779_v29 = vpop.f32.mrf.mxu1  ;;  %v30925_v31 = vpop.f32.mrf.mxu0 }
0x2ccd   : > { %v30964_v34 = vpop.f32.mrf.mxu1 }
0x2cd4   : > { %v23701_v56 = vpop.f32.mrf.mxu0 }
0x2cd5   : > { %v23702_v42 = vadd.f32 %v23701_v56, %v23620_v39 }
0x2cd6   : > { %v30951_v35 = vpop.f32.mrf.mxu0 }
0x2cd7   : > { %v23941_v36 = vpop.f32.mrf.mxu1  ;;  %v23780_v43 = vadd.f32 %v23779_v29, %v23702_v42 }
0x2cd9   : > { %v30990_v60 = vpop.f32.mrf.mxu1 }
0x2cdf   : > { %v23865_v45 = vpop.f32.mrf.mxu0 }
0x2ce0   : > { %v23866_v18 = vadd.f32 %v23865_v45, %v23780_v43 }
0x2ce1   : > { %v30977_v46 = vpop.f32.mrf.mxu0 }
0x2ce2   : > { %v23942_v47 = vadd.f32 %v23941_v36, %v23866_v18 }
0x2ce4   : > { %v23945_v49 = vsub.f32 %v23942_v47, %v31388_v0 }
0x2ce6   : > { %v23946_v8 = vadd.f32 %v23945_v49, %v35251_v44 }
0x2ce8   : > { %v23947_v50 = vmax.f32 %v31403_v6, %v23946_v8 }
0x2cea   : > { %v23948_v51 = vmin.f32 %v31408_v7, %v23947_v50 }
0x2cec   : > { %v23949_v53 = vsub.f32 %v23945_v49, %v23948_v51 }
0x2cee   : > { %v35332_v38 = vadd.f32 %v23949_v53, %v35251_v44 }
0x2cf0   : > { %v23951_v54 = vsub.f32 %v23948_v51, %v35332_v38 }
0x2cf2   : > { %v23953_v55 = vsel %vm75_vm1, %v23951_v54, 0 }
0x2cf3   : > { %v24025_v57 = vand.u32 4294901760, %v23953_v55 }
0x2cf5   : > { %v24026_v58 = vsub.f32 %v23953_v55, %v24025_v57  ;;  %31015 = vmatmul.mubr.f32.vlgmr.msra.gmra.mxu1 %v24025_v57 }
0x2cf6   : > { %31031 = vmatpush3.msra.mxu1 %v31426_v10  ;;  %31040 = vmatprep.mubr.msk.f32.mxu1 %vm31354_vm0, %v31353_v13 }
0x2cf7   : > { %31032 = vmatprep.subr.mxu1 %v31353_v13  ;;  %v24027_v59 = vand.u32 4294901760, %v24026_v58 }
0x2cf8   : > { %31033 = vmatpush3.msra.mxu1 %v31429_v11 }
0x2cf9   : > { %31034 = vmatprep.subr.mxu1 %v31353_v13  ;;  %v24028_v44 = vsub.f32 %v24026_v58, %v24027_v59 }
0x2cfa   : > { %31035 = vmatpush3.msra.mxu1 %v31432_v12 }
0x2cfb   : > { %31036 = vmatprep.subr.mxu1 %v31353_v13  ;;  %v24029_v61 = vand.u32 4294901760, %v24028_v44 }
0x2cfc   : > { %31037 = vmatpush3.msra.mxu1 %v31436_v14 }
0x2cfd   : > { %31038 = vmatprep.subr.mxu1 %v31353_v13  ;;  %31002 = vmatmul.mubr.f32.vlgmr.msra.gmra.mxu0 %v24029_v61 }
0x2cfe   : > { %31018 = vmatpush3.msra.mxu0 %v31445_v16  ;;  %31039 = vmatpush3.msra.mxu1 %v31440_v15 }
0x2cff   : > { %31019 = vmatprep.subr.mxu0 %v31353_v13  ;;  %31041 = vmatmul.mubr.f32.vlgmr.msra.gmra.mxu1 %v24027_v59 }
0x2d00   : > { %31056 = vmatprep.subr.mxu1 %v31353_v13  ;;  %31020 = vmatpush3.msra.mxu0 %v31451_v17 }
0x2d01   : > { %31057 = vmatpush3.msra.mxu1 %v31426_v10  ;;  %31021 = vmatprep.subr.mxu0 %v31353_v13 }
0x2d02   : > { %31058 = vmatprep.subr.mxu1 %v31353_v13  ;;  %31022 = vmatpush3.msra.mxu0 %v31458_v19 }
0x2d03   : > { %31059 = vmatpush3.msra.mxu1 %v31429_v11  ;;  %31023 = vmatprep.subr.mxu0 %v31353_v13 }
0x2d04   : > { %31060 = vmatprep.subr.mxu1 %v31353_v13  ;;  %31024 = vmatpush3.msra.mxu0 %v31462_v20 }
0x2d05   : > { %31061 = vmatpush3.msra.mxu1 %v31432_v12  ;;  %31025 = vmatprep.subr.mxu0 %v31353_v13 }
0x2d06   : > { %31062 = vmatprep.subr.mxu1 %v31353_v13  ;;  %31026 = vmatpush3.msra.mxu0 %v31466_v21 }
0x2d07   : > { %31027 = vmatprep.mubr.msk.f32.mxu0 %vm31354_vm0, %v31353_v13  ;;  %31063 = vmatpush3.msra.mxu1 %v31436_v14 }
0x2d08   : > { %31028 = vmatmul.mubr.f32.vlgmr.msra.gmra.mxu0 %v24026_v58  ;;  %31043 = vmatprep.subr.mxu0 %v31353_v13 }
0x2d09   : > { %31064 = vmatprep.subr.mxu1 %v31353_v13  ;;  %31044 = vmatpush3.msra.mxu0 %v31472_v22 }
0x2d0a   : > { %31065 = vmatpush3.msra.mxu1 %v31440_v15  ;;  %31066 = vmatprep.mubr.msk.f32.mxu1 %vm31354_vm0, %v31353_v13 }
0x2d0b   : > { %31045 = vmatprep.subr.mxu0 %v31353_v13  ;;  %31067 = vmatmul.mubr.f32.vlgmr.msra.gmra.mxu1 %v24025_v57 }
0x2d0c   : > { %31046 = vmatpush3.msra.mxu0 %v31475_v23  ;;  %31053 = vmatprep.mubr.msk.f32.mxu0 %vm31354_vm0, %v31353_v13 }
0x2d0d   : > { %31047 = vmatprep.subr.mxu0 %v31353_v13  ;;  %31082 = vmatprep.subr.mxu1 %v31353_v13 }
0x2d0e   : > { %31048 = vmatpush3.msra.mxu0 %v31481_v25  ;;  %31083 = vmatpush3.msra.mxu1 %v31499_v32 }
0x2d0f   : > { %31049 = vmatprep.subr.mxu0 %v31353_v13  ;;  %31084 = vmatprep.subr.mxu1 %v31353_v13 }
0x2d10   : > { %31050 = vmatpush3.msra.mxu0 %v31484_v26  ;;  %31085 = vmatpush3.msra.mxu1 %v31501_v33 }
0x2d11   : > { %31051 = vmatprep.subr.mxu0 %v31353_v13  ;;  %31086 = vmatprep.subr.mxu1 %v31353_v13 }
0x2d12   : > { %31052 = vmatpush3.msra.mxu0 %v31493_v30  ;;  %31087 = vmatpush3.msra.mxu1 %v31508_v37 }
0x2d13   : > { %31054 = vmatmul.mubr.f32.vlgmr.msra.gmra.mxu0 %v24025_v57  ;;  %31088 = vmatprep.subr.mxu1 %v31353_v13 }
0x2d14   : > { %31089 = vmatpush3.msra.mxu1 %v31515_v40  ;;  %31069 = vmatprep.subr.mxu0 %v31353_v13 }
0x2d15   : > { %31090 = vmatprep.subr.mxu1 %v31353_v13  ;;  %31070 = vmatpush3.msra.mxu0 %v31426_v10 }
0x2d16   : > { %31091 = vmatpush3.msra.mxu1 %v31519_v41  ;;  %31071 = vmatprep.subr.mxu0 %v31353_v13 }
0x2d17   : > { %31092 = vmatprep.mubr.msk.f32.mxu1 %vm31354_vm0, %v31353_v13  ;;  %31108 = vmatprep.subr.mxu1 %v31353_v13 }
0x2d18   : > { %31072 = vmatpush3.msra.mxu0 %v31429_v11  ;;  %31079 = vmatprep.mubr.msk.f32.mxu0 %vm31354_vm0, %v31353_v13 }
0x2d19   : > { %31073 = vmatprep.subr.mxu0 %v31353_v13 }
0x2d1a   : > { %31074 = vmatpush3.msra.mxu0 %v31432_v12 }
0x2d1b   : > { %31075 = vmatprep.subr.mxu0 %v31353_v13 }
0x2d1c   : > { %31076 = vmatpush3.msra.mxu0 %v31436_v14 }
0x2d1d   : > { %31077 = vmatprep.subr.mxu0 %v31353_v13 }
0x2d1e   : > { %31078 = vmatpush3.msra.mxu0 %v31440_v15 }
0x2d1f   : > { %31095 = vmatprep.subr.mxu0 %v31353_v13 }
0x2db5   : > { %v24127_v62 = vpop.f32.mrf.mxu1 }
0x2db7   : > { %v31016_v63 = vpop.f32.mrf.mxu1 }
0x2dbd   : > { %v24031_v48 = vpop.f32.mrf.mxu0 }
0x2dbe   : > { %v24128_v34 = vadd.f32 %v24127_v62, %v24031_v48 }
0x2dbf   : > { %v24287_v24 = vpop.f32.mrf.mxu1  ;;  %v31003_v27 = vpop.f32.mrf.mxu0 }
0x2dc1   : > { %v31042_v28 = vpop.f32.mrf.mxu1 }
0x2dc8   : > { %v24209_v52 = vpop.f32.mrf.mxu0 }
0x2dc9   : > { %v24210_v35 = vadd.f32 %v24209_v52, %v24128_v34 }
0x2dca   : > { %v31029_v29 = vpop.f32.mrf.mxu0 }
0x2dcb   : > { %v24449_v31 = vpop.f32.mrf.mxu1  ;;  %v24288_v36 = vadd.f32 %v24287_v24, %v24210_v35 }
0x2dcd   : > { %v31068_v56 = vpop.f32.mrf.mxu1 }
0x2dd3   : > { %v24373_v39 = vpop.f32.mrf.mxu0 }
0x2dd4   : > { %v24374_v60 = vadd.f32 %v24373_v39, %v24288_v36 }
0x2dd5   : > { %v31055_v42 = vpop.f32.mrf.mxu0 }
0x2dd6   : > { %v24450_v43 = vadd.f32 %v24449_v31, %v24374_v60 }
0x2dd8   : > { %v24453_v45 = vsub.f32 %v24450_v43, %v31388_v0 }
0x2dda   : > { %v24454_v18 = vadd.f32 %v24453_v45, %v35332_v38 }
0x2ddc   : > { %v24455_v46 = vmax.f32 %v31403_v6, %v24454_v18 }
0x2dde   : > { %v24456_v47 = vmin.f32 %v31408_v7, %v24455_v46 }
0x2de0   : > { %v24457_v49 = vsub.f32 %v24453_v45, %v24456_v47 }
0x2de2   : > { %v35413_v8 = vadd.f32 %v24457_v49, %v35332_v38 }
0x2de4   : > { %v24459_v50 = vsub.f32 %v24456_v47, %v35413_v8 }
0x2de6   : > { %v24461_v51 = vsel %vm75_vm1, %v24459_v50, 0 }
0x2de7   : > { %v24533_v53 = vand.u32 4294901760, %v24461_v51 }
0x2de9   : > { %v24534_v54 = vsub.f32 %v24461_v51, %v24533_v53  ;;  %31093 = vmatmul.mubr.f32.vlgmr.msra.gmra.mxu1 %v24533_v53 }
0x2dea   : > { %31109 = vmatpush3.msra.mxu1 %v31426_v10  ;;  %31118 = vmatprep.mubr.msk.f32.mxu1 %vm31354_vm0, %v31353_v13 }
0x2deb   : > { %31110 = vmatprep.subr.mxu1 %v31353_v13  ;;  %v24535_v55 = vand.u32 4294901760, %v24534_v54 }
0x2dec   : > { %31111 = vmatpush3.msra.mxu1 %v31429_v11 }
0x2ded   : > { %31112 = vmatprep.subr.mxu1 %v31353_v13  ;;  %v24536_v38 = vsub.f32 %v24534_v54, %v24535_v55 }
0x2dee   : > { %31113 = vmatpush3.msra.mxu1 %v31432_v12 }
0x2def   : > { %31114 = vmatprep.subr.mxu1 %v31353_v13  ;;  %v24537_v57 = vand.u32 4294901760, %v24536_v38 }
0x2df0   : > { %31115 = vmatpush3.msra.mxu1 %v31436_v14 }
0x2df1   : > { %31116 = vmatprep.subr.mxu1 %v31353_v13  ;;  %31080 = vmatmul.mubr.f32.vlgmr.msra.gmra.mxu0 %v24537_v57 }
0x2df2   : > { %31096 = vmatpush3.msra.mxu0 %v31445_v16  ;;  %31117 = vmatpush3.msra.mxu1 %v31440_v15 }
0x2df3   : > { %31097 = vmatprep.subr.mxu0 %v31353_v13  ;;  %31119 = vmatmul.mubr.f32.vlgmr.msra.gmra.mxu1 %v24535_v55 }
0x2df4   : > { %31134 = vmatprep.subr.mxu1 %v31353_v13  ;;  %31098 = vmatpush3.msra.mxu0 %v31451_v17 }
0x2df5   : > { %31135 = vmatpush3.msra.mxu1 %v31426_v10  ;;  %31099 = vmatprep.subr.mxu0 %v31353_v13 }
0x2df6   : > { %31136 = vmatprep.subr.mxu1 %v31353_v13  ;;  %31100 = vmatpush3.msra.mxu0 %v31458_v19 }
0x2df7   : > { %31137 = vmatpush3.msra.mxu1 %v31429_v11  ;;  %31101 = vmatprep.subr.mxu0 %v31353_v13 }
0x2df8   : > { %31138 = vmatprep.subr.mxu1 %v31353_v13  ;;  %31102 = vmatpush3.msra.mxu0 %v31462_v20 }
0x2df9   : > { %31139 = vmatpush3.msra.mxu1 %v31432_v12  ;;  %31103 = vmatprep.subr.mxu0 %v31353_v13 }
0x2dfa   : > { %31140 = vmatprep.subr.mxu1 %v31353_v13  ;;  %31104 = vmatpush3.msra.mxu0 %v31466_v21 }
0x2dfb   : > { %31105 = vmatprep.mubr.msk.f32.mxu0 %vm31354_vm0, %v31353_v13  ;;  %31141 = vmatpush3.msra.mxu1 %v31436_v14 }
0x2dfc   : > { %31106 = vmatmul.mubr.f32.vlgmr.msra.gmra.mxu0 %v24534_v54  ;;  %31121 = vmatprep.subr.mxu0 %v31353_v13 }
0x2dfd   : > { %31142 = vmatprep.subr.mxu1 %v31353_v13  ;;  %31122 = vmatpush3.msra.mxu0 %v31472_v22 }
0x2dfe   : > { %31143 = vmatpush3.msra.mxu1 %v31440_v15  ;;  %31144 = vmatprep.mubr.msk.f32.mxu1 %vm31354_vm0, %v31353_v13 }
0x2dff   : > { %31123 = vmatprep.subr.mxu0 %v31353_v13  ;;  %31145 = vmatmul.mubr.f32.vlgmr.msra.gmra.mxu1 %v24533_v53 }
0x2e00   : > { %31124 = vmatpush3.msra.mxu0 %v31475_v23  ;;  %31131 = vmatprep.mubr.msk.f32.mxu0 %vm31354_vm0, %v31353_v13 }
0x2e01   : > { %31125 = vmatprep.subr.mxu0 %v31353_v13  ;;  %31160 = vmatprep.subr.mxu1 %v31353_v13 }
0x2e02   : > { %31126 = vmatpush3.msra.mxu0 %v31481_v25  ;;  %31161 = vmatpush3.msra.mxu1 %v31499_v32 }
0x2e03   : > { %31127 = vmatprep.subr.mxu0 %v31353_v13  ;;  %31162 = vmatprep.subr.mxu1 %v31353_v13 }
0x2e04   : > { %31128 = vmatpush3.msra.mxu0 %v31484_v26  ;;  %31163 = vmatpush3.msra.mxu1 %v31501_v33 }
0x2e05   : > { %31129 = vmatprep.subr.mxu0 %v31353_v13  ;;  %31164 = vmatprep.subr.mxu1 %v31353_v13 }
0x2e06   : > { %31130 = vmatpush3.msra.mxu0 %v31493_v30  ;;  %31165 = vmatpush3.msra.mxu1 %v31508_v37 }
0x2e07   : > { %31132 = vmatmul.mubr.f32.vlgmr.msra.gmra.mxu0 %v24533_v53  ;;  %31166 = vmatprep.subr.mxu1 %v31353_v13 }
0x2e08   : > { %31167 = vmatpush3.msra.mxu1 %v31515_v40  ;;  %31147 = vmatprep.subr.mxu0 %v31353_v13 }
0x2e09   : > { %31168 = vmatprep.subr.mxu1 %v31353_v13  ;;  %31148 = vmatpush3.msra.mxu0 %v31426_v10 }
0x2e0a   : > { %31169 = vmatpush3.msra.mxu1 %v31519_v41  ;;  %31149 = vmatprep.subr.mxu0 %v31353_v13 }
0x2e0b   : > { %31170 = vmatprep.mubr.msk.f32.mxu1 %vm31354_vm0, %v31353_v13  ;;  %31186 = vmatprep.subr.mxu1 %v31353_v13 }
0x2e0c   : > { %31150 = vmatpush3.msra.mxu0 %v31429_v11  ;;  %31157 = vmatprep.mubr.msk.f32.mxu0 %vm31354_vm0, %v31353_v13 }
0x2e0d   : > { %31151 = vmatprep.subr.mxu0 %v31353_v13 }
0x2e0e   : > { %31152 = vmatpush3.msra.mxu0 %v31432_v12 }
0x2e0f   : > { %31153 = vmatprep.subr.mxu0 %v31353_v13 }
0x2e10   : > { %31154 = vmatpush3.msra.mxu0 %v31436_v14 }
0x2e11   : > { %31155 = vmatprep.subr.mxu0 %v31353_v13 }
0x2e12   : > { %31156 = vmatpush3.msra.mxu0 %v31440_v15 }
0x2e13   : > { %31173 = vmatprep.subr.mxu0 %v31353_v13 }
0x2ea9   : > { %v24635_v32 = vpop.f32.mrf.mxu1 }
0x2eab   : > { %v31094_v33 = vpop.f32.mrf.mxu1 }
0x2eb1   : > { %v24539_v37 = vpop.f32.mrf.mxu0 }
0x2eb2   : > { %v24636_v62 = vadd.f32 %v24635_v32, %v24539_v37 }
0x2eb3   : > { %v24795_v40 = vpop.f32.mrf.mxu1  ;;  %v31081_v41 = vpop.f32.mrf.mxu0 }
0x2eb5   : > { %v31120_v58 = vpop.f32.mrf.mxu1 }
0x2ebc   : > { %v24717_v59 = vpop.f32.mrf.mxu0 }
0x2ebd   : > { %v24718_v48 = vadd.f32 %v24717_v59, %v24636_v62 }
0x2ebe   : > { %v31107_v44 = vpop.f32.mrf.mxu0 }
0x2ebf   : > { %v24957_v61 = vpop.f32.mrf.mxu1  ;;  %v24796_v24 = vadd.f32 %v24795_v40, %v24718_v48 }
0x2ec1   : > { %v31146_v63 = vpop.f32.mrf.mxu1 }
0x2ec7   : > { %v24881_v27 = vpop.f32.mrf.mxu0 }
0x2ec8   : > { %v24882_v28 = vadd.f32 %v24881_v27, %v24796_v24 }
0x2ec9   : > { %v31133_v52 = vpop.f32.mrf.mxu0 }
0x2eca   : > { %v24958_v29 = vadd.f32 %v24957_v61, %v24882_v28 }
0x2ecc   : > { %v24961_v31 = vsub.f32 %v24958_v29, %v31388_v0 }
0x2ece   : > { %v24962_v34 = vadd.f32 %v24961_v31, %v35413_v8 }
0x2ed0   : > { %v24963_v56 = vmax.f32 %v31403_v6, %v24962_v34 }
0x2ed2   : > { %v24964_v35 = vmin.f32 %v31408_v7, %v24963_v56 }
0x2ed4   : > { %v24965_v36 = vsub.f32 %v24961_v31, %v24964_v35 }
0x2ed6   : > { %v35494_v39 = vadd.f32 %v24965_v36, %v35413_v8 }
0x2ed8   : > { %v24967_v60 = vsub.f32 %v24964_v35, %v35494_v39 }
0x2eda   : > { %v24969_v42 = vsel %vm75_vm1, %v24967_v60, 0 }
0x2edb   : > { %v25041_v43 = vand.u32 4294901760, %v24969_v42 }
0x2edd   : > { %v25042_v45 = vsub.f32 %v24969_v42, %v25041_v43  ;;  %31171 = vmatmul.mubr.f32.vlgmr.msra.gmra.mxu1 %v25041_v43 }
0x2ede   : > { %31187 = vmatpush3.msra.mxu1 %v31426_v10  ;;  %31196 = vmatprep.mubr.msk.f32.mxu1 %vm31354_vm0, %v31353_v13 }
0x2edf   : > { %31188 = vmatprep.subr.mxu1 %v31353_v13  ;;  %v25043_v18 = vand.u32 4294901760, %v25042_v45 }
0x2ee0   : > { %31189 = vmatpush3.msra.mxu1 %v31429_v11 }
0x2ee1   : > { %31190 = vmatprep.subr.mxu1 %v31353_v13  ;;  %v25044_v46 = vsub.f32 %v25042_v45, %v25043_v18 }
0x2ee2   : > { %31191 = vmatpush3.msra.mxu1 %v31432_v12 }
0x2ee3   : > { %31192 = vmatprep.subr.mxu1 %v31353_v13  ;;  %v25045_v47 = vand.u32 4294901760, %v25044_v46 }
0x2ee4   : > { %31193 = vmatpush3.msra.mxu1 %v31436_v14 }
0x2ee5   : > { %31194 = vmatprep.subr.mxu1 %v31353_v13  ;;  %31158 = vmatmul.mubr.f32.vlgmr.msra.gmra.mxu0 %v25045_v47 }
0x2ee6   : > { %31174 = vmatpush3.msra.mxu0 %v31445_v16  ;;  %31195 = vmatpush3.msra.mxu1 %v31440_v15 }
0x2ee7   : > { %31175 = vmatprep.subr.mxu0 %v31353_v13  ;;  %31197 = vmatmul.mubr.f32.vlgmr.msra.gmra.mxu1 %v25043_v18 }
0x2ee8   : > { %31212 = vmatprep.subr.mxu1 %v31353_v13  ;;  %31176 = vmatpush3.msra.mxu0 %v31451_v17 }
0x2ee9   : > { %31213 = vmatpush3.msra.mxu1 %v31426_v10  ;;  %31177 = vmatprep.subr.mxu0 %v31353_v13 }
0x2eea   : > { %31214 = vmatprep.subr.mxu1 %v31353_v13  ;;  %31178 = vmatpush3.msra.mxu0 %v31458_v19 }
0x2eeb   : > { %31215 = vmatpush3.msra.mxu1 %v31429_v11  ;;  %31179 = vmatprep.subr.mxu0 %v31353_v13 }
0x2eec   : > { %31216 = vmatprep.subr.mxu1 %v31353_v13  ;;  %31180 = vmatpush3.msra.mxu0 %v31462_v20 }
0x2eed   : > { %31217 = vmatpush3.msra.mxu1 %v31432_v12  ;;  %31181 = vmatprep.subr.mxu0 %v31353_v13 }
0x2eee   : > { %31218 = vmatprep.subr.mxu1 %v31353_v13  ;;  %31182 = vmatpush3.msra.mxu0 %v31466_v21 }
0x2eef   : > { %31183 = vmatprep.mubr.msk.f32.mxu0 %vm31354_vm0, %v31353_v13  ;;  %31219 = vmatpush3.msra.mxu1 %v31436_v14 }
0x2ef0   : > { %31184 = vmatmul.mubr.f32.vlgmr.msra.gmra.mxu0 %v25042_v45  ;;  %31199 = vmatprep.subr.mxu0 %v31353_v13 }
0x2ef1   : > { %31220 = vmatprep.subr.mxu1 %v31353_v13  ;;  %31200 = vmatpush3.msra.mxu0 %v31472_v22 }
0x2ef2   : > { %31221 = vmatpush3.msra.mxu1 %v31440_v15  ;;  %31222 = vmatprep.mubr.msk.f32.mxu1 %vm31354_vm0, %v31353_v13 }
0x2ef3   : > { %31201 = vmatprep.subr.mxu0 %v31353_v13  ;;  %31223 = vmatmul.mubr.f32.vlgmr.msra.gmra.mxu1 %v25041_v43 }
0x2ef4   : > { %31202 = vmatpush3.msra.mxu0 %v31475_v23  ;;  %31209 = vmatprep.mubr.msk.f32.mxu0 %vm31354_vm0, %v31353_v13 }
0x2ef5   : > { %31203 = vmatprep.subr.mxu0 %v31353_v13 }
0x2ef6   : > { %31204 = vmatpush3.msra.mxu0 %v31481_v25 }
0x2ef7   : > { %31205 = vmatprep.subr.mxu0 %v31353_v13 }
0x2ef8   : > { %31206 = vmatpush3.msra.mxu0 %v31484_v26 }
0x2ef9   : > { %31207 = vmatprep.subr.mxu0 %v31353_v13 }
0x2efa   : > { %31208 = vmatpush3.msra.mxu0 %v31493_v30 }
0x2efb   : > { %31210 = vmatmul.mubr.f32.vlgmr.msra.gmra.mxu0 %v25041_v43 }
0x2f9d   : > { %v25143_v10 = vpop.f32.mrf.mxu1 }
0x2f9f   : > { %v31172_v11 = vpop.f32.mrf.mxu1 }
0x2fa5   : > { %v25047_v12 = vpop.f32.mrf.mxu0 }
0x2fa6   : > { %v25144_v21 = vadd.f32 %v25143_v10, %v25047_v12 }
0x2fa7   : > { %v25303_v14 = vpop.f32.mrf.mxu1  ;;  %v31159_v15 = vpop.f32.mrf.mxu0 }
0x2fa9   : > { %v31198_v16 = vpop.f32.mrf.mxu1 }
0x2fb0   : > { %v25225_v17 = vpop.f32.mrf.mxu0 }
0x2fb1   : > { %v25226_v23 = vadd.f32 %v25225_v17, %v25144_v21 }
0x2fb2   : > { %v31185_v19 = vpop.f32.mrf.mxu0 }
0x2fb3   : > { %v25465_v20 = vpop.f32.mrf.mxu1  ;;  %v25304_v25 = vadd.f32 %v25303_v14, %v25226_v23 }
0x2fb5   : > { %v31224_v22 = vpop.f32.mrf.mxu1 }
0x2fbb   : > { %v25389_v49 = vpop.f32.mrf.mxu0 }
0x2fbc   : > { %v25390_v26 = vadd.f32 %v25389_v49, %v25304_v25 }
0x2fbd   : > { %v31211_v13 = vpop.f32.mrf.mxu0 }
0x2fbe   : > { %v25466_v8 = vadd.f32 %v25465_v20, %v25390_v26 }
0x2fc0   : > { %v25469_v30 = vsub.f32 %v25466_v8, %v31388_v0 }
0x2fc2   : > { %v25470_v50 = vadd.f32 %v25469_v30, %v35494_v39 }
0x2fc4   : > { %v25471_v51 = vmax.f32 %v31403_v6, %v25470_v50 }
0x2fc6   : > { %v25472_v53 = vmin.f32 %v31408_v7, %v25471_v51 }
0x2fc8   : > { %v25473_v54 = vsub.f32 %v25469_v30, %v25472_v53 }
0x2fca   : > { %v25474_v8 = vadd.f32 %v25473_v54, %v35494_v39  }
0x2fcc   : > { %v25475_v55 = vsub.f32 %v25472_v53, %v25474_v8  }
0x2fce   : > { %v25476_v38 = vsub.f32 %v25475_v55, %v31343_v9  ;;  %v35567_v9 = vmov %v25475_v55 }
0x2fd0   : > { %v25477_v57 = vand.u32 2147483647, %v25476_v38 }
0x2fd2   : > { %v25479_v32 = vsel %vm25478_vm2, %v25477_v57, -inf }
0x2fd3   : > { %25480 = vmax.xlane.f32.xlu0 %v25479_v32 }
0x305c   : > { %v25481_v33 = vpop.xlane.xlu0 %25480 }
0x305d   : > { %v25482_v37 = vrot.slane %v25481_v33, 4 }
0x305f   : > { %v25483_v40 = vmax.f32 %v25481_v33, %v25482_v37 }
0x3061   : > { %v25484_v41 = vrot.slane %v25483_v40, 2 }
0x3063   : > { %v25485_v58 = vmax.f32 %v25483_v40, %v25484_v41 }
0x3065   : > { %v25486_v59 = vrot.slane %v25485_v58, 1 }
0x3067   : > { %v25487_v44 = vmax.f32 %v25485_v58, %v25486_v59 }
0x3069   : > { %31225 = vpush %v25487_v44 }
0x309a   : > { %s31226_s2 = spop %31225 }
0x309b   : > { %s25489_s30 = smax.f32 %s31355_s3, %s31226_s2 }
0x309c   : > { %p70_p11 = scmp.gt.f32.partialorder %s25489_s30, 1e-06 }
0x309e   : > { %p71_p12 = pnand %p70_p11, %p69_p10 }
0x309f   :  { %25492 = vst.msk [vmem:[#allocation7] sm:$0xf] (%p71_p12), %vm25478_vm2, %v25475_v55  ;;  %s31356_s5 = smov (%p71_p12), [#allocation7]  }
0x30a0   :  { %74 = sbr.rel (!%p71_p12) target bundleno = 30 (0x1e), region = 51  ;;  %s25499_s6 = sshll.u32 (%p71_p12), %s31356_s5, 4  ;;  %s25500_s6 = int_to_ptr.vmem [resolvable:$true] %s25499_s6 }
0x30a1   :  { %s31299_s7 = scalar_lea.vmem (%p71_p12), %s25500_s6, 64  ;;  %p31304_p0 = scmp.lt.s32.totalorder (%p71_p12), %s25500_s6, %s25500_s6 }
0x30a2   :  { %p31300_p13 = scmp.ne.s32.totalorder (%p71_p12), %s25500_s6, %s31299_s7  ;;  %p31305_p1 = scmp.lt.s32.totalorder (%p71_p12), %s31299_s7, %s31299_s7 }
0x30a4   :  { %p31306_p2 = por (%p71_p12), %p31305_p1, %p31304_p0 }
0x30a6   :  { %p31307_p3 = pnand %p31306_p2, %p31300_p13 }
0x30a8   :  { %31310 = shalt.err (!%p31307_p3)
}
0x30a9   :  { %25502 = dma.vmem_to_hbm [thread:$0]  %s25500_s6, 64, %s35566_s4, [#allocation4]  }
0x30aa   :  { %31335 = dma.done.wait [#allocation4], 64  }
0x30ab   :  { %31336 = vsyncadd [#allocation4], 4294967232 }
0x30ac   :  { %25506 = vsyncpa [#allocation3], 1 }
0x30ad   :  { %25507 = vsyncpa [#allocation6], 1 }
0x30ae   :  { %25508 = vsyncpa [#allocation4], 1 }

</bundles_post_ra>
